<compile_context>
chip_gen: v6e
topology: v6e:2x2x1
jax: 0.10.0
libtpu: 0.0.40
codegen_flags: <defaults>
</compile_context>

<pallas_src>
import functools

import jax
import jax.numpy as jnp
from jax.experimental import pallas as pl
from jax.experimental.pallas import tpu as pltpu


def _round_up(x, m):
    return ((x + m - 1) // m) * m


def _mlp_kernel(n_hidden, cols_ref, sfreq_ref, w_sin_ref, w_cos_ref, b_in_ref,
                *refs):
    """One batch tile of the fused MLP forward.

    cols_ref  : [TB, 8]   f32  columns 0..2 = (x1, x2, logsnr), rest zero
    sfreq_ref : [8, half] f32  rows 0..2 = scale_j * freqs, rest zero
    w_sin/cos : [3*half, hidden]  (w_in rows regrouped sin-rows / cos-rows)
    then (w_h_i [hidden, hidden], b_h_i [1, hidden]) * n_hidden,
    w_out [hidden, out_pad], b_out [1, out_pad], out [TB, out_pad] f32.
    """
    hidden_refs = refs[:2 * n_hidden]
    w_out_ref, b_out_ref, out_ref = refs[2 * n_hidden:]

    c = cols_ref[...]                                   # [TB, 8]   f32
    sf = sfreq_ref[...]                                 # [8, half] f32

    # Fused angle tile [TB, 3*half]; exactly (x*scale) * freqs of the
    # SinusoidalEmbedding module, computed in f32 on the VPU. One concat
    # (vs. the previous 6-way concat of the embedding vector).
    ang = jnp.concatenate(
        [c[:, j:j + 1] * sf[j:j + 1, :] for j in range(3)], axis=-1)
    s = jnp.sin(ang)                                    # one EUP launch
    co = jnp.cos(ang)                                   # one EUP launch

    w_sin = w_sin_ref[...]
    w_cos = w_cos_ref[...]
    dot_dt = w_sin.dtype
    acc = jnp.dot(s.astype(dot_dt), w_sin, preferred_element_type=jnp.float32)
    acc = acc + jnp.dot(co.astype(dot_dt), w_cos,
                        preferred_element_type=jnp.float32)
    h = jnp.maximum(acc + b_in_ref[...], 0.0)           # f32 bias + ReLU

    for i in range(n_hidden):
        w = hidden_refs[2 * i][...]
        b = hidden_refs[2 * i + 1][...]
        h = jnp.maximum(
            jnp.dot(h.astype(w.dtype), w,
                    preferred_element_type=jnp.float32) + b, 0.0)

    w_out = w_out_ref[...]
    out_ref[...] = (
        jnp.dot(h.astype(w_out.dtype), w_out,
                preferred_element_type=jnp.float32)
        + b_out_ref[...]).astype(out_ref.dtype)         # lane-dense [TB, 128]


def init_mlp_params(key, in_dim, hidden_dim, n_layers, emb_size):
    """Deterministic parameter init. Weights stored as [in, out] (pre-transposed)."""
    params = {}
    n_hidden = n_layers - 2

    def linear(key, fan_in, fan_out):
        kw, kb = jax.random.split(key)
        bound = 1.0 / jnp.sqrt(fan_in)
        w = jax.random.uniform(kw, (fan_in, fan_out), jnp.float32, -bound, bound)
        b = jax.random.uniform(kb, (1, fan_out), jnp.float32, -bound, bound)
        return w, b

    keys = jax.random.split(key, 2 + n_hidden)
    params["w_in"], params["b_in"] = linear(keys[0], (in_dim + 1) * emb_size, hidden_dim)
    for i in range(n_hidden):
        params[f"w_h{i}"], params[f"b_h{i}"] = linear(keys[1 + i], hidden_dim, hidden_dim)
    params["w_out"], params["b_out"] = linear(keys[-1], hidden_dim, in_dim)
    return params


def mlp_forward(x, logsnr, params, *, emb_size, n_layers,
                tile_b=128, dot_dtype=jnp.bfloat16):
    """Pallas forward. tile_b: 128 is safe on all gens (use 256 on v6e/v7x for
    large batches); dot_dtype: MXU operand dtype (f32 accumulation always)."""
    B, in_dim = x.shape
    assert in_dim == 2, "forward uses x[:,0] and x[:,1]"
    half = emb_size // 2
    n_hidden = n_layers - 2
    hidden_dim = params["w_in"].shape[1]
    assert params["w_in"].shape[0] == 3 * emb_size
    out_dim = params["w_out"].shape[1]
    out_pad = _round_up(out_dim, 128)                   # lane-dense output width

    # ---- constant tables --------------------------------------------------
    freqs = jnp.exp(
        -(jnp.log(jnp.float32(10000.0)) / (half - 1))
        * jnp.arange(half, dtype=jnp.float32))                    # [half]
    scales = jnp.array([100.0, 100.0, 50.0], jnp.float32)         # x1, x2, logsnr
    sfreqs = jnp.zeros((8, half), jnp.float32)
    sfreqs = sfreqs.at[:3].set(scales[:, None] * freqs[None, :])  # [8, half]

    # ---- pack inputs into one lane-dense [B, 8] column block ---------------
    cols = jnp.zeros((B, 8), jnp.float32)
    cols = cols.at[:, 0:2].set(x.astype(jnp.float32))
    cols = cols.at[:, 2].set(logsnr.astype(jnp.float32))

    tile_b = min(tile_b, _round_up(B, 8))
    B_pad = _round_up(B, tile_b)
    if B_pad != B:
        cols = jnp.pad(cols, ((0, B_pad - B), (0, 0)))
    grid = (B_pad // tile_b,)

    # ---- wrapper-side weight repacking (free, one-time) --------------------
    w_in = params["w_in"]                                         # [6*half, hidden]
    w_sin = jnp.concatenate(
        [w_in[0:half], w_in[2 * half:3 * half], w_in[4 * half:5 * half]],
        axis=0).astype(dot_dtype)                                 # [3*half, hidden]
    w_cos = jnp.concatenate(
        [w_in[half:2 * half], w_in[3 * half:4 * half], w_in[5 * half:6 * half]],
        axis=0).astype(dot_dtype)
    b_in = params["b_in"].astype(jnp.float32)

    w_out_p = jnp.zeros((hidden_dim, out_pad), dot_dtype)
    w_out_p = w_out_p.at[:, :out_dim].set(params["w_out"].astype(dot_dtype))
    b_out_p = jnp.zeros((1, out_pad), jnp.float32)
    b_out_p = b_out_p.at[:, :out_dim].set(params["b_out"].astype(jnp.float32))

    inputs = [cols, sfreqs, w_sin, w_cos, b_in]
    in_specs = [
        pl.BlockSpec((tile_b, 8), lambda i: (i, 0)),              # batch-tiled
        pl.BlockSpec((8, half), lambda i: (0, 0)),                # resident
        pl.BlockSpec((3 * half, hidden_dim), lambda i: (0, 0)),   # resident
        pl.BlockSpec((3 * half, hidden_dim), lambda i: (0, 0)),
        pl.BlockSpec((1, hidden_dim), lambda i: (0, 0)),
    ]
    for li in range(n_hidden):
        inputs += [params[f"w_h{li}"].astype(dot_dtype),
                   params[f"b_h{li}"].astype(jnp.float32)]
        in_specs += [pl.BlockSpec((hidden_dim, hidden_dim), lambda i: (0, 0)),
                     pl.BlockSpec((1, hidden_dim), lambda i: (0, 0))]
    inputs += [w_out_p, b_out_p]
    in_specs += [pl.BlockSpec((hidden_dim, out_pad), lambda i: (0, 0)),
                 pl.BlockSpec((1, out_pad), lambda i: (0, 0))]

    flops = 2 * B_pad * (2 * (3 * half) * hidden_dim
                         + n_hidden * hidden_dim * hidden_dim
                         + hidden_dim * out_pad)
    transcendentals = 2 * B_pad * 3 * half                        # sin + cos
    bytes_accessed = int(sum(int(a.nbytes) for a in inputs)
                         + B_pad * out_pad * 4)

    out = pl.pallas_call(
        functools.partial(_mlp_kernel, n_hidden),
        out_shape=jax.ShapeDtypeStruct((B_pad, out_pad), jnp.float32),
        grid=grid,
        in_specs=in_specs,
        out_specs=pl.BlockSpec((tile_b, out_pad), lambda i: (i, 0)),
        compiler_params=pltpu.CompilerParams(
            dimension_semantics=("parallel",)),
        cost_estimate=pl.CostEstimate(
            flops=flops, transcendentals=transcendentals,
            bytes_accessed=bytes_accessed),
    )(*inputs)
    return out[:B, :out_dim]


def mlp_forward_ref(x, logsnr, params, *, emb_size, n_layers, dot_dtype=None):
    """Pure-JAX reference mirroring the PyTorch forward (embedding=True, dropout=0).
    If dot_dtype is given, the matmul operands are cast to it (f32 accumulate),
    mirroring the kernel's MXU precision."""
    half = emb_size // 2
    freqs = jnp.exp(
        -(jnp.log(jnp.float32(10000.0)) / (half - 1))
        * jnp.arange(half, dtype=jnp.float32))

    def sincos(v, scale):
        ang = (v * scale)[:, None] * freqs[None, :]
        return jnp.concatenate([jnp.sin(ang), jnp.cos(ang)], axis=-1)

    def linear(h, w, b):
        if dot_dtype is not None:
            h = h.astype(dot_dtype)
            w = w.astype(dot_dtype)
        return jnp.dot(h, w, preferred_element_type=jnp.float32) + b

    h = jnp.concatenate(
        [sincos(x[:, 0], 100.0), sincos(x[:, 1], 100.0), sincos(logsnr, 50.0)],
        axis=-1)
    h = jnp.maximum(linear(h, params["w_in"], params["b_in"]), 0.0)
    for i in range(n_layers - 2):
        h = jnp.maximum(linear(h, params[f"w_h{i}"], params[f"b_h{i}"]), 0.0)
    return linear(h, params["w_out"], params["b_out"])


if __name__ == "__main__":
    # in_dim must be 2 (forward uses x[:,0], x[:,1]); B=256 exercises the
    # batch grid (two 128-row tiles).
    B, in_dim, hidden_dim, n_layers, emb_size = 256, 2, 128, 3, 128

    key = jax.random.PRNGKey(0)
    k_params, k_x, k_t = jax.random.split(key, 3)
    params = init_mlp_params(k_params, in_dim, hidden_dim, n_layers, emb_size)

    x = jax.random.normal(k_x, (B, in_dim), jnp.float32)
    logsnr = jax.random.uniform(k_t, (B,), jnp.float32)

    out = mlp_forward(x, logsnr, params, emb_size=emb_size, n_layers=n_layers,
                      tile_b=128, dot_dtype=jnp.bfloat16)
    out = jax.block_until_ready(out)
    assert out.shape == (B, in_dim)

    # Precision-matched reference (bf16 MXU operands, f32 accumulate).
    ref_bf16 = mlp_forward_ref(x, logsnr, params, emb_size=emb_size,
                               n_layers=n_layers, dot_dtype=jnp.bfloat16)
    assert jnp.allclose(out, ref_bf16, atol=1e-2, rtol=1e-2), \
        "mismatch vs precision-matched JAX reference"

    # Full-f32, PyTorch-faithful reference (loose tolerance: bf16 dot inputs).
    ref_f32 = mlp_forward_ref(x, logsnr, params, emb_size=emb_size,
                              n_layers=n_layers)
    assert jnp.allclose(out, ref_f32, atol=5e-2, rtol=5e-2), \
        "mismatch vs f32 JAX reference"

    print("KERNEL_OK")
</pallas_src>

<mosaic_0001>
module attributes {stable_mosaic.version = 11 : i64} {
  func.func @_mlp_kernel(%arg0: i32, %arg1: memref<128x8xf32, #tpu.memory_space<vmem>>, %arg2: memref<8x64xf32, #tpu.memory_space<vmem>>, %arg3: memref<192x128xbf16, #tpu.memory_space<vmem>>, %arg4: memref<192x128xbf16, #tpu.memory_space<vmem>>, %arg5: memref<1x128xf32, #tpu.memory_space<vmem>>, %arg6: memref<128x128xbf16, #tpu.memory_space<vmem>>, %arg7: memref<1x128xf32, #tpu.memory_space<vmem>>, %arg8: memref<128x128xbf16, #tpu.memory_space<vmem>>, %arg9: memref<1x128xf32, #tpu.memory_space<vmem>>, %arg10: memref<128x128xf32, #tpu.memory_space<vmem>>) attributes {dimension_semantics = [#tpu.dimension_semantics<parallel>], iteration_bounds = array<i64: 2>, scalar_prefetch = 0 : i64, scratch_operands = 0 : i64, tpu.core_type = #tpu.core_type<tc>, window_params = [{transform_indices = @transform_0, window_bounds = array<i64: 128, 8>}, {pipeline_mode = #tpu.pipeline_mode<synchronous>, transform_indices = @transform_1, window_bounds = array<i64: 8, 64>}, {pipeline_mode = #tpu.pipeline_mode<synchronous>, transform_indices = @transform_2, window_bounds = array<i64: 192, 128>}, {pipeline_mode = #tpu.pipeline_mode<synchronous>, transform_indices = @transform_3, window_bounds = array<i64: 192, 128>}, {pipeline_mode = #tpu.pipeline_mode<synchronous>, transform_indices = @transform_4, window_bounds = array<i64: 1, 128>}, {pipeline_mode = #tpu.pipeline_mode<synchronous>, transform_indices = @transform_5, window_bounds = array<i64: 128, 128>}, {pipeline_mode = #tpu.pipeline_mode<synchronous>, transform_indices = @transform_6, window_bounds = array<i64: 1, 128>}, {pipeline_mode = #tpu.pipeline_mode<synchronous>, transform_indices = @transform_7, window_bounds = array<i64: 128, 128>}, {pipeline_mode = #tpu.pipeline_mode<synchronous>, transform_indices = @transform_8, window_bounds = array<i64: 1, 128>}, {transform_indices = @transform_9, window_bounds = array<i64: 128, 128>}]} {
    %c0 = arith.constant 0 : index
    %c0_0 = arith.constant 0 : index
    %0 = vector.load %arg1[%c0, %c0_0] : memref<128x8xf32, #tpu.memory_space<vmem>>, vector<128x8xf32>
    %c0_1 = arith.constant 0 : index
    %c0_2 = arith.constant 0 : index
    %1 = vector.load %arg2[%c0_1, %c0_2] : memref<8x64xf32, #tpu.memory_space<vmem>>, vector<8x64xf32>
    %2 = vector.extract_strided_slice %0 {offsets = [0, 0], sizes = [128, 1], strides = [1, 1]} : vector<128x8xf32> to vector<128x1xf32>
    %3 = vector.extract_strided_slice %1 {offsets = [0, 0], sizes = [1, 64], strides = [1, 1]} : vector<8x64xf32> to vector<1x64xf32>
    %4 = vector.broadcast %2 : vector<128x1xf32> to vector<128x64xf32>
    %5 = vector.broadcast %3 : vector<1x64xf32> to vector<128x64xf32>
    %6 = arith.mulf %4, %5 : vector<128x64xf32>
    %7 = vector.extract_strided_slice %0 {offsets = [0, 1], sizes = [128, 1], strides = [1, 1]} : vector<128x8xf32> to vector<128x1xf32>
    %8 = vector.extract_strided_slice %1 {offsets = [1, 0], sizes = [1, 64], strides = [1, 1]} : vector<8x64xf32> to vector<1x64xf32>
    %9 = vector.broadcast %7 : vector<128x1xf32> to vector<128x64xf32>
    %10 = vector.broadcast %8 : vector<1x64xf32> to vector<128x64xf32>
    %11 = arith.mulf %9, %10 : vector<128x64xf32>
    %12 = vector.extract_strided_slice %0 {offsets = [0, 2], sizes = [128, 1], strides = [1, 1]} : vector<128x8xf32> to vector<128x1xf32>
    %13 = vector.extract_strided_slice %1 {offsets = [2, 0], sizes = [1, 64], strides = [1, 1]} : vector<8x64xf32> to vector<1x64xf32>
    %14 = vector.broadcast %12 : vector<128x1xf32> to vector<128x64xf32>
    %15 = vector.broadcast %13 : vector<1x64xf32> to vector<128x64xf32>
    %16 = arith.mulf %14, %15 : vector<128x64xf32>
    %17 = tpu.concatenate %6, %11, %16 in 1 : vector<128x64xf32>, vector<128x64xf32>, vector<128x64xf32> -> vector<128x192xf32>
    %18 = math.sin %17 : vector<128x192xf32>
    %19 = math.cos %17 : vector<128x192xf32>
    %c0_3 = arith.constant 0 : index
    %c0_4 = arith.constant 0 : index
    %20 = vector.load %arg3[%c0_3, %c0_4] : memref<192x128xbf16, #tpu.memory_space<vmem>>, vector<192x128xbf16>
    %c0_5 = arith.constant 0 : index
    %c0_6 = arith.constant 0 : index
    %21 = vector.load %arg4[%c0_5, %c0_6] : memref<192x128xbf16, #tpu.memory_space<vmem>>, vector<192x128xbf16>
    %22 = arith.truncf %18 : vector<128x192xf32> to vector<128x192xbf16>
    %cst = arith.constant dense<0.000000e+00> : vector<128x128xf32>
    %23 = tpu.matmul %22, %20, %cst {dimension_numbers = #tpu.dot_dimension_numbers<[1], [0], [0], [1], [0, 0, 1, 1], [], []>} : vector<128x192xbf16>, vector<192x128xbf16>, vector<128x128xf32> -> vector<128x128xf32>
    %24 = arith.truncf %19 : vector<128x192xf32> to vector<128x192xbf16>
    %cst_7 = arith.constant dense<0.000000e+00> : vector<128x128xf32>
    %25 = tpu.matmul %24, %21, %cst_7 {dimension_numbers = #tpu.dot_dimension_numbers<[1], [0], [0], [1], [0, 0, 1, 1], [], []>} : vector<128x192xbf16>, vector<192x128xbf16>, vector<128x128xf32> -> vector<128x128xf32>
    %26 = arith.addf %23, %25 : vector<128x128xf32>
    %c0_8 = arith.constant 0 : index
    %c0_9 = arith.constant 0 : index
    %27 = vector.load %arg5[%c0_8, %c0_9] : memref<1x128xf32, #tpu.memory_space<vmem>>, vector<1x128xf32>
    %28 = vector.broadcast %27 : vector<1x128xf32> to vector<128x128xf32>
    %29 = arith.addf %26, %28 : vector<128x128xf32>
    %cst_10 = arith.constant 0.000000e+00 : f32
    %30 = vector.broadcast %cst_10 : f32 to vector<128x128xf32>
    %31 = arith.maximumf %29, %30 : vector<128x128xf32>
    %c0_11 = arith.constant 0 : index
    %c0_12 = arith.constant 0 : index
    %32 = vector.load %arg6[%c0_11, %c0_12] : memref<128x128xbf16, #tpu.memory_space<vmem>>, vector<128x128xbf16>
    %c0_13 = arith.constant 0 : index
    %c0_14 = arith.constant 0 : index
    %33 = vector.load %arg7[%c0_13, %c0_14] : memref<1x128xf32, #tpu.memory_space<vmem>>, vector<1x128xf32>
    %34 = arith.truncf %31 : vector<128x128xf32> to vector<128x128xbf16>
    %cst_15 = arith.constant dense<0.000000e+00> : vector<128x128xf32>
    %35 = tpu.matmul %34, %32, %cst_15 {dimension_numbers = #tpu.dot_dimension_numbers<[1], [0], [0], [1], [0, 0, 1, 1], [], []>} : vector<128x128xbf16>, vector<128x128xbf16>, vector<128x128xf32> -> vector<128x128xf32>
    %36 = vector.broadcast %33 : vector<1x128xf32> to vector<128x128xf32>
    %37 = arith.addf %35, %36 : vector<128x128xf32>
    %cst_16 = arith.constant 0.000000e+00 : f32
    %38 = vector.broadcast %cst_16 : f32 to vector<128x128xf32>
    %39 = arith.maximumf %37, %38 : vector<128x128xf32>
    %c0_17 = arith.constant 0 : index
    %c0_18 = arith.constant 0 : index
    %40 = vector.load %arg8[%c0_17, %c0_18] : memref<128x128xbf16, #tpu.memory_space<vmem>>, vector<128x128xbf16>
    %41 = arith.truncf %39 : vector<128x128xf32> to vector<128x128xbf16>
    %cst_19 = arith.constant dense<0.000000e+00> : vector<128x128xf32>
    %42 = tpu.matmul %41, %40, %cst_19 {dimension_numbers = #tpu.dot_dimension_numbers<[1], [0], [0], [1], [0, 0, 1, 1], [], []>} : vector<128x128xbf16>, vector<128x128xbf16>, vector<128x128xf32> -> vector<128x128xf32>
    %c0_20 = arith.constant 0 : index
    %c0_21 = arith.constant 0 : index
    %43 = vector.load %arg9[%c0_20, %c0_21] : memref<1x128xf32, #tpu.memory_space<vmem>>, vector<1x128xf32>
    %44 = vector.broadcast %43 : vector<1x128xf32> to vector<128x128xf32>
    %45 = arith.addf %42, %44 : vector<128x128xf32>
    %c0_22 = arith.constant 0 : index
    %c0_23 = arith.constant 0 : index
    %46 = vector.load %arg10[%c0_22, %c0_23] : memref<128x128xf32, #tpu.memory_space<vmem>>, vector<128x128xf32>
    tpu.vector_store %arg10[%c0_22, %c0_23], %45 {strides = array<i32>} : memref<128x128xf32, #tpu.memory_space<vmem>>, vector<128x128xf32>,
    return
  }
  func.func @transform_0(%arg0: i32) -> (i32, i32) {
    %c0_i32 = arith.constant 0 : i32
    %c0_i32_0 = arith.constant 0 : i32
    return %arg0, %c0_i32 : i32, i32
  }
  func.func @transform_1(%arg0: i32) -> (i32, i32) {
    %c0_i32 = arith.constant 0 : i32
    %c0_i32_0 = arith.constant 0 : i32
    %c0_i32_1 = arith.constant 0 : i32
    return %c0_i32, %c0_i32_0 : i32, i32
  }
  func.func @transform_2(%arg0: i32) -> (i32, i32) {
    %c0_i32 = arith.constant 0 : i32
    %c0_i32_0 = arith.constant 0 : i32
    %c0_i32_1 = arith.constant 0 : i32
    return %c0_i32, %c0_i32_0 : i32, i32
  }
  func.func @transform_3(%arg0: i32) -> (i32, i32) {
    %c0_i32 = arith.constant 0 : i32
    %c0_i32_0 = arith.constant 0 : i32
    %c0_i32_1 = arith.constant 0 : i32
    return %c0_i32, %c0_i32_0 : i32, i32
  }
  func.func @transform_4(%arg0: i32) -> (i32, i32) {
    %c0_i32 = arith.constant 0 : i32
    %c0_i32_0 = arith.constant 0 : i32
    %c0_i32_1 = arith.constant 0 : i32
    return %c0_i32, %c0_i32_0 : i32, i32
  }
  func.func @transform_5(%arg0: i32) -> (i32, i32) {
    %c0_i32 = arith.constant 0 : i32
    %c0_i32_0 = arith.constant 0 : i32
    %c0_i32_1 = arith.constant 0 : i32
    return %c0_i32, %c0_i32_0 : i32, i32
  }
  func.func @transform_6(%arg0: i32) -> (i32, i32) {
    %c0_i32 = arith.constant 0 : i32
    %c0_i32_0 = arith.constant 0 : i32
    %c0_i32_1 = arith.constant 0 : i32
    return %c0_i32, %c0_i32_0 : i32, i32
  }
  func.func @transform_7(%arg0: i32) -> (i32, i32) {
    %c0_i32 = arith.constant 0 : i32
    %c0_i32_0 = arith.constant 0 : i32
    %c0_i32_1 = arith.constant 0 : i32
    return %c0_i32, %c0_i32_0 : i32, i32
  }
  func.func @transform_8(%arg0: i32) -> (i32, i32) {
    %c0_i32 = arith.constant 0 : i32
    %c0_i32_0 = arith.constant 0 : i32
    %c0_i32_1 = arith.constant 0 : i32
    return %c0_i32, %c0_i32_0 : i32, i32
  }
  func.func @transform_9(%arg0: i32) -> (i32, i32) {
    %c0_i32 = arith.constant 0 : i32
    %c0_i32_0 = arith.constant 0 : i32
    return %arg0, %c0_i32 : i32, i32
  }
}

</mosaic_0001>

<bundles_post_ra>
// kernel: tpu_custom_call.1
= control target key start
LH: loop header
LB: loop body
LE: loop exit
PB: predicated region body
PF: predicated region fallthrough
CT: control target
= control target key end

     0   :  { %14 = vsyncpa [#allocation3], 0  ;;  %s13192_s0 = inlined_call_operand.vmem [shape: f32[256,8], index: 0, kind: input, shape index: {}]   ;;  %s13193_s1 = inlined_call_operand.vmem [shape: f32[8,64], index: 1, kind: input, shape index: {}]   ;;  %s13194_s2 = inlined_call_operand.vmem [shape: bf16[192,128], index: 2, kind: input, shape index: {}]   ;;  %s13195_s3 = inlined_call_operand.vmem [shape: bf16[192,128], index: 3, kind: input, shape index: {}]   ;;  %s13196_s4 = inlined_call_operand.vmem [shape: f32[1,128], index: 4, kind: input, shape index: {}]   ;;  %s13197_s5 = inlined_call_operand.vmem [shape: bf16[128,128], index: 5, kind: input, shape index: {}]   ;;  %s13198_s6 = inlined_call_operand.vmem [shape: f32[1,128], index: 6, kind: input, shape index: {}]   ;;  %s13199_s7 = inlined_call_operand.hbm [shape: bf16[128,128], index: 7, kind: input, shape index: {}]   ;;  %s13200_s8 = inlined_call_operand.vmem [shape: f32[1,128], index: 8, kind: input, shape index: {}]   ;;  %s13201_s9 = inlined_call_operand.hbm [shape: f32[256,128], index: 9, kind: output, shape index: {}]  }
   0x1   :  { %15 = vsyncpa [#allocation4], 0 }
   0x2   :  { %17 = vsyncpa [#allocation4 + $0x1], 0  ;;  %s9284_s30 = smov 0   ;;  %s9286_s10 = smov 0  }
   0x3   :  { %s9288_s11 = smov 0   ;;  %s9290_s12 = smov 0  }
   0x4 LB: > { %s9305_s13 = sadd.s32 4294967295, %s9216_s12   ;;  %s8317_s14 = sadd.s32 4294967294, %s9216_s12   ;;  %s9216_s12 = sphi %s9290_s12, %s13731_s12   ;;  %s9212_s11 = sphi %s9288_s11, %s13730_s11   ;;  %s9208_s10 = sphi %s9286_s10, %s13729_s10   ;;  %s9204_s30 = sphi %s9284_s30, %s13728_s30  }
   0x5   : > { %s9309_s15 = sadd.s32 1, %s9216_s12   ;;  %s224_s16 = sadd.s32 1, %s9212_s11 }
   0x6   : > { %s221_s17 = ssub.s32 %s9216_s12, %s9309_s15  ;;  %p234_p0 = scmp.ne.s32.totalorder %s9212_s11, %s9208_s10 }
   0x7   : > { %p222_p1 = scmp.eq.s32.totalorder %s221_s17, 0  ;;  %p235_p2 = scmp.eq.s32.totalorder %s9305_s13, 1 }
   0x8   : > { %p240_p3 = scmp.ne.s32.totalorder %s9208_s10, %s9204_s30  ;;  %p241_p4 = scmp.eq.s32.totalorder %s8317_s14, 1 }
   0x9   : > { %s9320_s18 = scalar_select %p222_p1, %s9212_s11, %s224_s16  }
   0xa   : > { %p9322_p5 = por %p235_p2, %p234_p0  ;;  %p9326_p6 = por %p241_p4, %p240_p3 }
   0xb   : > { %p8318_p7 = scmp.ge.s32.totalorder %s9216_s12, 1  ;;  %p248_p8 = scmp.lt.s32.totalorder %s9216_s12, 3 }
   0xc   : > { %s13370_s20 = scalar_select %p9326_p6, 1, 0 }
   0xd   : > { %p8885_p9 = scmp.eq.s32.totalorder %s9305_s13, 0  ;;  %p9333_p10 = pnand %p8318_p7, %p248_p8 }
   0xe   : > { %s9218_s22 = smov [#allocation2]  }
   0xf   : > { %s278_s23 = sshll.u32 %s9218_s22, 4  ;;  %p8877_p11 = pneg %p9333_p10  ;;  %s279_s23 = int_to_ptr.vmem [resolvable:$true] %s278_s23 }
  0x10   : > { %s9137_s24 = scalar_lea.vmem %s279_s23, 1024  ;;  %p9145_p3 = scmp.lt.s32.totalorder %s279_s23, %s279_s23 }
  0x11   : > { %p8878_p12 = pnand %p8885_p9, %p8877_p11  ;;  %p9138_p0 = scmp.ne.s32.totalorder %s279_s23, %s9137_s24 }
  0x12   : > { %p9146_p4 = scmp.lt.s32.totalorder %s9137_s24, %s9137_s24 }
  0x13   : > { %p9128_p13 = pneg %p8878_p12 }
  0x14   : > { %p9147_p6 = por %p9146_p4, %p9145_p3 }
  0x15   : > { %p9140_p1 = pnand %p9138_p0, %p9128_p13 }
  0x17   : > { %p9141_p2 = pneg %p9140_p1 }
  0x19   : > { %p9148_p7 = pnand %p9147_p6, %p9141_p2 }
  0x1b   : > { %9151 = shalt.err (!%p9148_p7)
}
  0x1c   : > { %s9219_s25 = smov 64   ;;  %s9220_s26 = smov 4  }
  0x1d   : > { %8880 = dma.hbm_to_vmem [thread:$0]  (!%p8878_p12), %s13199_s7, 1024, %s279_s23, [#allocation3], %s9219_s25, %s9219_s25, %s9220_s26  }
  0x1e   : > { %306 = sbr.rel (%p9333_p10) target bundleno = 1717 (0x6b5), region = 56 }
  0x23   : > { %9195 = dma.done.wait (%p8885_p9), [#allocation3], 1024  }
  0x24   : > { %9197 = vsyncadd (%p8885_p9), [#allocation3], 4294966272  ;;  %s8324_s29 = sshll.u32 %s9305_s13, 4  ;;  %v9221_v0 = vmov 1   ;;  %v13202_v1 = vmov 0   ;;  %v447_v4 = vlaneseq  ;;  %v366_v20 = vld [vmem:[%s13193_s1] sm:$0xff] }
  0x25   : > { %8936 = vset.pattern.permute.xlu1 %v9221_v0  ;;  %8935 = vset.pattern.permute.xlu0 %v9221_v0  ;;  %p343_p6 = scmp.lt.s32.totalorder %s8324_s29, 31  ;;  %v9223_v24 = vmov 2   ;;  %s9224_s24 = smov 64  }
  0x26   : > { %7516 = vmatprep.subr.bf16.mxu0 %v13202_v1  ;;  %7709 = vmatprep.subr.bf16.mxu1 %v13202_v1  ;;  %v9356_v9 = vshrl.u32 %v447_v4, 7  ;;  %s8646_s26 = sshll.u32 %s9305_s13, 11  ;;  %s9231_s17 = smov [#allocation5]  }
  0x27   : > { %s13733_s29 = smov (!%p343_p6, %s8324_s29), 31 }
  0x28   : > { %s8325_s14 = sshll.u32 %s13733_s29, 3  ;;  %v449_v21 = vsub.s32 0, %v9356_v9  ;;  %v617_v23 = vsub.s32 2, %v9356_v9  ;;  %v533_v26 = vsub.s32 1, %v9356_v9 }
  0x29   : > { %s346_s21 = scalar_lea.vmem %s13192_s0, %s8325_s14  ;;  %s13144_s14 = scalar_lea.hbm %s13201_s9, %s8646_s26 }
  0x2a   : > { %v352_v2 = vld [vmem:[%s346_s21 + $0x10] sm:$0xff]  ;;  %v350_v3 = vld [vmem:[%s346_s21] sm:$0xff]  ;;  %v353_v5 = vld [vmem:[%s346_s21 + $0x18] sm:$0xff]  ;;  %v9368_v22 = vrot.slane %v366_v20, %v449_v21  ;;  %v9373_v25 = vrot.slane %v366_v20, %v617_v23  ;;  %v9396_v27 = vrot.slane %v366_v20, %v533_v26 }
  0x2b   : > { %476 = vperm.xlu1 %8936, %v352_v2   ;;  %468 = vperm.xlu0 %8935, %v350_v3   ;;  %v351_v6 = vld [vmem:[%s346_s21 + $0x8] sm:$0xff]  ;;  %v354_v8 = vld [vmem:[%s346_s21 + $0x20] sm:$0xff]  ;;  %v357_v10 = vld [vmem:[%s346_s21 + $0x38] sm:$0xff] }
  0x2c   : > { %v355_v7 = vld [vmem:[%s346_s21 + $0x28] sm:$0xff]  ;;  %v356_v11 = vld [vmem:[%s346_s21 + $0x30] sm:$0xff]  ;;  %v358_v13 = vld [vmem:[%s346_s21 + $0x40] sm:$0xff] }
  0x2d   : > { %v359_v12 = vld [vmem:[%s346_s21 + $0x48] sm:$0xff]  ;;  %v361_v14 = vld [vmem:[%s346_s21 + $0x58] sm:$0xff]  ;;  %v360_v15 = vld [vmem:[%s346_s21 + $0x50] sm:$0xff] }
  0x2e   : > { %v363_v16 = vld [vmem:[%s346_s21 + $0x68] sm:$0xff]  ;;  %v362_v17 = vld [vmem:[%s346_s21 + $0x60] sm:$0xff]  ;;  %v9358_v18 = vld [vmem:[%s346_s21 + $0x78] sm:$0xff] }
  0x2f   : > { %480 = vperm.xlu1 %8936, %v353_v5   ;;  %472 = vperm.xlu0 %8935, %v351_v6   ;;  %v9360_v19 = vld [vmem:[%s346_s21 + $0x70] sm:$0xff]  ;;  %s339_s21 = sand.u32 1, %s9208_s10  }
  0x30   : > { %s8323_s22 = sshll.u32 %s339_s21, 7  ;;  %s13152_s13 = scalar_lea.sflag [#allocation4], %s339_s21 }
  0x31   : > { %s13123_s25 = scalar_lea.vmem [#allocation5], %s8323_s22  ;;  %s9156_s22 = sshll.u32 %s9231_s17, 4  ;;  %s9157_s22 = int_to_ptr.vmem [resolvable:$false] %s9156_s22 }
  0x32   : > { %s8243_s27 = sshll.u32 %s13123_s25, 4  ;;  %s9158_s23 = scalar_lea.vmem %s9157_s22, 4096  ;;  %s13146_s27 = int_to_ptr.vmem [resolvable:$true] %s8243_s27 }
  0x33   : > { %488 = vperm.xlu1 %8936, %v355_v7   ;;  %484 = vperm.xlu0 %8935, %v354_v8   ;;  %s9152_s16 = scalar_lea.vmem %s13146_s27, 2048  ;;  %p9159_p11 = scmp.lt.s32.totalorder %s13146_s27, %s9157_s22 }
  0x34   : > { %p9153_p8 = scmp.ne.s32.totalorder %s13146_s27, %s9152_s16  ;;  %p9160_p12 = scmp.lt.s32.totalorder %s9158_s23, %s9152_s16 }
  0x36   : > { %p9154_p9 = pnand %p9153_p8, %p9322_p5  ;;  %p9161_p13 = por %p9160_p12, %p9159_p11 }
  0x37   : > { %496 = vperm.xlu1 %8936, %v357_v10   ;;  %492 = vperm.xlu0 %8935, %v356_v11  }
  0x38   : > { %p9155_p10 = pneg %p9154_p9 }
  0x3a   : > { %p9162_p0 = pnand %p9161_p13, %p9155_p10 }
  0x3b   : > { %504 = vperm.xlu1 %8936, %v359_v12   ;;  %500 = vperm.xlu0 %8935, %v358_v13  }
  0x3f   : > { %512 = vperm.xlu1 %8936, %v361_v14   ;;  %508 = vperm.xlu0 %8935, %v360_v15  }
  0x43   : > { %520 = vperm.xlu1 %8936, %v363_v16   ;;  %516 = vperm.xlu0 %8935, %v362_v17  }
  0x47   : > { %528 = vperm.xlu1 %8936, %v9358_v18   ;;  %524 = vperm.xlu0 %8935, %v9360_v19  }
  0x4b   : > { %8937 = vset.pattern.permute.xlu1 %v13202_v1  ;;  %8939 = vset.pattern.permute.xlu0 %v9223_v24 }
  0x4c   : > { %374 = vperm.xlu1 %8937, %v351_v6   ;;  %556 = vperm.xlu0 %8939, %v351_v6  }
  0x50   : > { %8938 = vset.pattern.permute.xlu1 %v9223_v24  ;;  %564 = vperm.xlu0 %8939, %v353_v5  }
  0x51   : > { %552 = vperm.xlu1 %8938, %v350_v3  }
  0x54   : > { %8942 = vset.pattern.permute.xlu0 %v13202_v1 }
  0x55   : > { %8940 = vset.pattern.permute.xlu1 %v13202_v1  ;;  %369 = vperm.xlu0 %8942, %v350_v3  }
  0x56   : > { %384 = vperm.xlu1 %8940, %v353_v5  }
  0x59   : > { %379 = vperm.xlu0 %8942, %v352_v2  }
  0x5a   : > { %8941 = vset.pattern.permute.xlu1 %v9223_v24 }
  0x5b   : > { %560 = vperm.xlu1 %8941, %v352_v2  }
  0x5d   : > { %389 = vperm.xlu0 %8942, %v354_v8  }
  0x5f   : > { %8943 = vset.pattern.permute.xlu1 %v13202_v1 }
  0x60   : > { %394 = vperm.xlu1 %8943, %v355_v7  }
  0x61   : > { %399 = vperm.xlu0 %8942, %v356_v11  }
  0x64   : > { %8944 = vset.pattern.permute.xlu1 %v9223_v24 }
  0x65   : > { %568 = vperm.xlu1 %8944, %v354_v8   ;;  %409 = vperm.xlu0 %8942, %v358_v13  }
  0x69   : > { %8945 = vset.pattern.permute.xlu1 %v13202_v1  ;;  %8947 = vset.pattern.permute.xlu0 %v9223_v24 }
  0x6a   : > { %404 = vperm.xlu1 %8945, %v357_v10   ;;  %572 = vperm.xlu0 %8947, %v355_v7  }
  0x6e   : > { %8946 = vset.pattern.permute.xlu1 %v9223_v24  ;;  %580 = vperm.xlu0 %8947, %v357_v10  }
  0x6f   : > { %576 = vperm.xlu1 %8946, %v356_v11  }
  0x72   : > { %588 = vperm.xlu0 %8947, %v359_v12  }
  0x73   : > { %8948 = vset.pattern.permute.xlu1 %v13202_v1 }
  0x74   : > { %414 = vperm.xlu1 %8948, %v359_v12  }
  0x76   : > { %596 = vperm.xlu0 %8947, %v361_v14  }
  0x78   : > { %8949 = vset.pattern.permute.xlu1 %v9223_v24 }
  0x79   : > { %584 = vperm.xlu1 %8949, %v358_v13  }
  0x7a   : > { %604 = vperm.xlu0 %8947, %v363_v16  }
  0x7d   : > { %8950 = vset.pattern.permute.xlu1 %v13202_v1 }
  0x7e   : > { %424 = vperm.xlu1 %8950, %v361_v14   ;;  %8954 = vset.pattern.permute.xlu0 %v13202_v1 }
  0x7f   : > { %419 = vperm.xlu0 %8954, %v360_v15  }
  0x82   : > { %8951 = vset.pattern.permute.xlu1 %v9223_v24 }
  0x83   : > { %592 = vperm.xlu1 %8951, %v360_v15   ;;  %429 = vperm.xlu0 %8954, %v362_v17  }
  0x87   : > { %8952 = vset.pattern.permute.xlu1 %v13202_v1  ;;  %439 = vperm.xlu0 %8954, %v9360_v19  }
  0x88   : > { %434 = vperm.xlu1 %8952, %v363_v16  }
  0x8b   : > { %8957 = vset.pattern.permute.xlu0 %v9223_v24 }
  0x8c   : > { %8953 = vset.pattern.permute.xlu1 %v9223_v24  ;;  %612 = vperm.xlu0 %8957, %v9358_v18  }
  0x8d   : > { %600 = vperm.xlu1 %8953, %v362_v17  }
  0x91   : > { %8955 = vset.pattern.permute.xlu1 %v13202_v1 }
  0xa6   : > { %v477_v28 = vpop.permute.xlu1 %476  ;;  %v469_v29 = vpop.permute.xlu0 %468 }
  0xa7   : > { %v535_v30 = vmul.f32 %v9396_v27, %v469_v29  ;;  %v537_v34 = vmul.f32 %v9396_v27, %v477_v28 }
  0xa9   : > { %651 = vrot.lane.b32.xlu1 %v535_v30, %s9224_s24 }
  0xaa   : > { %v481_v31 = vpop.permute.xlu1 %480  ;;  %v473_v32 = vpop.permute.xlu0 %472 }
  0xab   : > { %v536_v33 = vmul.f32 %v9396_v27, %v473_v32  ;;  %v538_v39 = vmul.f32 %v9396_v27, %v481_v31 }
  0xad   : > { %653 = vrot.lane.b32.xlu1 %v536_v33, %s9224_s24  ;;  %v13219_v33 = vmov 683565275  }
  0xae   : > { %v489_v35 = vpop.permute.xlu1 %488  ;;  %v485_v36 = vpop.permute.xlu0 %484 }
  0xaf   : > { %v539_v42 = vmul.f32 %v9396_v27, %v485_v36  ;;  %v540_v45 = vmul.f32 %v9396_v27, %v489_v35  ;;  %v13211_v35 = vmov 2475754826  }
  0xb1   : > { %655 = vrot.lane.b32.xlu1 %v537_v34, %s9224_s24 }
  0xb2   : > { %v497_v37 = vpop.permute.xlu1 %496  ;;  %v493_v38 = vpop.permute.xlu0 %492 }
  0xb3   : > { %v541_v48 = vmul.f32 %v9396_v27, %v493_v38  ;;  %v542_v49 = vmul.f32 %v9396_v27, %v497_v37  ;;  %v13209_v37 = vmov 2131351028  }
  0xb5   : > { %657 = vrot.lane.b32.xlu1 %v538_v39, %s9224_s24  ;;  %v13213_v39 = vmov 2102212464  }
  0xb6   : > { %v505_v40 = vpop.permute.xlu1 %504  ;;  %v501_v41 = vpop.permute.xlu0 %500 }
  0xb7   : > { %v543_v52 = vmul.f32 %v9396_v27, %v501_v41  ;;  %v544_v58 = vmul.f32 %v9396_v27, %v505_v40  ;;  %v13215_v41 = vmov 920167782  }
  0xb9   : > { %659 = vrot.lane.b32.xlu1 %v539_v42, %s9224_s24 }
  0xba   : > { %v513_v43 = vpop.permute.xlu1 %512  ;;  %v509_v44 = vpop.permute.xlu0 %508 }
  0xbb   : > { %v545_v3 = vmul.f32 %v9396_v27, %v509_v44  ;;  %v546_v13 = vmul.f32 %v9396_v27, %v513_v43 }
  0xbd   : > { %661 = vrot.lane.b32.xlu1 %v540_v45, %s9224_s24 }
  0xbe   : > { %v521_v46 = vpop.permute.xlu1 %520  ;;  %v517_v47 = vpop.permute.xlu0 %516 }
  0xbf   : > { %v548_v14 = vmul.f32 %v9396_v27, %v521_v46  ;;  %v547_v20 = vmul.f32 %v9396_v27, %v517_v47 }
  0xc1   : > { %663 = vrot.lane.b32.xlu1 %v541_v48, %s9224_s24 }
  0xc2   : > { %v9413_v50 = vpop.permute.xlu1 %528  ;;  %v525_v51 = vpop.permute.xlu0 %524 }
  0xc3   : > { %v9447_v21 = vmul.f32 %v9396_v27, %v525_v51 }
  0xc5   : > { %665 = vrot.lane.b32.xlu1 %v542_v49, %s9224_s24  ;;  %v13217_v49 = vmov 1326507024  }
  0xc7   : > { %v9417_v53 = vpop.permute.xlu1 %374  ;;  %v557_v54 = vpop.permute.xlu0 %556 }
  0xc8   : > { %v9420_v55 = vmul.f32 %v9373_v25, %v557_v54 }
  0xc9   : > { %667 = vrot.lane.b32.xlu1 %v543_v52, %s9224_s24 }
  0xca   : > { %13372 = vst [vmem:[#allocation8_spill] sm:$0xff] %v9420_v55  ;;  %v13204_v56 = vand.u32 2147483647, %v9420_v55  ;;  %v1031_v57 = vand.u32 2139095040, %v9420_v55 }
  0xcb   : > { %v565_v59 = vpop.permute.xlu0 %564 }
  0xcc   : > { %v1032_v60 = vshrl.u32 %v1031_v57, 23  ;;  %v1035_v61 = vand.u32 8388607, %v13204_v56  ;;  %v553_v62 = vpop.permute.xlu1 %552  ;;  %v9429_v63 = vmul.f32 %v9373_v25, %v565_v59 }
  0xcd   : > { %v9432_v0 = vmul.f32 %v9373_v25, %v553_v62  ;;  %669 = vrot.lane.b32.xlu1 %v544_v58, %s9224_s24 }
  0xce   : > { %13373 = vst [vmem:[#allocation9_spill] sm:$0xff] %v9429_v63  ;;  %v8338_v2 = vadd.s32 4294967169, %v1032_v60  ;;  %v1447_v6 = vand.u32 2139095040, %v9429_v63  ;;  %v1036_v7 = vor.u32 8388608, %v1035_v61  ;;  %v13208_v11 = vand.u32 2147483647, %v9429_v63 }
  0xcf   : > { %13374 = vst [vmem:[#allocation10_spill] sm:$0xff] %v9432_v0  ;;  %v13205_v4 = vand.u32 2147483647, %v9432_v0  ;;  %v823_v5 = vand.u32 2139095040, %v9432_v0 }
  0xd0   : > { %v1038_v8 = vadd.s32 1, %v8338_v2  ;;  %v1448_v12 = vshrl.u32 %v1447_v6, 23  ;;  %v9449_v28 = vshll.u32 %v1036_v7, 8  ;;  %v9453_v31 = vand.u32 8388607, %v13208_v11 }
  0xd1   : > { %v824_v9 = vshrl.u32 %v823_v5, 23  ;;  %v827_v10 = vand.u32 8388607, %v13205_v4  ;;  %671 = vrot.lane.b32.xlu1 %v545_v3, %s9224_s24 }
  0xd2   : > { %vm1039_vm0 = vcmp.gt.s32.totalorder %v1038_v8, 0  ;;  %v8354_v17 = vadd.s32 4294967169, %v1448_v12 }
  0xd3   : > { %v1040_v15 = vsel %vm1039_vm0, %v1038_v8, 0  ;;  %v8330_v16 = vadd.s32 4294967169, %v824_v9  ;;  %v828_v29 = vor.u32 8388608, %v827_v10 }
  0xd4   : > { %v1041_v23 = vshrl.u32 %v1040_v15, 5  ;;  %v1042_v26 = vand.u32 31, %v1040_v15  ;;  %v9461_v43 = vadd.s32 1, %v8354_v17 }
  0xd5   : > { %v830_v30 = vadd.s32 1, %v8330_v16  ;;  %673 = vrot.lane.b32.xlu1 %v546_v13, %s9224_s24  ;;  %v9476_v8 = vshll.u32 %v828_v29, 8 }
  0xd6   : > { %v1043_v32 = vsub.s32 32, %v1042_v26  ;;  %v1045_v34 = vshll.u32 %v13219_v33, %v1042_v26  ;;  %v1048_v36 = vshll.u32 %v13211_v35, %v1042_v26  ;;  %v1051_v38 = vshll.u32 %v13209_v37, %v1042_v26 }
  0xd7   : > { %v1054_v40 = vshll.u32 %v13213_v39, %v1042_v26  ;;  %v1057_v42 = vshll.u32 %v13215_v41, %v1042_v26  ;;  %vm1060_vm1 = vcmp.lt.s32.totalorder %v1041_v23, 1  ;;  %vm1061_vm2 = vcmp.lt.s32.totalorder %v1041_v23, 2 }
  0xd8   : > { %v1044_v44 = vshrl.u32 %v13219_v33, %v1043_v32  ;;  %v1046_v45 = vshrl.u32 %v13211_v35, %v1043_v32  ;;  %v1049_v46 = vshrl.u32 %v13209_v37, %v1043_v32  ;;  %v1052_v47 = vshrl.u32 %v13213_v39, %v1043_v32 }
  0xd9   : > { %v1055_v48 = vshrl.u32 %v13215_v41, %v1043_v32  ;;  %v1058_v51 = vshrl.u32 %v13217_v49, %v1043_v32  ;;  %vm1063_vm3 = vcmp.lt.s32.totalorder %v1041_v23, 4  ;;  %675 = vrot.lane.b32.xlu1 %v547_v20, %s9224_s24  ;;  %vm831_vm4 = vcmp.gt.s32.totalorder %v830_v30, 0 }
  0xda   : > { %v1047_v52 = vor.u32 %v1046_v45, %v1045_v34  ;;  %v1050_v54 = vor.u32 %v1049_v46, %v1048_v36  ;;  %v1053_v57 = vor.u32 %v1052_v47, %v1051_v38  ;;  %vm1062_vm5 = vcmp.lt.s32.totalorder %v1041_v23, 3 }
  0xdb   : > { %v1056_v58 = vor.u32 %v1055_v48, %v1054_v40  ;;  %v1059_v59 = vor.u32 %v1058_v51, %v1057_v42  ;;  %v832_v60 = vsel %vm831_vm4, %v830_v30, 0  ;;  %vm1455_vm6 = vcmp.gt.s32.totalorder %v9461_v43, 0 }
  0xdc   : > { %v1064_v61 = vsel %vm1060_vm1, %v1044_v44, %v1047_v52  ;;  %v1065_v62 = vsel %vm1063_vm3, %v1053_v57, 2102212464  ;;  %v1068_v2 = vsel %vm1060_vm1, %v1047_v52, %v1050_v54  ;;  %v1072_v3 = vsel %vm1060_vm1, %v1050_v54, %v1053_v57 }
  0xdd   : > { %v1066_v5 = vsel %vm1062_vm5, %v1050_v54, %v1065_v62  ;;  %v1069_v6 = vsel %vm1063_vm3, %v1056_v58, 920167782  ;;  %v1073_v7 = vsel %vm1063_vm3, %v1059_v59, 1326507024  ;;  %677 = vrot.lane.b32.xlu1 %v548_v14, %s9224_s24  ;;  %v833_v12 = vshrl.u32 %v832_v60, 5 }
  0xde   : > { %v1070_v9 = vsel %vm1062_vm5, %v1053_v57, %v1069_v6  ;;  %v1074_v10 = vsel %vm1062_vm5, %v1056_v58, %v1073_v7  ;;  %v834_v13 = vand.u32 31, %v832_v60  ;;  %v1067_v15 = vsel %vm1061_vm2, %v1064_v61, %v1066_v5 }
  0xdf   : > { %v1071_v16 = vsel %vm1061_vm2, %v1068_v2, %v1070_v9  ;;  %v1075_v17 = vsel %vm1061_vm2, %v1072_v3, %v1074_v10  ;;  %v1083_v23 = vmul.u32 %v9449_v28, %v1067_v15  ;;  %vm852_vm7 = vcmp.lt.s32.totalorder %v833_v12, 1 }
  0xe0   : > { %v9484_v20 = vmul.u32.u64.low %v9449_v28, %v1075_v17  ;;  %v9485_v26 = vmul.u32.u64.high %v9449_v28, %v1075_v17, %v9484_v20  ;;  %v9488_v29 = vmul.u32.u64.low %v9449_v28, %v1071_v16  ;;  %v9489_v30 = vmul.u32.u64.high %v9449_v28, %v1071_v16, %v9488_v29 }
  0xe1   : > { %v835_v14 = vsub.s32 32, %v834_v13  ;;  %v837_v32 = vshll.u32 %v13219_v33, %v834_v13  ;;  %v840_v34 = vshll.u32 %v13211_v35, %v834_v13  ;;  %v843_v36 = vshll.u32 %v13209_v37, %v834_v13  ;;  %444 = vperm.xlu1 %8955, %v9358_v18  }
  0xe2   : > { %v846_v38 = vshll.u32 %v13213_v39, %v834_v13  ;;  %v849_v40 = vshll.u32 %v13215_v41, %v834_v13  ;;  %vm1085_vm8 = vc.u32 %v9485_v26, %v9488_v29  ;;  %v1086_v18 = vadd.s32 1, %v9489_v30 }
  0xe3   : > { %v836_v42 = vshrl.u32 %v13219_v33, %v835_v14  ;;  %v838_v44 = vshrl.u32 %v13211_v35, %v835_v14  ;;  %v841_v45 = vshrl.u32 %v13209_v37, %v835_v14  ;;  %v844_v46 = vshrl.u32 %v13213_v39, %v835_v14 }
  0xe4   : > { %v847_v28 = vshrl.u32 %v13215_v41, %v835_v14  ;;  %vm853_vm9 = vcmp.lt.s32.totalorder %v833_v12, 2  ;;  %v850_v52 = vshrl.u32 %v13217_v49, %v835_v14  ;;  %v1087_v54 = vsel %vm1085_vm8, %v1086_v18, %v9489_v30 }
  0xe5   : > { %v839_v47 = vor.u32 %v838_v44, %v837_v32  ;;  %v842_v48 = vor.u32 %v841_v45, %v840_v34  ;;  %v845_v51 = vor.u32 %v844_v46, %v843_v36  ;;  %8956 = vset.pattern.permute.xlu1 %v9223_v24  ;;  %vm854_vm10 = vcmp.lt.s32.totalorder %v833_v12, 3 }
  0xe6   : > { %v848_v57 = vor.u32 %v847_v28, %v846_v38  ;;  %vm855_vm11 = vcmp.lt.s32.totalorder %v833_v12, 4  ;;  %608 = vperm.xlu1 %8956, %v9360_v19   ;;  %v9511_v58 = vadd.s32 %v1087_v54, %v1083_v23  ;;  %v851_v59 = vor.u32 %v850_v52, %v849_v40  ;;  %v9550_v40 = vpop.permute.xlu1 %384 }
  0xe7   : > { %v856_v60 = vsel %vm852_vm7, %v836_v42, %v839_v47  ;;  %v857_v61 = vsel %vm855_vm11, %v845_v51, 2102212464  ;;  %v860_v2 = vsel %vm852_vm7, %v839_v47, %v842_v48  ;;  %v864_v24 = vsel %vm852_vm7, %v842_v48, %v845_v51 }
  0xe8   : > { %v858_v62 = vsel %vm854_vm10, %v842_v48, %v857_v61  ;;  %v861_v3 = vsel %vm855_vm11, %v848_v57, 920167782  ;;  %v865_v6 = vsel %vm855_vm11, %v851_v59, 1326507024  ;;  %v1456_v19 = vsel %vm1455_vm6, %v9461_v43, 0 }
  0xe9   : > { %v862_v5 = vsel %vm854_vm10, %v845_v51, %v861_v3  ;;  %v1089_v7 = vadd.s32 536870912, %v9511_v58  ;;  %v866_v10 = vsel %vm854_vm10, %v848_v57, %v865_v6  ;;  %v1452_v13 = vor.u32 8388608, %v9453_v31 }
  0xea   : > { %v863_v9 = vsel %vm853_vm9, %v860_v2, %v862_v5  ;;  %679 = vrot.lane.b32.xlu1 %v9447_v21, %s9224_s24  ;;  %v859_v15 = vsel %vm853_vm9, %v856_v60, %v858_v62  ;;  %v867_v16 = vsel %vm853_vm9, %v864_v24, %v866_v10  ;;  %v550_v43 = vmul.f32 %v9396_v27, %v9413_v50  ;;  %v9564_v62 = vpop.permute.xlu0 %369  ;;  %v561_v5 = vpop.permute.xlu1 %560 }
  0xeb   : > { %v9530_v17 = vmul.u32.u64.low %v9476_v8, %v863_v9  ;;  %v9531_v20 = vmul.u32.u64.high %v9476_v8, %v863_v9, %v9530_v17  ;;  %v9537_v30 = vmul.u32.u64.low %v9476_v8, %v867_v16  ;;  %v9538_v14 = vmul.u32.u64.high %v9476_v8, %v867_v16, %v9537_v30 }
  0xec   : > { %v1458_v31 = vand.u32 31, %v1456_v19  ;;  %v1457_v32 = vshrl.u32 %v1456_v19, 5  ;;  %v875_v21 = vmul.u32 %v9476_v8, %v859_v15  ;;  %v9542_v36 = vshll.u32 %v1452_v13, 8 }
  0xed   : > { %v9545_v23 = vshrl.u32 %v1089_v7, 30  ;;  %v878_v38 = vadd.s32 1, %v9531_v20  ;;  %vm877_vm12 = vc.u32 %v9538_v14, %v9530_v17  ;;  %v9575_v30 = vmul.f32 %v9373_v25, %v561_v5 }
  0xee   : > { %v1459_v34 = vsub.s32 32, %v1458_v31  ;;  %v1461_v12 = vshll.u32 %v13219_v33, %v1458_v31  ;;  %681 = vrot.lane.b32.xlu1 %v550_v43, %s9224_s24  ;;  %v1464_v27 = vshll.u32 %v13211_v35, %v1458_v31  ;;  %v1467_v50 = vshll.u32 %v13209_v37, %v1458_v31 }
  0xef   : > { %13375 = vst [vmem:[#allocation11_spill] sm:$0xff] %v9545_v23  ;;  %v1470_v42 = vshll.u32 %v13213_v39, %v1458_v31  ;;  %v1473_v44 = vshll.u32 %v13215_v41, %v1458_v31  ;;  %v879_v45 = vsel %vm877_vm12, %v878_v38, %v9531_v20  ;;  %vm1476_vm13 = vcmp.lt.s32.totalorder %v1457_v32, 1  ;;  %13376 = vst [vmem:[#allocation12_spill] sm:$0xff] %v9575_v30 }
  0xf0   : > { %v1462_v8 = vshrl.u32 %v13211_v35, %v1459_v34  ;;  %v1465_v46 = vshrl.u32 %v13209_v37, %v1459_v34  ;;  %v1468_v18 = vshrl.u32 %v13213_v39, %v1459_v34  ;;  %v880_v28 = vadd.s32 %v879_v45, %v875_v21 }
  0xf1   : > { %v1471_v48 = vshrl.u32 %v13215_v41, %v1459_v34  ;;  %v1474_v51 = vshrl.u32 %v13217_v49, %v1459_v34  ;;  %v1460_v52 = vshrl.u32 %v13219_v33, %v1459_v34  ;;  %vm1479_vm14 = vcmp.lt.s32.totalorder %v1457_v32, 4 }
  0xf2   : > { %v1463_v47 = vor.u32 %v1462_v8, %v1461_v12  ;;  %v1466_v54 = vor.u32 %v1465_v46, %v1464_v27  ;;  %v1469_v57 = vor.u32 %v1468_v18, %v1467_v50  ;;  %v1091_v59 = vshll.u32 %v9545_v23, 30 }
  0xf3   : > { %v1472_v60 = vor.u32 %v1471_v48, %v1470_v42  ;;  %v1475_v61 = vor.u32 %v1474_v51, %v1473_v44  ;;  %vm1478_vm15 = vcmp.lt.s32.totalorder %v1457_v32, 3  ;;  %vm1477_vm0 = vcmp.lt.s32.totalorder %v1457_v32, 2 }
  0xf4   : > { %v1481_v2 = vsel %vm1479_vm14, %v1469_v57, 2102212464  ;;  %v1484_v3 = vsel %vm1476_vm13, %v1463_v47, %v1466_v54  ;;  %v1488_v24 = vsel %vm1476_vm13, %v1466_v54, %v1469_v57  ;;  %v881_v6 = vadd.s32 536870912, %v880_v28 }
  0xf5   : > { %v1485_v19 = vsel %vm1479_vm14, %v1472_v60, 920167782  ;;  %v1489_v7 = vsel %vm1479_vm14, %v1475_v61, 1326507024  ;;  %v1480_v9 = vsel %vm1476_vm13, %v1460_v52, %v1463_v47  ;;  %v1482_v10 = vsel %vm1478_vm15, %v1466_v54, %v1481_v2 }
  0xf6   : > { %v1486_v13 = vsel %vm1478_vm15, %v1469_v57, %v1485_v19  ;;  %v1490_v15 = vsel %vm1478_vm15, %v1472_v60, %v1489_v7  ;;  %v9570_v16 = vsub.s32 %v9511_v58, %v1091_v59  ;;  %v1483_v34 = vsel %vm1477_vm0, %v1480_v9, %v1482_v10  ;;  %v9587_v58 = vpop.permute.xlu0 %379 }
  0xf7   : > { %v1487_v20 = vsel %vm1477_vm0, %v1484_v3, %v1486_v13  ;;  %v1491_v43 = vsel %vm1477_vm0, %v1488_v24, %v1490_v15  ;;  %v9589_v27 = vshrl.u32 %v881_v6, 30  ;;  %v1239_v8 = vand.u32 2139095040, %v9575_v30 }
  0xf8   : > { %v9578_v31 = vmul.u32.u64.low %v9542_v36, %v1491_v43  ;;  %v9579_v21 = vmul.u32.u64.high %v9542_v36, %v1491_v43, %v9578_v31  ;;  %v9583_v12 = vmul.u32.u64.low %v9542_v36, %v1487_v20  ;;  %v9584_v38 = vmul.u32.u64.high %v9542_v36, %v1487_v20, %v9583_v12  ;;  %v9619_v43 = vpop.permute.xlu1 %394 }
  0xf9   : > { %13377 = vst [vmem:[#allocation13_spill] sm:$0xff] %v9589_v27  ;;  %v1094_v50 = vsub.s32 0, %v9570_v16  ;;  %v1499_v42 = vmul.u32 %v9542_v36, %v1483_v34  ;;  %v1240_v44 = vshrl.u32 %v1239_v8, 23  ;;  %v883_v45 = vshll.u32 %v9589_v27, 30 }
  0xfa   : > { %vm1501_vm1 = vc.u32 %v9579_v21, %v9583_v12  ;;  %v1502_v32 = vadd.s32 1, %v9584_v38  ;;  %v9600_v48 = vpop.permute.xlu0 %389  ;;  %v13207_v59 = vand.u32 2147483647, %v9575_v30  ;;  %v13387_v27 = vmov 1326507024  }
  0xfb   : > { %v8339_v46 = vmin.u32 %v1094_v50, %v9570_v16  ;;  %v8346_v47 = vadd.s32 4294967169, %v1240_v44  ;;  %v9602_v54 = vsub.s32 %v880_v28, %v883_v45 }
  0xfc   : > { %v1503_v18 = vsel %vm1501_vm1, %v1502_v32, %v9584_v38  ;;  %v1243_v28 = vand.u32 8388607, %v13207_v59 }
  0xfd   : > { %v1504_v51 = vadd.s32 %v1503_v18, %v1499_v42  ;;  %v1246_v52 = vadd.s32 1, %v8346_v47  ;;  %v1096_v57 = vclz %v8339_v46  ;;  %v886_v3 = vsub.s32 0, %v9602_v54 }
  0xfe   : > { %v9607_v2 = vpop.permute.xlu0 %399  ;;  %v1244_v31 = vor.u32 8388608, %v1243_v28 }
  0xff   : > { %v1505_v36 = vadd.s32 536870912, %v1504_v51  ;;  %vm1247_vm2 = vcmp.gt.s32.totalorder %v1246_v52, 0  ;;  %v8340_v6 = vadd.s32 4294967294, %v1096_v57  ;;  %v8331_v10 = vmin.u32 %v886_v3, %v9602_v54 }
 0x100   : > { %v1248_v61 = vsel %vm1247_vm2, %v1246_v52, 0 }
 0x101   : > { %v9605_v60 = vshrl.u32 %v1505_v36, 30  ;;  %v1250_v5 = vand.u32 31, %v1248_v61  ;;  %v1249_v19 = vshrl.u32 %v1248_v61, 5  ;;  %vm8341_vm3 = vcmp.lt.s32.totalorder %v8340_v6, 0 }
 0x102   : > { %v9623_v50 = vpop.permute.xlu0 %409  ;;  %v888_v47 = vclz %v8331_v10  ;;  %v1284_v61 = vshll.u32 %v1244_v31, 8  ;;  %v1099_v31 = vsel %vm8341_vm3, 0, %v8340_v6 }
 0x103   : > { %v1507_v24 = vshll.u32 %v9605_v60, 30  ;;  %v1251_v7 = vsub.s32 32, %v1250_v5  ;;  %v1253_v9 = vshll.u32 %v13219_v33, %v1250_v5  ;;  %v1256_v20 = vshll.u32 %v13211_v35, %v1250_v5 }
 0x104   : > { %v1259_v38 = vshll.u32 %v13209_v37, %v1250_v5  ;;  %v1262_v32 = vshll.u32 %v13213_v39, %v1250_v5  ;;  %vm1268_vm4 = vcmp.lt.s32.totalorder %v1249_v19, 1  ;;  %v1265_v18 = vshll.u32 %v13215_v41, %v1250_v5 }
 0x105   : > { %v9615_v13 = vsub.s32 %v1504_v51, %v1507_v24  ;;  %v1254_v15 = vshrl.u32 %v13211_v35, %v1251_v7  ;;  %v1257_v34 = vshrl.u32 %v13209_v37, %v1251_v7  ;;  %v1260_v42 = vshrl.u32 %v13213_v39, %v1251_v7 }
 0x106   : > { %v1252_v44 = vshrl.u32 %v13219_v33, %v1251_v7  ;;  %v1263_v46 = vshrl.u32 %v13215_v41, %v1251_v7  ;;  %v1266_v36 = vshrl.u32 %v13217_v49, %v1251_v7  ;;  %vm1270_vm5 = vcmp.lt.s32.totalorder %v1249_v19, 3 }
 0x107   : > { %v1255_v8 = vor.u32 %v1254_v15, %v1253_v9  ;;  %v1258_v45 = vor.u32 %v1257_v34, %v1256_v20  ;;  %v1510_v51 = vsub.s32 0, %v9615_v13  ;;  %v1261_v52 = vor.u32 %v1260_v42, %v1259_v38  ;;  %v569_v9 = vpop.permute.xlu1 %568  ;;  %v573_v34 = vpop.permute.xlu0 %572 }
 0x108   : > { %v1264_v57 = vor.u32 %v1263_v46, %v1262_v32  ;;  %vm1271_vm6 = vcmp.lt.s32.totalorder %v1249_v19, 4  ;;  %v1267_v3 = vor.u32 %v1266_v36, %v1265_v18  ;;  %vm1269_vm7 = vcmp.lt.s32.totalorder %v1249_v19, 2 }
 0x109   : > { %v1273_v24 = vsel %vm1271_vm6, %v1261_v52, 2102212464  ;;  %v1276_v28 = vsel %vm1268_vm4, %v1255_v8, %v1258_v45  ;;  %v1272_v15 = vsel %vm1268_vm4, %v1252_v44, %v1255_v8  ;;  %v1280_v20 = vsel %vm1268_vm4, %v1258_v45, %v1261_v52 }
 0x10a   : > { %v1274_v5 = vsel %vm1270_vm5, %v1258_v45, %v1273_v24  ;;  %v1277_v10 = vsel %vm1271_vm6, %v1264_v57, 920167782  ;;  %v8355_v7 = vmin.u32 %v1510_v51, %v9615_v13  ;;  %v1281_v42 = vsel %vm1271_vm6, %v1267_v3, 1326507024 }
 0x10b   : > { %v1278_v38 = vsel %vm1270_vm5, %v1261_v52, %v1277_v10  ;;  %v1282_v46 = vsel %vm1270_vm5, %v1264_v57, %v1281_v42  ;;  %v9642_v18 = vmul.f32 %v9373_v25, %v569_v9  ;;  %v8332_v8 = vadd.s32 4294967294, %v888_v47 }
 0x10c   : > { %v1279_v32 = vsel %vm1269_vm7, %v1276_v28, %v1278_v38  ;;  %v1275_v44 = vsel %vm1269_vm7, %v1272_v15, %v1274_v5  ;;  %v1283_v45 = vsel %vm1269_vm7, %v1280_v20, %v1282_v46  ;;  %v9647_v36 = vmul.f32 %v9373_v25, %v573_v34 }
 0x10d   : > { %13378 = vst [vmem:[#allocation14_spill] sm:$0xff] %v9642_v18  ;;  %v9649_v51 = vmul.u32.u64.low %v1284_v61, %v1283_v45  ;;  %v9650_v52 = vmul.u32.u64.high %v1284_v61, %v1283_v45, %v9649_v51  ;;  %v9652_v3 = vmul.u32.u64.low %v1284_v61, %v1279_v32  ;;  %v9653_v6 = vmul.u32.u64.high %v1284_v61, %v1279_v32, %v9652_v3 }
 0x10e   : > { %13379 = vst [vmem:[#allocation15_spill] sm:$0xff] %v9647_v36  ;;  %v1104_v24 = vsub.s32 4294967266, %v1099_v31  ;;  %v1512_v57 = vclz %v8355_v7  ;;  %v1084_v28 = vadd.s32 %v9488_v29, %v9485_v26  ;;  %v1655_v47 = vand.u32 2139095040, %v9642_v18 }
 0x10f   : > { %v1100_v9 = vsub.s32 32, %v1099_v31  ;;  %vm8333_vm8 = vcmp.lt.s32.totalorder %v8332_v8, 0  ;;  %v1291_v19 = vmul.u32 %v1284_v61, %v1275_v44  ;;  %v1863_v15 = vand.u32 2139095040, %v9647_v36 }
 0x110   : > { %vm1293_vm9 = vc.u32 %v9650_v52, %v9652_v3  ;;  %v1294_v5 = vadd.s32 1, %v9653_v6  ;;  %v13206_v10 = vand.u32 2147483647, %v9642_v18  ;;  %v1656_v20 = vshrl.u32 %v1655_v47, 23 }
 0x111   : > { %v1105_v34 = vadd.s32 127, %v1104_v24  ;;  %v8356_v7 = vadd.s32 4294967294, %v1512_v57  ;;  %v1864_v29 = vshrl.u32 %v1863_v15, 23  ;;  %v1101_v42 = vshll.u32 %v9570_v16, %v1099_v31 }
 0x112   : > { %v1295_v38 = vsel %vm1293_vm9, %v1294_v5, %v9653_v6  ;;  %v8362_v26 = vadd.s32 4294967169, %v1656_v20  ;;  %v1102_v32 = vshrl.u32 %v1084_v28, %v1100_v9  ;;  %v9666_v61 = vsel %vm8333_vm8, 0, %v8332_v8 }
 0x113   : > { %v1296_v46 = vadd.s32 %v1295_v38, %v1291_v19  ;;  %v1659_v44 = vand.u32 8388607, %v13206_v10  ;;  %v8370_v51 = vadd.s32 4294967169, %v1864_v29  ;;  %v1106_v1 = vshll.u32 %v1105_v34, 23 }
 0x114   : > { %v1662_v45 = vadd.s32 1, %v8362_v26  ;;  %vm8357_vm10 = vcmp.lt.s32.totalorder %v8356_v7, 0  ;;  %v9672_v24 = vmul.f32 %v9368_v22, %v9417_v53  ;;  %v896_v6 = vsub.s32 4294967266, %v9666_v61 }
 0x115   : > { %v1297_v47 = vadd.s32 536870912, %v1296_v46  ;;  %v9675_v16 = vor.u32 %v1102_v32, %v1101_v42  ;;  %v876_v31 = vadd.s32 %v9530_v17, %v9538_v14  ;;  %v1500_v8 = vadd.s32 %v9583_v12, %v9579_v21 }
 0x116   : > { %13380 = vst [vmem:[#allocation16_spill] sm:$0xff] %v9672_v24  ;;  %vm1663_vm11 = vcmp.gt.s32.totalorder %v1662_v45, 0  ;;  %v9681_v28 = vsel %vm8357_vm10, 0, %v8356_v7  ;;  %v1660_v9 = vor.u32 8388608, %v1659_v44  ;;  %v1870_v15 = vadd.s32 1, %v8370_v51 }
 0x117   : > { %v1664_v57 = vsel %vm1663_vm11, %v1662_v45, 0  ;;  %v9683_v5 = vor.u32 4788187, %v1106_v1  ;;  %v892_v53 = vsub.s32 32, %v9666_v61  ;;  %v9688_v34 = vshrl.u32 %v1297_v47, 30 }
 0x118   : > { %v1666_v19 = vand.u32 31, %v1664_v57  ;;  %v9690_v38 = vadd.s32 127, %v896_v6  ;;  %v1516_v17 = vsub.s32 32, %v9681_v28  ;;  %v1520_v12 = vsub.s32 4294967266, %v9681_v28 }
 0x119   : > { %v1665_v7 = vshrl.u32 %v1664_v57, 5  ;;  %v9698_v42 = vshll.u32 %v1660_v9, 8  ;;  %vm1871_vm12 = vcmp.gt.s32.totalorder %v1870_v15, 0  ;;  %v1299_v44 = vshll.u32 %v9688_v34, 30 }
 0x11a   : > { %v1667_v14 = vsub.s32 32, %v1666_v19  ;;  %v1669_v21 = vshll.u32 %v13219_v33, %v1666_v19  ;;  %v1672_v1 = vshll.u32 %v13211_v35, %v1666_v19  ;;  %v1675_v26 = vshll.u32 %v13209_v37, %v1666_v19 }
 0x11b   : > { %v1678_v47 = vshll.u32 %v13213_v39, %v1666_v19  ;;  %v1681_v56 = vshll.u32 %v13215_v41, %v1666_v19  ;;  %vm1684_vm13 = vcmp.lt.s32.totalorder %v1665_v7, 1  ;;  %vm1686_vm14 = vcmp.lt.s32.totalorder %v1665_v7, 3 }
 0x11c   : > { %v1670_v29 = vshrl.u32 %v13211_v35, %v1667_v14  ;;  %v1673_v45 = vshrl.u32 %v13209_v37, %v1667_v14  ;;  %v1676_v51 = vshrl.u32 %v13213_v39, %v1667_v14  ;;  %v1679_v57 = vshrl.u32 %v13215_v41, %v1667_v14 }
 0x11d   : > { %v1682_v4 = vshrl.u32 %v13217_v49, %v1667_v14  ;;  %v1668_v9 = vshrl.u32 %v13219_v33, %v1667_v14  ;;  %v1872_v37 = vsel %vm1871_vm12, %v1870_v15, 0  ;;  %v9710_v35 = vsub.s32 %v1296_v46, %v1299_v44  ;;  %v581_v44 = vpop.permute.xlu0 %580 }
 0x11e   : > { %v1671_v6 = vor.u32 %v1670_v29, %v1669_v21  ;;  %v1674_v10 = vor.u32 %v1673_v45, %v1672_v1  ;;  %v1677_v59 = vor.u32 %v1676_v51, %v1675_v26  ;;  %v1680_v11 = vor.u32 %v1679_v57, %v1678_v47 }
 0x11f   : > { %v1683_v20 = vor.u32 %v1682_v4, %v1681_v56  ;;  %vm1685_vm15 = vcmp.lt.s32.totalorder %v1665_v7, 2  ;;  %vm1687_vm0 = vcmp.lt.s32.totalorder %v1665_v7, 4  ;;  %v9712_v26 = vshrl.u32 %v876_v31, %v892_v53 }
 0x120   : > { %v1692_v21 = vsel %vm1684_vm13, %v1671_v6, %v1674_v10  ;;  %v1689_v29 = vsel %vm1687_vm0, %v1677_v59, 2102212464  ;;  %v1693_v39 = vsel %vm1687_vm0, %v1680_v11, 920167782  ;;  %v1696_v19 = vsel %vm1684_vm13, %v1674_v10, %v1677_v59 }
 0x121   : > { %v1697_v41 = vsel %vm1687_vm0, %v1683_v20, 1326507024  ;;  %v1688_v49 = vsel %vm1684_vm13, %v1668_v9, %v1671_v6  ;;  %v1690_v32 = vsel %vm1686_vm14, %v1674_v10, %v1689_v29  ;;  %v1694_v14 = vsel %vm1686_vm14, %v1677_v59, %v1693_v39 }
 0x122   : > { %v1698_v1 = vsel %vm1686_vm14, %v1680_v11, %v1697_v41  ;;  %v1695_v56 = vsel %vm1685_vm15, %v1692_v21, %v1694_v14  ;;  %v13381_v46 = vand.u32 2147483647, %v9647_v36  ;;  %v898_v45 = vshll.u32 %v9690_v38, 23 }
 0x123   : > { %v1699_v4 = vsel %vm1685_vm15, %v1696_v19, %v1698_v1  ;;  %v1302_v51 = vsub.s32 0, %v9710_v35  ;;  %v1691_v11 = vsel %vm1685_vm15, %v1688_v49, %v1690_v32  ;;  %v1874_v59 = vand.u32 31, %v1872_v37 }
 0x124   : > { %v1867_v15 = vand.u32 8388607, %v13381_v46  ;;  %v9721_v20 = vmul.u32.u64.low %v9698_v42, %v1699_v4  ;;  %v9722_v47 = vmul.u32.u64.high %v9698_v42, %v1699_v4, %v9721_v20  ;;  %v1517_v10 = vshll.u32 %v9615_v13, %v9681_v28 }
 0x125   : > { %v9726_v39 = vmul.u32.u64.low %v9698_v42, %v1695_v56  ;;  %v9727_v41 = vmul.u32.u64.high %v9698_v42, %v1695_v56, %v9726_v39  ;;  %v1518_v31 = vshrl.u32 %v1500_v8, %v1516_v17  ;;  %v1521_v53 = vadd.s32 127, %v1520_v12 }
 0x126   : > { %v9733_v38 = vmul.f32 %v9373_v25, %v581_v44  ;;  %v1868_v6 = vor.u32 8388608, %v1867_v15  ;;  %v1875_v57 = vsub.s32 32, %v1874_v59  ;;  %v1877_v9 = vshll.u32 %v13219_v33, %v1874_v59 }
 0x127   : > { %v13383_v7 = vmov 2475754826   ;;  %v8347_v32 = vmin.u32 %v1302_v51, %v9710_v35  ;;  %v1707_v21 = vmul.u32 %v9698_v42, %v1691_v11  ;;  %vm1709_vm1 = vc.u32 %v9722_v47, %v9726_v39 }
 0x128   : > { %13382 = vst [vmem:[#allocation17_spill] sm:$0xff] %v9733_v38  ;;  %v1880_v49 = vshll.u32 %v13383_v7, %v1874_v59  ;;  %v1873_v29 = vshrl.u32 %v1872_v37, 5  ;;  %v1710_v13 = vadd.s32 1, %v9727_v41  ;;  %v1878_v8 = vshrl.u32 %v13383_v7, %v1875_v57 }
 0x129   : > { %v13384_v28 = vmov 2131351028   ;;  %v1522_v19 = vshll.u32 %v1521_v53, 23  ;;  %v13385_v14 = vmov 2102212464   ;;  %v2279_v4 = vand.u32 2139095040, %v9733_v38 }
 0x12a   : > { %v1881_v17 = vshrl.u32 %v13384_v28, %v1875_v57  ;;  %v1883_v12 = vshll.u32 %v13384_v28, %v1874_v59  ;;  %v1884_v1 = vshrl.u32 %v13385_v14, %v1875_v57  ;;  %v1886_v56 = vshll.u32 %v13385_v14, %v1874_v59 }
 0x12b   : > { %v1711_v42 = vsel %vm1709_vm1, %v1710_v13, %v9727_v41  ;;  %v1879_v46 = vor.u32 %v1878_v8, %v1877_v9  ;;  %v13386_v37 = vmov 920167782   ;;  %v1304_v51 = vclz %v8347_v32 }
 0x12c   : > { %v1882_v15 = vor.u32 %v1881_v17, %v1880_v49  ;;  %v1887_v44 = vshrl.u32 %v13386_v37, %v1875_v57  ;;  %v1712_v20 = vadd.s32 %v1711_v42, %v1707_v21  ;;  %vm1892_vm2 = vcmp.lt.s32.totalorder %v1873_v29, 1 }
 0x12d   : > { %v9750_v11 = vshll.u32 %v1868_v6, 8  ;;  %v1885_v33 = vor.u32 %v1884_v1, %v1883_v12  ;;  %v1889_v53 = vshll.u32 %v13386_v37, %v1874_v59  ;;  %v1890_v24 = vshrl.u32 %v13387_v27, %v1875_v57 }
 0x12e   : > { %v1888_v23 = vor.u32 %v1887_v44, %v1886_v56  ;;  %v13388_v36 = vmov 683565275   ;;  %vm1893_vm3 = vcmp.lt.s32.totalorder %v1873_v29, 2  ;;  %vm1894_vm4 = vcmp.lt.s32.totalorder %v1873_v29, 3 }
 0x12f   : > { %v1876_v18 = vshrl.u32 %v13388_v36, %v1875_v57  ;;  %vm1895_vm5 = vcmp.lt.s32.totalorder %v1873_v29, 4  ;;  %v1713_v41 = vadd.s32 536870912, %v1712_v20  ;;  %v1891_v9 = vor.u32 %v1890_v24, %v1889_v53 }
 0x130   : > { %v1897_v49 = vsel %vm1895_vm5, %v1885_v33, 2102212464  ;;  %v1900_v32 = vsel %vm1892_vm2, %v1879_v46, %v1882_v15  ;;  %v899_v21 = vor.u32 4788187, %v898_v45  ;;  %v1519_v13 = vor.u32 %v1518_v31, %v1517_v10 }
 0x131   : > { %v8348_v6 = vadd.s32 4294967294, %v1304_v51  ;;  %v1901_v8 = vsel %vm1895_vm5, %v1888_v23, 920167782  ;;  %v1523_v17 = vor.u32 4788187, %v1522_v19  ;;  %v1904_v59 = vsel %vm1892_vm2, %v1882_v15, %v1885_v33 }
 0x132   : > { %v1902_v12 = vsel %vm1894_vm4, %v1885_v33, %v1901_v8  ;;  %v1905_v1 = vsel %vm1895_vm5, %v1891_v9, 1326507024  ;;  %v1896_v57 = vsel %vm1892_vm2, %v1876_v18, %v1879_v46  ;;  %v1898_v56 = vsel %vm1894_vm4, %v1882_v15, %v1897_v49  ;;  %v9786_v49 = vpop.permute.xlu1 %404 }
 0x133   : > { %v1903_v42 = vsel %vm1893_vm3, %v1900_v32, %v1902_v12  ;;  %v2280_v24 = vshrl.u32 %v2279_v4, 23  ;;  %v9761_v44 = vshrl.u32 %v1713_v41, 30  ;;  %v1906_v45 = vsel %vm1894_vm4, %v1888_v23, %v1905_v1 }
 0x134   : > { %v9765_v10 = vmul.u32.u64.low %v9750_v11, %v1903_v42  ;;  %v9766_v31 = vmul.u32.u64.high %v9750_v11, %v1903_v42, %v9765_v10  ;;  %v1110_v19 = vcvt.s32.f32 %v9675_v16  ;;  %v13389_v33 = vshll.u32 %v9602_v54, %v9666_v61 }
 0x135   : > { %vm8349_vm6 = vcmp.lt.s32.totalorder %v8348_v6, 0  ;;  %v1907_v46 = vsel %vm1893_vm3, %v1904_v59, %v1906_v45  ;;  %v1108_v4 = vand.u32 2147483647, %v9683_v5  ;;  %v1899_v15 = vsel %vm1893_vm3, %v1896_v57, %v1898_v56 }
 0x136   : > { %v895_v18 = vor.u32 %v9712_v26, %v13389_v33  ;;  %v9778_v23 = vmul.u32.u64.low %v9750_v11, %v1907_v46  ;;  %v9779_v51 = vmul.u32.u64.high %v9750_v11, %v1907_v46, %v9778_v23  ;;  %v900_v53 = vand.u32 2147483647, %v899_v21 }
 0x137   : > { %vm1446_vm7 = vcmp.lt.s32.totalorder %v9429_v63, 0  ;;  %v1526_v16 = vcvt.s32.f32 %v1519_v13  ;;  %v8386_v41 = vadd.s32 4294967169, %v2280_v24  ;;  %v1524_v9 = vand.u32 2147483647, %v1523_v17 }
 0x138   : > { %v9782_v54 = vsel %vm8349_vm6, 0, %v8348_v6  ;;  %v1715_v61 = vshll.u32 %v9761_v44, 30  ;;  %v1918_v26 = vadd.s32 1, %v9766_v31  ;;  %v902_v5 = vcvt.s32.f32 %v895_v18 }
 0x139   : > { %v9790_v29 = vmul.f32 %v9368_v22, %v9564_v62  ;;  %v1915_v32 = vmul.u32 %v9750_v11, %v1899_v15  ;;  %v2286_v21 = vadd.s32 1, %v8386_v41  ;;  %v9793_v8 = vmul.f32 %v1110_v19, %v1108_v4 }
 0x13a   : > { %v1530_v13 = vsub.s32 4, %v9605_v60  ;;  %v9798_v6 = vmul.f32 %v9368_v22, %v9550_v40  ;;  %vm1917_vm8 = vc.u32 %v9779_v51, %v9765_v10  ;;  %v9802_v17 = vmul.f32 %v902_v5, %v900_v53 }
 0x13b   : > { %v1312_v12 = vsub.s32 4294967266, %v9782_v54  ;;  %v1919_v62 = vsel %vm1917_vm8, %v1918_v26, %v9766_v31  ;;  %vm2287_vm9 = vcmp.gt.s32.totalorder %v2286_v21, 0  ;;  %v1527_v11 = vmul.f32 %v1526_v16, %v1524_v9 }
 0x13c   : > { %13390 = vst [vmem:[#allocation18_spill] sm:$0xff] %v9798_v6  ;;  %v9806_v59 = vsub.s32 %v1712_v20, %v1715_v61  ;;  %v13229_v1 = vand.u32 2147483647, %v9733_v38  ;;  %v2288_v57 = vsel %vm2287_vm9, %v2286_v21, 0  ;;  %v9811_v40 = vmul.f32 %v9368_v22, %v9587_v58 }
 0x13d   : > { %v9815_v56 = vmul.f32 %v9368_v22, %v9600_v48  ;;  %v9817_v42 = vadd.s32 %v1919_v62, %v1915_v32  ;;  %v2290_v24 = vand.u32 31, %v2288_v57  ;;  %v9823_v20 = vsel %vm1446_vm7, %v1530_v13, %v9605_v60  ;;  %v577_v48 = vpop.permute.xlu1 %576 }
 0x13e   : > { %v9827_v31 = vmul.f32 %v9368_v22, %v9619_v43  ;;  %v9831_v58 = vmul.f32 %v9368_v22, %v9607_v2  ;;  %v1292_v33 = vadd.s32 %v9652_v3, %v9650_v52  ;;  %v1313_v18 = vadd.s32 127, %v1312_v12 }
 0x13f   : > { %13391 = vst [vmem:[#allocation19_spill] sm:$0xff] %v9815_v56  ;;  %v2291_v46 = vsub.s32 32, %v2290_v24  ;;  %v1528_v4 = vxor.u32 2147483648, %v1527_v11  ;;  %v1308_v60 = vsub.s32 32, %v9782_v54  ;;  %v1718_v15 = vsub.s32 0, %v9806_v59 }
 0x140   : > { %13392 = vst [vmem:[#allocation20_spill] sm:$0xff] %v9827_v31  ;;  %13393 = vst [vmem:[#allocation21_spill] sm:$0xff] %v9831_v58  ;;  %v2283_v43 = vand.u32 8388607, %v13229_v1  ;;  %v1921_v23 = vadd.s32 536870912, %v9817_v42  ;;  %v2293_v2 = vshll.u32 %v13388_v36, %v2290_v24  ;;  %v2296_v53 = vshll.u32 %v13383_v7, %v2290_v24 }
 0x141   : > { %v9844_v16 = vmul.f32 %v9373_v25, %v577_v48  ;;  %v2294_v52 = vshrl.u32 %v13383_v7, %v2291_v46  ;;  %v2297_v3 = vshrl.u32 %v13384_v28, %v2291_v46  ;;  %v2299_v41 = vshll.u32 %v13384_v28, %v2290_v24 }
 0x142   : > { %v2302_v9 = vshll.u32 %v13385_v14, %v2290_v24  ;;  %v1314_v61 = vshll.u32 %v1313_v18, 23  ;;  %v2289_v26 = vshrl.u32 %v2288_v57, 5  ;;  %v2300_v5 = vshrl.u32 %v13385_v14, %v2291_v46 }
 0x143   : > { %13394 = vst [vmem:[#allocation22_spill] sm:$0xff] %v9844_v16  ;;  %v2303_v32 = vshrl.u32 %v13386_v37, %v2291_v46  ;;  %vm1030_vm10 = vcmp.lt.s32.totalorder %v9420_v55, 0  ;;  %v1529_v21 = vsel %vm1446_vm7, %v1528_v4, %v1527_v11  ;;  %v1309_v13 = vshll.u32 %v9710_v35, %v9782_v54 }
 0x144   : > { %v8363_v12 = vmin.u32 %v1718_v15, %v9806_v59  ;;  %v2284_v62 = vor.u32 8388608, %v2283_v43  ;;  %v9858_v48 = vshrl.u32 %v1921_v23, 30  ;;  %v2295_v1 = vor.u32 %v2294_v52, %v2293_v2 }
 0x145   : > { %v2298_v18 = vor.u32 %v2297_v3, %v2296_v53  ;;  %v2071_v57 = vand.u32 2139095040, %v9844_v16  ;;  %v13395_v19 = vand.u32 2147483647, %v9429_v63  ;;  %v2301_v58 = vor.u32 %v2300_v5, %v2299_v41 }
 0x146   : > { %v2304_v11 = vor.u32 %v2303_v32, %v2302_v9  ;;  %v2305_v4 = vshll.u32 %v13386_v37, %v2290_v24  ;;  %v2306_v35 = vshrl.u32 %v13387_v27, %v2291_v46  ;;  %v1310_v54 = vshrl.u32 %v1292_v33, %v1308_v60 }
 0x147   : > { %vm9863_vm11 = vcmp.le.f32.partialorder %v13395_v19, 0.7853982  ;;  %v1315_v15 = vor.u32 4788187, %v1314_v61  ;;  %v2292_v43 = vshrl.u32 %v13388_v36, %v2291_v46  ;;  %vm2308_vm12 = vcmp.lt.s32.totalorder %v2289_v26, 1 }
 0x148   : > { %v1720_v23 = vclz %v8363_v12  ;;  %v2307_v2 = vor.u32 %v2306_v35, %v2305_v4  ;;  %vm2310_vm13 = vcmp.lt.s32.totalorder %v2289_v26, 3  ;;  %vm2311_vm14 = vcmp.lt.s32.totalorder %v2289_v26, 4 }
 0x149   : > { %vm822_vm15 = vcmp.lt.s32.totalorder %v9432_v0, 0  ;;  %vm2309_vm0 = vcmp.lt.s32.totalorder %v2289_v26, 2  ;;  %v2313_v19 = vsel %vm2311_vm14, %v2301_v58, 2102212464  ;;  %v2316_v53 = vsel %vm2308_vm12, %v2295_v1, %v2298_v18 }
 0x14a   : > { %v2324_v52 = vshll.u32 %v2284_v62, 8  ;;  %v1923_v3 = vshll.u32 %v9858_v48, 30  ;;  %v2317_v24 = vsel %vm2311_vm14, %v2304_v11, 920167782  ;;  %v2320_v41 = vsel %vm2308_vm12, %v2298_v18, %v2301_v58 }
 0x14b   : > { %v2072_v9 = vshrl.u32 %v2071_v57, 23  ;;  %vm1238_vm1 = vcmp.lt.s32.totalorder %v9575_v30, 0  ;;  %v2312_v33 = vsel %vm2308_vm12, %v2292_v43, %v2295_v1  ;;  %v2314_v46 = vsel %vm2310_vm13, %v2298_v18, %v2313_v19  ;;  %v589_v43 = vpop.permute.xlu0 %588 }
 0x14c   : > { %v2318_v60 = vsel %vm2310_vm13, %v2301_v58, %v2317_v24  ;;  %v2321_v61 = vsel %vm2311_vm14, %v2307_v2, 1326507024  ;;  %v1311_v5 = vor.u32 %v1310_v54, %v1309_v13  ;;  %v8364_v32 = vadd.s32 4294967294, %v1720_v23 }
 0x14d   : > { %v2319_v12 = vsel %vm2309_vm0, %v2316_v53, %v2318_v60  ;;  %v2322_v4 = vsel %vm2310_vm13, %v2304_v11, %v2321_v61  ;;  %v1316_v62 = vand.u32 2147483647, %v1315_v15  ;;  %v2315_v1 = vsel %vm2309_vm0, %v2312_v33, %v2314_v46 }
 0x14e   : > { %v2323_v35 = vsel %vm2309_vm0, %v2320_v41, %v2322_v4  ;;  %v9878_v31 = vmul.u32.u64.low %v2324_v52, %v2319_v12  ;;  %v9879_v56 = vmul.u32.u64.high %v2324_v52, %v2319_v12, %v9878_v31  ;;  %v8378_v58 = vadd.s32 4294967169, %v2072_v9 }
 0x14f   : > { %v9883_v57 = vmul.u32.u64.low %v2324_v52, %v2323_v35  ;;  %v9884_v18 = vmul.u32.u64.high %v2324_v52, %v2323_v35, %v9883_v57  ;;  %v13398_v13 = vxor.u32 2147483648, %v9793_v8  ;;  %v9895_v11 = vmul.f32 %v9368_v22, %v9623_v50 }
 0x150   : > { %v9898_v15 = vsub.s32 %v9817_v42, %v1923_v3  ;;  %v9902_v26 = vmul.f32 %v9368_v22, %v9786_v49  ;;  %v9907_v23 = vsel %vm9863_vm11, 0, %v9823_v20  ;;  %v1318_v2 = vcvt.s32.f32 %v1311_v5 }
 0x151   : > { %v9891_v54 = vsel %vm1030_vm10, %v13398_v13, %v9793_v8  ;;  %13400 = vst [vmem:[#allocation24_spill] sm:$0xff] %v9895_v11  ;;  %13402 = vst [vmem:[#allocation26_spill] sm:$0xff] %v9907_v23  ;;  %v1322_v8 = vsub.s32 4, %v9688_v34  ;;  %vm8365_vm2 = vcmp.lt.s32.totalorder %v8364_v32, 0  ;;  %v1532_v50 = vsel %vm9863_vm11, %v9429_v63, %v1529_v21  ;;  %v13406_v11 = vld [vmem:[#allocation14_spill] sm:$0xff] }
 0x152   : > { %13399 = vst [vmem:[#allocation23_spill] sm:$0xff] %v9891_v54  ;;  %13401 = vst [vmem:[#allocation25_spill] sm:$0xff] %v9902_v26  ;;  %v2331_v42 = vmul.u32 %v2324_v52, %v2315_v1  ;;  %v2334_v19 = vadd.s32 1, %v9879_v56  ;;  %v2078_v53 = vadd.s32 1, %v8378_v58  ;;  %v13403_v49 = vxor.u32 2147483648, %v9802_v17 }
 0x153   : > { %v9921_v20 = vmul.f32 %v1318_v2, %v1316_v62  ;;  %v13230_v24 = vand.u32 2147483647, %v9844_v16  ;;  %v9925_v41 = vmul.f32 %v9373_v25, %v589_v43  ;;  %v9927_v45 = vsel %vm8365_vm2, 0, %v8364_v32 }
 0x154   : > { %v9919_v3 = vsel %vm822_vm15, %v13403_v49, %v9802_v17  ;;  %v1926_v21 = vsub.s32 0, %v9898_v15  ;;  %vm2333_vm3 = vc.u32 %v9884_v18, %v9878_v31  ;;  %vm2079_vm4 = vcmp.gt.s32.totalorder %v2078_v53, 0 }
 0x155   : > { %13404 = vst [vmem:[#allocation27_spill] sm:$0xff] %v9919_v3  ;;  %13405 = vst [vmem:[#allocation28_spill] sm:$0xff] %v9925_v41  ;;  %8998 = vcosq.f32 %v1532_v50  ;;  %v9935_v17 = vsel %vm1238_vm1, %v1322_v8, %v9688_v34  ;;  %v2335_v52 = vsel %vm2333_vm3, %v2334_v19, %v9879_v56  ;;  %v2080_v9 = vsel %vm2079_vm4, %v2078_v53, 0 }
 0x156   : > { %9000 = vsinq.f32 %v1532_v50  ;;  %v1708_v33 = vadd.s32 %v9726_v39, %v9722_v47  ;;  %v2336_v46 = vadd.s32 %v2335_v52, %v2331_v42  ;;  %v2082_v60 = vand.u32 31, %v2080_v9 }
 0x157   : > { %v1320_v61 = vxor.u32 2147483648, %v9921_v20  ;;  %v1728_v5 = vsub.s32 4294967266, %v9927_v45  ;;  %v2075_v12 = vand.u32 8388607, %v13230_v24  ;;  %v8371_v34 = vmin.u32 %v1926_v21, %v9898_v15 }
 0x158   : > { %v2337_v4 = vadd.s32 536870912, %v2336_v46  ;;  %v2083_v56 = vsub.s32 32, %v2082_v60  ;;  %v2695_v62 = vand.u32 2139095040, %v9925_v41  ;;  %v2081_v35 = vshrl.u32 %v2080_v9, 5 }
 0x159   : > { %v2085_v47 = vshll.u32 %v13388_v36, %v2082_v60  ;;  %v2088_v39 = vshll.u32 %v13383_v7, %v2082_v60  ;;  %v2094_v1 = vshll.u32 %v13385_v14, %v2082_v60  ;;  %v2091_v43 = vshll.u32 %v13384_v28, %v2082_v60 }
 0x15a   : > { %v9950_v57 = vshrl.u32 %v2337_v4, 30  ;;  %v2086_v58 = vshrl.u32 %v13383_v7, %v2083_v56  ;;  %v2089_v13 = vshrl.u32 %v13384_v28, %v2083_v56  ;;  %v2092_v2 = vshrl.u32 %v13385_v14, %v2083_v56 }
 0x15b   : > { %v2095_v8 = vshrl.u32 %v13386_v37, %v2083_v56  ;;  %v2097_v50 = vshll.u32 %v13386_v37, %v2082_v60  ;;  %v2098_v42 = vshrl.u32 %v13387_v27, %v2083_v56  ;;  %v1724_v19 = vsub.s32 32, %v9927_v45 }
 0x15c   : > { %v1729_v53 = vadd.s32 127, %v1728_v5  ;;  %v1928_v49 = vclz %v8371_v34  ;;  %v2076_v21 = vor.u32 8388608, %v2075_v12  ;;  %v2087_v52 = vor.u32 %v2086_v58, %v2085_v47 }
 0x15d   : > { %v2090_v9 = vor.u32 %v2089_v13, %v2088_v39  ;;  %v2096_v4 = vor.u32 %v2095_v8, %v2094_v1  ;;  %v2696_v24 = vshrl.u32 %v2695_v62, 23  ;;  %v2339_v32 = vshll.u32 %v9950_v57, 30 }
 0x15e   : > { %v2084_v63 = vshrl.u32 %v13388_v36, %v2083_v56  ;;  %v2093_v23 = vor.u32 %v2092_v2, %v2091_v43  ;;  %vm2100_vm5 = vcmp.lt.s32.totalorder %v2081_v35, 1  ;;  %vm1654_vm6 = vcmp.lt.s32.totalorder %v13406_v11, 0 }
 0x15f   : > { %v1725_v60 = vshll.u32 %v9806_v59, %v9927_v45  ;;  %v2099_v26 = vor.u32 %v2098_v42, %v2097_v50  ;;  %vm2102_vm7 = vcmp.lt.s32.totalorder %v2081_v35, 3  ;;  %vm2103_vm8 = vcmp.lt.s32.totalorder %v2081_v35, 4 }
 0x160   : > { %v8372_v5 = vadd.s32 4294967294, %v1928_v49  ;;  %vm2101_vm9 = vcmp.lt.s32.totalorder %v2081_v35, 2  ;;  %v2105_v12 = vsel %vm2103_vm8, %v2093_v23, 2102212464  ;;  %v2116_v34 = vshll.u32 %v2076_v21, 8 }
 0x161   : > { %v1726_v62 = vshrl.u32 %v1708_v33, %v1724_v19  ;;  %v2108_v47 = vsel %vm2100_vm5, %v2087_v52, %v2090_v9  ;;  %v2109_v56 = vsel %vm2103_vm8, %v2096_v4, 920167782  ;;  %v8402_v39 = vadd.s32 4294967169, %v2696_v24 }
 0x162   : > { %v9968_v1 = vpop.eup %8998  ;;  %v1730_v58 = vshll.u32 %v1729_v53, 23  ;;  %v9970_v13 = vsub.s32 %v2336_v46, %v2339_v32  ;;  %v2104_v59 = vsel %vm2100_vm5, %v2084_v63, %v2087_v52  ;;  %v2110_v45 = vsel %vm2102_vm7, %v2093_v23, %v2109_v56 }
 0x163   : > { %13407 = vst [vmem:[#allocation29_spill] sm:$0xff] %v9968_v1  ;;  %v9974_v43 = vpop.eup %9000  ;;  %v2106_v2 = vsel %vm2102_vm7, %v2090_v9, %v2105_v12  ;;  %v2111_v33 = vsel %vm2101_vm9, %v2108_v47, %v2110_v45  ;;  %v2112_v8 = vsel %vm2100_vm5, %v2090_v9, %v2093_v23  ;;  %v2113_v50 = vsel %vm2103_vm8, %v2099_v26, 1326507024  ;;  %v597_v23 = vpop.permute.xlu0 %596 }
 0x164   : > { %13408 = vst [vmem:[#allocation30_spill] sm:$0xff] %v9974_v43  ;;  %vm8373_vm11 = vcmp.lt.s32.totalorder %v8372_v5, 0  ;;  %v2114_v24 = vsel %vm2102_vm7, %v2096_v4, %v2113_v50  ;;  %v9981_v42 = vmul.u32.u64.low %v2116_v34, %v2111_v33  ;;  %v9982_v46 = vmul.u32.u64.high %v2116_v34, %v2111_v33, %v9981_v42 }
 0x165   : > { %v9988_v63 = vsel %vm1238_vm1, %v1320_v61, %v9921_v20  ;;  %v9990_v32 = vor.u32 %v1726_v62, %v1725_v60  ;;  %v2115_v19 = vsel %vm2101_vm9, %v2112_v8, %v2114_v24  ;;  %v2702_v53 = vadd.s32 1, %v8402_v39 }
 0x166   : > { %v9993_v49 = vor.u32 4788187, %v1730_v58  ;;  %v2107_v26 = vsel %vm2101_vm9, %v2104_v59, %v2106_v2  ;;  %v9996_v21 = vmul.u32.u64.low %v2116_v34, %v2115_v19  ;;  %v9997_v52 = vmul.u32.u64.high %v2116_v34, %v2115_v19, %v9996_v21 }
 0x167   : > { %v9999_v9 = vsel %vm8373_vm11, 0, %v8372_v5  ;;  %v2342_v4 = vsub.s32 0, %v9970_v13  ;;  %v13234_v20 = vand.u32 2147483647, %v9925_v41  ;;  %vm2703_vm12 = vcmp.gt.s32.totalorder %v2702_v53, 0 }
 0x168   : > { %v13409_v61 = vsub.s32 4, %v9761_v44  ;;  %v2126_v35 = vadd.s32 1, %v9982_v46  ;;  %v2704_v12 = vsel %vm2703_vm12, %v2702_v53, 0  ;;  %v10012_v62 = vmul.f32 %v9373_v25, %v597_v23 }
 0x169   : > { %v1734_v5 = vcvt.s32.f32 %v9990_v32  ;;  %v1916_v47 = vadd.s32 %v9765_v10, %v9779_v51  ;;  %v2123_v56 = vmul.u32 %v2116_v34, %v2107_v26  ;;  %v2706_v39 = vand.u32 31, %v2704_v12 }
 0x16a   : > { %v10008_v60 = vsel %vm1654_vm6, %v13409_v61, %v9761_v44  ;;  %13410 = vst [vmem:[#allocation31_spill] sm:$0xff] %v10012_v62  ;;  %v1732_v58 = vand.u32 2147483647, %v9993_v49  ;;  %v1932_v59 = vsub.s32 32, %v9999_v9  ;;  %v1933_v44 = vshll.u32 %v9898_v15, %v9999_v9 }
 0x16b   : > { %v1936_v45 = vsub.s32 4294967266, %v9999_v9  ;;  %v8387_v2 = vmin.u32 %v2342_v4, %v9970_v13  ;;  %vm2125_vm13 = vc.u32 %v9997_v52, %v9981_v42  ;;  %v2699_v33 = vand.u32 8388607, %v13234_v20 }
 0x16c   : > { %v2707_v10 = vsub.s32 32, %v2706_v39  ;;  %v13411_v51 = vand.u32 2147483647, %v9575_v30  ;;  %v2127_v8 = vsel %vm2125_vm13, %v2126_v35, %v9982_v46  ;;  %v2705_v15 = vshrl.u32 %v2704_v12, 5 }
 0x16d   : > { %v2709_v50 = vshll.u32 %v13388_v36, %v2706_v39  ;;  %v2712_v24 = vshll.u32 %v13383_v7, %v2706_v39  ;;  %v2128_v32 = vadd.s32 %v2127_v8, %v2123_v56  ;;  %v2715_v23 = vshll.u32 %v13384_v28, %v2706_v39 }
 0x16e   : > { %vm10029_vm14 = vcmp.le.f32.partialorder %v13411_v51, 0.7853982  ;;  %v2710_v19 = vshrl.u32 %v13383_v7, %v2707_v10  ;;  %v2713_v53 = vshrl.u32 %v13384_v28, %v2707_v10  ;;  %v1934_v49 = vshrl.u32 %v1916_v47, %v1932_v59 }
 0x16f   : > { %v1937_v26 = vadd.s32 127, %v1936_v45  ;;  %v2716_v21 = vshrl.u32 %v13385_v14, %v2707_v10  ;;  %v2718_v9 = vshll.u32 %v13385_v14, %v2706_v39  ;;  %v2344_v4 = vclz %v8387_v2 }
 0x170   : > { %v2129_v46 = vadd.s32 536870912, %v2128_v32  ;;  %v2700_v61 = vor.u32 8388608, %v2699_v33  ;;  %v2719_v35 = vshrl.u32 %v13386_v37, %v2707_v10  ;;  %v2711_v12 = vor.u32 %v2710_v19, %v2709_v50 }
 0x171   : > { %v2714_v51 = vor.u32 %v2713_v53, %v2712_v24  ;;  %v2721_v56 = vshll.u32 %v13386_v37, %v2706_v39  ;;  %v3111_v8 = vand.u32 2139095040, %v10012_v62  ;;  %v2717_v20 = vor.u32 %v2716_v21, %v2715_v23 }
 0x172   : > { %v2720_v1 = vor.u32 %v2719_v35, %v2718_v9  ;;  %v2722_v47 = vshrl.u32 %v13387_v27, %v2707_v10  ;;  %vm2724_vm0 = vcmp.lt.s32.totalorder %v2705_v15, 1  ;;  %v13414_v59 = vand.u32 2147483647, %v13406_v11  ;;  %v415_v35 = vpop.permute.xlu1 %414 }
 0x173   : > { %v10051_v2 = vshrl.u32 %v2129_v46, 30  ;;  %v2708_v33 = vshrl.u32 %v13388_v36, %v2707_v10  ;;  %vm2726_vm2 = vcmp.lt.s32.totalorder %v2705_v15, 3  ;;  %vm2727_vm3 = vcmp.lt.s32.totalorder %v2705_v15, 4 }
 0x174   : > { %vm10047_vm1 = vcmp.le.f32.partialorder %v13414_v59, 0.7853982  ;;  %v1938_v39 = vshll.u32 %v1937_v26, 23  ;;  %v8388_v50 = vadd.s32 4294967294, %v2344_v4  ;;  %v2723_v24 = vor.u32 %v2722_v47, %v2721_v56 }
 0x175   : > { %vm2725_vm4 = vcmp.lt.s32.totalorder %v2705_v15, 2  ;;  %v2729_v19 = vsel %vm2727_vm3, %v2717_v20, 2102212464  ;;  %v2732_v53 = vsel %vm2724_vm0, %v2711_v12, %v2714_v51  ;;  %v2733_v23 = vsel %vm2727_vm3, %v2720_v1, 920167782 }
 0x176   : > { %v2740_v21 = vshll.u32 %v2700_v61, 8  ;;  %v1324_v9 = vsel %vm10029_vm14, %v9575_v30, %v9988_v63  ;;  %v1735_v46 = vmul.f32 %v1734_v5, %v1732_v58  ;;  %v2734_v10 = vsel %vm2726_vm2, %v2717_v20, %v2733_v23 }
 0x177   : > { %v3112_v26 = vshrl.u32 %v3111_v8, 23  ;;  %v2131_v4 = vshll.u32 %v10051_v2, 30  ;;  %v2728_v56 = vsel %vm2724_vm0, %v2708_v33, %v2711_v12  ;;  %v2730_v47 = vsel %vm2726_vm2, %v2714_v51, %v2729_v19 }
 0x178   : > { %v2735_v59 = vsel %vm2725_vm4, %v2732_v53, %v2734_v10  ;;  %v1935_v43 = vor.u32 %v1934_v49, %v1933_v44  ;;  %vm8389_vm5 = vcmp.lt.s32.totalorder %v8388_v50, 0  ;;  %v2736_v61 = vsel %vm2724_vm0, %v2714_v51, %v2717_v20 }
 0x179   : > { %v2737_v6 = vsel %vm2727_vm3, %v2723_v24, 1326507024  ;;  %v1939_v63 = vor.u32 4788187, %v1938_v39  ;;  %v10069_v58 = vmul.u32.u64.low %v2740_v21, %v2735_v59  ;;  %v10070_v23 = vmul.u32.u64.high %v2740_v21, %v2735_v59, %v10069_v58  ;;  %v585_v39 = vpop.permute.xlu1 %584 }
 0x17a   : > { %v2738_v5 = vsel %vm2726_vm2, %v2720_v1, %v2737_v6  ;;  %v10076_v12 = vsel %vm10029_vm14, 0, %v9935_v17  ;;  %v2731_v8 = vsel %vm2725_vm4, %v2728_v56, %v2730_v47  ;;  %v8418_v49 = vadd.s32 4294967169, %v3112_v26 }
 0x17b   : > { %13417 = vst [vmem:[#allocation32_spill] sm:$0xff] %v10076_v12  ;;  %v2739_v44 = vsel %vm2725_vm4, %v2736_v61, %v2738_v5  ;;  %v10080_v20 = vsel %vm8389_vm5, 0, %v8388_v50  ;;  %v10082_v51 = vsub.s32 %v2128_v32, %v2131_v4  ;;  %9002 = vcosq.f32 %v1324_v9 }
 0x17c   : > { %v10084_v33 = vmul.u32.u64.low %v2740_v21, %v2739_v44  ;;  %v10085_v6 = vmul.u32.u64.high %v2740_v21, %v2739_v44, %v10084_v33  ;;  %v1736_v1 = vxor.u32 2147483648, %v1735_v46  ;;  %v10090_v34 = vsel %vm10047_vm1, 0, %v10008_v60 }
 0x17d   : > { %13418 = vst [vmem:[#allocation33_spill] sm:$0xff] %v10090_v34  ;;  %v3118_v17 = vadd.s32 1, %v8418_v49  ;;  %v1940_v24 = vand.u32 2147483647, %v1939_v63  ;;  %v1942_v15 = vcvt.s32.f32 %v1935_v43  ;;  %v2747_v19 = vmul.u32 %v2740_v21, %v2731_v8 }
 0x17e   : > { %v2750_v50 = vadd.s32 1, %v10070_v23  ;;  %9004 = vsinq.f32 %v1324_v9  ;;  %v2352_v32 = vsub.s32 4294967266, %v10080_v20  ;;  %v13237_v53 = vand.u32 2147483647, %v10012_v62 }
 0x17f   : > { %vm3119_vm7 = vcmp.gt.s32.totalorder %v3118_v17, 0  ;;  %v2134_v10 = vsub.s32 0, %v10082_v51  ;;  %vm2749_vm8 = vc.u32 %v10085_v6, %v10069_v58  ;;  %v10099_v26 = vmul.f32 %v9373_v25, %v585_v39 }
 0x180   : > { %v3120_v60 = vsel %vm3119_vm7, %v3118_v17, 0  ;;  %v2751_v21 = vsel %vm2749_vm8, %v2750_v50, %v10070_v23  ;;  %v10104_v9 = vmul.f32 %v9368_v22, %v415_v35  ;;  %v10108_v56 = vsel %vm1654_vm6, %v1736_v1, %v1735_v46 }
 0x181   : > { %13419 = vst [vmem:[#allocation34_spill] sm:$0xff] %v10099_v26  ;;  %v3122_v4 = vand.u32 31, %v3120_v60  ;;  %v10110_v47 = vmul.f32 %v1942_v15, %v1940_v24  ;;  %v2332_v59 = vadd.s32 %v9878_v31, %v9884_v18  ;;  %v2752_v61 = vadd.s32 %v2751_v21, %v2747_v19 }
 0x182   : > { %13420 = vst [vmem:[#allocation35_spill] sm:$0xff] %v10104_v9  ;;  %v2348_v63 = vsub.s32 32, %v10080_v20  ;;  %v2353_v5 = vadd.s32 127, %v2352_v32  ;;  %v3115_v23 = vand.u32 8388607, %v13237_v53  ;;  %v8379_v35 = vmin.u32 %v2134_v10, %v10082_v51 }
 0x183   : > { %v3123_v8 = vsub.s32 32, %v3122_v4  ;;  %v2753_v44 = vadd.s32 536870912, %v2752_v61  ;;  %v3121_v49 = vshrl.u32 %v3120_v60, 5  ;;  %v2487_v46 = vand.u32 2139095040, %v10099_v26 }
 0x184   : > { %v3125_v33 = vshll.u32 %v13388_v36, %v3122_v4  ;;  %v3128_v31 = vshll.u32 %v13383_v7, %v3122_v4  ;;  %v3131_v18 = vshll.u32 %v13384_v28, %v3122_v4  ;;  %v3134_v15 = vshll.u32 %v13385_v14, %v3122_v4 }
 0x185   : > { %v3126_v1 = vshrl.u32 %v13383_v7, %v3123_v8  ;;  %v10123_v17 = vshrl.u32 %v2753_v44, 30  ;;  %v3129_v39 = vshrl.u32 %v13384_v28, %v3123_v8  ;;  %v3132_v24 = vshrl.u32 %v13385_v14, %v3123_v8 }
 0x186   : > { %v2349_v19 = vshll.u32 %v9970_v13, %v10080_v20  ;;  %v2350_v50 = vshrl.u32 %v2332_v59, %v2348_v63  ;;  %v3116_v32 = vor.u32 8388608, %v3115_v23  ;;  %v3135_v10 = vshrl.u32 %v13386_v37, %v3123_v8  ;;  %v13422_v20 = vld [vmem:[#allocation15_spill] sm:$0xff] }
 0x187   : > { %v2354_v60 = vshll.u32 %v2353_v5, 23  ;;  %v2136_v21 = vclz %v8379_v35  ;;  %v2755_v53 = vshll.u32 %v10123_v17, 30  ;;  %v2488_v43 = vshrl.u32 %v2487_v46, 23 }
 0x188   : > { %v3127_v44 = vor.u32 %v3126_v1, %v3125_v33  ;;  %v3130_v34 = vor.u32 %v3129_v39, %v3128_v31  ;;  %v3136_v12 = vor.u32 %v3135_v10, %v3134_v15  ;;  %v3137_v30 = vshll.u32 %v13386_v37, %v3122_v4  ;;  %v10133_v9 = vpop.eup %9002 }
 0x189   : > { %13421 = vst [vmem:[#allocation36_spill] sm:$0xff] %v10133_v9  ;;  %v10135_v54 = vsub.s32 %v2752_v61, %v2755_v53  ;;  %v3133_v55 = vor.u32 %v3132_v24, %v3131_v18  ;;  %v3138_v13 = vshrl.u32 %v13387_v27, %v3123_v8  ;;  %vm3140_vm6 = vcmp.lt.s32.totalorder %v3121_v49, 1 }
 0x18a   : > { %vm1862_vm9 = vcmp.lt.s32.totalorder %v13422_v20, 0  ;;  %v2351_v59 = vor.u32 %v2350_v50, %v2349_v19  ;;  %v3124_v63 = vshrl.u32 %v13388_v36, %v3123_v8  ;;  %vm3142_vm11 = vcmp.lt.s32.totalorder %v3121_v49, 3 }
 0x18b   : > { %v3156_v5 = vshll.u32 %v3116_v32, 8  ;;  %v10140_v23 = vpop.eup %9004  ;;  %vm2278_vm12 = vcmp.lt.s32.totalorder %v9733_v38, 0  ;;  %v8380_v4 = vadd.s32 4294967294, %v2136_v21  ;;  %v3139_v35 = vor.u32 %v3138_v13, %v3137_v30 }
 0x18c   : > { %13423 = vst [vmem:[#allocation37_spill] sm:$0xff] %v10140_v23  ;;  %vm3141_vm13 = vcmp.lt.s32.totalorder %v3121_v49, 2  ;;  %vm3143_vm14 = vcmp.lt.s32.totalorder %v3121_v49, 4  ;;  %v3148_v61 = vsel %vm3140_vm6, %v3127_v44, %v3130_v34  ;;  %v8394_v33 = vadd.s32 4294967169, %v2488_v43 }
 0x18d   : > { %v3145_v53 = vsel %vm3143_vm14, %v3133_v55, 2102212464  ;;  %v3149_v46 = vsel %vm3143_vm14, %v3136_v12, 920167782  ;;  %v2355_v1 = vor.u32 4788187, %v2354_v60  ;;  %v3152_v18 = vsel %vm3140_vm6, %v3130_v34, %v3133_v55 }
 0x18e   : > { %v2758_v31 = vsub.s32 0, %v10135_v54  ;;  %v3150_v8 = vsel %vm3142_vm11, %v3133_v55, %v3149_v46  ;;  %v3144_v39 = vsel %vm3140_vm6, %v3124_v63, %v3127_v44  ;;  %v3146_v24 = vsel %vm3142_vm11, %v3130_v34, %v3145_v53  ;;  %v605_v53 = vpop.permute.xlu0 %604 }
 0x18f   : > { %v3151_v30 = vsel %vm3141_vm13, %v3148_v61, %v3150_v8  ;;  %v3153_v15 = vsel %vm3143_vm14, %v3139_v35, 1326507024  ;;  %vm8381_vm0 = vcmp.lt.s32.totalorder %v8380_v4, 0  ;;  %v2358_v43 = vcvt.s32.f32 %v2351_v59 }
 0x190   : > { %v3154_v19 = vsel %vm3142_vm11, %v3136_v12, %v3153_v15  ;;  %v10151_v50 = vmul.u32.u64.low %v3156_v5, %v3151_v30  ;;  %v10152_v32 = vmul.u32.u64.high %v3156_v5, %v3151_v30, %v10151_v50  ;;  %v2362_v10 = vsub.s32 4, %v9950_v57 }
 0x191   : > { %v3155_v60 = vsel %vm3141_vm13, %v3152_v18, %v3154_v19  ;;  %v2494_v55 = vadd.s32 1, %v8394_v33  ;;  %v3147_v21 = vsel %vm3141_vm13, %v3144_v39, %v3146_v24  ;;  %v13244_v13 = vand.u32 2147483647, %v10099_v26 }
 0x192   : > { %v10158_v44 = vmul.u32.u64.low %v3156_v5, %v3155_v60  ;;  %v10159_v34 = vmul.u32.u64.high %v3156_v5, %v3155_v60, %v10158_v44  ;;  %v2356_v63 = vand.u32 2147483647, %v2355_v1  ;;  %v10162_v35 = vsel %vm8381_vm0, 0, %v8380_v4 }
 0x193   : > { %v8403_v12 = vmin.u32 %v2758_v31, %v10135_v54  ;;  %vm2495_vm2 = vcmp.gt.s32.totalorder %v2494_v55, 0  ;;  %v10169_v59 = vsel %vm10047_vm1, %v13406_v11, %v10108_v56  ;;  %v13424_v49 = vsub.s32 4, %v9858_v48 }
 0x194   : > { %v3166_v4 = vadd.s32 1, %v10152_v32  ;;  %v2496_v46 = vsel %vm2495_vm2, %v2494_v55, 0  ;;  %v1944_v33 = vxor.u32 2147483648, %v10110_v47  ;;  %v10183_v1 = vsel %vm2278_vm12, %v2362_v10, %v9950_v57 }
 0x195   : > { %v10176_v61 = vsel %vm1862_vm9, %v13424_v49, %v9858_v48  ;;  %v3163_v45 = vmul.u32 %v3156_v5, %v3147_v21  ;;  %v2498_v56 = vand.u32 31, %v2496_v46  ;;  %v2124_v31 = vadd.s32 %v9981_v42, %v9997_v52 }
 0x196   : > { %v2144_v8 = vsub.s32 4294967266, %v10162_v35  ;;  %v2491_v48 = vand.u32 8388607, %v13244_v13  ;;  %v10191_v18 = vmul.f32 %v9373_v25, %v605_v53  ;;  %v10193_v39 = vmul.f32 %v2358_v43, %v2356_v63 }
 0x197   : > { %v2760_v24 = vclz %v8403_v12  ;;  %vm3165_vm1 = vc.u32 %v10159_v34, %v10151_v50  ;;  %v2499_v57 = vsub.s32 32, %v2498_v56  ;;  %v2501_v30 = vshll.u32 %v13388_v36, %v2498_v56 }
 0x198   : > { %13425 = vst [vmem:[#allocation38_spill] sm:$0xff] %v10191_v18  ;;  %v3167_v5 = vsel %vm3165_vm1, %v3166_v4, %v10152_v32  ;;  %v2504_v42 = vshll.u32 %v13383_v7, %v2498_v56  ;;  %v2507_v52 = vshll.u32 %v13384_v28, %v2498_v56  ;;  %v2497_v19 = vshrl.u32 %v2496_v46, 5 }
 0x199   : > { %v3168_v15 = vadd.s32 %v3167_v5, %v3163_v45  ;;  %v2502_v10 = vshrl.u32 %v13383_v7, %v2499_v57  ;;  %v2505_v43 = vshrl.u32 %v13384_v28, %v2499_v57  ;;  %v2145_v60 = vadd.s32 127, %v2144_v8 }
 0x19a   : > { %v2492_v55 = vor.u32 8388608, %v2491_v48  ;;  %v2508_v21 = vshrl.u32 %v13385_v14, %v2499_v57  ;;  %v2510_v44 = vshll.u32 %v13385_v14, %v2498_v56  ;;  %v2140_v32 = vsub.s32 32, %v10162_v35 }
 0x19b   : > { %v8404_v63 = vadd.s32 4294967294, %v2760_v24  ;;  %v3169_v12 = vadd.s32 536870912, %v3168_v15  ;;  %v2511_v53 = vshrl.u32 %v13386_v37, %v2499_v57  ;;  %v2503_v49 = vor.u32 %v2502_v10, %v2501_v30 }
 0x19c   : > { %v2506_v4 = vor.u32 %v2505_v43, %v2504_v42  ;;  %v2509_v45 = vor.u32 %v2508_v21, %v2507_v52  ;;  %v2513_v46 = vshll.u32 %v13386_v37, %v2498_v56  ;;  %v2514_v8 = vshrl.u32 %v13387_v27, %v2499_v57 }
 0x19d   : > { %v10208_v5 = vshrl.u32 %v3169_v12, 30  ;;  %v2512_v13 = vor.u32 %v2511_v53, %v2510_v44  ;;  %vm2516_vm3 = vcmp.lt.s32.totalorder %v2497_v19, 1  ;;  %v13426_v48 = vand.u32 2147483647, %v13422_v20 }
 0x19e   : > { %v2146_v24 = vshll.u32 %v2145_v60, 23  ;;  %v2500_v9 = vshrl.u32 %v13388_v36, %v2499_v57  ;;  %vm2518_vm5 = vcmp.lt.s32.totalorder %v2497_v19, 3  ;;  %vm2519_vm7 = vcmp.lt.s32.totalorder %v2497_v19, 4 }
 0x19f   : > { %vm10213_vm4 = vcmp.le.f32.partialorder %v13426_v48, 0.7853982  ;;  %v2142_v30 = vshrl.u32 %v2124_v31, %v2140_v32  ;;  %v3171_v56 = vshll.u32 %v10208_v5, 30  ;;  %v2515_v42 = vor.u32 %v2514_v8, %v2513_v46 }
 0x1a0   : > { %vm2517_vm8 = vcmp.lt.s32.totalorder %v2497_v19, 2  ;;  %v13429_v52 = vand.u32 2147483647, %v9733_v38  ;;  %v2521_v43 = vsel %vm2519_vm7, %v2509_v45, 2102212464  ;;  %v2524_v21 = vsel %vm2516_vm3, %v2503_v49, %v2506_v4 }
 0x1a1   : > { %v2525_v60 = vsel %vm2519_vm7, %v2512_v13, 920167782  ;;  %v2532_v57 = vshll.u32 %v2492_v55, 8  ;;  %v2141_v31 = vshll.u32 %v10082_v51, %v10162_v35  ;;  %vm8405_vm11 = vcmp.lt.s32.totalorder %v8404_v63, 0 }
 0x1a2   : > { %vm10221_vm6 = vcmp.le.f32.partialorder %v13429_v52, 0.7853982  ;;  %v10230_v44 = vsub.s32 %v3168_v15, %v3171_v56  ;;  %v2526_v32 = vsel %vm2518_vm5, %v2509_v45, %v2525_v60  ;;  %v2147_v12 = vor.u32 4788187, %v2146_v24 }
 0x1a3   : > { %v2520_v53 = vsel %vm2516_vm3, %v2500_v9, %v2503_v49  ;;  %v2522_v46 = vsel %vm2518_vm5, %v2506_v4, %v2521_v43  ;;  %v2527_v8 = vsel %vm2517_vm8, %v2524_v21, %v2526_v32  ;;  %v1945_v48 = vsel %vm1862_vm9, %v1944_v33, %v10110_v47  ;;  %v10252_v33 = vpop.permute.xlu1 %424 }
 0x1a4   : > { %v2143_v55 = vor.u32 %v2142_v30, %v2141_v31  ;;  %v2528_v52 = vsel %vm2516_vm3, %v2506_v4, %v2509_v45  ;;  %v2529_v51 = vsel %vm2519_vm7, %v2515_v42, 1326507024  ;;  %v10241_v35 = vsel %vm8405_vm11, 0, %v8404_v63 }
 0x1a5   : > { %v2530_v15 = vsel %vm2518_vm5, %v2512_v13, %v2529_v51  ;;  %v10244_v24 = vmul.u32.u64.low %v2532_v57, %v2527_v8  ;;  %v10245_v56 = vmul.u32.u64.high %v2532_v57, %v2527_v8, %v10244_v24  ;;  %v2360_v9 = vxor.u32 2147483648, %v10193_v39 }
 0x1a6   : > { %v3174_v49 = vsub.s32 0, %v10230_v44  ;;  %v2523_v43 = vsel %vm2517_vm8, %v2520_v53, %v2522_v46  ;;  %v2531_v47 = vsel %vm2517_vm8, %v2528_v52, %v2530_v15  ;;  %v2148_v4 = vand.u32 2147483647, %v2147_v12 }
 0x1a7   : > { %v10254_v45 = vmul.u32.u64.low %v2532_v57, %v2531_v47  ;;  %v10255_v63 = vmul.u32.u64.high %v2532_v57, %v2531_v47, %v10254_v45  ;;  %v3527_v13 = vand.u32 2139095040, %v10191_v18  ;;  %9006 = vcosq.f32 %v10169_v59 }
 0x1a8   : > { %v10262_v30 = vsel %vm10213_vm4, 0, %v10176_v61  ;;  %vm2070_vm9 = vcmp.lt.s32.totalorder %v9844_v16, 0  ;;  %v2768_v19 = vsub.s32 4294967266, %v10241_v35  ;;  %v2150_v42 = vcvt.s32.f32 %v2143_v55 }
 0x1a9   : > { %13432 = vst [vmem:[#allocation39_spill] sm:$0xff] %v10262_v30  ;;  %v2539_v21 = vmul.u32 %v2532_v57, %v2523_v43  ;;  %v2542_v60 = vadd.s32 1, %v10245_v56  ;;  %v3528_v31 = vshrl.u32 %v3527_v13, 23  ;;  %9008 = vsinq.f32 %v10169_v59 }
 0x1aa   : > { %v1948_v32 = vsel %vm10213_vm4, %v13422_v20, %v1945_v48  ;;  %v10274_v61 = vsel %vm10221_vm6, 0, %v10183_v1  ;;  %v8419_v12 = vmin.u32 %v3174_v49, %v10230_v44  ;;  %v2361_v57 = vsel %vm2278_vm12, %v2360_v9, %v10193_v39  ;;  %v593_v48 = vpop.permute.xlu1 %592 }
 0x1ab   : > { %13433 = vst [vmem:[#allocation40_spill] sm:$0xff] %v10274_v61  ;;  %v2151_v53 = vmul.f32 %v2150_v42, %v2148_v4  ;;  %vm2541_vm13 = vc.u32 %v10255_v63, %v10244_v24  ;;  %v8434_v59 = vadd.s32 4294967169, %v3528_v31  ;;  %v2748_v11 = vadd.s32 %v10069_v58, %v10085_v6 }
 0x1ac   : > { %v2764_v46 = vsub.s32 32, %v10241_v35  ;;  %v2769_v8 = vadd.s32 127, %v2768_v19  ;;  %v2543_v1 = vsel %vm2541_vm13, %v2542_v60, %v10245_v56  ;;  %9010 = vcosq.f32 %v1948_v32 }
 0x1ad   : > { %v2154_v55 = vsub.s32 4, %v10051_v2  ;;  %v2544_v52 = vadd.s32 %v2543_v1, %v2539_v21  ;;  %v3534_v51 = vadd.s32 1, %v8434_v59  ;;  %9012 = vsinq.f32 %v1948_v32 }
 0x1ae   : > { %v2364_v39 = vsel %vm10221_vm6, %v9733_v38, %v2361_v57  ;;  %v3176_v15 = vclz %v8419_v12  ;;  %v13247_v9 = vand.u32 2147483647, %v10191_v18  ;;  %v2152_v58 = vxor.u32 2147483648, %v2151_v53 }
 0x1af   : > { %v2545_v6 = vadd.s32 536870912, %v2544_v52  ;;  %vm3535_vm12 = vcmp.gt.s32.totalorder %v3534_v51, 0  ;;  %v10292_v49 = vmul.f32 %v9373_v25, %v593_v48  ;;  %v2765_v56 = vshll.u32 %v10135_v54, %v10241_v35 }
 0x1b0   : > { %v2766_v43 = vshrl.u32 %v2748_v11, %v2764_v46  ;;  %v2770_v47 = vshll.u32 %v2769_v8, 23  ;;  %v3536_v4 = vsel %vm3535_vm12, %v3534_v51, 0  ;;  %9014 = vcosq.f32 %v2364_v39 }
 0x1b1   : > { %13434 = vst [vmem:[#allocation41_spill] sm:$0xff] %v10292_v49  ;;  %v10299_v10 = vsel %vm2070_vm9, %v2154_v55, %v10051_v2  ;;  %v10301_v45 = vshrl.u32 %v2545_v6, 30  ;;  %v3538_v13 = vand.u32 31, %v3536_v4  ;;  %9016 = vsinq.f32 %v2364_v39 }
 0x1b2   : > { %v8420_v42 = vadd.s32 4294967294, %v3176_v15  ;;  %v3531_v21 = vand.u32 8388607, %v13247_v9  ;;  %v10308_v54 = vsel %vm2070_vm9, %v2152_v58, %v2151_v53  ;;  %v2903_v2 = vand.u32 2139095040, %v10292_v49 }
 0x1b3   : > { %v2547_v35 = vshll.u32 %v10301_v45, 30  ;;  %v3539_v60 = vsub.s32 32, %v3538_v13  ;;  %v10312_v31 = vor.u32 %v2766_v43, %v2765_v56  ;;  %v10314_v32 = vor.u32 4788187, %v2770_v47 }
 0x1b4   : > { %v3541_v12 = vshll.u32 %v13388_v36, %v3538_v13  ;;  %v3544_v57 = vshll.u32 %v13383_v7, %v3538_v13  ;;  %v10318_v59 = vpop.eup %9006  ;;  %v3537_v46 = vshrl.u32 %v3536_v4, 5  ;;  %v3547_v8 = vshll.u32 %v13384_v28, %v3538_v13 }
 0x1b5   : > { %13435 = vst [vmem:[#allocation42_spill] sm:$0xff] %v10318_v59  ;;  %v10320_v11 = vsub.s32 %v2544_v52, %v2547_v35  ;;  %v3542_v53 = vshrl.u32 %v13383_v7, %v3539_v60  ;;  %vm8421_vm14 = vcmp.lt.s32.totalorder %v8420_v42, 0  ;;  %v3532_v1 = vor.u32 8388608, %v3531_v21 }
 0x1b6   : > { %v3545_v48 = vshrl.u32 %v13384_v28, %v3539_v60  ;;  %v3548_v55 = vshrl.u32 %v13385_v14, %v3539_v60  ;;  %v10326_v51 = vpop.eup %9008  ;;  %v3540_v39 = vshrl.u32 %v13388_v36, %v3539_v60  ;;  %v3550_v15 = vshll.u32 %v13385_v14, %v3538_v13 }
 0x1b7   : > { %13436 = vst [vmem:[#allocation43_spill] sm:$0xff] %v10326_v51  ;;  %v3551_v52 = vshrl.u32 %v13386_v37, %v3539_v60  ;;  %v2904_v58 = vshrl.u32 %v2903_v2, 23  ;;  %v13437_v6 = vand.u32 2147483647, %v9844_v16  ;;  %v2550_v43 = vsub.s32 0, %v10320_v11 }
 0x1b8   : > { %v3543_v47 = vor.u32 %v3542_v53, %v3541_v12  ;;  %v3546_v4 = vor.u32 %v3545_v48, %v3544_v57  ;;  %v3553_v21 = vshll.u32 %v13386_v37, %v3538_v13  ;;  %v3549_v35 = vor.u32 %v3548_v55, %v3547_v8 }
 0x1b9   : > { %vm10333_vm0 = vcmp.le.f32.partialorder %v13437_v6, 0.7853982  ;;  %v3552_v9 = vor.u32 %v3551_v52, %v3550_v15  ;;  %v3554_v19 = vshrl.u32 %v13387_v27, %v3539_v60  ;;  %vm3556_vm2 = vcmp.lt.s32.totalorder %v3537_v46, 1  ;;  %v10340_v38 = vpop.eup %9010 }
 0x1ba   : > { %13440 = vst [vmem:[#allocation44_spill] sm:$0xff] %v10340_v38  ;;  %v2772_v2 = vand.u32 2147483647, %v10314_v32  ;;  %v2774_v6 = vcvt.s32.f32 %v10312_v31  ;;  %vm3558_vm1 = vcmp.lt.s32.totalorder %v3537_v46, 3  ;;  %vm3559_vm3 = vcmp.lt.s32.totalorder %v3537_v46, 4  ;;  %v10344_v61 = vpop.eup %9012 }
 0x1bb   : > { %13441 = vst [vmem:[#allocation45_spill] sm:$0xff] %v10344_v61  ;;  %v3555_v20 = vor.u32 %v3554_v19, %v3553_v21  ;;  %vm3557_vm4 = vcmp.lt.s32.totalorder %v3537_v46, 2  ;;  %v3561_v12 = vsel %vm3559_vm3, %v3549_v35, 2102212464  ;;  %v3572_v13 = vshll.u32 %v3532_v1, 8  ;;  %v10356_v1 = vpop.permute.xlu1 %434 }
 0x1bc   : > { %vm2694_vm5 = vcmp.lt.s32.totalorder %v9925_v41, 0  ;;  %vm3110_vm7 = vcmp.lt.s32.totalorder %v10012_v62, 0  ;;  %v3179_v60 = vsel %vm8421_vm14, 0, %v8420_v42  ;;  %v8395_v57 = vmin.u32 %v2550_v43, %v10320_v11 }
 0x1bd   : > { %v3564_v32 = vsel %vm3556_vm2, %v3543_v47, %v3546_v4  ;;  %v3565_v31 = vsel %vm3559_vm3, %v3552_v9, 920167782  ;;  %v3560_v53 = vsel %vm3556_vm2, %v3540_v39, %v3543_v47  ;;  %v8410_v48 = vadd.s32 4294967169, %v2904_v58  ;;  %v10358_v55 = vpop.eup %9014 }
 0x1be   : > { %v3566_v19 = vsel %vm3558_vm1, %v3549_v35, %v3565_v31  ;;  %13442 = vst [vmem:[#allocation46_spill] sm:$0xff] %v10358_v55  ;;  %v3562_v15 = vsel %vm3558_vm1, %v3546_v4, %v3561_v12  ;;  %v3568_v52 = vsel %vm3556_vm2, %v3546_v4, %v3549_v35  ;;  %v3569_v43 = vsel %vm3559_vm3, %v3555_v20, 1326507024  ;;  %v10364_v21 = vpop.eup %9016 }
 0x1bf   : > { %v3567_v42 = vsel %vm3557_vm4, %v3564_v32, %v3566_v19  ;;  %13443 = vst [vmem:[#allocation47_spill] sm:$0xff] %v10364_v21  ;;  %v3164_v39 = vadd.s32 %v10151_v50, %v10159_v34  ;;  %v3180_v47 = vsub.s32 32, %v3179_v60  ;;  %v3184_v31 = vsub.s32 4294967266, %v3179_v60 }
 0x1c0   : > { %v3570_v58 = vsel %vm3558_vm1, %v3552_v9, %v3569_v43  ;;  %v2552_v8 = vclz %v8395_v57  ;;  %v10370_v30 = vmul.u32.u64.low %v3572_v13, %v3567_v42  ;;  %v10371_v12 = vmul.u32.u64.high %v3572_v13, %v3567_v42, %v10370_v30 }
 0x1c1   : > { %v3571_v55 = vsel %vm3557_vm4, %v3568_v52, %v3570_v58  ;;  %v10378_v20 = vsel %vm10333_vm0, %v9844_v16, %v10308_v54  ;;  %v3194_v4 = vsub.s32 4, %v10208_v5  ;;  %v3563_v50 = vsel %vm3557_vm4, %v3560_v53, %v3562_v15  ;;  %v601_v54 = vpop.permute.xlu1 %600 }
 0x1c2   : > { %v2910_v34 = vadd.s32 1, %v8410_v48  ;;  %v10382_v35 = vmul.f32 %v2774_v6, %v2772_v2  ;;  %v10384_v9 = vmul.u32.u64.low %v3572_v13, %v3571_v55  ;;  %v10385_v57 = vmul.u32.u64.high %v3572_v13, %v3571_v55, %v10384_v9 }
 0x1c3   : > { %v13444_v32 = vand.u32 2147483647, %v10292_v49  ;;  %v3181_v42 = vshll.u32 %v10230_v44, %v3179_v60  ;;  %v3182_v52 = vshrl.u32 %v3164_v39, %v3180_v47  ;;  %v3185_v43 = vadd.s32 127, %v3184_v31 }
 0x1c4   : > { %vm2911_vm8 = vcmp.gt.s32.totalorder %v2910_v34, 0  ;;  %v8396_v58 = vadd.s32 4294967294, %v2552_v8  ;;  %v3579_v16 = vmul.u32 %v3572_v13, %v3563_v50  ;;  %v3582_v46 = vadd.s32 1, %v10371_v12 }
 0x1c5   : > { %v2907_v19 = vand.u32 8388607, %v13444_v32  ;;  %v2912_v53 = vsel %vm2911_vm8, %v2910_v34, 0  ;;  %9018 = vcosq.f32 %v10378_v20  ;;  %v13445_v2 = vsub.s32 4, %v10123_v17 }
 0x1c6   : > { %v10402_v44 = vsel %vm3110_vm7, %v3194_v4, %v10208_v5  ;;  %v2914_v60 = vand.u32 31, %v2912_v53  ;;  %vm3581_vm6 = vc.u32 %v10385_v57, %v10370_v30  ;;  %v10408_v48 = vmul.f32 %v9373_v25, %v601_v54 }
 0x1c7   : > { %v10397_v6 = vsel %vm2694_vm5, %v13445_v2, %v10123_v17  ;;  %v2908_v8 = vor.u32 8388608, %v2907_v19  ;;  %v10410_v55 = vor.u32 %v3182_v52, %v3181_v42  ;;  %v3186_v15 = vshll.u32 %v3185_v43, 23 }
 0x1c8   : > { %13446 = vst [vmem:[#allocation48_spill] sm:$0xff] %v10408_v48  ;;  %v3583_v17 = vsel %vm3581_vm6, %v3582_v46, %v10371_v12  ;;  %v2915_v39 = vsub.s32 32, %v2914_v60  ;;  %vm8397_vm11 = vcmp.lt.s32.totalorder %v8396_v58, 0  ;;  %v2917_v5 = vshll.u32 %v13388_v36, %v2914_v60 }
 0x1c9   : > { %v3584_v47 = vadd.s32 %v3583_v17, %v3579_v16  ;;  %v2920_v31 = vshll.u32 %v13383_v7, %v2914_v60  ;;  %v2913_v4 = vshrl.u32 %v2912_v53, 5  ;;  %v2923_v9 = vshll.u32 %v13384_v28, %v2914_v60 }
 0x1ca   : > { %v2918_v50 = vshrl.u32 %v13383_v7, %v2915_v39  ;;  %v2921_v34 = vshrl.u32 %v13384_v28, %v2915_v39  ;;  %v2924_v19 = vshrl.u32 %v13385_v14, %v2915_v39  ;;  %v2926_v42 = vshll.u32 %v13385_v14, %v2914_v60 }
 0x1cb   : > { %v3585_v32 = vadd.s32 536870912, %v3584_v47  ;;  %v2927_v12 = vshrl.u32 %v13386_v37, %v2915_v39  ;;  %v3187_v52 = vor.u32 4788187, %v3186_v15  ;;  %v10421_v16 = vsel %vm8397_vm11, 0, %v8396_v58 }
 0x1cc   : > { %v2929_v43 = vshll.u32 %v13386_v37, %v2914_v60  ;;  %v3319_v54 = vand.u32 2139095040, %v10408_v48  ;;  %v2919_v53 = vor.u32 %v2918_v50, %v2917_v5  ;;  %v2922_v2 = vor.u32 %v2921_v34, %v2920_v31  ;;  %v10432_v60 = vpop.permute.xlu0 %419 }
 0x1cd   : > { %v10425_v46 = vshrl.u32 %v3585_v32, 30  ;;  %v2930_v17 = vshrl.u32 %v13387_v27, %v2915_v39  ;;  %v2916_v13 = vshrl.u32 %v13388_v36, %v2915_v39  ;;  %v2925_v21 = vor.u32 %v2924_v19, %v2923_v9 }
 0x1ce   : > { %v2928_v38 = vor.u32 %v2927_v12, %v2926_v42  ;;  %vm2932_vm9 = vcmp.lt.s32.totalorder %v2913_v4, 1  ;;  %v3190_v61 = vcvt.s32.f32 %v10410_v55  ;;  %v2560_v58 = vsub.s32 4294967266, %v10421_v16 }
 0x1cf   : > { %v3587_v15 = vshll.u32 %v10425_v46, 30  ;;  %vm2935_vm13 = vcmp.lt.s32.totalorder %v2913_v4, 4  ;;  %v2931_v32 = vor.u32 %v2930_v17, %v2929_v43  ;;  %vm2934_vm12 = vcmp.lt.s32.totalorder %v2913_v4, 3 }
 0x1d0   : > { %v2937_v5 = vsel %vm2935_vm13, %v2925_v21, 2102212464  ;;  %v3320_v31 = vshrl.u32 %v3319_v54, 23  ;;  %v13447_v50 = vand.u32 2147483647, %v9925_v41  ;;  %vm2933_vm2 = vcmp.lt.s32.totalorder %v2913_v4, 2  ;;  %v10467_v0 = vpop.permute.xlu0 %429 }
 0x1d1   : > { %v10441_v34 = vsub.s32 %v3584_v47, %v3587_v15  ;;  %v2940_v55 = vsel %vm2932_vm9, %v2919_v53, %v2922_v2  ;;  %v2948_v9 = vshll.u32 %v2908_v8, 8  ;;  %v13450_v19 = vand.u32 2147483647, %v10012_v62 }
 0x1d2   : > { %vm10437_vm14 = vcmp.le.f32.partialorder %v13447_v50, 0.7853982  ;;  %v3188_v12 = vand.u32 2147483647, %v3187_v52  ;;  %v2556_v43 = vsub.s32 32, %v10421_v16  ;;  %v2936_v54 = vsel %vm2932_vm9, %v2916_v13, %v2919_v53  ;;  %v10453_v50 = vpop.eup %9018 }
 0x1d3   : > { %vm10446_vm1 = vcmp.le.f32.partialorder %v13450_v19, 0.7853982  ;;  %v2941_v17 = vsel %vm2935_vm13, %v2928_v38, 920167782  ;;  %13453 = vst [vmem:[#allocation49_spill] sm:$0xff] %v10453_v50  ;;  %v3590_v47 = vsub.s32 0, %v10441_v34  ;;  %v2938_v15 = vsel %vm2934_vm12, %v2922_v2, %v2937_v5 }
 0x1d4   : > { %v2942_v8 = vsel %vm2934_vm12, %v2925_v21, %v2941_v17  ;;  %v2944_v19 = vsel %vm2932_vm9, %v2922_v2, %v2925_v21  ;;  %v2561_v59 = vadd.s32 127, %v2560_v58  ;;  %v2945_v52 = vsel %vm2935_vm13, %v2931_v32, 1326507024  ;;  %v10507_v56 = vpop.permute.xlu0 %439 }
 0x1d5   : > { %v2943_v51 = vsel %vm2933_vm2, %v2940_v55, %v2942_v8  ;;  %v8426_v23 = vadd.s32 4294967169, %v3320_v31  ;;  %v8435_v13 = vmin.u32 %v3590_v47, %v10441_v34  ;;  %v2946_v53 = vsel %vm2934_vm12, %v2928_v38, %v2945_v52 }
 0x1d6   : > { %v10463_v3 = vmul.u32.u64.low %v2948_v9, %v2943_v51  ;;  %v10464_v50 = vmul.u32.u64.high %v2948_v9, %v2943_v51, %v10463_v3  ;;  %v2540_v5 = vadd.s32 %v10244_v24, %v10255_v63  ;;  %v2939_v21 = vsel %vm2933_vm2, %v2936_v54, %v2938_v15 }
 0x1d7   : > { %v2947_v2 = vsel %vm2933_vm2, %v2944_v19, %v2946_v53  ;;  %v3326_v58 = vadd.s32 1, %v8426_v23  ;;  %v13454_v32 = vxor.u32 2147483648, %v10382_v35  ;;  %v13265_v55 = vand.u32 2147483647, %v10408_v48 }
 0x1d8   : > { %v10478_v31 = vmul.u32.u64.low %v2948_v9, %v2947_v2  ;;  %v10479_v51 = vmul.u32.u64.high %v2948_v9, %v2947_v2, %v10478_v31  ;;  %v10482_v17 = vmul.f32 %v3190_v61, %v3188_v12  ;;  %v2558_v47 = vshrl.u32 %v2540_v5, %v2556_v43 }
 0x1d9   : > { %v2777_v38 = vsel %vm2694_vm5, %v13454_v32, %v10382_v35  ;;  %v3592_v24 = vclz %v8435_v13  ;;  %vm3327_vm3 = vcmp.gt.s32.totalorder %v3326_v58, 0  ;;  %v2562_v63 = vshll.u32 %v2561_v59, 23 }
 0x1da   : > { %v2955_v4 = vmul.u32 %v2948_v9, %v2939_v21  ;;  %v2958_v23 = vadd.s32 1, %v10464_v50  ;;  %v3328_v54 = vsel %vm3327_vm3, %v3326_v58, 0  ;;  %v10488_v15 = vsel %vm10333_vm0, 0, %v10299_v10 }
 0x1db   : > { %13455 = vst [vmem:[#allocation50_spill] sm:$0xff] %v10488_v15  ;;  %9020 = vsinq.f32 %v10378_v20  ;;  %v10494_v61 = vsel %vm10437_vm14, 0, %v10397_v6  ;;  %v3330_v35 = vand.u32 31, %v3328_v54  ;;  %v10499_v59 = vsel %vm10446_vm1, 0, %v10402_v44 }
 0x1dc   : > { %13456 = vst [vmem:[#allocation51_spill] sm:$0xff] %v10494_v61  ;;  %13457 = vst [vmem:[#allocation52_spill] sm:$0xff] %v10499_v59  ;;  %v2557_v9 = vshll.u32 %v10320_v11, %v10421_v16  ;;  %vm2957_vm0 = vc.u32 %v10479_v51, %v10463_v3  ;;  %v3323_v10 = vand.u32 8388607, %v13265_v55  ;;  %v10512_v20 = vsel %vm10437_vm14, %v9925_v41, %v2777_v38 }
 0x1dd   : > { %v8436_v6 = vadd.s32 4294967294, %v3592_v24  ;;  %v2959_v44 = vsel %vm2957_vm0, %v2958_v23, %v10464_v50  ;;  %v3331_v12 = vsub.s32 32, %v3330_v35  ;;  %v2563_v16 = vor.u32 4788187, %v2562_v63  ;;  %v613_v63 = vpop.permute.xlu0 %612 }
 0x1de   : > { %v2559_v11 = vor.u32 %v2558_v47, %v2557_v9  ;;  %v2960_v8 = vadd.s32 %v2959_v44, %v2955_v4  ;;  %v3333_v19 = vshll.u32 %v13388_v36, %v3330_v35  ;;  %v3336_v13 = vshll.u32 %v13383_v7, %v3330_v35 }
 0x1df   : > { %v3334_v52 = vshrl.u32 %v13383_v7, %v3331_v12  ;;  %v3337_v53 = vshrl.u32 %v13384_v28, %v3331_v12  ;;  %v3580_v39 = vadd.s32 %v10370_v30, %v10385_v57  ;;  %v3324_v21 = vor.u32 8388608, %v3323_v10 }
 0x1e0   : > { %v2961_v5 = vadd.s32 536870912, %v2960_v8  ;;  %v3329_v50 = vshrl.u32 %v3328_v54, 5  ;;  %vm8437_vm4 = vcmp.lt.s32.totalorder %v8436_v6, 0  ;;  %v3339_v2 = vshll.u32 %v13384_v28, %v3330_v35 }
 0x1e1   : > { %v3340_v58 = vshrl.u32 %v13385_v14, %v3331_v12  ;;  %v3342_v32 = vshll.u32 %v13385_v14, %v3330_v35  ;;  %v2564_v38 = vand.u32 2147483647, %v2563_v16  ;;  %v2566_v31 = vcvt.s32.f32 %v2559_v11 }
 0x1e2   : > { %v10525_v47 = vshrl.u32 %v2961_v5, 30  ;;  %v3343_v24 = vshrl.u32 %v13386_v37, %v3331_v12  ;;  %v3335_v4 = vor.u32 %v3334_v52, %v3333_v19  ;;  %v3338_v23 = vor.u32 %v3337_v53, %v3336_v13 }
 0x1e3   : > { %v3345_v30 = vshll.u32 %v13386_v37, %v3330_v35  ;;  %v3346_v57 = vshrl.u32 %v13387_v27, %v3331_v12  ;;  %v3595_v54 = vsel %vm8437_vm4, 0, %v8436_v6  ;;  %v3332_v10 = vshrl.u32 %v13388_v36, %v3331_v12 }
 0x1e4   : > { %v2963_v9 = vshll.u32 %v10525_v47, 30  ;;  %vm3348_vm5 = vcmp.lt.s32.totalorder %v3329_v50, 1  ;;  %v3341_v44 = vor.u32 %v3340_v58, %v3339_v2  ;;  %v3344_v16 = vor.u32 %v3343_v24, %v3342_v32 }
 0x1e5   : > { %v3347_v11 = vor.u32 %v3346_v57, %v3345_v30  ;;  %v10533_v5 = vmul.f32 %v9373_v25, %v613_v63  ;;  %vm3350_vm8 = vcmp.lt.s32.totalorder %v3329_v50, 3  ;;  %vm3351_vm6 = vcmp.lt.s32.totalorder %v3329_v50, 4 }
 0x1e6   : > { %v10535_v55 = vsub.s32 %v2960_v8, %v2963_v9  ;;  %v3364_v19 = vshll.u32 %v3324_v21, 8  ;;  %v3600_v35 = vsub.s32 4294967266, %v3595_v54  ;;  %vm3349_vm11 = vcmp.lt.s32.totalorder %v3329_v50, 2 }
 0x1e7   : > { %13458 = vst [vmem:[#allocation53_spill] sm:$0xff] %v10533_v5  ;;  %v3353_v52 = vsel %vm3351_vm6, %v3341_v44, 2102212464  ;;  %v3356_v6 = vsel %vm3348_vm5, %v3335_v4, %v3338_v23  ;;  %v3352_v53 = vsel %vm3348_vm5, %v3332_v10, %v3335_v4  ;;  %v3357_v58 = vsel %vm3351_vm6, %v3344_v16, 920167782 }
 0x1e8   : > { %v10538_v13 = vpop.eup %9020  ;;  %v2966_v12 = vsub.s32 0, %v10535_v55  ;;  %v3354_v2 = vsel %vm3350_vm8, %v3338_v23, %v3353_v52  ;;  %v3358_v8 = vsel %vm3350_vm8, %v3341_v44, %v3357_v58  ;;  %v3360_v32 = vsel %vm3348_vm5, %v3338_v23, %v3341_v44 }
 0x1e9   : > { %13459 = vst [vmem:[#allocation54_spill] sm:$0xff] %v10538_v13  ;;  %v3361_v24 = vsel %vm3351_vm6, %v3347_v11, 1326507024  ;;  %v3943_v21 = vand.u32 2139095040, %v10533_v5  ;;  %vm2486_vm9 = vcmp.lt.s32.totalorder %v10099_v26, 0  ;;  %v3596_v63 = vsub.s32 32, %v3595_v54 }
 0x1ea   : > { %v8411_v30 = vmin.u32 %v2966_v12, %v10535_v55  ;;  %v3359_v57 = vsel %vm3349_vm11, %v3356_v6, %v3358_v8  ;;  %v3362_v9 = vsel %vm3350_vm8, %v3344_v16, %v3361_v24  ;;  %v3355_v4 = vsel %vm3349_vm11, %v3352_v53, %v3354_v2 }
 0x1eb   : > { %v3363_v10 = vsel %vm3349_vm11, %v3360_v32, %v3362_v9  ;;  %v10552_v52 = vmul.u32.u64.low %v3364_v19, %v3359_v57  ;;  %v10553_v58 = vmul.u32.u64.high %v3364_v19, %v3359_v57, %v10552_v52  ;;  %v3601_v23 = vadd.s32 127, %v3600_v35 }
 0x1ec   : > { %v2968_v44 = vclz %v8411_v30  ;;  %v10556_v11 = vmul.u32.u64.low %v3364_v19, %v3363_v10  ;;  %v10557_v43 = vmul.u32.u64.high %v3364_v19, %v3363_v10, %v10556_v11  ;;  %9022 = vcosq.f32 %v10512_v20 }
 0x1ed   : > { %v2567_v12 = vmul.f32 %v2566_v31, %v2564_v38  ;;  %v13266_v6 = vand.u32 2147483647, %v10533_v5  ;;  %v3944_v8 = vshrl.u32 %v3943_v21, 23  ;;  %v3597_v16 = vshll.u32 %v10441_v34, %v3595_v54 }
 0x1ee   : > { %v3598_v53 = vshrl.u32 %v3580_v39, %v3596_v63  ;;  %v8412_v50 = vadd.s32 4294967294, %v2968_v44  ;;  %v3371_v2 = vmul.u32 %v3364_v19, %v3355_v4  ;;  %9024 = vsinq.f32 %v10512_v20 }
 0x1ef   : > { %v2570_v32 = vsub.s32 4, %v10301_v45  ;;  %v3374_v35 = vadd.s32 1, %v10553_v58  ;;  %v8450_v24 = vadd.s32 4294967169, %v3944_v8  ;;  %v13460_v30 = vxor.u32 2147483648, %v10482_v17 }
 0x1f0   : > { %v3602_v31 = vshll.u32 %v3601_v23, 23  ;;  %v10572_v34 = vmul.f32 %v9368_v22, %v10252_v33  ;;  %vm3373_vm13 = vc.u32 %v10557_v43, %v10552_v52  ;;  %v2568_v20 = vxor.u32 2147483648, %v2567_v12 }
 0x1f1   : > { %v3193_v38 = vsel %vm3110_vm7, %v13460_v30, %v10482_v17  ;;  %v10578_v39 = vmul.f32 %v9368_v22, %v10356_v1  ;;  %v3375_v54 = vsel %vm3373_vm13, %v3374_v35, %v10553_v58  ;;  %v3950_v19 = vadd.s32 1, %v8450_v24  ;;  %v652_v58 = vpop.permute.xlu1 %651 }
 0x1f2   : > { %v10581_v21 = vor.u32 %v3598_v53, %v3597_v16  ;;  %vm8413_vm12 = vcmp.lt.s32.totalorder %v8412_v50, 0  ;;  %v3376_v17 = vadd.s32 %v3375_v54, %v3371_v2  ;;  %v3947_v63 = vand.u32 8388607, %v13266_v6 }
 0x1f3   : > { %v10588_v33 = vsel %vm10446_vm1, %v10012_v62, %v3193_v38  ;;  %v10593_v1 = vsel %vm2486_vm9, %v2570_v32, %v10301_v45  ;;  %v10597_v57 = vmul.f32 %v9368_v22, %v10432_v60  ;;  %vm3951_vm7 = vcmp.gt.s32.totalorder %v3950_v19, 0 }
 0x1f4   : > { %v10599_v9 = vor.u32 4788187, %v3602_v31  ;;  %v3377_v4 = vadd.s32 536870912, %v3376_v17  ;;  %v3952_v10 = vsel %vm3951_vm7, %v3950_v19, 0  ;;  %vm699_vm14 = vcmask 523264  }
 0x1f5   : > { %v10603_v42 = vsel %vm2486_vm9, %v2568_v20, %v2567_v12  ;;  %v10606_v44 = vsel %vm8413_vm12, 0, %v8412_v50  ;;  %v3954_v45 = vand.u32 31, %v3952_v10  ;;  %v2956_v60 = vadd.s32 %v10463_v3, %v10479_v51 }
 0x1f6   : > { %v10611_v8 = vshrl.u32 %v3377_v4, 30  ;;  %v3948_v16 = vor.u32 8388608, %v3947_v63  ;;  %v10617_v12 = vsel %vm699_vm14, %v9790_v29, %v652_v58  ;;  %v2976_v35 = vsub.s32 4294967266, %v10606_v44 }
 0x1f7   : > { %v3955_v53 = vsub.s32 32, %v3954_v45  ;;  %v3957_v2 = vshll.u32 %v13388_v36, %v3954_v45  ;;  %v3960_v32 = vshll.u32 %v13383_v7, %v3954_v45  ;;  %v3953_v30 = vshrl.u32 %v3952_v10, 5 }
 0x1f8   : > { %v3379_v24 = vshll.u32 %v10611_v8, 30  ;;  %v3963_v38 = vshll.u32 %v13384_v28, %v3954_v45  ;;  %v3966_v29 = vshll.u32 %v13385_v14, %v3954_v45  ;;  %v10631_v19 = vshll.u32 %v3948_v16, 8 }
 0x1f9   : > { %v3958_v3 = vshrl.u32 %v13383_v7, %v3955_v53  ;;  %v3961_v51 = vshrl.u32 %v13384_v28, %v3955_v53  ;;  %v3964_v31 = vshrl.u32 %v13385_v14, %v3955_v53  ;;  %v10626_v20 = vpop.eup %9022  ;;  %v2972_v4 = vsub.s32 32, %v10606_v44 }
 0x1fa   : > { %13461 = vst [vmem:[#allocation55_spill] sm:$0xff] %v10626_v20  ;;  %v10628_v54 = vsub.s32 %v3376_v17, %v3379_v24  ;;  %v719_v6 = vand.u32 2139095040, %v10617_v12  ;;  %v13463_v50 = vand.u32 2147483647, %v10099_v26  ;;  %v2977_v17 = vadd.s32 127, %v2976_v35 }
 0x1fb   : > { %v3959_v10 = vor.u32 %v3958_v3, %v3957_v2  ;;  %v3962_v58 = vor.u32 %v3961_v51, %v3960_v32  ;;  %v10636_v11 = vpop.eup %9024  ;;  %v3967_v24 = vshrl.u32 %v13386_v37, %v3955_v53  ;;  %v3969_v63 = vshll.u32 %v13386_v37, %v3954_v45 }
 0x1fc   : > { %13462 = vst [vmem:[#allocation56_spill] sm:$0xff] %v10636_v11  ;;  %vm10640_vm2 = vcmp.le.f32.partialorder %v13463_v50, 0.7853982  ;;  %v3382_v16 = vsub.s32 0, %v10628_v54  ;;  %vm3526_vm1 = vcmp.lt.s32.totalorder %v10191_v18, 0  ;;  %v3956_v2 = vshrl.u32 %v13388_v36, %v3955_v53 }
 0x1fd   : > { %v3965_v32 = vor.u32 %v3964_v31, %v3963_v38  ;;  %v3970_v3 = vshrl.u32 %v13387_v27, %v3955_v53  ;;  %vm3972_vm3 = vcmp.lt.s32.totalorder %v3953_v30, 1  ;;  %v3968_v51 = vor.u32 %v3967_v24, %v3966_v29 }
 0x1fe   : > { %v8427_v50 = vmin.u32 %v3382_v16, %v10628_v54  ;;  %vm3974_vm0 = vcmp.lt.s32.totalorder %v3953_v30, 3  ;;  %vm3975_vm4 = vcmp.lt.s32.totalorder %v3953_v30, 4  ;;  %vm3973_vm5 = vcmp.lt.s32.totalorder %v3953_v30, 2 }
 0x1ff   : > { %v3971_v35 = vor.u32 %v3970_v3, %v3969_v63  ;;  %v3977_v62 = vsel %vm3975_vm4, %v3965_v32, 2102212464  ;;  %v3980_v59 = vsel %vm3972_vm3, %v3959_v10, %v3962_v58  ;;  %v2978_v45 = vshll.u32 %v2977_v17, 23 }
 0x200   : > { %v3384_v41 = vclz %v8427_v50  ;;  %v3981_v61 = vsel %vm3975_vm4, %v3968_v51, 920167782  ;;  %v720_v20 = vshrl.u32 %v719_v6, 23  ;;  %v3976_v38 = vsel %vm3972_vm3, %v3956_v2, %v3959_v10 }
 0x201   : > { %v3978_v53 = vsel %vm3974_vm0, %v3962_v58, %v3977_v62  ;;  %v3982_v31 = vsel %vm3974_vm0, %v3965_v32, %v3981_v61  ;;  %v3984_v29 = vsel %vm3972_vm3, %v3962_v58, %v3965_v32  ;;  %v13466_v63 = vand.u32 2147483647, %v10191_v18 }
 0x202   : > { %v2973_v17 = vshll.u32 %v10535_v55, %v10606_v44  ;;  %v2974_v24 = vshrl.u32 %v2956_v60, %v2972_v4  ;;  %v3983_v6 = vsel %vm3973_vm5, %v3980_v59, %v3982_v31  ;;  %v3985_v10 = vsel %vm3975_vm4, %v3971_v35, 1326507024  ;;  %v654_v55 = vpop.permute.xlu1 %653 }
 0x203   : > { %vm10660_vm8 = vcmp.le.f32.partialorder %v13466_v63, 0.7853982  ;;  %v8428_v2 = vadd.s32 4294967294, %v3384_v41  ;;  %v3986_v62 = vsel %vm3974_vm0, %v3968_v51, %v3985_v10  ;;  %v2979_v32 = vor.u32 4788187, %v2978_v45  ;;  %v13471_v45 = vld [vmem:[#allocation16_spill] sm:$0xff] }
 0x204   : > { %v10670_v61 = vmul.u32.u64.low %v10631_v19, %v3983_v6  ;;  %v10671_v58 = vmul.u32.u64.high %v10631_v19, %v3983_v6, %v10670_v61  ;;  %v3979_v3 = vsel %vm3973_vm5, %v3976_v38, %v3978_v53  ;;  %v3987_v50 = vsel %vm3973_vm5, %v3984_v29, %v3986_v62 }
 0x205   : > { %v8326_v63 = vadd.s32 4294967169, %v720_v20  ;;  %9026 = vcosq.f32 %v10588_v33  ;;  %v10680_v41 = vsel %vm10640_vm2, 0, %v10593_v1  ;;  %v10690_v60 = vsel %vm10640_vm2, %v10099_v26, %v10603_v42 }
 0x206   : > { %13469 = vst [vmem:[#allocation57_spill] sm:$0xff] %v10680_v41  ;;  %v10683_v59 = vmul.u32.u64.low %v10631_v19, %v3987_v50  ;;  %v10684_v44 = vmul.u32.u64.high %v10631_v19, %v3987_v50, %v10683_v59  ;;  %v13470_v30 = vsub.s32 4, %v10425_v46  ;;  %v2975_v4 = vor.u32 %v2974_v24, %v2973_v17 }
 0x207   : > { %v726_v51 = vadd.s32 1, %v8326_v63  ;;  %vm8429_vm6 = vcmp.lt.s32.totalorder %v8428_v2, 0  ;;  %v3995_v1 = vmul.u32 %v10631_v19, %v3979_v3  ;;  %v3998_v35 = vadd.s32 1, %v10671_v58 }
 0x208   : > { %v3611_v20 = vsel %vm3526_vm1, %v13470_v30, %v10425_v46  ;;  %v10701_v38 = vsel %vm699_vm14, %v13471_v45, %v654_v55  ;;  %v13472_v42 = vand.u32 2147483647, %v10599_v9  ;;  %v13473_v23 = vcvt.s32.f32 %v10581_v21 }
 0x209   : > { %v2980_v31 = vand.u32 2147483647, %v2979_v32  ;;  %v13474_v46 = vand.u32 2147483647, %v10617_v12  ;;  %vm727_vm11 = vcmp.gt.s32.totalorder %v726_v51, 0  ;;  %9028 = vsinq.f32 %v10588_v33 }
 0x20a   : > { %v10707_v53 = vmul.f32 %v13473_v23, %v13472_v42  ;;  %v10714_v19 = vmul.f32 %v9368_v22, %v10467_v0  ;;  %vm3997_vm9 = vc.u32 %v10684_v44, %v10670_v61  ;;  %v728_v17 = vsel %vm727_vm11, %v726_v51, 0 }
 0x20b   : > { %v723_v29 = vand.u32 8388607, %v13474_v46  ;;  %v2982_v9 = vcvt.s32.f32 %v2975_v4  ;;  %v10718_v24 = vsel %vm8429_vm6, 0, %v8428_v2  ;;  %v3999_v21 = vsel %vm3997_vm9, %v3998_v35, %v10671_v58 }
 0x20c   : > { %v927_v6 = vand.u32 2139095040, %v10701_v38  ;;  %9030 = vcosq.f32 %v10690_v60  ;;  %v10725_v33 = vsel %vm10660_vm8, 0, %v3611_v20  ;;  %v4000_v10 = vadd.s32 %v3999_v21, %v3995_v1 }
 0x20d   : > { %13475 = vst [vmem:[#allocation16_spill] sm:$0xff] %v10725_v33  ;;  %v730_v0 = vand.u32 31, %v728_v17  ;;  %v10728_v32 = vmul.f32 %v2982_v9, %v2980_v31  ;;  %v3372_v2 = vadd.s32 %v10552_v52, %v10557_v43  ;;  %v724_v3 = vor.u32 8388608, %v723_v29 }
 0x20e   : > { %v3388_v58 = vsub.s32 32, %v10718_v24  ;;  %v3392_v50 = vsub.s32 4294967266, %v10718_v24  ;;  %v4001_v63 = vadd.s32 536870912, %v4000_v10  ;;  %v729_v59 = vshrl.u32 %v728_v17, 5 }
 0x20f   : > { %v731_v55 = vsub.s32 32, %v730_v0  ;;  %v733_v30 = vshll.u32 %v13388_v36, %v730_v0  ;;  %v736_v20 = vshll.u32 %v13383_v7, %v730_v0  ;;  %v928_v4 = vshrl.u32 %v927_v6, 23 }
 0x210   : > { %v10736_v51 = vshrl.u32 %v4001_v63, 30  ;;  %v739_v43 = vshll.u32 %v13384_v28, %v730_v0  ;;  %v742_v45 = vshll.u32 %v13385_v14, %v730_v0  ;;  %v745_v17 = vshll.u32 %v13386_v37, %v730_v0 }
 0x211   : > { %v734_v1 = vshrl.u32 %v13383_v7, %v731_v55  ;;  %v737_v35 = vshrl.u32 %v13384_v28, %v731_v55  ;;  %v740_v52 = vshrl.u32 %v13385_v14, %v731_v55  ;;  %v743_v42 = vshrl.u32 %v13386_v37, %v731_v55 }
 0x212   : > { %v746_v23 = vshrl.u32 %v13387_v27, %v731_v55  ;;  %v4003_v31 = vshll.u32 %v10736_v51, 30  ;;  %v10747_v9 = vpop.eup %9026  ;;  %v2984_v21 = vxor.u32 2147483648, %v10728_v32  ;;  %vm2902_vm13 = vcmp.lt.s32.totalorder %v10292_v49, 0 }
 0x213   : > { %v735_v46 = vor.u32 %v734_v1, %v733_v30  ;;  %v738_v29 = vor.u32 %v737_v35, %v736_v20  ;;  %13476 = vst [vmem:[#allocation58_spill] sm:$0xff] %v10747_v9  ;;  %v741_v6 = vor.u32 %v740_v52, %v739_v43  ;;  %v744_v63 = vor.u32 %v743_v42, %v742_v45 }
 0x214   : > { %v3390_v33 = vshrl.u32 %v3372_v2, %v3388_v58  ;;  %v10752_v41 = vsub.s32 %v4000_v10, %v4003_v31  ;;  %v747_v11 = vor.u32 %v746_v23, %v745_v17  ;;  %v764_v26 = vshll.u32 %v724_v3, 8 }
 0x215   : > { %v3393_v15 = vadd.s32 127, %v3392_v50  ;;  %vm748_vm12 = vcmp.lt.s32.totalorder %v729_v59, 1  ;;  %vm751_vm7 = vcmp.lt.s32.totalorder %v729_v59, 4  ;;  %v8334_v30 = vadd.s32 4294967169, %v928_v4 }
 0x216   : > { %v4006_v0 = vsub.s32 0, %v10752_v41  ;;  %v732_v20 = vshrl.u32 %v13388_v36, %v731_v55  ;;  %v753_v1 = vsel %vm751_vm7, %v741_v6, 2102212464  ;;  %v756_v35 = vsel %vm748_vm12, %v735_v46, %v738_v29  ;;  %v10756_v43 = vpop.eup %9028 }
 0x217   : > { %13477 = vst [vmem:[#allocation59_spill] sm:$0xff] %v10756_v43  ;;  %vm749_vm2 = vcmp.lt.s32.totalorder %v729_v59, 2  ;;  %vm750_vm3 = vcmp.lt.s32.totalorder %v729_v59, 3  ;;  %v757_v52 = vsel %vm751_vm7, %v744_v63, 920167782  ;;  %v760_v2 = vsel %vm748_vm12, %v738_v29, %v741_v6 }
 0x218   : > { %v8451_v10 = vmin.u32 %v4006_v0, %v10752_v41  ;;  %v752_v58 = vsel %vm748_vm12, %v732_v20, %v735_v46  ;;  %v758_v3 = vsel %vm750_vm3, %v741_v6, %v757_v52  ;;  %v761_v50 = vsel %vm751_vm7, %v747_v11, 1326507024 }
 0x219   : > { %v10759_v45 = vpop.eup %9030  ;;  %v13479_v4 = vand.u32 2147483647, %v10292_v49  ;;  %v754_v55 = vsel %vm750_vm3, %v738_v29, %v753_v1  ;;  %v759_v23 = vsel %vm749_vm2, %v756_v35, %v758_v3  ;;  %v762_v31 = vsel %vm750_vm3, %v744_v63, %v761_v50 }
 0x21a   : > { %13478 = vst [vmem:[#allocation60_spill] sm:$0xff] %v10759_v45  ;;  %v934_v17 = vadd.s32 1, %v8334_v30  ;;  %v4008_v62 = vclz %v8451_v10  ;;  %v763_v9 = vsel %vm749_vm2, %v760_v2, %v762_v31  ;;  %v3394_v11 = vshll.u32 %v3393_v15, 23 }
 0x21b   : > { %vm10763_vm0 = vcmp.le.f32.partialorder %v13479_v4, 0.7853982  ;;  %v10769_v0 = vmul.u32.u64.low %v764_v26, %v759_v23  ;;  %v10770_v46 = vmul.u32.u64.high %v764_v26, %v759_v23, %v10769_v0  ;;  %v3389_v52 = vshll.u32 %v10628_v54, %v10718_v24 }
 0x21c   : > { %v10773_v6 = vmul.u32.u64.low %v764_v26, %v763_v9  ;;  %v10774_v20 = vmul.u32.u64.high %v764_v26, %v763_v9, %v10773_v6  ;;  %vm935_vm4 = vcmp.gt.s32.totalorder %v934_v17, 0  ;;  %v8452_v29 = vadd.s32 4294967294, %v4008_v62 }
 0x21d   : > { %v755_v1 = vsel %vm749_vm2, %v752_v58, %v754_v55  ;;  %v936_v63 = vsel %vm935_vm4, %v934_v17, 0  ;;  %v13482_v30 = vxor.u32 2147483648, %v10707_v53  ;;  %v2985_v15 = vsel %vm2902_vm13, %v2984_v21, %v10728_v32  ;;  %v13484_v21 = vld [vmem:[#allocation13_spill] sm:$0xff]  ;;  %v656_v55 = vpop.permute.xlu1 %655 }
 0x21e   : > { %v2986_v9 = vsub.s32 4, %v10525_v47  ;;  %v938_v2 = vand.u32 31, %v936_v63  ;;  %v3391_v10 = vor.u32 %v3390_v33, %v3389_v52  ;;  %vm8453_vm5 = vcmp.lt.s32.totalorder %v8452_v29, 0 }
 0x21f   : > { %v3609_v35 = vsel %vm3526_vm1, %v13482_v30, %v10707_v53  ;;  %v774_v54 = vadd.s32 1, %v10770_v46  ;;  %v13483_v24 = vand.u32 2147483647, %v10701_v38  ;;  %v3395_v59 = vor.u32 4788187, %v3394_v11 }
 0x220   : > { %v771_v58 = vmul.u32 %v764_v26, %v755_v1  ;;  %vm773_vm6 = vc.u32 %v10774_v20, %v10769_v0  ;;  %v939_v53 = vsub.s32 32, %v938_v2  ;;  %9032 = vsinq.f32 %v10690_v60 }
 0x221   : > { %v931_v62 = vand.u32 8388607, %v13483_v24  ;;  %v10796_v32 = vmul.f32 %v9368_v22, %v10507_v56  ;;  %v775_v33 = vsel %vm773_vm6, %v774_v54, %v10770_v46  ;;  %v10803_v50 = vsel %vm10660_vm8, %v10191_v18, %v3609_v35 }
 0x222   : > { %v10808_v26 = vsel %vm2902_vm13, %v2986_v9, %v10525_v47  ;;  %v10810_v4 = vsel %vm8453_vm5, 0, %v8452_v29  ;;  %v776_v60 = vadd.s32 %v775_v33, %v771_v58  ;;  %v10815_v56 = vsel %vm10763_vm0, %v10292_v49, %v2985_v15 }
 0x223   : > { %v3398_v23 = vcvt.s32.f32 %v3391_v10  ;;  %v932_v16 = vor.u32 8388608, %v931_v62  ;;  %v3396_v17 = vand.u32 2147483647, %v3395_v59  ;;  %v942_v11 = vshrl.u32 %v13383_v7, %v939_v53 }
 0x224   : > { %v777_v46 = vadd.s32 536870912, %v776_v60  ;;  %v945_v47 = vshrl.u32 %v13384_v28, %v939_v53  ;;  %v4016_v6 = vsub.s32 4294967266, %v10810_v4  ;;  %v10821_v52 = vshrl.u32 %v936_v63, 5 }
 0x225   : > { %v948_v29 = vshrl.u32 %v13385_v14, %v939_v53  ;;  %v10826_v1 = vsel %vm699_vm14, %v9811_v40, %v656_v55  ;;  %v941_v35 = vshll.u32 %v13388_v36, %v938_v2  ;;  %v944_v15 = vshll.u32 %v13383_v7, %v938_v2 }
 0x226   : > { %13485 = vst [vmem:[#allocation13_spill] sm:$0xff] %v10826_v1  ;;  %v10828_v30 = vshrl.u32 %v777_v46, 30  ;;  %v951_v9 = vshrl.u32 %v13386_v37, %v939_v53  ;;  %v947_v10 = vshll.u32 %v13384_v28, %v938_v2  ;;  %v950_v54 = vshll.u32 %v13385_v14, %v938_v2 }
 0x227   : > { %v953_v63 = vshll.u32 %v13386_v37, %v938_v2  ;;  %v954_v24 = vshrl.u32 %v13387_v27, %v939_v53  ;;  %v3996_v40 = vadd.s32 %v10670_v61, %v10684_v44  ;;  %v943_v59 = vor.u32 %v942_v11, %v941_v35 }
 0x228   : > { %v779_v62 = vshll.u32 %v10828_v30, 30  ;;  %v946_v58 = vor.u32 %v945_v47, %v944_v15  ;;  %v10840_v33 = vmul.f32 %v3398_v23, %v3396_v17  ;;  %v949_v55 = vor.u32 %v948_v29, %v947_v10 }
 0x229   : > { %v952_v46 = vor.u32 %v951_v9, %v950_v54  ;;  %v955_v3 = vor.u32 %v954_v24, %v953_v63  ;;  %vm3318_vm1 = vcmp.lt.s32.totalorder %v10408_v48, 0  ;;  %v4012_v31 = vsub.s32 32, %v10810_v4 }
 0x22a   : > { %v10844_v18 = vsub.s32 %v776_v60, %v779_v62  ;;  %v972_v2 = vshll.u32 %v932_v16, 8  ;;  %v1135_v49 = vand.u32 2139095040, %v10826_v1  ;;  %v4013_v61 = vshll.u32 %v10752_v41, %v10810_v4  ;;  %v13486_v4 = vld [vmem:[#allocation10_spill] sm:$0xff] }
 0x22b   : > { %v4017_v44 = vadd.s32 127, %v4016_v6  ;;  %v940_v11 = vshrl.u32 %v13388_v36, %v939_v53  ;;  %vm956_vm8 = vcmp.lt.s32.totalorder %v10821_v52, 1  ;;  %vm958_vm11 = vcmp.lt.s32.totalorder %v10821_v52, 3 }
 0x22c   : > { %v782_v23 = vsub.s32 0, %v10844_v18  ;;  %vm959_vm9 = vcmp.lt.s32.totalorder %v10821_v52, 4  ;;  %v964_v60 = vsel %vm956_vm8, %v943_v59, %v946_v58  ;;  %v968_v47 = vsel %vm956_vm8, %v946_v58, %v949_v55 }
 0x22d   : > { %v961_v16 = vsel %vm959_vm9, %v949_v55, 2102212464  ;;  %v965_v17 = vsel %vm959_vm9, %v952_v46, 920167782  ;;  %v969_v41 = vsel %vm959_vm9, %v955_v3, 1326507024  ;;  %v10864_v29 = vpop.eup %9032  ;;  %v4014_v10 = vshrl.u32 %v3996_v40, %v4012_v31 }
 0x22e   : > { %v13487_v6 = vand.u32 2147483647, %v13486_v4  ;;  %13490 = vst [vmem:[#allocation10_spill] sm:$0xff] %v10864_v29  ;;  %v8327_v35 = vmin.u32 %v782_v23, %v10844_v18  ;;  %vm957_vm12 = vcmp.lt.s32.totalorder %v10821_v52, 2  ;;  %v966_v15 = vsel %vm958_vm11, %v949_v55, %v965_v17 }
 0x22f   : > { %v970_v9 = vsel %vm958_vm11, %v952_v46, %v969_v41  ;;  %v4018_v3 = vshll.u32 %v4017_v44, 23  ;;  %v967_v54 = vsel %vm957_vm12, %v964_v60, %v966_v15  ;;  %v13491_v24 = vand.u32 2147483647, %v10408_v48 }
 0x230   : > { %vm10860_vm13 = vcmp.le.f32.partialorder %v13487_v6, 0.7853982  ;;  %v971_v63 = vsel %vm957_vm12, %v968_v47, %v970_v9  ;;  %v960_v55 = vsel %vm956_vm8, %v940_v11, %v943_v59  ;;  %v962_v46 = vsel %vm958_vm11, %v946_v58, %v961_v16  ;;  %v13499_v9 = vld [vmem:[#allocation27_spill] sm:$0xff] }
 0x231   : > { %vm10878_vm7 = vcmp.le.f32.partialorder %v13491_v24, 0.7853982  ;;  %v10886_v31 = vmul.u32.u64.low %v972_v2, %v971_v63  ;;  %v10887_v40 = vmul.u32.u64.high %v972_v2, %v971_v63, %v10886_v31  ;;  %9034 = vcosq.f32 %v10803_v50  ;;  %v13500_v63 = vld [vmem:[#allocation8_spill] sm:$0xff] }
 0x232   : > { %v10893_v44 = vsel %vm10763_vm0, 0, %v10808_v26  ;;  %v10895_v23 = vmul.u32.u64.low %v972_v2, %v967_v54  ;;  %v10896_v60 = vmul.u32.u64.high %v972_v2, %v967_v54, %v10895_v23  ;;  %9036 = vsinq.f32 %v10803_v50 }
 0x233   : > { %13494 = vst [vmem:[#allocation61_spill] sm:$0xff] %v10893_v44  ;;  %vm3942_vm2 = vcmp.lt.s32.totalorder %v10533_v5, 0  ;;  %vm718_vm3 = vcmp.lt.s32.totalorder %v10617_v12, 0  ;;  %v784_v59 = vclz %v8327_v35  ;;  %v1136_v58 = vshrl.u32 %v1135_v49, 23 }
 0x234   : > { %9038 = vcosq.f32 %v10815_v56  ;;  %v3400_v11 = vxor.u32 2147483648, %v10840_v33  ;;  %v13495_v42 = vsub.s32 4, %v10611_v8  ;;  %v963_v16 = vsel %vm957_vm12, %v960_v55, %v962_v46 }
 0x235   : > { %v4015_v50 = vor.u32 %v4014_v10, %v4013_v61  ;;  %v4019_v17 = vor.u32 4788187, %v4018_v3  ;;  %v13496_v47 = vand.u32 2147483647, %v10617_v12  ;;  %vm981_vm4 = vc.u32 %v10887_v40, %v10895_v23 }
 0x236   : > { %v3403_v26 = vsel %vm3318_vm1, %v13495_v42, %v10611_v8  ;;  %v8342_v49 = vadd.s32 4294967169, %v1136_v58  ;;  %9040 = vsinq.f32 %v10815_v56  ;;  %v802_v6 = vsub.s32 4, %v10828_v30  ;;  %v13505_v42 = vld [vmem:[#allocation23_spill] sm:$0xff] }
 0x237   : > { %vm10913_vm0 = vcmp.le.f32.partialorder %v13496_v47, 0.7853982  ;;  %v982_v8 = vadd.s32 1, %v10896_v60  ;;  %v13285_v52 = vand.u32 2147483647, %v10826_v1  ;;  %v8328_v61 = vadd.s32 4294967294, %v784_v59 }
 0x238   : > { %v979_v35 = vmul.u32 %v972_v2, %v963_v16  ;;  %v1142_v15 = vadd.s32 1, %v8342_v49  ;;  %v908_v10 = vsel %vm10860_vm13, %v13486_v4, %v13499_v9  ;;  %v3401_v3 = vsel %vm3318_vm1, %v3400_v11, %v10840_v33  ;;  %v13508_v9 = vld [vmem:[#allocation11_spill] sm:$0xff] }
 0x239   : > { %v4026_v56 = vsub.s32 4, %v10736_v51  ;;  %v983_v54 = vsel %vm981_vm4, %v982_v8, %v10896_v60  ;;  %v13501_v24 = vand.u32 2147483647, %v13500_v63  ;;  %v4020_v2 = vand.u32 2147483647, %v4019_v17 }
 0x23a   : > { %v4022_v46 = vcvt.s32.f32 %v4015_v50  ;;  %v984_v31 = vadd.s32 %v983_v54, %v979_v35  ;;  %vm1143_vm6 = vcmp.gt.s32.totalorder %v1142_v15, 0  ;;  %v10940_v59 = vsel %vm10878_vm7, 0, %v3403_v26 }
 0x23b   : > { %vm10934_vm5 = vcmp.le.f32.partialorder %v13501_v24, 0.7853982  ;;  %13504 = vst [vmem:[#allocation27_spill] sm:$0xff] %v10940_v59  ;;  %v803_v33 = vsel %vm718_vm3, %v802_v6, %v10828_v30  ;;  %v1144_v58 = vsel %vm1143_vm6, %v1142_v15, 0  ;;  %9042 = vsinq.f32 %v908_v10 }
 0x23c   : > { %vm8329_vm1 = vcmp.lt.s32.totalorder %v8328_v61, 0  ;;  %v985_v60 = vadd.s32 536870912, %v984_v31  ;;  %v1139_v11 = vand.u32 8388607, %v13285_v52  ;;  %v1116_v16 = vsel %vm10934_vm5, %v13500_v63, %v13505_v42 }
 0x23d   : > { %v10954_v26 = vsel %vm10878_vm7, %v10408_v48, %v3401_v3  ;;  %v10959_v30 = vsel %vm3942_vm2, %v4026_v56, %v10736_v51  ;;  %v1146_v50 = vand.u32 31, %v1144_v58  ;;  %9044 = vcosq.f32 %v908_v10 }
 0x23e   : > { %v10961_v17 = vmul.f32 %v4022_v46, %v4020_v2  ;;  %v10965_v47 = vadd.s32 %v10769_v0, %v10774_v20  ;;  %v10967_v49 = vshrl.u32 %v985_v60, 30  ;;  %v13506_v62 = vsub.s32 4, %v13484_v21  ;;  %v10980_v15 = vpop.eup %9034 }
 0x23f   : > { %v10974_v8 = vsel %vm8329_vm1, 0, %v8328_v61  ;;  %v10978_v51 = vsel %vm10913_vm0, 0, %v803_v33  ;;  %v1147_v35 = vsub.s32 32, %v1146_v50  ;;  %9046 = vsinq.f32 %v1116_v16  ;;  %13507 = vst [vmem:[#allocation8_spill] sm:$0xff] %v10980_v15  ;;  %v10984_v3 = vpop.eup %9036 }
 0x240   : > { %v907_v6 = vsel %vm822_vm15, %v13506_v62, %v13484_v21  ;;  %v987_v0 = vshll.u32 %v10967_v49, 30  ;;  %v1140_v20 = vor.u32 8388608, %v1139_v11  ;;  %v1114_v10 = vsub.s32 4, %v13508_v9  ;;  %13509 = vst [vmem:[#allocation23_spill] sm:$0xff] %v10984_v3 }
 0x241   : > { %9048 = vcosq.f32 %v1116_v16  ;;  %v1149_v21 = vshll.u32 %v13388_v36, %v1146_v50  ;;  %v1150_v61 = vshrl.u32 %v13383_v7, %v1147_v35  ;;  %v1153_v56 = vshrl.u32 %v13384_v28, %v1147_v35  ;;  %v10990_v24 = vpop.eup %9038 }
 0x242   : > { %v1156_v54 = vshrl.u32 %v13385_v14, %v1147_v35  ;;  %13510 = vst [vmem:[#allocation11_spill] sm:$0xff] %v10990_v24  ;;  %v10992_v2 = vsub.s32 %v984_v31, %v987_v0  ;;  %v1152_v46 = vshll.u32 %v13383_v7, %v1146_v50  ;;  %v1155_v33 = vshll.u32 %v13384_v28, %v1146_v50 }
 0x243   : > { %v1159_v60 = vshrl.u32 %v13386_v37, %v1147_v35  ;;  %v788_v11 = vsub.s32 32, %v10974_v8  ;;  %v1145_v42 = vshrl.u32 %v1144_v58, 5  ;;  %v1158_v16 = vshll.u32 %v13385_v14, %v1146_v50  ;;  %v11003_v52 = vpop.eup %9040 }
 0x244   : > { %v11001_v62 = vsel %vm10860_vm13, 0, %v907_v6  ;;  %13511 = vst [vmem:[#allocation62_spill] sm:$0xff] %v11003_v52  ;;  %v990_v31 = vsub.s32 0, %v10992_v2  ;;  %v1151_v0 = vor.u32 %v1150_v61, %v1149_v21  ;;  %v1154_v59 = vor.u32 %v1153_v56, %v1152_v46 }
 0x245   : > { %v1157_v15 = vor.u32 %v1156_v54, %v1155_v33  ;;  %v792_v3 = vsub.s32 4294967266, %v10974_v8  ;;  %v1160_v48 = vor.u32 %v1159_v60, %v1158_v16  ;;  %v1161_v44 = vshll.u32 %v13386_v37, %v1146_v50 }
 0x246   : > { %v1162_v58 = vshrl.u32 %v13387_v27, %v1147_v35  ;;  %v8335_v43 = vmin.u32 %v990_v31, %v10992_v2  ;;  %v1148_v53 = vshrl.u32 %v13388_v36, %v1147_v35  ;;  %v1180_v6 = vshll.u32 %v1140_v20, 8 }
 0x247   : > { %v1115_v24 = vsel %vm1030_vm10, %v1114_v10, %v13508_v9  ;;  %vm1164_vm15 = vcmp.lt.s32.totalorder %v1145_v42, 1  ;;  %vm1166_vm8 = vcmp.lt.s32.totalorder %v1145_v42, 3  ;;  %vm1167_vm11 = vcmp.lt.s32.totalorder %v1145_v42, 4 }
 0x248   : > { %v1163_v52 = vor.u32 %v1162_v58, %v1161_v44  ;;  %v11014_v21 = vpop.eup %9042  ;;  %v992_v61 = vclz %v8335_v43  ;;  %v1168_v56 = vsel %vm1164_vm15, %v1148_v53, %v1151_v0  ;;  %v1169_v50 = vsel %vm1167_vm11, %v1157_v15, 2102212464 }
 0x249   : > { %v1172_v54 = vsel %vm1164_vm15, %v1151_v0, %v1154_v59  ;;  %v1170_v46 = vsel %vm1166_vm8, %v1154_v59, %v1169_v50  ;;  %v1173_v33 = vsel %vm1167_vm11, %v1160_v48, 920167782  ;;  %v1176_v60 = vsel %vm1164_vm15, %v1154_v59, %v1157_v15 }
 0x24a   : > { %v4240_v35 = vand.u32 3, %v11001_v62  ;;  %v11018_v20 = vpop.eup %9044  ;;  %v8336_v16 = vadd.s32 4294967294, %v992_v61  ;;  %vm1165_vm10 = vcmp.lt.s32.totalorder %v1145_v42, 2  ;;  %v1174_v44 = vsel %vm1166_vm8, %v1157_v15, %v1173_v33 }
 0x24b   : > { %v1177_v9 = vsel %vm1167_vm11, %v1163_v52, 1326507024  ;;  %v1171_v10 = vsel %vm1165_vm10, %v1168_v56, %v1170_v46  ;;  %v1175_v31 = vsel %vm1165_vm10, %v1172_v54, %v1174_v44  ;;  %v917_v58 = vxor.u32 2147483648, %v11014_v21 }
 0x24c   : > { %v1178_v43 = vsel %vm1166_vm8, %v1160_v48, %v1177_v9  ;;  %v11023_v0 = vpop.eup %9046  ;;  %vm8337_vm9 = vcmp.lt.s32.totalorder %v8336_v16, 0  ;;  %v11025_v59 = vmul.u32.u64.low %v1180_v6, %v1175_v31  ;;  %v11026_v50 = vmul.u32.u64.high %v1180_v6, %v1175_v31, %v11025_v59 }
 0x24d   : > { %v1179_v53 = vsel %vm1165_vm10, %v1176_v60, %v1178_v43  ;;  %vm912_vm13 = vweird.f32 %v13486_v4  ;;  %v920_v52 = vxor.u32 2147483648, %v11018_v20  ;;  %v789_v48 = vshll.u32 %v10844_v18, %v10974_v8 }
 0x24e   : > { %v11029_v45 = vpop.eup %9048  ;;  %v11031_v61 = vmul.u32.u64.low %v1180_v6, %v1179_v53  ;;  %v11032_v29 = vmul.u32.u64.high %v1180_v6, %v1179_v53, %v11031_v61  ;;  %v790_v15 = vshrl.u32 %v10965_v47, %v788_v11  ;;  %v793_v42 = vadd.s32 127, %v792_v3 }
 0x24f   : > { %v1117_v56 = vsel %vm10934_vm5, 0, %v1115_v24  ;;  %v11041_v54 = vsel %vm8337_vm9, 0, %v8336_v16  ;;  %v1187_v46 = vmul.u32 %v1180_v6, %v1171_v10  ;;  %v1125_v33 = vxor.u32 2147483648, %v11023_v0  ;;  %v658_v10 = vpop.permute.xlu1 %657 }
 0x250   : > { %vm4242_vm12 = vcmp.eq.s32.totalorder %v4240_v35, 0  ;;  %v1190_v60 = vadd.s32 1, %v11026_v50  ;;  %v1128_v44 = vxor.u32 2147483648, %v11029_v45  ;;  %vm4245_vm7 = vcmp.eq.s32.totalorder %v4240_v35, 2 }
 0x251   : > { %v4244_v18 = vsel %vm4242_vm12, %v11018_v20, %v917_v58  ;;  %vm1189_vm4 = vc.u32 %v11032_v29, %v11025_v59  ;;  %vm4241_vm6 = vcmp.lt.s32.totalorder %v4240_v35, 2  ;;  %v4247_v55 = vsel %vm4245_vm7, %v920_v52, %v11014_v21 }
 0x252   : > { %v4446_v47 = vand.u32 3, %v1117_v56  ;;  %v794_v8 = vshll.u32 %v793_v42, 23  ;;  %v1000_v3 = vsub.s32 4294967266, %v11041_v54  ;;  %v1191_v24 = vsel %vm1189_vm4, %v1190_v60, %v11026_v50 }
 0x253   : > { %v4248_v11 = vsel %vm4241_vm6, %v4244_v18, %v4247_v55  ;;  %v1192_v6 = vadd.s32 %v1191_v24, %v1187_v46  ;;  %vm1120_vm5 = vweird.f32 %v13500_v63  ;;  %v791_v16 = vor.u32 %v790_v15, %v789_v48 }
 0x254   : > { %vm4447_vm1 = vcmp.lt.s32.totalorder %v4446_v47, 2  ;;  %vm4448_vm15 = vcmp.eq.s32.totalorder %v4446_v47, 0  ;;  %v4249_v35 = vsel %vm912_vm13, nan, %v4248_v11  ;;  %vm4451_vm8 = vcmp.eq.s32.totalorder %v4446_v47, 2 }
 0x255   : > { %v4450_v9 = vsel %vm4448_vm15, %v11029_v45, %v1125_v33  ;;  %v1193_v31 = vadd.s32 536870912, %v1192_v6  ;;  %v4453_v43 = vsel %vm4451_vm8, %v1128_v44, %v11023_v0  ;;  %v913_v53 = vadd.s32 3, %v11001_v62 }
 0x256   : > { %v1121_v50 = vadd.s32 3, %v1117_v56  ;;  %9050 = vcosq.f32 %v10954_v26  ;;  %v795_v61 = vor.u32 4788187, %v794_v8  ;;  %v1001_v48 = vadd.s32 127, %v1000_v3 }
 0x257   : > { %v4454_v15 = vsel %vm4447_vm1, %v4450_v9, %v4453_v43  ;;  %v11067_v42 = vshrl.u32 %v1193_v31, 30  ;;  %v914_v60 = vand.u32 3, %v913_v53  ;;  %v4024_v55 = vxor.u32 2147483648, %v10961_v17  ;;  %v660_v43 = vpop.permute.xlu1 %659 }
 0x258   : > { %v4455_v46 = vsel %vm1120_vm5, nan, %v4454_v15  ;;  %v1122_v18 = vand.u32 3, %v1121_v50  ;;  %v11073_v47 = vadd.s32 3, %v10978_v51  ;;  %v996_v62 = vsub.s32 32, %v11041_v54 }
 0x259   : > { %v7405_v56 = vpack.c.bf16 %v4455_v46, %v4249_v35  ;;  %v798_v24 = vcvt.s32.f32 %v791_v16  ;;  %vm926_vm11 = vcmp.lt.s32.totalorder %v10701_v38, 0  ;;  %v980_v8 = vadd.s32 %v10895_v23, %v10887_v40 }
 0x25a   : > { %v1195_v3 = vshll.u32 %v11067_v42, 30  ;;  %vm916_vm10 = vcmp.eq.s32.totalorder %v914_v60, 0  ;;  %v796_v11 = vand.u32 2147483647, %v795_v61  ;;  %v1002_v9 = vshll.u32 %v1001_v48, 23  ;;  %v13515_v61 = vld [vmem:[#allocation18_spill] sm:$0xff] }
 0x25b   : > { %8594 = vmatprep.mubr.msk.bf16.mxu0 %vm699_vm14, %v7405_v56  ;;  %v918_v31 = vsel %vm916_vm10, %v11018_v20, %v917_v58  ;;  %vm919_vm9 = vcmp.eq.s32.totalorder %v914_v60, 2  ;;  %v13512_v16 = vand.u32 2147483647, %v10533_v5  ;;  %vm915_vm7 = vcmp.lt.s32.totalorder %v914_v60, 2  ;;  %v13519_v20 = vld [vmem:[#allocation19_spill] sm:$0xff] }
 0x25c   : > { %v11090_v40 = vsub.s32 %v1192_v6, %v1195_v3  ;;  %v921_v23 = vsel %vm919_vm9, %v920_v52, %v11014_v21  ;;  %vm1124_vm4 = vcmp.eq.s32.totalorder %v1122_v18, 0  ;;  %v998_v53 = vshrl.u32 %v980_v8, %v996_v62 }
 0x25d   : > { %vm11086_vm12 = vcmp.le.f32.partialorder %v13512_v16, 0.7853982  ;;  %v1010_v50 = vsub.s32 4, %v10967_v49  ;;  %v922_v58 = vsel %vm915_vm7, %v918_v31, %v921_v23  ;;  %v11098_v48 = vsel %vm699_vm14, %v13515_v61, %v658_v10 }
 0x25e   : > { %v13516_v15 = vand.u32 2147483647, %v10701_v38  ;;  %v1198_v6 = vsub.s32 0, %v11090_v40  ;;  %vm1123_vm1 = vcmp.lt.s32.totalorder %v1122_v18, 2  ;;  %v1126_v21 = vsel %vm1124_vm4, %v11029_v45, %v1125_v33 }
 0x25f   : > { %v11112_v52 = vsel %vm699_vm14, %v13519_v20, %v660_v43  ;;  %v799_v60 = vmul.f32 %v798_v24, %v796_v11  ;;  %v997_v10 = vshll.u32 %v10992_v2, %v11041_v54  ;;  %v1003_v62 = vor.u32 4788187, %v1002_v9 }
 0x260   : > { %vm11102_vm6 = vcmp.le.f32.partialorder %v13516_v15, 0.7853982  ;;  %13520 = vst [vmem:[#allocation18_spill] sm:$0xff] %v11112_v52  ;;  %vm1127_vm15 = vcmp.eq.s32.totalorder %v1122_v18, 2  ;;  %v8343_v56 = vmin.u32 %v1198_v6, %v11090_v40  ;;  %v923_v8 = vsel %vm912_vm13, nan, %v922_v58  ;;  %v662_v6 = vpop.permute.xlu1 %661 }
 0x261   : > { %v1129_v3 = vsel %vm1127_vm15, %v1128_v44, %v11023_v0  ;;  %v13298_v33 = vand.u32 2147483647, %v11098_v48  ;;  %v4025_v24 = vsel %vm3942_vm2, %v4024_v55, %v10961_v17  ;;  %v1343_v2 = vand.u32 2139095040, %v11098_v48 }
 0x262   : > { %v1130_v11 = vsel %vm1123_vm1, %v1126_v21, %v1129_v3  ;;  %v13297_v54 = vand.u32 2147483647, %v11112_v52  ;;  %v999_v18 = vor.u32 %v998_v53, %v997_v10  ;;  %v1200_v9 = vclz %v8343_v56  ;;  %v13524_v3 = vld [vmem:[#allocation20_spill] sm:$0xff] }
 0x263   : > { %v1131_v4 = vsel %vm1120_vm5, nan, %v1130_v11  ;;  %v1551_v31 = vand.u32 2139095040, %v11112_v52  ;;  %v800_v45 = vxor.u32 2147483648, %v799_v60  ;;  %v1011_v0 = vsel %vm926_vm11, %v1010_v50, %v10967_v49  ;;  %v11134_v17 = vpop.eup %9050 }
 0x264   : > { %v7389_v44 = vpack.c.bf16 %v1131_v4, %v923_v8  ;;  %v1344_v43 = vshrl.u32 %v1343_v2, 23  ;;  %13521 = vst [vmem:[#allocation19_spill] sm:$0xff] %v11134_v17  ;;  %v1004_v55 = vand.u32 2147483647, %v1003_v62  ;;  %v8344_v16 = vadd.s32 4294967294, %v1200_v9 }
 0x265   : > { %v1347_v23 = vand.u32 8388607, %v13298_v33  ;;  %v1552_v53 = vshrl.u32 %v1551_v31, 23  ;;  %9052 = vsinq.f32 %v10954_v26  ;;  %v11142_v63 = vsel %vm11086_vm12, 0, %v10959_v30 }
 0x266   : > { %13522 = vst [vmem:[#allocation63_spill] sm:$0xff] %v11142_v63  ;;  %8614 = vmatprep.mubr.msk.bf16.mxu1 %vm699_vm14, %v7389_v44  ;;  %v8350_v49 = vadd.s32 4294967169, %v1344_v43  ;;  %v1555_v50 = vand.u32 8388607, %v13297_v54  ;;  %v11148_v58 = vand.u32 3, %v10978_v51  ;;  %v1006_v61 = vcvt.s32.f32 %v999_v18 }
 0x267   : > { %vm8345_vm2 = vcmp.lt.s32.totalorder %v8344_v16, 0  ;;  %v8358_v15 = vadd.s32 4294967169, %v1552_v53  ;;  %v11153_v26 = vsel %vm11086_vm12, %v10533_v5, %v4025_v24  ;;  %v801_v30 = vsel %vm718_vm3, %v800_v45, %v799_v60 }
 0x268   : > { %v11159_v21 = vsel %vm11102_vm6, 0, %v1011_v0  ;;  %v1350_v20 = vadd.s32 1, %v8350_v49  ;;  %v11162_v51 = vand.u32 3, %v11073_v47  ;;  %v11164_v10 = vmul.f32 %v1006_v61, %v1004_v55 }
 0x269   : > { %v1348_v62 = vor.u32 8388608, %v1347_v23  ;;  %v1558_v56 = vadd.s32 1, %v8358_v15  ;;  %v11166_v8 = vsel %vm8345_vm2, 0, %v8344_v16  ;;  %v1556_v35 = vor.u32 8388608, %v1555_v50 }
 0x26a   : > { %13523 = vst [vmem:[#allocation64_spill] sm:$0xff] %v11162_v51  ;;  %vm1351_vm13 = vcmp.gt.s32.totalorder %v1350_v20, 0  ;;  %v11170_v24 = vsel %vm699_vm14, %v13524_v3, %v662_v6  ;;  %9054 = vcosq.f32 %v11153_v26  ;;  %v11176_v60 = vsel %vm10913_vm0, %v10617_v12, %v801_v30 }
 0x26b   : > { %13525 = vst [vmem:[#allocation20_spill] sm:$0xff] %v11170_v24  ;;  %v11179_v47 = vadd.s32 3, %v11159_v21  ;;  %v1352_v11 = vsel %vm1351_vm13, %v1350_v20, 0  ;;  %v1188_v2 = vadd.s32 %v11025_v59, %v11032_v29  ;;  %vm1559_vm3 = vcmp.gt.s32.totalorder %v1558_v56, 0 }
 0x26c   : > { %v1354_v9 = vand.u32 31, %v1352_v11  ;;  %v1204_v31 = vsub.s32 32, %v11166_v8  ;;  %v11186_v45 = vshll.u32 %v1348_v62, 8  ;;  %v1759_v41 = vand.u32 2139095040, %v11170_v24 }
 0x26d   : > { %v1208_v44 = vsub.s32 4294967266, %v11166_v8  ;;  %v11192_v55 = vshll.u32 %v1556_v35, 8  ;;  %v1353_v29 = vshrl.u32 %v1352_v11, 5  ;;  %v1560_v23 = vsel %vm1559_vm3, %v1558_v56, 0 }
 0x26e   : > { %v1355_v43 = vsub.s32 32, %v1354_v9  ;;  %v1357_v59 = vshll.u32 %v13388_v36, %v1354_v9  ;;  %v1360_v16 = vshll.u32 %v13383_v7, %v1354_v9  ;;  %v1363_v50 = vshll.u32 %v13384_v28, %v1354_v9 }
 0x26f   : > { %v1366_v15 = vshll.u32 %v13385_v14, %v1354_v9  ;;  %v1369_v30 = vshll.u32 %v13386_v37, %v1354_v9  ;;  %v1562_v56 = vand.u32 31, %v1560_v23  ;;  %vm1372_vm0 = vcmp.lt.s32.totalorder %v1353_v29, 1 }
 0x270   : > { %v1358_v53 = vshrl.u32 %v13383_v7, %v1355_v43  ;;  %v1361_v49 = vshrl.u32 %v13384_v28, %v1355_v43  ;;  %v1364_v61 = vshrl.u32 %v13385_v14, %v1355_v43  ;;  %v1367_v6 = vshrl.u32 %v13386_v37, %v1355_v43 }
 0x271   : > { %v1370_v20 = vshrl.u32 %v13387_v27, %v1355_v43  ;;  %v1760_v4 = vshrl.u32 %v1759_v41, 23  ;;  %v11206_v0 = vadd.s32 127, %v1208_v44  ;;  %v1356_v18 = vshrl.u32 %v13388_v36, %v1355_v43 }
 0x272   : > { %v1359_v62 = vor.u32 %v1358_v53, %v1357_v59  ;;  %v1362_v35 = vor.u32 %v1361_v49, %v1360_v16  ;;  %v1365_v3 = vor.u32 %v1364_v61, %v1363_v50  ;;  %v11204_v11 = vpop.eup %9052  ;;  %v1368_v54 = vor.u32 %v1367_v6, %v1366_v15 }
 0x273   : > { %13526 = vst [vmem:[#allocation65_spill] sm:$0xff] %v11204_v11  ;;  %v1371_v33 = vor.u32 %v1370_v20, %v1369_v30  ;;  %vm1375_vm5 = vcmp.lt.s32.totalorder %v1353_v29, 4  ;;  %vm1374_vm8 = vcmp.lt.s32.totalorder %v1353_v29, 3  ;;  %vm1373_vm10 = vcmp.lt.s32.totalorder %v1353_v29, 2 }
 0x274   : > { %v1380_v5 = vsel %vm1372_vm0, %v1359_v62, %v1362_v35  ;;  %v1377_v9 = vsel %vm1375_vm5, %v1365_v3, 2102212464  ;;  %v1381_v63 = vsel %vm1375_vm5, %v1368_v54, 920167782  ;;  %v1384_v17 = vsel %vm1372_vm0, %v1362_v35, %v1365_v3 }
 0x275   : > { %v1382_v59 = vsel %vm1374_vm8, %v1365_v3, %v1381_v63  ;;  %v1385_v16 = vsel %vm1375_vm5, %v1371_v33, 1326507024  ;;  %v1563_v53 = vsub.s32 32, %v1562_v56  ;;  %v1376_v49 = vsel %vm1372_vm0, %v1356_v18, %v1359_v62 }
 0x276   : > { %v1378_v50 = vsel %vm1374_vm8, %v1362_v35, %v1377_v9  ;;  %v1383_v61 = vsel %vm1373_vm10, %v1380_v5, %v1382_v59  ;;  %v1386_v15 = vsel %vm1374_vm8, %v1368_v54, %v1385_v16  ;;  %v11211_v41 = vshrl.u32 %v1188_v2, %v1204_v31 }
 0x277   : > { %v11209_v6 = vpop.eup %9054  ;;  %v1387_v44 = vsel %vm1373_vm10, %v1384_v17, %v1386_v15  ;;  %v11214_v43 = vmul.u32.u64.low %v11186_v45, %v1383_v61  ;;  %v11215_v30 = vmul.u32.u64.high %v11186_v45, %v1383_v61, %v11214_v43  ;;  %v1210_v20 = vshll.u32 %v11206_v0, 23 }
 0x278   : > { %13527 = vst [vmem:[#allocation66_spill] sm:$0xff] %v11209_v6  ;;  %v11220_v63 = vmul.u32.u64.low %v11186_v45, %v1387_v44  ;;  %v11221_v33 = vmul.u32.u64.high %v11186_v45, %v1387_v44, %v11220_v63  ;;  %v8366_v18 = vadd.s32 4294967169, %v1760_v4  ;;  %v1379_v29 = vsel %vm1373_vm10, %v1376_v49, %v1378_v50  ;;  %v8958_v49 = vld [vmem:[%s13195_s3 + $0x38] sm:$0xff]  }
 0x279   : > { %v11223_v5 = vshrl.u32 %v1560_v23, 5  ;;  %v1565_v54 = vshll.u32 %v13388_v36, %v1562_v56  ;;  %v1566_v2 = vshrl.u32 %v13383_v7, %v1563_v53  ;;  %v1568_v17 = vshll.u32 %v13383_v7, %v1562_v56  ;;  %v8959_v50 = vld [vmem:[%s13194_s2 + $0x38] sm:$0xff]   ;;  %7517 = vmatpush1.bf16.msra.mxu0 %v8958_v49 }
 0x27a   : > { %v1569_v31 = vshrl.u32 %v13384_v28, %v1563_v53  ;;  %v1571_v62 = vshll.u32 %v13384_v28, %v1562_v56  ;;  %v1572_v0 = vshrl.u32 %v13385_v14, %v1563_v53  ;;  %v1398_v35 = vadd.s32 1, %v11215_v30  ;;  %7710 = vmatpush1.bf16.msra.mxu1 %v8959_v50 }
 0x27b   : > { %v1567_v3 = vor.u32 %v1566_v2, %v1565_v54  ;;  %v1574_v4 = vshll.u32 %v13385_v14, %v1562_v56  ;;  %v1575_v23 = vshrl.u32 %v13386_v37, %v1563_v53  ;;  %vm1134_vm9 = vcmp.lt.s32.totalorder %v10826_v1, 0 }
 0x27c   : > { %v1395_v9 = vmul.u32 %v11186_v45, %v1379_v29  ;;  %vm1397_vm12 = vc.u32 %v11221_v33, %v11214_v43  ;;  %v1570_v59 = vor.u32 %v1569_v31, %v1568_v17  ;;  %v1573_v16 = vor.u32 %v1572_v0, %v1571_v62 }
 0x27d   : > { %v1399_v61 = vsel %vm1397_vm12, %v1398_v35, %v11215_v30  ;;  %v1576_v15 = vor.u32 %v1575_v23, %v1574_v4  ;;  %v1577_v44 = vshll.u32 %v13386_v37, %v1562_v56  ;;  %v1578_v45 = vshrl.u32 %v13387_v27, %v1563_v53 }
 0x27e   : > { %v1400_v63 = vadd.s32 %v1399_v61, %v1395_v9  ;;  %v1564_v29 = vshrl.u32 %v13388_v36, %v1563_v53  ;;  %vm1580_vm7 = vcmp.lt.s32.totalorder %v11223_v5, 1  ;;  %vm1583_vm4 = vcmp.lt.s32.totalorder %v11223_v5, 4 }
 0x27f   : > { %v13528_v54 = vand.u32 2147483647, %v10826_v1  ;;  %v1579_v30 = vor.u32 %v1578_v45, %v1577_v44  ;;  %vm1581_vm15 = vcmp.lt.s32.totalorder %v11223_v5, 2  ;;  %v1585_v56 = vsel %vm1583_vm4, %v1573_v16, 2102212464 }
 0x280   : > { %v1588_v17 = vsel %vm1580_vm7, %v1567_v3, %v1570_v59  ;;  %v13531_v53 = vmov 0   ;;  %v1401_v31 = vadd.s32 536870912, %v1400_v63  ;;  %vm1582_vm2 = vcmp.lt.s32.totalorder %v11223_v5, 3 }
 0x281   : > { %vm11252_vm1 = vcmp.le.f32.partialorder %v13528_v54, 0.7853982  ;;  %7518 = vmatprep.subr.bf16.mxu0 %v13531_v53  ;;  %7711 = vmatprep.subr.bf16.mxu1 %v13531_v53  ;;  %v1589_v62 = vsel %vm1583_vm4, %v1576_v15, 920167782  ;;  %v1592_v0 = vsel %vm1580_vm7, %v1570_v59, %v1573_v16  ;;  %v1584_v35 = vsel %vm1580_vm7, %v1564_v29, %v1567_v3 }
 0x282   : > { %v1590_v4 = vsel %vm1582_vm2, %v1573_v16, %v1589_v62  ;;  %v1593_v23 = vsel %vm1583_vm4, %v1579_v30, 1326507024  ;;  %v1766_v9 = vadd.s32 1, %v8366_v18  ;;  %v11266_v49 = vshrl.u32 %v1401_v31, 30 }
 0x283   : > { %v1586_v50 = vsel %vm1582_vm2, %v1570_v59, %v1585_v56  ;;  %v1591_v61 = vsel %vm1581_vm15, %v1588_v17, %v1590_v4  ;;  %v1594_v44 = vsel %vm1582_vm2, %v1576_v15, %v1593_v23  ;;  %v1211_v3 = vor.u32 4788187, %v1210_v20 }
 0x284   : > { %v1595_v45 = vsel %vm1581_vm15, %v1592_v0, %v1594_v44  ;;  %v11273_v54 = vmul.u32.u64.low %v11192_v55, %v1591_v61  ;;  %v11274_v6 = vmul.u32.u64.high %v11192_v55, %v1591_v61, %v11273_v54  ;;  %vm1767_vm13 = vcmp.gt.s32.totalorder %v1766_v9, 0 }
 0x285   : > { %v1403_v16 = vshll.u32 %v11266_v49, 30  ;;  %v11279_v18 = vmul.u32.u64.low %v11192_v55, %v1595_v45  ;;  %v11280_v29 = vmul.u32.u64.high %v11192_v55, %v1595_v45, %v11279_v18  ;;  %9056 = vsinq.f32 %v11153_v26 }
 0x286   : > { %v11284_v59 = vand.u32 3, %v11159_v21  ;;  %v13533_v15 = vsub.s32 4, %v11067_v42  ;;  %v1768_v56 = vsel %vm1767_vm13, %v1766_v9, 0  ;;  %v13534_v20 = vshll.u32 %v11090_v40, %v11166_v8 }
 0x287   : > { %v11295_v31 = vsub.s32 %v1400_v63, %v1403_v16  ;;  %v1587_v26 = vsel %vm1581_vm15, %v1584_v35, %v1586_v50  ;;  %v1770_v62 = vand.u32 31, %v1768_v56  ;;  %9058 = vcosq.f32 %v11176_v60 }
 0x288   : > { %13532 = vst [vmem:[#allocation67_spill] sm:$0xff] %v11284_v59  ;;  %v1219_v30 = vsel %vm1134_vm9, %v13533_v15, %v11067_v42  ;;  %v1207_v17 = vor.u32 %v11211_v41, %v13534_v20  ;;  %v13535_v21 = vxor.u32 2147483648, %v11164_v10  ;;  %v11306_v0 = vand.u32 3, %v11179_v47 }
 0x289   : > { %v1606_v40 = vadd.s32 1, %v11274_v6  ;;  %v1212_v8 = vand.u32 2147483647, %v1211_v3  ;;  %v1221_v41 = vsel %vm11252_vm1, 0, %v1219_v30  ;;  %v1406_v5 = vsub.s32 0, %v11295_v31 }
 0x28a   : > { %v1009_v42 = vsel %vm926_vm11, %v13535_v21, %v11164_v10  ;;  %13536 = vst [vmem:[#allocation68_spill] sm:$0xff] %v11306_v0  ;;  %v13304_v63 = vand.u32 2147483647, %v11170_v24  ;;  %9060 = vsinq.f32 %v11176_v60  ;;  %v1603_v35 = vmul.u32 %v11192_v55, %v1587_v26 }
 0x28b   : > { %vm1605_vm11 = vc.u32 %v11280_v29, %v11273_v54  ;;  %v1771_v10 = vsub.s32 32, %v1770_v62  ;;  %v1012_v47 = vsel %vm11102_vm6, %v10701_v38, %v1009_v42  ;;  %v1214_v4 = vcvt.s32.f32 %v1207_v17 }
 0x28c   : > { %v8351_v23 = vmin.u32 %v1406_v5, %v11295_v31  ;;  %v1607_v9 = vsel %vm1605_vm11, %v1606_v40, %v11274_v6  ;;  %v11322_v50 = vadd.s32 3, %v1221_v41  ;;  %v1763_v3 = vand.u32 8388607, %v13304_v63 }
 0x28d   : > { %v1608_v61 = vadd.s32 %v1607_v9, %v1603_v35  ;;  %v1774_v60 = vshrl.u32 %v13383_v7, %v1771_v10  ;;  %v1777_v55 = vshrl.u32 %v13384_v28, %v1771_v10  ;;  %v11326_v44 = vmul.f32 %v1214_v4, %v1212_v8 }
 0x28e   : > { %v1408_v45 = vclz %v8351_v23  ;;  %v1783_v46 = vshrl.u32 %v13386_v37, %v1771_v10  ;;  %v1773_v18 = vshll.u32 %v13388_v36, %v1770_v62  ;;  %v1776_v6 = vshll.u32 %v13383_v7, %v1770_v62 }
 0x28f   : > { %v1609_v16 = vadd.s32 536870912, %v1608_v61  ;;  %v1780_v15 = vshrl.u32 %v13385_v14, %v1771_v10  ;;  %v11334_v20 = vshrl.u32 %v1768_v56, 5  ;;  %v1779_v17 = vshll.u32 %v13384_v28, %v1770_v62 }
 0x290   : > { %v8352_v30 = vadd.s32 4294967294, %v1408_v45  ;;  %v1782_v26 = vshll.u32 %v13385_v14, %v1770_v62  ;;  %v1775_v42 = vor.u32 %v1774_v60, %v1773_v18  ;;  %v1778_v40 = vor.u32 %v1777_v55, %v1776_v6 }
 0x291   : > { %v11338_v21 = vshrl.u32 %v1609_v16, 30  ;;  %v1786_v8 = vshrl.u32 %v13387_v27, %v1771_v10  ;;  %9062 = vcosq.f32 %v1012_v47  ;;  %v11341_v5 = vand.u32 3, %v1221_v41  ;;  %v664_v16 = vpop.permute.xlu1 %663 }
 0x292   : > { %vm8353_vm6 = vcmp.lt.s32.totalorder %v8352_v30, 0  ;;  %v1784_v35 = vor.u32 %v1783_v46, %v1782_v26  ;;  %v1781_v23 = vor.u32 %v1780_v15, %v1779_v17  ;;  %v1785_v9 = vshll.u32 %v13386_v37, %v1770_v62  ;;  %v11347_v45 = vpop.eup %9056  ;;  %v8960_v62 = vld [vmem:[%s13195_s3 + $0x30] sm:$0xff]  }
 0x293   : > { %13537 = vst [vmem:[#allocation69_spill] sm:$0xff] %v11341_v5  ;;  %v11343_v4 = vsel %vm8353_vm6, 0, %v8352_v30  ;;  %v1611_v56 = vshll.u32 %v11338_v21, 30  ;;  %13538 = vst [vmem:[#allocation70_spill] sm:$0xff] %v11347_v45  ;;  %9064 = vsinq.f32 %v1012_v47  ;;  %v1216_v60 = vxor.u32 2147483648, %v11326_v44  ;;  %v8961_v47 = vld [vmem:[%s13194_s2 + $0x30] sm:$0xff]   ;;  %7519 = vmatpush1.bf16.msra.mxu0 %v8960_v62 }
 0x294   : > { %v1764_v55 = vor.u32 8388608, %v1763_v3  ;;  %vm1788_vm3 = vcmp.lt.s32.totalorder %v11334_v20, 1  ;;  %vm1342_vm0 = vcmp.lt.s32.totalorder %v11098_v48, 0  ;;  %v1787_v46 = vor.u32 %v1786_v8, %v1785_v9  ;;  %v11363_v3 = vpop.eup %9058  ;;  %7712 = vmatpush1.bf16.msra.mxu1 %v8961_v47  ;;  %7520 = vmatprep.subr.bf16.mxu0 %v13531_v53 }
 0x295   : > { %v11352_v41 = vsub.s32 %v1608_v61, %v1611_v56  ;;  %vm1791_vm5 = vcmp.lt.s32.totalorder %v11334_v20, 4  ;;  %v1796_v18 = vsel %vm1788_vm3, %v1775_v42, %v1778_v40  ;;  %v1416_v6 = vsub.s32 4294967266, %v11343_v4  ;;  %7713 = vmatprep.subr.bf16.mxu1 %v13531_v53 }
 0x296   : > { %v1772_v61 = vshrl.u32 %v13388_v36, %v1771_v10  ;;  %vm1790_vm8 = vcmp.lt.s32.totalorder %v11334_v20, 3  ;;  %v1797_v15 = vsel %vm1791_vm5, %v1784_v35, 920167782  ;;  %vm1789_vm10 = vcmp.lt.s32.totalorder %v11334_v20, 2 }
 0x297   : > { %v1614_v30 = vsub.s32 0, %v11352_v41  ;;  %v1793_v17 = vsel %vm1791_vm5, %v1781_v23, 2102212464  ;;  %v1798_v26 = vsel %vm1790_vm8, %v1781_v23, %v1797_v15  ;;  %v11376_v8 = vpop.eup %9060  ;;  %v13539_v10 = vand.u32 2147483647, %v11098_v48 }
 0x298   : > { %v1426_v9 = vsub.s32 4, %v11266_v49  ;;  %v1799_v63 = vsel %vm1789_vm10, %v1796_v18, %v1798_v26  ;;  %v1800_v45 = vsel %vm1788_vm3, %v1778_v40, %v1781_v23  ;;  %v1804_v11 = vshll.u32 %v1764_v55, 8 }
 0x299   : > { %vm11380_vm12 = vcmp.le.f32.partialorder %v13539_v10, 0.7853982  ;;  %vm1550_vm7 = vcmp.lt.s32.totalorder %v11112_v52, 0  ;;  %v8359_v62 = vmin.u32 %v1614_v30, %v11352_v41  ;;  %v1792_v47 = vsel %vm1788_vm3, %v1772_v61, %v1775_v42  ;;  %v13542_v10 = vld [vmem:[#allocation21_spill] sm:$0xff]  ;;  %v666_v30 = vpop.permute.xlu1 %665 }
 0x29a   : > { %v1801_v15 = vsel %vm1791_vm5, %v1787_v46, 1326507024  ;;  %v11399_v18 = vsel %vm699_vm14, %v13542_v10, %v664_v16  ;;  %v1412_v23 = vsub.s32 32, %v11343_v4  ;;  %v1417_v55 = vadd.s32 127, %v1416_v6 }
 0x29b   : > { %v1794_v26 = vsel %vm1790_vm8, %v1778_v40, %v1793_v17  ;;  %v1802_v13 = vsel %vm1790_vm8, %v1784_v35, %v1801_v15  ;;  %v1616_v5 = vclz %v8359_v62  ;;  %v1217_v16 = vsel %vm1134_vm9, %v1216_v60, %v11326_v44 }
 0x29c   : > { %v1803_v42 = vsel %vm1789_vm10, %v1800_v45, %v1802_v13  ;;  %v11408_v61 = vmul.u32.u64.low %v1804_v11, %v1799_v63  ;;  %v11409_v46 = vmul.u32.u64.high %v1804_v11, %v1799_v63, %v11408_v61  ;;  %v1967_v40 = vand.u32 2139095040, %v11399_v18  ;;  %v13543_v45 = vld [vmem:[#allocation25_spill] sm:$0xff] }
 0x29d   : > { %v11415_v6 = vmul.u32.u64.low %v1804_v11, %v1803_v42  ;;  %v11416_v10 = vmul.u32.u64.high %v1804_v11, %v1803_v42, %v11415_v6  ;;  %v1396_v35 = vadd.s32 %v11214_v43, %v11221_v33  ;;  %v8360_v17 = vadd.s32 4294967294, %v1616_v5 }
 0x29e   : > { %v1795_v13 = vsel %vm1789_vm10, %v1792_v47, %v1794_v26  ;;  %v11425_v63 = vsel %vm699_vm14, %v13543_v45, %v666_v30  ;;  %v1418_v62 = vshll.u32 %v1417_v55, 23  ;;  %v1427_v44 = vsel %vm1342_vm0, %v1426_v9, %v11266_v49  ;;  %v11431_v42 = vpop.eup %9062 }
 0x29f   : > { %13544 = vst [vmem:[#allocation21_spill] sm:$0xff] %v11425_v63  ;;  %v1634_v60 = vsub.s32 4, %v11338_v21  ;;  %v1968_v15 = vshrl.u32 %v1967_v40, 23  ;;  %v1220_v43 = vsel %vm11252_vm1, %v10826_v1, %v1217_v16  ;;  %v1414_v33 = vshrl.u32 %v1396_v35, %v1412_v23 }
 0x2a0   : > { %vm8361_vm9 = vcmp.lt.s32.totalorder %v8360_v17, 0  ;;  %v1814_v20 = vadd.s32 1, %v11409_v46  ;;  %v1811_v47 = vmul.u32 %v1804_v11, %v1795_v13  ;;  %vm1813_vm4 = vc.u32 %v11416_v10, %v11408_v61  ;;  %v11442_v9 = vpop.eup %9064 }
 0x2a1   : > { %v11437_v5 = vsel %vm8361_vm9, 0, %v8360_v17  ;;  %v2175_v49 = vand.u32 2139095040, %v11425_v63  ;;  %v1413_v55 = vshll.u32 %v11295_v31, %v11343_v4  ;;  %v1429_v2 = vsel %vm11380_vm12, 0, %v1427_v44 }
 0x2a2   : > { %v1815_v23 = vsel %vm1813_vm4, %v1814_v20, %v11409_v46  ;;  %v13309_v26 = vand.u32 2147483647, %v11399_v18  ;;  %v1419_v30 = vor.u32 4788187, %v1418_v62  ;;  %v1635_v11 = vsel %vm1550_vm7, %v1634_v60, %v11338_v21 }
 0x2a3   : > { %v1816_v16 = vadd.s32 %v1815_v23, %v1811_v47  ;;  %v8374_v6 = vadd.s32 4294967169, %v1968_v15  ;;  %9066 = vcosq.f32 %v1220_v43  ;;  %v11454_v40 = vand.u32 3, %v11322_v50 }
 0x2a4   : > { %v13546_v31 = vand.u32 2147483647, %v11112_v52  ;;  %v1624_v46 = vsub.s32 4294967266, %v11437_v5  ;;  %v1415_v35 = vor.u32 %v1414_v33, %v1413_v55  ;;  %v2176_v45 = vshrl.u32 %v2175_v49, 23 }
 0x2a5   : > { %13545 = vst [vmem:[#allocation25_spill] sm:$0xff] %v11454_v40  ;;  %v1817_v17 = vadd.s32 536870912, %v1816_v16  ;;  %v1974_v13 = vadd.s32 1, %v8374_v6  ;;  %9068 = vsinq.f32 %v1220_v43  ;;  %v1433_v21 = vadd.s32 3, %v1429_v2 }
 0x2a6   : > { %vm11458_vm1 = vcmp.le.f32.partialorder %v13546_v31, 0.7853982  ;;  %v11463_v62 = vand.u32 3, %v1429_v2  ;;  %v1420_v44 = vand.u32 2147483647, %v1419_v30  ;;  %v1604_v33 = vadd.s32 %v11273_v54, %v11280_v29  ;;  %v8962_v30 = vld [vmem:[%s13195_s3 + $0x28] sm:$0xff]  }
 0x2a7   : > { %v1637_v50 = vsel %vm11458_vm1, 0, %v1635_v11  ;;  %v11467_v60 = vshrl.u32 %v1817_v17, 30  ;;  %v1971_v15 = vand.u32 8388607, %v13309_v26  ;;  %vm1975_vm15 = vcmp.gt.s32.totalorder %v1974_v13, 0  ;;  %v8963_v11 = vld [vmem:[%s13194_s2 + $0x28] sm:$0xff]   ;;  %7521 = vmatpush1.bf16.msra.mxu0 %v8962_v30 }
 0x2a8   : > { %13549 = vst [vmem:[#allocation71_spill] sm:$0xff] %v11463_v62  ;;  %v1620_v20 = vsub.s32 32, %v11437_v5  ;;  %v1625_v47 = vadd.s32 127, %v1624_v46  ;;  %v1976_v43 = vsel %vm1975_vm15, %v1974_v13, 0  ;;  %v1422_v49 = vcvt.s32.f32 %v1415_v35  ;;  %7714 = vmatpush1.bf16.msra.mxu1 %v8963_v11  ;;  %7522 = vmatprep.subr.bf16.mxu0 %v13531_v53 }
 0x2a9   : > { %v1819_v55 = vshll.u32 %v11467_v60, 30  ;;  %v1978_v2 = vand.u32 31, %v1976_v43  ;;  %v8382_v23 = vadd.s32 4294967169, %v2176_v45  ;;  %v11481_v6 = vand.u32 3, %v1433_v21  ;;  %7715 = vmatprep.subr.bf16.mxu1 %v13531_v53 }
 0x2aa   : > { %v11483_v54 = vadd.s32 3, %v1637_v50  ;;  %v11485_v29 = vand.u32 3, %v1637_v50  ;;  %v11488_v46 = vmul.f32 %v1422_v49, %v1420_v44  ;;  %v1972_v17 = vor.u32 8388608, %v1971_v15 }
 0x2ab   : > { %13550 = vst [vmem:[#allocation72_spill] sm:$0xff] %v11481_v6  ;;  %v11490_v35 = vsub.s32 %v1816_v16, %v1819_v55  ;;  %v1979_v13 = vsub.s32 32, %v1978_v2  ;;  %v1621_v45 = vshll.u32 %v11352_v41, %v11437_v5  ;;  %v1622_v26 = vshrl.u32 %v1604_v33, %v1620_v20 }
 0x2ac   : > { %13551 = vst [vmem:[#allocation73_spill] sm:$0xff] %v11485_v29  ;;  %v1626_v21 = vshll.u32 %v1625_v47, 23  ;;  %v1812_v6 = vadd.s32 %v11408_v61, %v11416_v10  ;;  %v1981_v16 = vshll.u32 %v13388_v36, %v1978_v2  ;;  %v1984_v44 = vshll.u32 %v13383_v7, %v1978_v2 }
 0x2ad   : > { %v1822_v50 = vsub.s32 0, %v11490_v35  ;;  %v2182_v15 = vadd.s32 1, %v8382_v23  ;;  %v1982_v49 = vshrl.u32 %v13383_v7, %v1979_v13  ;;  %v1985_v41 = vshrl.u32 %v13384_v28, %v1979_v13 }
 0x2ae   : > { %v1987_v5 = vshll.u32 %v13384_v28, %v1978_v2  ;;  %v1988_v33 = vshrl.u32 %v13385_v14, %v1979_v13  ;;  %v1977_v10 = vshrl.u32 %v1976_v43, 5  ;;  %v1990_v20 = vshll.u32 %v13385_v14, %v1978_v2 }
 0x2af   : > { %v8367_v61 = vmin.u32 %v1822_v50, %v11490_v35  ;;  %v1991_v47 = vshrl.u32 %v13386_v37, %v1979_v13  ;;  %v1983_v55 = vor.u32 %v1982_v49, %v1981_v16  ;;  %v1986_v30 = vor.u32 %v1985_v41, %v1984_v44 }
 0x2b0   : > { %v1989_v11 = vor.u32 %v1988_v33, %v1987_v5  ;;  %v11508_v31 = vshll.u32 %v1972_v17, 8  ;;  %v11510_v23 = vpop.eup %9066  ;;  %v1623_v29 = vor.u32 %v1622_v26, %v1621_v45  ;;  %v13553_v1 = vand.u32 2147483647, %v11425_v63 }
 0x2b1   : > { %13552 = vst [vmem:[#allocation74_spill] sm:$0xff] %v11510_v23  ;;  %v1824_v40 = vclz %v8367_v61  ;;  %v1992_v62 = vor.u32 %v1991_v47, %v1990_v20  ;;  %v1627_v50 = vor.u32 4788187, %v1626_v21  ;;  %v1993_v43 = vshll.u32 %v13386_v37, %v1978_v2 }
 0x2b2   : > { %v11514_v0 = vand.u32 8388607, %v13553_v1  ;;  %v1994_v51 = vshrl.u32 %v13387_v27, %v1979_v13  ;;  %vm2183_vm2 = vcmp.gt.s32.totalorder %v2182_v15, 0  ;;  %v11518_v16 = vpop.eup %9068  ;;  %v1980_v17 = vshrl.u32 %v13388_v36, %v1979_v13 }
 0x2b3   : > { %13554 = vst [vmem:[#allocation75_spill] sm:$0xff] %v11518_v16  ;;  %v8368_v44 = vadd.s32 4294967294, %v1824_v40  ;;  %vm1996_vm13 = vcmp.lt.s32.totalorder %v1977_v10, 1  ;;  %vm1999_vm11 = vcmp.lt.s32.totalorder %v1977_v10, 4  ;;  %vm1997_vm6 = vcmp.lt.s32.totalorder %v1977_v10, 2  ;;  %v668_v16 = vpop.permute.xlu1 %667 }
 0x2b4   : > { %v1995_v26 = vor.u32 %v1994_v51, %v1993_v43  ;;  %v2001_v45 = vsel %vm1999_vm11, %v1989_v11, 2102212464  ;;  %v2004_v49 = vsel %vm1996_vm13, %v1983_v55, %v1986_v30  ;;  %vm1998_vm5 = vcmp.lt.s32.totalorder %v1977_v10, 3 }
 0x2b5   : > { %vm8369_vm3 = vcmp.lt.s32.totalorder %v8368_v44, 0  ;;  %v2000_v1 = vsel %vm1996_vm13, %v1980_v17, %v1983_v55  ;;  %v2005_v21 = vsel %vm1999_vm11, %v1992_v62, 920167782  ;;  %v2008_v5 = vsel %vm1996_vm13, %v1986_v30, %v1989_v11 }
 0x2b6   : > { %v1827_v41 = vsel %vm8369_vm3, 0, %v8368_v44  ;;  %v2006_v2 = vsel %vm1998_vm5, %v1989_v11, %v2005_v21  ;;  %v2009_v33 = vsel %vm1999_vm11, %v1995_v26, 1326507024  ;;  %v2002_v47 = vsel %vm1998_vm5, %v1986_v30, %v2001_v45  ;;  %v13555_v21 = vld [vmem:[#allocation24_spill] sm:$0xff] }
 0x2b7   : > { %v1828_v61 = vsub.s32 32, %v1827_v41  ;;  %v1832_v20 = vsub.s32 4294967266, %v1827_v41  ;;  %v2007_v40 = vsel %vm1997_vm6, %v2004_v49, %v2006_v2  ;;  %v1628_v13 = vand.u32 2147483647, %v1627_v50 }
 0x2b8   : > { %v2010_v23 = vsel %vm1998_vm5, %v1992_v62, %v2009_v33  ;;  %v11523_v51 = vmul.u32.u64.low %v11508_v31, %v2007_v40  ;;  %v11524_v43 = vmul.u32.u64.high %v11508_v31, %v2007_v40, %v11523_v51  ;;  %v2184_v11 = vsel %vm2183_vm2, %v2182_v15, 0 }
 0x2b9   : > { %v1830_v59 = vshrl.u32 %v1812_v6, %v1828_v61  ;;  %v1833_v55 = vadd.s32 127, %v1832_v20  ;;  %v2011_v44 = vsel %vm1997_vm6, %v2008_v5, %v2010_v23  ;;  %v2003_v17 = vsel %vm1997_vm6, %v2000_v1, %v2002_v47 }
 0x2ba   : > { %v11531_v30 = vmul.u32.u64.low %v11508_v31, %v2011_v44  ;;  %v11532_v26 = vmul.u32.u64.high %v11508_v31, %v2011_v44, %v11531_v30  ;;  %v2186_v50 = vand.u32 31, %v2184_v11  ;;  %v1630_v62 = vcvt.s32.f32 %v1623_v29 }
 0x2bb   : > { %v1829_v45 = vshll.u32 %v11490_v35, %v1827_v41  ;;  %v1834_v49 = vshll.u32 %v1833_v55, 23  ;;  %v11537_v2 = vsel %vm699_vm14, %v13555_v21, %v668_v16  ;;  %v2022_v23 = vadd.s32 1, %v11524_v43  ;;  %v8964_v55 = vld [vmem:[%s13195_s3 + $0x20] sm:$0xff]  }
 0x2bc   : > { %13556 = vst [vmem:[#allocation24_spill] sm:$0xff] %v11537_v2  ;;  %v2180_v15 = vor.u32 8388608, %v11514_v0  ;;  %v2187_v10 = vsub.s32 32, %v2186_v50  ;;  %v11542_v1 = vmul.f32 %v1630_v62, %v1628_v13  ;;  %v2019_v33 = vmul.u32 %v11508_v31, %v2003_v17  ;;  %7523 = vmatpush1.bf16.msra.mxu0 %v8964_v55 }
 0x2bd   : > { %v1831_v5 = vor.u32 %v1830_v59, %v1829_v45  ;;  %v11545_v29 = vshrl.u32 %v2184_v11, 5  ;;  %v1835_v35 = vor.u32 4788187, %v1834_v49  ;;  %vm2021_vm8 = vc.u32 %v11532_v26, %v11523_v51  ;;  %7524 = vmatprep.subr.bf16.mxu0 %v13531_v53 }
 0x2be   : > { %v2189_v16 = vshll.u32 %v13388_v36, %v2186_v50  ;;  %v2190_v41 = vshrl.u32 %v13383_v7, %v2187_v10  ;;  %v2023_v61 = vsel %vm2021_vm8, %v2022_v23, %v11524_v43  ;;  %v2192_v0 = vshll.u32 %v13383_v7, %v2186_v50  ;;  %v8965_v43 = vld [vmem:[%s13194_s2 + $0x20] sm:$0xff]  }
 0x2bf   : > { %v2193_v20 = vshrl.u32 %v13384_v28, %v2187_v10  ;;  %v2196_v59 = vshrl.u32 %v13385_v14, %v2187_v10  ;;  %v2024_v47 = vadd.s32 %v2023_v61, %v2019_v33  ;;  %v2195_v31 = vshll.u32 %v13384_v28, %v2186_v50  ;;  %7716 = vmatpush1.bf16.msra.mxu1 %v8965_v43 }
 0x2c0   : > { %v2198_v40 = vshll.u32 %v13385_v14, %v2186_v50  ;;  %v2199_v13 = vshrl.u32 %v13386_v37, %v2187_v10  ;;  %vm1758_vm10 = vcmp.lt.s32.totalorder %v11170_v24, 0  ;;  %v2191_v44 = vor.u32 %v2190_v41, %v2189_v16  ;;  %7717 = vmatprep.subr.bf16.mxu1 %v13531_v53 }
 0x2c1   : > { %v2194_v11 = vor.u32 %v2193_v20, %v2192_v0  ;;  %v2201_v17 = vshll.u32 %v13386_v37, %v2186_v50  ;;  %v2202_v30 = vshrl.u32 %v13387_v27, %v2187_v10  ;;  %v1836_v62 = vand.u32 2147483647, %v1835_v35  ;;  %v8967_v0 = vld [vmem:[%s13194_s2 + $0x18] sm:$0xff]  }
 0x2c2   : > { %v2025_v45 = vadd.s32 536870912, %v2024_v47  ;;  %v2197_v49 = vor.u32 %v2196_v59, %v2195_v31  ;;  %v2200_v21 = vor.u32 %v2199_v13, %v2198_v40  ;;  %v1632_v23 = vxor.u32 2147483648, %v11542_v1 }
 0x2c3   : > { %v1842_v33 = vsub.s32 4, %v11467_v60  ;;  %v2203_v61 = vor.u32 %v2202_v30, %v2201_v17  ;;  %v11569_v6 = vshll.u32 %v2180_v15, 8  ;;  %v13557_v50 = vand.u32 2147483647, %v11170_v24  ;;  %v8966_v15 = vld [vmem:[%s13195_s3 + $0x18] sm:$0xff]   ;;  %7718 = vmatpush1.bf16.msra.mxu1 %v8967_v0 }
 0x2c4   : > { %v1838_v16 = vcvt.s32.f32 %v1831_v5  ;;  %v11579_v41 = vshrl.u32 %v2025_v45, 30  ;;  %vm2204_vm4 = vcmp.lt.s32.totalorder %v11545_v29, 1  ;;  %vm2207_vm15 = vcmp.lt.s32.totalorder %v11545_v29, 4  ;;  %7525 = vmatpush1.bf16.msra.mxu0 %v8966_v15  ;;  %7719 = vmatprep.subr.bf16.mxu1 %v13531_v53 }
 0x2c5   : > { %vm11575_vm9 = vcmp.le.f32.partialorder %v13557_v50, 0.7853982  ;;  %v2188_v20 = vshrl.u32 %v13388_v36, %v2187_v10  ;;  %v2212_v59 = vsel %vm2204_vm4, %v2191_v44, %v2194_v11  ;;  %v2213_v5 = vsel %vm2207_vm15, %v2200_v21, 920167782  ;;  %7526 = vmatprep.subr.bf16.mxu0 %v13531_v53 }
 0x2c6   : > { %v2383_v31 = vand.u32 2139095040, %v11537_v2  ;;  %v1839_v40 = vmul.f32 %v1838_v16, %v1836_v62  ;;  %v2027_v13 = vshll.u32 %v11579_v41, 30  ;;  %vm2206_vm2 = vcmp.lt.s32.totalorder %v11545_v29, 3  ;;  %v8969_v16 = vld [vmem:[%s13194_s2 + $0x10] sm:$0xff]  }
 0x2c7   : > { %v2209_v55 = vsel %vm2207_vm15, %v2197_v49, 2102212464  ;;  %vm2205_vm13 = vcmp.lt.s32.totalorder %v11545_v29, 2  ;;  %v2214_v10 = vsel %vm2206_vm2, %v2197_v49, %v2213_v5  ;;  %v2216_v43 = vsel %vm2204_vm4, %v2194_v11, %v2197_v49  ;;  %7720 = vmatpush1.bf16.msra.mxu1 %v8969_v16  ;;  %v670_v16 = vpop.permute.xlu1 %669 }
 0x2c8   : > { %v2217_v17 = vsel %vm2207_vm15, %v2203_v61, 1326507024  ;;  %v13560_v30 = vxor.u32 2147483648, %v11488_v46  ;;  %v11613_v45 = vsub.s32 %v2024_v47, %v2027_v13  ;;  %v2208_v50 = vsel %vm2204_vm4, %v2188_v20, %v2191_v44  ;;  %v8968_v61 = vld [vmem:[%s13195_s3 + $0x10] sm:$0xff]   ;;  %7721 = vmatprep.subr.bf16.mxu1 %v13531_v53 }
 0x2c9   : > { %v2215_v49 = vsel %vm2205_vm13, %v2212_v59, %v2214_v10  ;;  %vm1966_vm11 = vcmp.lt.s32.totalorder %v11399_v18, 0  ;;  %v2218_v47 = vsel %vm2206_vm2, %v2200_v21, %v2217_v17  ;;  %v1840_v0 = vxor.u32 2147483648, %v1839_v40  ;;  %7527 = vmatpush1.bf16.msra.mxu0 %v8968_v61 }
 0x2ca   : > { %v1425_v62 = vsel %vm1342_vm0, %v13560_v30, %v11488_v46  ;;  %v2210_v46 = vsel %vm2206_vm2, %v2194_v11, %v2209_v55  ;;  %v11631_v44 = vmul.u32.u64.low %v11569_v6, %v2215_v49  ;;  %v11632_v15 = vmul.u32.u64.high %v11569_v6, %v2215_v49, %v11631_v44  ;;  %7528 = vmatprep.subr.bf16.mxu0 %v13531_v53 }
 0x2cb   : > { %v1843_v20 = vsel %vm1758_vm10, %v1842_v33, %v11467_v60  ;;  %v2030_v59 = vsub.s32 0, %v11613_v45  ;;  %v2219_v5 = vsel %vm2205_vm13, %v2216_v43, %v2218_v47  ;;  %v1633_v11 = vsel %vm1550_vm7, %v1632_v23, %v11542_v1  ;;  %v8970_v23 = vld [vmem:[%s13195_s3 + $0x8] sm:$0xff]  }
 0x2cc   : > { %v11645_v21 = vmul.u32.u64.low %v11569_v6, %v2219_v5  ;;  %v11646_v13 = vmul.u32.u64.high %v11569_v6, %v2219_v5, %v11645_v21  ;;  %v2384_v55 = vshrl.u32 %v2383_v31, 23  ;;  %v1428_v60 = vsel %vm11380_vm12, %v11098_v48, %v1425_v62  ;;  %v8971_v31 = vld [vmem:[%s13194_s2 + $0x8] sm:$0xff]  }
 0x2cd   : > { %v11654_v33 = vand.u32 3, %v11483_v54  ;;  %v8375_v10 = vmin.u32 %v2030_v59, %v11613_v45  ;;  %v2211_v1 = vsel %vm2205_vm13, %v2208_v50, %v2210_v46  ;;  %v1845_v56 = vsel %vm11575_vm9, 0, %v1843_v20  ;;  %7529 = vmatpush1.bf16.msra.mxu0 %v8970_v23  ;;  %7722 = vmatpush1.bf16.msra.mxu1 %v8971_v31 }
 0x2ce   : > { %v13562_v43 = vand.u32 2147483647, %v11399_v18  ;;  %v2230_v29 = vadd.s32 1, %v11632_v15  ;;  %v13321_v17 = vand.u32 2147483647, %v11537_v2  ;;  %v8390_v30 = vadd.s32 4294967169, %v2384_v55  ;;  %7530 = vmatprep.subr.bf16.mxu0 %v13531_v53  ;;  %7723 = vmatprep.subr.bf16.mxu1 %v13531_v53 }
 0x2cf   : > { %13561 = vst [vmem:[#allocation76_spill] sm:$0xff] %v11654_v33  ;;  %v1636_v62 = vsel %vm11458_vm1, %v11112_v52, %v1633_v11  ;;  %v1841_v50 = vsel %vm1758_vm10, %v1840_v0, %v1839_v40  ;;  %v2032_v49 = vclz %v8375_v10  ;;  %v2050_v61 = vsub.s32 4, %v11579_v41 }
 0x2d0   : > { %vm11669_vm0 = vcmp.le.f32.partialorder %v13562_v43, 0.7853982  ;;  %9070 = vcosq.f32 %v1428_v60  ;;  %v2227_v46 = vmul.u32 %v11569_v6, %v2211_v1  ;;  %vm2229_vm12 = vc.u32 %v11646_v13, %v11631_v44 }
 0x2d1   : > { %v2390_v47 = vadd.s32 1, %v8390_v30  ;;  %9072 = vsinq.f32 %v1428_v60  ;;  %v1849_v4 = vadd.s32 3, %v1845_v56  ;;  %v8376_v40 = vadd.s32 4294967294, %v2032_v49 }
 0x2d2   : > { %v2231_v0 = vsel %vm2229_vm12, %v2230_v29, %v11632_v15  ;;  %9074 = vcosq.f32 %v1636_v62  ;;  %v1844_v20 = vsel %vm11575_vm9, %v11170_v24, %v1841_v50  ;;  %v2051_v6 = vsel %vm1966_vm11, %v2050_v61, %v11579_v41  ;;  %v13565_v15 = vld [vmem:[#allocation35_spill] sm:$0xff]  ;;  %v672_v41 = vpop.permute.xlu1 %671 }
 0x2d3   : > { %v2232_v59 = vadd.s32 %v2231_v0, %v2227_v46  ;;  %vm2391_vm7 = vcmp.gt.s32.totalorder %v2390_v47, 0  ;;  %vm8377_vm1 = vcmp.lt.s32.totalorder %v8376_v40, 0  ;;  %v2387_v5 = vand.u32 8388607, %v13321_v17 }
 0x2d4   : > { %v2392_v11 = vsel %vm2391_vm7, %v2390_v47, 0  ;;  %v2035_v21 = vsel %vm8377_vm1, 0, %v8376_v40  ;;  %v11697_v10 = vsel %vm699_vm14, %v13565_v15, %v670_v16  ;;  %9076 = vsinq.f32 %v1636_v62 }
 0x2d5   : > { %v2233_v55 = vadd.s32 536870912, %v2232_v59  ;;  %v2394_v60 = vand.u32 31, %v2392_v11  ;;  %v11699_v35 = vand.u32 3, %v1849_v4  ;;  %v11701_v1 = vand.u32 3, %v1845_v56 }
 0x2d6   : > { %v2020_v23 = vadd.s32 %v11523_v51, %v11532_v26  ;;  %9078 = vcosq.f32 %v1844_v20  ;;  %v2040_v31 = vsub.s32 4294967266, %v2035_v21  ;;  %v2036_v30 = vsub.s32 32, %v2035_v21 }
 0x2d7   : > { %13566 = vst [vmem:[#allocation35_spill] sm:$0xff] %v11699_v35  ;;  %13567 = vst [vmem:[#allocation77_spill] sm:$0xff] %v11701_v1  ;;  %v11705_v43 = vshrl.u32 %v2233_v55, 30  ;;  %v2395_v29 = vsub.s32 32, %v2394_v60  ;;  %9080 = vsinq.f32 %v1844_v20  ;;  %v11709_v50 = vsel %vm11669_vm0, 0, %v2051_v6  ;;  %v8973_v6 = vld [vmem:[%s13194_s2] sm:$0xff]  }
 0x2d8   : > { %v2591_v62 = vand.u32 2139095040, %v11697_v10  ;;  %v2388_v49 = vor.u32 8388608, %v2387_v5  ;;  %v11716_v51 = vsel %vm699_vm14, %v10597_v57, %v672_v41  ;;  %v2397_v26 = vshll.u32 %v13388_v36, %v2394_v60  ;;  %v8972_v57 = vld [vmem:[%s13195_s3] sm:$0xff]   ;;  %7724 = vmatpush1.bf16.msra.mxu1 %v8973_v6 }
 0x2d9   : > { %v2235_v56 = vshll.u32 %v11705_v43, 30  ;;  %v2398_v61 = vshrl.u32 %v13383_v7, %v2395_v29  ;;  %13568 = vst [vmem:[#allocation78_spill] sm:$0xff] %v11716_v51  ;;  %v2400_v16 = vshll.u32 %v13383_v7, %v2394_v60  ;;  %v2401_v46 = vshrl.u32 %v13384_v28, %v2395_v29  ;;  %7531 = vmatpush1.bf16.msra.mxu0 %v8972_v57 }
 0x2da   : > { %v2404_v47 = vshrl.u32 %v13385_v14, %v2395_v29  ;;  %v2041_v4 = vadd.s32 127, %v2040_v31  ;;  %v2403_v0 = vshll.u32 %v13384_v28, %v2394_v60  ;;  %v2407_v20 = vshrl.u32 %v13386_v37, %v2395_v29  ;;  %7540 = vmatprep.subr.bf16.mxu0 %v13531_v53  ;;  %7733 = vmatprep.subr.bf16.mxu1 %v13531_v53 }
 0x2db   : > { %v11722_v40 = vsub.s32 %v2232_v59, %v2235_v56  ;;  %v2038_v5 = vshrl.u32 %v2020_v23, %v2036_v30  ;;  %v2393_v55 = vshrl.u32 %v2392_v11, 5  ;;  %v2406_v15 = vshll.u32 %v13385_v14, %v2394_v60 }
 0x2dc   : > { %v2592_v41 = vshrl.u32 %v2591_v62, 23  ;;  %v2399_v31 = vor.u32 %v2398_v61, %v2397_v26  ;;  %v2402_v56 = vor.u32 %v2401_v46, %v2400_v16  ;;  %v2405_v17 = vor.u32 %v2404_v47, %v2403_v0 }
 0x2dd   : > { %v2238_v59 = vsub.s32 0, %v11722_v40  ;;  %v11734_v35 = vpop.eup %9070  ;;  %v11737_v33 = vadd.s32 3, %v11709_v50  ;;  %v2408_v1 = vor.u32 %v2407_v20, %v2406_v15  ;;  %v2409_v24 = vshll.u32 %v13386_v37, %v2394_v60 }
 0x2de   : > { %13569 = vst [vmem:[#allocation79_spill] sm:$0xff] %v11734_v35  ;;  %v2410_v11 = vshrl.u32 %v13387_v27, %v2395_v29  ;;  %v11743_v23 = vpop.eup %9072  ;;  %v2037_v30 = vshll.u32 %v11613_v45, %v2035_v21  ;;  %v2042_v62 = vshll.u32 %v2041_v4, 23  ;;  %v11747_v26 = vshll.u32 %v2388_v49, 8 }
 0x2df   : > { %v8383_v61 = vmin.u32 %v2238_v59, %v11722_v40  ;;  %v11749_v16 = vpop.eup %9074  ;;  %v2396_v46 = vshrl.u32 %v13388_v36, %v2395_v29  ;;  %vm2415_vm6 = vcmp.lt.s32.totalorder %v2393_v55, 4  ;;  %v8398_v47 = vadd.s32 4294967169, %v2592_v41 }
 0x2e0   : > { %13570 = vst [vmem:[#allocation80_spill] sm:$0xff] %v11749_v16  ;;  %v2411_v60 = vor.u32 %v2410_v11, %v2409_v24  ;;  %v2039_v0 = vor.u32 %v2038_v5, %v2037_v30  ;;  %vm2412_vm3 = vcmp.lt.s32.totalorder %v2393_v55, 1  ;;  %v2417_v57 = vsel %vm2415_vm6, %v2405_v17, 2102212464 }
 0x2e1   : > { %v2240_v20 = vclz %v8383_v61  ;;  %vm2414_vm5 = vcmp.lt.s32.totalorder %v2393_v55, 3  ;;  %v2420_v6 = vsel %vm2412_vm3, %v2399_v31, %v2402_v56  ;;  %v2421_v15 = vsel %vm2415_vm6, %v2408_v1, 920167782  ;;  %v11752_v21 = vpop.eup %9076 }
 0x2e2   : > { %v2424_v45 = vsel %vm2412_vm3, %v2402_v56, %v2405_v17  ;;  %13571 = vst [vmem:[#allocation81_spill] sm:$0xff] %v11752_v21  ;;  %v2043_v4 = vor.u32 4788187, %v2042_v62  ;;  %v2422_v59 = vsel %vm2414_vm5, %v2405_v17, %v2421_v15  ;;  %v2425_v52 = vsel %vm2415_vm6, %v2411_v60, 1326507024 }
 0x2e3   : > { %v8384_v49 = vadd.s32 4294967294, %v2240_v20  ;;  %v11754_v16 = vpop.eup %9078  ;;  %vm2413_vm8 = vcmp.lt.s32.totalorder %v2393_v55, 2  ;;  %v2416_v24 = vsel %vm2412_vm3, %v2396_v46, %v2399_v31  ;;  %v2418_v29 = vsel %vm2414_vm5, %v2402_v56, %v2417_v57 }
 0x2e4   : > { %13572 = vst [vmem:[#allocation82_spill] sm:$0xff] %v11754_v16  ;;  %v2426_v41 = vsel %vm2414_vm5, %v2408_v1, %v2425_v52  ;;  %v11756_v5 = vpop.eup %9080  ;;  %v2423_v11 = vsel %vm2413_vm8, %v2420_v6, %v2422_v59  ;;  %v2598_v61 = vadd.s32 1, %v8398_v47  ;;  %v13331_v17 = vand.u32 2147483647, %v11697_v10 }
 0x2e5   : > { %13573 = vst [vmem:[#allocation83_spill] sm:$0xff] %v11756_v5  ;;  %vm8385_vm10 = vcmp.lt.s32.totalorder %v8384_v49, 0  ;;  %v2427_v30 = vsel %vm2413_vm8, %v2424_v45, %v2426_v41  ;;  %v2044_v60 = vand.u32 2147483647, %v2043_v4  ;;  %v2228_v31 = vadd.s32 %v11631_v44, %v11646_v13 }
 0x2e6   : > { %v2243_v35 = vsel %vm8385_vm10, 0, %v8384_v49  ;;  %v11761_v62 = vmul.u32.u64.low %v11747_v26, %v2427_v30  ;;  %v11762_v20 = vmul.u32.u64.high %v11747_v26, %v2427_v30, %v11761_v62  ;;  %vm2174_vm9 = vcmp.lt.s32.totalorder %v11425_v63, 0 }
 0x2e7   : > { %v2244_v52 = vsub.s32 32, %v2243_v35  ;;  %v2248_v1 = vsub.s32 4294967266, %v2243_v35  ;;  %v2419_v56 = vsel %vm2413_vm8, %v2416_v24, %v2418_v29  ;;  %vm2599_vm4 = vcmp.gt.s32.totalorder %v2598_v61, 0 }
 0x2e8   : > { %v11770_v46 = vmul.u32.u64.low %v11747_v26, %v2423_v11  ;;  %v11771_v47 = vmul.u32.u64.high %v11747_v26, %v2423_v11, %v11770_v46  ;;  %v2046_v57 = vcvt.s32.f32 %v2039_v0  ;;  %v2600_v45 = vsel %vm2599_vm4, %v2598_v61, 0 }
 0x2e9   : > { %v2246_v6 = vshrl.u32 %v2228_v31, %v2244_v52  ;;  %v2249_v15 = vadd.s32 127, %v2248_v1  ;;  %v2245_v4 = vshll.u32 %v11722_v40, %v2243_v35  ;;  %v2258_v44 = vsub.s32 4, %v11705_v43 }
 0x2ea   : > { %v11778_v13 = vand.u32 8388607, %v13331_v17  ;;  %v2602_v55 = vand.u32 31, %v2600_v45  ;;  %v2047_v49 = vmul.f32 %v2046_v57, %v2044_v60  ;;  %v13574_v59 = vand.u32 2147483647, %v11425_v63  ;;  %v8975_v57 = vld [vmem:[%s13194_s2 + $0x58] sm:$0xff]  }
 0x2eb   : > { %v2250_v0 = vshll.u32 %v2249_v15, 23  ;;  %v2435_v29 = vmul.u32 %v11747_v26, %v2419_v56  ;;  %vm2437_vm2 = vc.u32 %v11762_v20, %v11770_v46  ;;  %v2247_v35 = vor.u32 %v2246_v6, %v2245_v4  ;;  %v8974_v56 = vld [vmem:[%s13195_s3 + $0x58] sm:$0xff]   ;;  %7734 = vmatpush2.bf16.msra.mxu1 %v8975_v57 }
 0x2ec   : > { %vm11782_vm15 = vcmp.le.f32.partialorder %v13574_v59, 0.7853982  ;;  %v2438_v40 = vadd.s32 1, %v11771_v47  ;;  %v11790_v41 = vshrl.u32 %v2600_v45, 5  ;;  %v2603_v11 = vsub.s32 32, %v2602_v55  ;;  %7541 = vmatpush2.bf16.msra.mxu0 %v8974_v56  ;;  %7735 = vmatprep.subr.bf16.mxu1 %v13531_v53 }
 0x2ed   : > { %v2251_v30 = vor.u32 4788187, %v2250_v0  ;;  %v2605_v61 = vshll.u32 %v13388_v36, %v2602_v55  ;;  %v2608_v62 = vshll.u32 %v13383_v7, %v2602_v55  ;;  %v2611_v60 = vshll.u32 %v13384_v28, %v2602_v55  ;;  %7542 = vmatprep.subr.bf16.mxu0 %v13531_v53 }
 0x2ee   : > { %v2439_v31 = vsel %vm2437_vm2, %v2438_v40, %v11771_v47  ;;  %v2606_v26 = vshrl.u32 %v13383_v7, %v2603_v11  ;;  %v2609_v52 = vshrl.u32 %v13384_v28, %v2603_v11  ;;  %v2614_v1 = vshll.u32 %v13385_v14, %v2602_v55 }
 0x2ef   : > { %v2252_v6 = vand.u32 2147483647, %v2251_v30  ;;  %v2440_v15 = vadd.s32 %v2439_v31, %v2435_v29  ;;  %v2612_v45 = vshrl.u32 %v13385_v14, %v2603_v11  ;;  %v2615_v47 = vshrl.u32 %v13386_v37, %v2603_v11 }
 0x2f0   : > { %v2607_v4 = vor.u32 %v2606_v26, %v2605_v61  ;;  %v2610_v59 = vor.u32 %v2609_v52, %v2608_v62  ;;  %v2617_v0 = vshll.u32 %v13386_v37, %v2602_v55  ;;  %v2618_v40 = vshrl.u32 %v13387_v27, %v2603_v11 }
 0x2f1   : > { %v2048_v17 = vxor.u32 2147483648, %v2047_v49  ;;  %v2259_v16 = vsel %vm2174_vm9, %v2258_v44, %v11705_v43  ;;  %v2441_v5 = vadd.s32 536870912, %v2440_v15  ;;  %v2616_v21 = vor.u32 %v2615_v47, %v2614_v1 }
 0x2f2   : > { %v2254_v29 = vcvt.s32.f32 %v2247_v35  ;;  %v2596_v30 = vor.u32 8388608, %v11778_v13  ;;  %v2613_v61 = vor.u32 %v2612_v45, %v2611_v60  ;;  %v2619_v62 = vor.u32 %v2618_v40, %v2617_v0 }
 0x2f3   : > { %v2442_v55 = vshrl.u32 %v2441_v5, 30  ;;  %vm2620_vm13 = vcmp.lt.s32.totalorder %v11790_v41, 1  ;;  %vm2623_vm12 = vcmp.lt.s32.totalorder %v11790_v41, 4  ;;  %v2799_v31 = vand.u32 2139095040, %v11716_v51 }
 0x2f4   : > { %v2255_v43 = vmul.f32 %v2254_v29, %v2252_v6  ;;  %v2261_v44 = vsel %vm11782_vm15, 0, %v2259_v16  ;;  %v2628_v35 = vsel %vm2620_vm13, %v2607_v4, %v2610_v59  ;;  %v2629_v26 = vsel %vm2623_vm12, %v2616_v21, 920167782 }
 0x2f5   : > { %v2049_v13 = vsel %vm1966_vm11, %v2048_v17, %v2047_v49  ;;  %v2443_v60 = vshll.u32 %v2442_v55, 30  ;;  %vm2621_vm7 = vcmp.lt.s32.totalorder %v11790_v41, 2  ;;  %vm2622_vm1 = vcmp.lt.s32.totalorder %v11790_v41, 3 }
 0x2f6   : > { %v2625_v5 = vsel %vm2623_vm12, %v2613_v61, 2102212464  ;;  %v2630_v52 = vsel %vm2622_vm1, %v2613_v61, %v2629_v26  ;;  %v2632_v1 = vsel %vm2620_vm13, %v2610_v59, %v2613_v61  ;;  %v2633_v16 = vsel %vm2623_vm12, %v2619_v62, 1326507024 }
 0x2f7   : > { %vm2382_vm6 = vcmp.lt.s32.totalorder %v11537_v2, 0  ;;  %v11831_v56 = vsub.s32 %v2440_v15, %v2443_v60  ;;  %v2604_v57 = vshrl.u32 %v13388_v36, %v2603_v11  ;;  %v2631_v17 = vsel %vm2621_vm7, %v2628_v35, %v2630_v52 }
 0x2f8   : > { %v2800_v49 = vshrl.u32 %v2799_v31, 23  ;;  %v2052_v6 = vsel %vm11669_vm0, %v11399_v18, %v2049_v13  ;;  %v2256_v45 = vxor.u32 2147483648, %v2255_v43  ;;  %v2634_v47 = vsel %vm2622_vm1, %v2616_v21, %v2633_v16 }
 0x2f9   : > { %v2636_v0 = vshll.u32 %v2596_v30, 8  ;;  %v2446_v40 = vsub.s32 0, %v11831_v56  ;;  %v2624_v15 = vsel %vm2620_vm13, %v2604_v57, %v2607_v4  ;;  %v2626_v11 = vsel %vm2622_vm1, %v2610_v59, %v2625_v5 }
 0x2fa   : > { %v2635_v29 = vsel %vm2621_vm7, %v2632_v1, %v2634_v47  ;;  %v11856_v21 = vand.u32 3, %v11737_v33  ;;  %v11859_v30 = vand.u32 3, %v11709_v50  ;;  %v13579_v4 = vand.u32 2147483647, %v11537_v2 }
 0x2fb   : > { %v11848_v61 = vmul.u32.u64.low %v2636_v0, %v2635_v29  ;;  %v11849_v62 = vmul.u32.u64.high %v2636_v0, %v2635_v29, %v11848_v61  ;;  %v11851_v54 = vmul.u32.u64.low %v2636_v0, %v2631_v17  ;;  %v11852_v31 = vmul.u32.u64.high %v2636_v0, %v2631_v17, %v11851_v54  ;;  %v674_v17 = vpop.permute.xlu1 %673 }
 0x2fc   : > { %13577 = vst [vmem:[#allocation84_spill] sm:$0xff] %v11856_v21  ;;  %13578 = vst [vmem:[#allocation85_spill] sm:$0xff] %v11859_v30  ;;  %vm11863_vm11 = vcmp.le.f32.partialorder %v13579_v4, 0.7853982  ;;  %v8391_v35 = vmin.u32 %v2446_v40, %v11831_v56  ;;  %v8406_v26 = vadd.s32 4294967169, %v2800_v49  ;;  %v2257_v13 = vsel %vm2174_vm9, %v2256_v45, %v2255_v43  ;;  %v8976_v40 = vld [vmem:[%s13195_s3 + $0x50] sm:$0xff]  }
 0x2fd   : > { %v2466_v60 = vsub.s32 4, %v2442_v55  ;;  %v2627_v33 = vsel %vm2621_vm7, %v2624_v15, %v2626_v11  ;;  %v13335_v5 = vand.u32 2147483647, %v11716_v51  ;;  %9082 = vcosq.f32 %v2052_v6  ;;  %7543 = vmatpush2.bf16.msra.mxu0 %v8976_v40 }
 0x2fe   : > { %v2265_v50 = vadd.s32 3, %v2261_v44  ;;  %v2448_v52 = vclz %v8391_v35  ;;  %v2806_v1 = vadd.s32 1, %v8406_v26  ;;  %9084 = vsinq.f32 %v2052_v6  ;;  %7544 = vmatprep.subr.bf16.mxu0 %v13531_v53 }
 0x2ff   : > { %v11873_v16 = vand.u32 3, %v2261_v44  ;;  %vm2645_vm0 = vc.u32 %v11849_v62, %v11851_v54  ;;  %v2646_v57 = vadd.s32 1, %v11852_v31  ;;  %v2260_v41 = vsel %vm11782_vm15, %v11425_v63, %v2257_v13 }
 0x300   : > { %v8392_v43 = vadd.s32 4294967294, %v2448_v52  ;;  %v2643_v49 = vmul.u32 %v2636_v0, %v2627_v33  ;;  %vm2807_vm3 = vcmp.gt.s32.totalorder %v2806_v1, 0  ;;  %v2467_v45 = vsel %vm2382_vm6, %v2466_v60, %v2442_v55  ;;  %v8977_v55 = vld [vmem:[%s13194_s2 + $0x50] sm:$0xff]  }
 0x301   : > { %13582 = vst [vmem:[#allocation86_spill] sm:$0xff] %v11873_v16  ;;  %v2647_v6 = vsel %vm2645_vm0, %v2646_v57, %v11852_v31  ;;  %v2803_v44 = vand.u32 8388607, %v13335_v5  ;;  %v2808_v47 = vsel %vm2807_vm3, %v2806_v1, 0  ;;  %v11891_v0 = vsel %vm699_vm14, %v10572_v34, %v674_v17  ;;  %7736 = vmatpush2.bf16.msra.mxu1 %v8977_v55 }
 0x302   : > { %vm8393_vm5 = vcmp.lt.s32.totalorder %v8392_v43, 0  ;;  %v2648_v15 = vadd.s32 %v2647_v6, %v2643_v49  ;;  %v2810_v24 = vand.u32 31, %v2808_v47  ;;  %13583 = vst [vmem:[#allocation87_spill] sm:$0xff] %v11891_v0  ;;  %9086 = vcosq.f32 %v2260_v41  ;;  %7737 = vmatprep.subr.bf16.mxu1 %v13531_v53 }
 0x303   : > { %v11896_v11 = vand.u32 3, %v2265_v50  ;;  %v2436_v29 = vadd.s32 %v11770_v46, %v11762_v20  ;;  %v2451_v61 = vsel %vm8393_vm5, 0, %v8392_v43  ;;  %9088 = vsinq.f32 %v2260_v41  ;;  %v8978_v20 = vld [vmem:[%s13195_s3 + $0x48] sm:$0xff]  }
 0x304   : > { %v2452_v31 = vsub.s32 32, %v2451_v61  ;;  %v2456_v4 = vsub.s32 4294967266, %v2451_v61  ;;  %v2649_v35 = vadd.s32 536870912, %v2648_v15  ;;  %v11903_v34 = vsel %vm11863_vm11, 0, %v2467_v45  ;;  %v8979_v46 = vld [vmem:[%s13194_s2 + $0x48] sm:$0xff]   ;;  %7545 = vmatpush2.bf16.msra.mxu0 %v8978_v20 }
 0x305   : > { %13584 = vst [vmem:[#allocation88_spill] sm:$0xff] %v11896_v11  ;;  %v2804_v26 = vor.u32 8388608, %v2803_v44  ;;  %v2811_v13 = vsub.s32 32, %v2810_v24  ;;  %v3007_v60 = vand.u32 2139095040, %v11891_v0  ;;  %v11915_v1 = vshrl.u32 %v2808_v47, 5  ;;  %7738 = vmatpush2.bf16.msra.mxu1 %v8979_v46  ;;  %7546 = vmatprep.subr.bf16.mxu0 %v13531_v53 }
 0x306   : > { %v2454_v33 = vshrl.u32 %v2436_v29, %v2452_v31  ;;  %v2457_v50 = vadd.s32 127, %v2456_v4  ;;  %v11913_v52 = vshrl.u32 %v2649_v35, 30  ;;  %v2453_v57 = vshll.u32 %v11831_v56, %v2451_v61  ;;  %7739 = vmatprep.subr.bf16.mxu1 %v13531_v53  ;;  %v8980_v29 = vld [vmem:[%s13195_s3 + $0x40] sm:$0xff]  }
 0x307   : > { %v2814_v17 = vshrl.u32 %v13383_v7, %v2811_v13  ;;  %v2817_v41 = vshrl.u32 %v13384_v28, %v2811_v13  ;;  %v2820_v43 = vshrl.u32 %v13385_v14, %v2811_v13  ;;  %v2813_v6 = vshll.u32 %v13388_v36, %v2810_v24  ;;  %v8981_v61 = vld [vmem:[%s13194_s2 + $0x40] sm:$0xff]  }
 0x308   : > { %v2458_v49 = vshll.u32 %v2457_v50, 23  ;;  %v2651_v45 = vshll.u32 %v11913_v52, 30  ;;  %v2816_v44 = vshll.u32 %v13383_v7, %v2810_v24  ;;  %v2455_v47 = vor.u32 %v2454_v33, %v2453_v57  ;;  %7547 = vmatpush2.bf16.msra.mxu0 %v8980_v29 }
 0x309   : > { %v2819_v56 = vshll.u32 %v13384_v28, %v2810_v24  ;;  %v2822_v40 = vshll.u32 %v13385_v14, %v2810_v24  ;;  %v2823_v55 = vshrl.u32 %v13386_v37, %v2811_v13  ;;  %vm2590_vm8 = vcmp.lt.s32.totalorder %v11697_v10, 0  ;;  %7740 = vmatpush2.bf16.msra.mxu1 %v8981_v61 }
 0x30a   : > { %v2459_v31 = vor.u32 4788187, %v2458_v49  ;;  %v11936_v4 = vsub.s32 %v2648_v15, %v2651_v45  ;;  %v2815_v35 = vor.u32 %v2814_v17, %v2813_v6  ;;  %v2818_v20 = vor.u32 %v2817_v41, %v2816_v44  ;;  %v11938_v46 = vpop.eup %9082 }
 0x30b   : > { %v2821_v33 = vor.u32 %v2820_v43, %v2819_v56  ;;  %v2824_v50 = vor.u32 %v2823_v55, %v2822_v40  ;;  %v2825_v53 = vshll.u32 %v13386_v37, %v2810_v24  ;;  %v2826_v57 = vshrl.u32 %v13387_v27, %v2811_v13  ;;  %v11942_v5 = vpop.eup %9084 }
 0x30c   : > { %v11945_v11 = vadd.s32 3, %v11903_v34  ;;  %v2654_v49 = vsub.s32 0, %v11936_v4  ;;  %v11948_v15 = vshll.u32 %v2804_v26, 8  ;;  %v2460_v41 = vand.u32 2147483647, %v2459_v31  ;;  %v676_v26 = vpop.permute.xlu1 %675 }
 0x30d   : > { %v13585_v43 = vand.u32 2147483647, %v11697_v10  ;;  %v2674_v45 = vsub.s32 4, %v11913_v52  ;;  %v2827_v6 = vor.u32 %v2826_v57, %v2825_v53  ;;  %v3008_v44 = vshrl.u32 %v3007_v60, 23 }
 0x30e   : > { %v2462_v56 = vcvt.s32.f32 %v2455_v47  ;;  %v8399_v40 = vmin.u32 %v2654_v49, %v11936_v4  ;;  %vm2828_vm9 = vcmp.lt.s32.totalorder %v11915_v1, 1  ;;  %vm2831_vm4 = vcmp.lt.s32.totalorder %v11915_v1, 4 }
 0x30f   : > { %vm11953_vm10 = vcmp.le.f32.partialorder %v13585_v43, 0.7853982  ;;  %vm2830_vm15 = vcmp.lt.s32.totalorder %v11915_v1, 3  ;;  %v2833_v55 = vsel %vm2831_vm4, %v2821_v33, 2102212464  ;;  %v2836_v29 = vsel %vm2828_vm9, %v2815_v35, %v2818_v20  ;;  %v11964_v31 = vpop.eup %9086 }
 0x310   : > { %v2837_v61 = vsel %vm2831_vm4, %v2824_v50, 920167782  ;;  %13588 = vst [vmem:[#allocation89_spill] sm:$0xff] %v11964_v31  ;;  %v2656_v43 = vclz %v8399_v40  ;;  %v2812_v60 = vshrl.u32 %v13388_v36, %v2811_v13  ;;  %vm2829_vm2 = vcmp.lt.s32.totalorder %v11915_v1, 2  ;;  %v11970_v53 = vpop.eup %9088 }
 0x311   : > { %v2838_v47 = vsel %vm2830_vm15, %v2821_v33, %v2837_v61  ;;  %13589 = vst [vmem:[#allocation90_spill] sm:$0xff] %v11970_v53  ;;  %v2463_v57 = vmul.f32 %v2462_v56, %v2460_v41  ;;  %v2840_v17 = vsel %vm2828_vm9, %v2818_v20, %v2821_v33  ;;  %v2841_v21 = vsel %vm2831_vm4, %v2827_v6, 1326507024 }
 0x312   : > { %v2839_v49 = vsel %vm2829_vm2, %v2836_v29, %v2838_v47  ;;  %v8400_v16 = vadd.s32 4294967294, %v2656_v43  ;;  %v2832_v40 = vsel %vm2828_vm9, %v2812_v60, %v2815_v35  ;;  %v2834_v13 = vsel %vm2830_vm15, %v2818_v20, %v2833_v55  ;;  %v678_v20 = vpop.permute.xlu1 %677 }
 0x313   : > { %v2842_v61 = vsel %vm2830_vm15, %v2824_v50, %v2841_v21  ;;  %v2675_v41 = vsel %vm2590_vm8, %v2674_v45, %v11913_v52  ;;  %v11988_v33 = vmul.u32.u64.low %v11948_v15, %v2839_v49  ;;  %v11989_v6 = vmul.u32.u64.high %v11948_v15, %v2839_v49, %v11988_v33 }
 0x314   : > { %v2843_v56 = vsel %vm2829_vm2, %v2840_v17, %v2842_v61  ;;  %vm8401_vm13 = vcmp.lt.s32.totalorder %v8400_v16, 0  ;;  %v11998_v21 = vsel %vm699_vm14, %v10714_v19, %v676_v26  ;;  %v2464_v50 = vxor.u32 2147483648, %v2463_v57 }
 0x315   : > { %v11993_v35 = vmul.u32.u64.low %v11948_v15, %v2843_v56  ;;  %v11994_v29 = vmul.u32.u64.high %v11948_v15, %v2843_v56, %v11993_v35  ;;  %13590 = vst [vmem:[#allocation91_spill] sm:$0xff] %v11998_v21  ;;  %v2659_v52 = vsel %vm8401_vm13, 0, %v8400_v16  ;;  %v2835_v17 = vsel %vm2829_vm2, %v2832_v40, %v2834_v13 }
 0x316   : > { %v8414_v45 = vadd.s32 4294967169, %v3008_v44  ;;  %v12003_v55 = vand.u32 3, %v11903_v34  ;;  %v2660_v43 = vsub.s32 32, %v2659_v52  ;;  %v2664_v60 = vsub.s32 4294967266, %v2659_v52  ;;  %v445_v40 = vpop.permute.xlu1 %444 }
 0x317   : > { %v2677_v47 = vsel %vm11953_vm10, 0, %v2675_v41  ;;  %v2644_v49 = vadd.s32 %v11851_v54, %v11849_v62  ;;  %v2854_v19 = vadd.s32 1, %v11989_v6  ;;  %v13592_v26 = vand.u32 2147483647, %v11891_v0 }
 0x318   : > { %13591 = vst [vmem:[#allocation92_spill] sm:$0xff] %v12003_v55  ;;  %v3014_v61 = vadd.s32 1, %v8414_v45  ;;  %v2665_v1 = vadd.s32 127, %v2664_v60  ;;  %v2851_v44 = vmul.u32 %v11948_v15, %v2835_v17  ;;  %vm2853_vm12 = vc.u32 %v11994_v29, %v11988_v33 }
 0x319   : > { %v3011_v16 = vand.u32 8388607, %v13592_v26  ;;  %v13339_v34 = vand.u32 2147483647, %v11998_v21  ;;  %v2465_v13 = vsel %vm2382_vm6, %v2464_v50, %v2463_v57  ;;  %v2681_v41 = vadd.s32 3, %v2677_v47 }
 0x31a   : > { %v2855_v62 = vsel %vm2853_vm12, %v2854_v19, %v11989_v6  ;;  %vm3015_vm7 = vcmp.gt.s32.totalorder %v3014_v61, 0  ;;  %v2662_v54 = vshrl.u32 %v2644_v49, %v2660_v43  ;;  %v3215_v45 = vand.u32 2139095040, %v11998_v21 }
 0x31b   : > { %v2856_v56 = vadd.s32 %v2855_v62, %v2851_v44  ;;  %v3016_v35 = vsel %vm3015_vm7, %v3014_v61, 0  ;;  %v12021_v15 = vand.u32 3, %v11945_v11  ;;  %v12025_v60 = vsel %vm699_vm14, %v10578_v39, %v678_v20 }
 0x31c   : > { %v3018_v17 = vand.u32 31, %v3016_v35  ;;  %v12028_v26 = vmul.f32 %v9368_v22, %v445_v40  ;;  %v2661_v57 = vshll.u32 %v11936_v4, %v2659_v52  ;;  %v2666_v6 = vshll.u32 %v2665_v1, 23 }
 0x31d   : > { %13593 = vst [vmem:[#allocation93_spill] sm:$0xff] %v12021_v15  ;;  %v2857_v50 = vadd.s32 536870912, %v2856_v56  ;;  %v3012_v43 = vor.u32 8388608, %v3011_v16  ;;  %v12034_v49 = vsel %vm11863_vm11, %v11537_v2, %v2465_v13  ;;  %v12036_v11 = vand.u32 3, %v2681_v41 }
 0x31e   : > { %v12038_v19 = vand.u32 3, %v2677_v47  ;;  %v3019_v61 = vsub.s32 32, %v3018_v17  ;;  %v2663_v39 = vor.u32 %v2662_v54, %v2661_v57  ;;  %v3216_v22 = vshrl.u32 %v3215_v45, 23 }
 0x31f   : > { %13594 = vst [vmem:[#allocation94_spill] sm:$0xff] %v12036_v11  ;;  %v12040_v20 = vshrl.u32 %v2857_v50, 30  ;;  %v12044_v4 = vand.u32 8388607, %v13339_v34  ;;  %v3017_v52 = vshrl.u32 %v3016_v35, 5  ;;  %v3027_v40 = vshll.u32 %v13384_v28, %v3018_v17 }
 0x320   : > { %13595 = vst [vmem:[#allocation95_spill] sm:$0xff] %v12038_v19  ;;  %v3022_v16 = vshrl.u32 %v13383_v7, %v3019_v61  ;;  %v3025_v59 = vshrl.u32 %v13384_v28, %v3019_v61  ;;  %v3028_v1 = vshrl.u32 %v13385_v14, %v3019_v61  ;;  %v2667_v44 = vor.u32 4788187, %v2666_v6 }
 0x321   : > { %v2859_v47 = vshll.u32 %v12040_v20, 30  ;;  %v3031_v13 = vshrl.u32 %v13386_v37, %v3019_v61  ;;  %v3021_v41 = vshll.u32 %v13388_v36, %v3018_v17  ;;  %v3024_v62 = vshll.u32 %v13383_v7, %v3018_v17 }
 0x322   : > { %v3030_v54 = vshll.u32 %v13385_v14, %v3018_v17  ;;  %v3034_v35 = vshrl.u32 %v13387_v27, %v3019_v61  ;;  %9090 = vcosq.f32 %v12034_v49  ;;  %v3029_v57 = vor.u32 %v3028_v1, %v3027_v40 }
 0x323   : > { %v12057_v45 = vsub.s32 %v2856_v56, %v2859_v47  ;;  %v12059_v6 = vshll.u32 %v3012_v43, 8  ;;  %v3023_v50 = vor.u32 %v3022_v16, %v3021_v41  ;;  %v3026_v34 = vor.u32 %v3025_v59, %v3024_v62 }
 0x324   : > { %v3032_v11 = vor.u32 %v3031_v13, %v3030_v54  ;;  %v3033_v15 = vshll.u32 %v13386_v37, %v3018_v17  ;;  %v2670_v19 = vcvt.s32.f32 %v2663_v39  ;;  %v8422_v2 = vadd.s32 4294967169, %v3216_v22 }
 0x325   : > { %v2862_v55 = vsub.s32 0, %v12057_v45  ;;  %v3220_v30 = vor.u32 8388608, %v12044_v4  ;;  %v2668_v31 = vand.u32 2147483647, %v2667_v44  ;;  %v3020_v63 = vshrl.u32 %v13388_v36, %v3019_v61 }
 0x326   : > { %v3035_v53 = vor.u32 %v3034_v35, %v3033_v15  ;;  %vm3039_vm1 = vcmp.lt.s32.totalorder %v3017_v52, 4  ;;  %vm2798_vm6 = vcmp.lt.s32.totalorder %v11716_v51, 0  ;;  %vm3036_vm11 = vcmp.lt.s32.totalorder %v3017_v52, 1 }
 0x327   : > { %v8407_v56 = vmin.u32 %v2862_v55, %v12057_v45  ;;  %vm3037_vm0 = vcmp.lt.s32.totalorder %v3017_v52, 2  ;;  %v3041_v43 = vsel %vm3039_vm1, %v3029_v57, 2102212464  ;;  %vm3038_vm3 = vcmp.lt.s32.totalorder %v3017_v52, 3 }
 0x328   : > { %v3040_v17 = vsel %vm3036_vm11, %v3020_v63, %v3023_v50  ;;  %v3044_v39 = vsel %vm3036_vm11, %v3023_v50, %v3026_v34  ;;  %v3045_v22 = vsel %vm3039_vm1, %v3032_v11, 920167782  ;;  %v3042_v4 = vsel %vm3038_vm3, %v3026_v34, %v3041_v43 }
 0x329   : > { %v2864_v16 = vclz %v8407_v56  ;;  %v3046_v59 = vsel %vm3038_vm3, %v3029_v57, %v3045_v22  ;;  %v3048_v1 = vsel %vm3036_vm11, %v3026_v34, %v3029_v57  ;;  %v2671_v61 = vmul.f32 %v2670_v19, %v2668_v31  ;;  %v609_v57 = vpop.permute.xlu1 %608 }
 0x32a   : > { %v3047_v15 = vsel %vm3037_vm0, %v3044_v39, %v3046_v59  ;;  %v3049_v44 = vsel %vm3039_vm1, %v3035_v53, 1326507024  ;;  %v3222_v47 = vadd.s32 1, %v8422_v2  ;;  %v2882_v63 = vsub.s32 4, %v12040_v20 }
 0x32b   : > { %v8408_v55 = vadd.s32 4294967294, %v2864_v16  ;;  %v3050_v40 = vsel %vm3038_vm3, %v3032_v11, %v3049_v44  ;;  %v12072_v13 = vmul.u32.u64.low %v12059_v6, %v3047_v15  ;;  %v12073_v41 = vmul.u32.u64.high %v12059_v6, %v3047_v15, %v12072_v13 }
 0x32c   : > { %v3043_v62 = vsel %vm3037_vm0, %v3040_v17, %v3042_v4  ;;  %v3051_v54 = vsel %vm3037_vm0, %v3048_v1, %v3050_v40  ;;  %vm3223_vm5 = vcmp.gt.s32.totalorder %v3222_v47, 0  ;;  %9092 = vsinq.f32 %v12034_v49 }
 0x32d   : > { %vm8409_vm9 = vcmp.lt.s32.totalorder %v8408_v55, 0  ;;  %v12080_v31 = vmul.u32.u64.low %v12059_v6, %v3051_v54  ;;  %v12081_v34 = vmul.u32.u64.high %v12059_v6, %v3051_v54, %v12080_v31  ;;  %v3224_v2 = vsel %vm3223_vm5, %v3222_v47, 0 }
 0x32e   : > { %v2852_v53 = vadd.s32 %v11988_v33, %v11994_v29  ;;  %v2867_v11 = vsel %vm8409_vm9, 0, %v8408_v55  ;;  %v3226_v19 = vand.u32 31, %v3224_v2  ;;  %v13596_v35 = vand.u32 2147483647, %v11716_v51 }
 0x32f   : > { %v2868_v52 = vsub.s32 32, %v2867_v11  ;;  %v2872_v50 = vsub.s32 4294967266, %v2867_v11  ;;  %v3062_v56 = vadd.s32 1, %v12073_v41  ;;  %v12093_v43 = vshll.u32 %v3220_v30, 8  ;;  %v12095_v17 = vpop.eup %9090 }
 0x330   : > { %vm12088_vm4 = vcmp.le.f32.partialorder %v13596_v35, 0.7853982  ;;  %v2672_v49 = vxor.u32 2147483648, %v2671_v61  ;;  %v2883_v33 = vsel %vm2798_vm6, %v2882_v63, %v12040_v20  ;;  %v3059_v29 = vmul.u32 %v12059_v6, %v3043_v62 }
 0x331   : > { %v3227_v39 = vsub.s32 32, %v3226_v19  ;;  %v2869_v22 = vshll.u32 %v12057_v45, %v2867_v11  ;;  %v2870_v16 = vshrl.u32 %v2852_v53, %v2868_v52  ;;  %v2873_v4 = vadd.s32 127, %v2872_v50 }
 0x332   : > { %vm3061_vm15 = vc.u32 %v12081_v34, %v12072_v13  ;;  %v3229_v59 = vshll.u32 %v13388_v36, %v3226_v19  ;;  %vm3006_vm2 = vcmp.lt.s32.totalorder %v11891_v0, 0  ;;  %v12110_v45 = vshrl.u32 %v3224_v2, 5 }
 0x333   : > { %v3063_v30 = vsel %vm3061_vm15, %v3062_v56, %v12073_v41  ;;  %v3230_v1 = vshrl.u32 %v13383_v7, %v3227_v39  ;;  %v3233_v15 = vshrl.u32 %v13384_v28, %v3227_v39  ;;  %v2871_v44 = vor.u32 %v2870_v16, %v2869_v22 }
 0x334   : > { %v2874_v20 = vshll.u32 %v2873_v4, 23  ;;  %v3064_v47 = vadd.s32 %v3063_v30, %v3059_v29  ;;  %v3236_v6 = vshrl.u32 %v13385_v14, %v3227_v39  ;;  %v3232_v55 = vshll.u32 %v13383_v7, %v3226_v19 }
 0x335   : > { %v3238_v40 = vshll.u32 %v13385_v14, %v3226_v19  ;;  %v3239_v41 = vshrl.u32 %v13386_v37, %v3227_v39  ;;  %v3231_v54 = vor.u32 %v3230_v1, %v3229_v59  ;;  %v3235_v31 = vshll.u32 %v13384_v28, %v3226_v19 }
 0x336   : > { %v2875_v63 = vor.u32 4788187, %v2874_v20  ;;  %v3065_v62 = vadd.s32 536870912, %v3064_v47  ;;  %v3234_v53 = vor.u32 %v3233_v15, %v3232_v55  ;;  %v3241_v35 = vshll.u32 %v13386_v37, %v3226_v19 }
 0x337   : > { %v3240_v11 = vor.u32 %v3239_v41, %v3238_v40  ;;  %v3242_v52 = vshrl.u32 %v13387_v27, %v3227_v39  ;;  %v2878_v2 = vcvt.s32.f32 %v2871_v44  ;;  %v13599_v56 = vand.u32 2147483647, %v11891_v0 }
 0x338   : > { %v2876_v50 = vand.u32 2147483647, %v2875_v63  ;;  %v3066_v22 = vshrl.u32 %v3065_v62, 30  ;;  %v3237_v16 = vor.u32 %v3236_v6, %v3235_v31  ;;  %v2673_v4 = vsel %vm2590_vm8, %v2672_v49, %v2671_v61 }
 0x339   : > { %vm12120_vm13 = vcmp.le.f32.partialorder %v13599_v56, 0.7853982  ;;  %v2885_v30 = vsel %vm12088_vm4, 0, %v2883_v33  ;;  %v3243_v59 = vor.u32 %v3242_v52, %v3241_v35  ;;  %v13351_v19 = vand.u32 2147483647, %v12025_v60  ;;  %v12132_v40 = vpop.eup %9092 }
 0x33a   : > { %v2879_v1 = vmul.f32 %v2878_v2, %v2876_v50  ;;  %v3067_v15 = vshll.u32 %v3066_v22, 30  ;;  %v3090_v44 = vsub.s32 4, %v3066_v22  ;;  %vm3247_vm12 = vcmp.lt.s32.totalorder %v12110_v45, 4 }
 0x33b   : > { %vm3244_vm7 = vcmp.lt.s32.totalorder %v12110_v45, 1  ;;  %v3253_v20 = vsel %vm3247_vm12, %v3240_v11, 920167782  ;;  %v3257_v55 = vsel %vm3247_vm12, %v3243_v59, 1326507024  ;;  %v3423_v6 = vand.u32 2139095040, %v12025_v60 }
 0x33c   : > { %v12134_v61 = vsub.s32 %v3064_v47, %v3067_v15  ;;  %vm3246_vm8 = vcmp.lt.s32.totalorder %v12110_v45, 3  ;;  %v3252_v49 = vsel %vm3244_vm7, %v3231_v54, %v3234_v53  ;;  %v3256_v33 = vsel %vm3244_vm7, %v3234_v53, %v3237_v16 }
 0x33d   : > { %v3228_v41 = vshrl.u32 %v13388_v36, %v3227_v39  ;;  %v3249_v63 = vsel %vm3247_vm12, %v3237_v16, 2102212464  ;;  %v3254_v62 = vsel %vm3246_vm8, %v3237_v16, %v3253_v20  ;;  %v3258_v31 = vsel %vm3246_vm8, %v3240_v11, %v3257_v55 }
 0x33e   : > { %v2880_v35 = vxor.u32 2147483648, %v2879_v1  ;;  %v3070_v47 = vsub.s32 0, %v12134_v61  ;;  %v3091_v52 = vsel %vm3006_vm2, %v3090_v44, %v3066_v22  ;;  %vm3245_vm1 = vcmp.lt.s32.totalorder %v12110_v45, 2 }
 0x33f   : > { %v2889_v50 = vadd.s32 3, %v2885_v30  ;;  %v3255_v2 = vsel %vm3245_vm1, %v3252_v49, %v3254_v62  ;;  %v3259_v39 = vsel %vm3245_vm1, %v3256_v33, %v3258_v31  ;;  %v3424_v56 = vshrl.u32 %v3423_v6, 23 }
 0x340   : > { %v2676_v11 = vsel %vm11953_vm10, %v11697_v10, %v2673_v4  ;;  %v8415_v16 = vmin.u32 %v3070_v47, %v12134_v61  ;;  %v3248_v59 = vsel %vm3244_vm7, %v3228_v41, %v3231_v54  ;;  %v3250_v22 = vsel %vm3246_vm8, %v3234_v53, %v3249_v63 }
 0x341   : > { %v3093_v15 = vsel %vm12120_vm13, 0, %v3091_v52  ;;  %v12165_v44 = vmul.u32.u64.low %v12093_v43, %v3259_v39  ;;  %v12166_v20 = vmul.u32.u64.high %v12093_v43, %v3259_v39, %v12165_v44  ;;  %v8430_v55 = vadd.s32 4294967169, %v3424_v56 }
 0x342   : > { %v2881_v24 = vsel %vm2798_vm6, %v2880_v35, %v2879_v1  ;;  %v3072_v4 = vclz %v8415_v16  ;;  %v12171_v6 = vmul.u32.u64.low %v12093_v43, %v3255_v2  ;;  %v12172_v49 = vmul.u32.u64.high %v12093_v43, %v3255_v2, %v12171_v6 }
 0x343   : > { %9094 = vcosq.f32 %v2676_v11  ;;  %v12175_v54 = vand.u32 3, %v2889_v50  ;;  %v12177_v53 = vand.u32 3, %v2885_v30  ;;  %v3430_v33 = vadd.s32 1, %v8430_v55 }
 0x344   : > { %9096 = vsinq.f32 %v2676_v11  ;;  %v3060_v41 = vadd.s32 %v12072_v13, %v12081_v34  ;;  %v8416_v63 = vadd.s32 4294967294, %v3072_v4  ;;  %v3251_v1 = vsel %vm3245_vm1, %v3248_v59, %v3250_v22 }
 0x345   : > { %13602 = vst [vmem:[#allocation96_spill] sm:$0xff] %v12175_v54  ;;  %13603 = vst [vmem:[#allocation97_spill] sm:$0xff] %v12177_v53  ;;  %v2884_v62 = vsel %vm12088_vm4, %v11716_v51, %v2881_v24  ;;  %v3097_v31 = vadd.s32 3, %v3093_v15  ;;  %vm3269_vm10 = vc.u32 %v12166_v20, %v12171_v6  ;;  %vm3431_vm6 = vcmp.gt.s32.totalorder %v3430_v33, 0 }
 0x346   : > { %vm8417_vm11 = vcmp.lt.s32.totalorder %v8416_v63, 0  ;;  %v3270_v30 = vadd.s32 1, %v12172_v49  ;;  %v3427_v35 = vand.u32 8388607, %v13351_v19  ;;  %v3432_v13 = vsel %vm3431_vm6, %v3430_v33, 0 }
 0x347   : > { %v3075_v34 = vsel %vm8417_vm11, 0, %v8416_v63  ;;  %v12191_v47 = vand.u32 3, %v3093_v15  ;;  %v3267_v45 = vmul.u32 %v12093_v43, %v3251_v1  ;;  %v3434_v52 = vand.u32 31, %v3432_v13 }
 0x348   : > { %9098 = vcosq.f32 %v2884_v62  ;;  %v3076_v50 = vsub.s32 32, %v3075_v34  ;;  %v3080_v2 = vsub.s32 4294967266, %v3075_v34  ;;  %v3271_v39 = vsel %vm3269_vm10, %v3270_v30, %v12172_v49 }
 0x349   : > { %13604 = vst [vmem:[#allocation98_spill] sm:$0xff] %v12191_v47  ;;  %9100 = vsinq.f32 %v2884_v62  ;;  %v12195_v56 = vand.u32 3, %v3097_v31  ;;  %v3272_v11 = vadd.s32 %v3271_v39, %v3267_v45  ;;  %v3435_v16 = vsub.s32 32, %v3434_v52  ;;  %v680_v45 = vpop.permute.xlu1 %679 }
 0x34a   : > { %v3078_v59 = vshrl.u32 %v3060_v41, %v3076_v50  ;;  %v3081_v22 = vadd.s32 127, %v3080_v2  ;;  %v3428_v44 = vor.u32 8388608, %v3427_v35  ;;  %v12198_v15 = vmul.f32 %v9373_v25, %v609_v57 }
 0x34b   : > { %13605 = vst [vmem:[#allocation99_spill] sm:$0xff] %v12195_v56  ;;  %v3077_v43 = vshll.u32 %v12134_v61, %v3075_v34  ;;  %vm3214_vm0 = vcmp.lt.s32.totalorder %v11998_v21, 0  ;;  %v3273_v55 = vadd.s32 536870912, %v3272_v11  ;;  %v3438_v24 = vshrl.u32 %v13383_v7, %v3435_v16 }
 0x34c   : > { %v3441_v4 = vshrl.u32 %v13384_v28, %v3435_v16  ;;  %v3082_v49 = vshll.u32 %v3081_v22, 23  ;;  %v3437_v33 = vshll.u32 %v13388_v36, %v3434_v52  ;;  %v3444_v63 = vshrl.u32 %v13385_v14, %v3435_v16 }
 0x34d   : > { %v3447_v41 = vshrl.u32 %v13386_v37, %v3435_v16  ;;  %v3079_v1 = vor.u32 %v3078_v59, %v3077_v43  ;;  %v3274_v62 = vshrl.u32 %v3273_v55, 30  ;;  %v12207_v25 = vshrl.u32 %v3432_v13, 5 }
 0x34e   : > { %v3440_v61 = vshll.u32 %v13383_v7, %v3434_v52  ;;  %v3083_v31 = vor.u32 4788187, %v3082_v49  ;;  %v3439_v30 = vor.u32 %v3438_v24, %v3437_v33  ;;  %v3443_v35 = vshll.u32 %v13384_v28, %v3434_v52 }
 0x34f   : > { %v3446_v34 = vshll.u32 %v13385_v14, %v3434_v52  ;;  %v13606_v57 = vand.u32 2147483647, %v11998_v21  ;;  %v3275_v2 = vshll.u32 %v3274_v62, 30  ;;  %v3449_v13 = vshll.u32 %v13386_v37, %v3434_v52 }
 0x350   : > { %v3442_v39 = vor.u32 %v3441_v4, %v3440_v61  ;;  %v3450_v59 = vshrl.u32 %v13387_v27, %v3435_v16  ;;  %v12220_v22 = vpop.eup %9094  ;;  %v3084_v43 = vand.u32 2147483647, %v3083_v31  ;;  %v3298_v55 = vsub.s32 4, %v3274_v62 }
 0x351   : > { %vm12214_vm3 = vcmp.le.f32.partialorder %v13606_v57, 0.7853982  ;;  %13609 = vst [vmem:[#allocation100_spill] sm:$0xff] %v12220_v22  ;;  %v3445_v24 = vor.u32 %v3444_v63, %v3443_v35  ;;  %v3448_v49 = vor.u32 %v3447_v41, %v3446_v34  ;;  %v12222_v33 = vpop.eup %9096  ;;  %v3086_v19 = vcvt.s32.f32 %v3079_v1 }
 0x352   : > { %v12224_v56 = vsub.s32 %v3272_v11, %v3275_v2  ;;  %v3451_v57 = vor.u32 %v3450_v59, %v3449_v13  ;;  %v12228_v54 = vsel %vm699_vm14, %v10796_v32, %v680_v45  ;;  %v3436_v52 = vshrl.u32 %v13388_v36, %v3435_v16  ;;  %v682_v59 = vpop.permute.xlu1 %681 }
 0x353   : > { %vm3452_vm5 = vcmp.lt.s32.totalorder %v12207_v25, 1  ;;  %vm3453_vm9 = vcmp.lt.s32.totalorder %v12207_v25, 2  ;;  %v3468_v4 = vshll.u32 %v3428_v44, 8  ;;  %v3087_v61 = vmul.f32 %v3086_v19, %v3084_v43 }
 0x354   : > { %v3278_v63 = vsub.s32 0, %v12224_v56  ;;  %vm3455_vm4 = vcmp.lt.s32.totalorder %v12207_v25, 4  ;;  %v3460_v11 = vsel %vm3452_vm5, %v3439_v30, %v3442_v39  ;;  %v3299_v41 = vsel %vm3214_vm0, %v3298_v55, %v3274_v62 }
 0x355   : > { %vm3454_vm15 = vcmp.lt.s32.totalorder %v12207_v25, 3  ;;  %v3461_v32 = vsel %vm3455_vm4, %v3448_v49, 920167782  ;;  %v3464_v16 = vsel %vm3452_vm5, %v3442_v39, %v3445_v24  ;;  %v12242_v1 = vpop.eup %9098  ;;  %v3457_v44 = vsel %vm3455_vm4, %v3445_v24, 2102212464 }
 0x356   : > { %13610 = vst [vmem:[#allocation101_spill] sm:$0xff] %v12242_v1  ;;  %v8423_v19 = vmin.u32 %v3278_v63, %v12224_v56  ;;  %v3462_v31 = vsel %vm3454_vm15, %v3445_v24, %v3461_v32  ;;  %v3465_v35 = vsel %vm3455_vm4, %v3451_v57, 1326507024  ;;  %v12247_v34 = vpop.eup %9100  ;;  %v3456_v62 = vsel %vm3452_vm5, %v3436_v52, %v3439_v30 }
 0x357   : > { %13611 = vst [vmem:[#allocation102_spill] sm:$0xff] %v12247_v34  ;;  %v3463_v45 = vsel %vm3453_vm9, %v3460_v11, %v3462_v31  ;;  %v3466_v2 = vsel %vm3454_vm15, %v3448_v49, %v3465_v35  ;;  %v13354_v13 = vand.u32 2147483647, %v12198_v15  ;;  %v3088_v43 = vxor.u32 2147483648, %v3087_v61 }
 0x358   : > { %v3280_v55 = vclz %v8423_v19  ;;  %v3467_v24 = vsel %vm3453_vm9, %v3464_v16, %v3466_v2  ;;  %v3735_v57 = vand.u32 2139095040, %v12198_v15  ;;  %v3301_v63 = vsel %vm12214_vm3, 0, %v3299_v41 }
 0x359   : > { %v3458_v30 = vsel %vm3454_vm15, %v3442_v39, %v3457_v44  ;;  %v12263_v52 = vmul.u32.u64.low %v3468_v4, %v3467_v24  ;;  %v12264_v11 = vmul.u32.u64.high %v3468_v4, %v3467_v24, %v12263_v52  ;;  %v12271_v19 = vsel %vm699_vm14, %v12028_v26, %v682_v59 }
 0x35a   : > { %v8424_v49 = vadd.s32 4294967294, %v3280_v55  ;;  %v12266_v32 = vmul.u32.u64.low %v3468_v4, %v3463_v45  ;;  %v12267_v31 = vmul.u32.u64.high %v3468_v4, %v3463_v45, %v12266_v32  ;;  %v3268_v16 = vadd.s32 %v12171_v6, %v12166_v20 }
 0x35b   : > { %v3736_v35 = vshrl.u32 %v3735_v57, 23  ;;  %v3739_v41 = vand.u32 8388607, %v13354_v13  ;;  %v3089_v44 = vsel %vm3006_vm2, %v3088_v43, %v3087_v61  ;;  %v3305_v2 = vadd.s32 3, %v3301_v63 }
 0x35c   : > { %vm8425_vm12 = vcmp.lt.s32.totalorder %v8424_v49, 0  ;;  %v3459_v45 = vsel %vm3453_vm9, %v3456_v62, %v3458_v30  ;;  %vm3477_vm7 = vc.u32 %v12264_v11, %v12266_v32  ;;  %v3631_v20 = vand.u32 2139095040, %v12228_v54 }
 0x35d   : > { %v3283_v55 = vsel %vm8425_vm12, 0, %v8424_v49  ;;  %v8442_v26 = vadd.s32 4294967169, %v3736_v35  ;;  %v12284_v24 = vand.u32 3, %v3301_v63  ;;  %v3478_v57 = vadd.s32 1, %v12267_v31 }
 0x35e   : > { %v3284_v6 = vsub.s32 32, %v3283_v55  ;;  %v3288_v59 = vsub.s32 4294967266, %v3283_v55  ;;  %v3092_v61 = vsel %vm12120_vm13, %v11891_v0, %v3089_v44  ;;  %v3475_v43 = vmul.u32 %v3468_v4, %v3459_v45 }
 0x35f   : > { %13612 = vst [vmem:[#allocation103_spill] sm:$0xff] %v12284_v24  ;;  %v3740_v52 = vor.u32 8388608, %v3739_v41  ;;  %v3742_v25 = vadd.s32 1, %v8442_v26  ;;  %v3285_v62 = vshll.u32 %v12224_v56, %v3283_v55  ;;  %v3479_v35 = vsel %vm3477_vm7, %v3478_v57, %v12267_v31 }
 0x360   : > { %v3286_v30 = vshrl.u32 %v3268_v16, %v3284_v6  ;;  %v3289_v49 = vadd.s32 127, %v3288_v59  ;;  %v12292_v13 = vand.u32 3, %v3305_v2  ;;  %vm3422_vm2 = vcmp.lt.s32.totalorder %v12025_v60, 0 }
 0x361   : > { %v3480_v63 = vadd.s32 %v3479_v35, %v3475_v43  ;;  %vm3743_vm8 = vcmp.gt.s32.totalorder %v3742_v25, 0  ;;  %v3632_v39 = vshrl.u32 %v3631_v20, 23  ;;  %9102 = vcosq.f32 %v3092_v61 }
 0x362   : > { %13613 = vst [vmem:[#allocation104_spill] sm:$0xff] %v12292_v13  ;;  %v3287_v24 = vor.u32 %v3286_v30, %v3285_v62  ;;  %v3290_v29 = vshll.u32 %v3289_v49, 23  ;;  %v3744_v44 = vsel %vm3743_vm8, %v3742_v25, 0  ;;  %9104 = vsinq.f32 %v3092_v61 }
 0x363   : > { %v3481_v4 = vadd.s32 536870912, %v3480_v63  ;;  %v3746_v41 = vand.u32 31, %v3744_v44  ;;  %v13614_v56 = vand.u32 2147483647, %v12228_v54  ;;  %v13615_v31 = vand.u32 2147483647, %v12025_v60 }
 0x364   : > { %v3291_v45 = vor.u32 4788187, %v3290_v29  ;;  %v12306_v55 = vadd.s32 %v12266_v32, %v12264_v11  ;;  %v12308_v26 = vshll.u32 %v3740_v52, 8  ;;  %v8438_v57 = vadd.s32 4294967169, %v3632_v39 }
 0x365   : > { %v12297_v16 = vand.u32 8388607, %v13614_v56  ;;  %vm12301_vm13 = vcmp.le.f32.partialorder %v13615_v31, 0.7853982  ;;  %v3482_v6 = vshrl.u32 %v3481_v4, 30  ;;  %v3747_v59 = vsub.s32 32, %v3746_v41 }
 0x366   : > { %v3839_v61 = vand.u32 2139095040, %v12271_v19  ;;  %v3292_v43 = vand.u32 2147483647, %v3291_v45  ;;  %v3294_v25 = vcvt.s32.f32 %v3287_v24  ;;  %v3745_v62 = vshrl.u32 %v3744_v44, 5 }
 0x367   : > { %v3749_v30 = vshll.u32 %v13388_v36, %v3746_v41  ;;  %v3483_v49 = vshll.u32 %v3482_v6, 30  ;;  %v3506_v35 = vsub.s32 4, %v3482_v6  ;;  %v3750_v29 = vshrl.u32 %v13383_v7, %v3747_v59 }
 0x368   : > { %v3752_v11 = vshll.u32 %v13383_v7, %v3746_v41  ;;  %v3753_v32 = vshrl.u32 %v13384_v28, %v3747_v59  ;;  %v3755_v52 = vshll.u32 %v13384_v28, %v3746_v41  ;;  %v3756_v4 = vshrl.u32 %v13385_v14, %v3747_v59 }
 0x369   : > { %v3759_v39 = vshrl.u32 %v13386_v37, %v3747_v59  ;;  %v3295_v56 = vmul.f32 %v3294_v25, %v3292_v43  ;;  %v12319_v45 = vsub.s32 %v3480_v63, %v3483_v49  ;;  %v3758_v24 = vshll.u32 %v13385_v14, %v3746_v41 }
 0x36a   : > { %v3762_v44 = vshrl.u32 %v13387_v27, %v3747_v59  ;;  %v3507_v31 = vsel %vm3422_vm2, %v3506_v35, %v3482_v6  ;;  %v3751_v20 = vor.u32 %v3750_v29, %v3749_v30  ;;  %v3754_v13 = vor.u32 %v3753_v32, %v3752_v11 }
 0x36b   : > { %v3761_v47 = vshll.u32 %v13386_v37, %v3746_v41  ;;  %v3486_v53 = vsub.s32 0, %v12319_v45  ;;  %v3757_v0 = vor.u32 %v3756_v4, %v3755_v52  ;;  %v3760_v1 = vor.u32 %v3759_v39, %v3758_v24 }
 0x36c   : > { %v3636_v51 = vor.u32 8388608, %v12297_v16  ;;  %v3748_v63 = vshrl.u32 %v13388_v36, %v3747_v59  ;;  %v3638_v25 = vadd.s32 1, %v8438_v57  ;;  %v3840_v49 = vshrl.u32 %v3839_v61, 23 }
 0x36d   : > { %v3763_v43 = vor.u32 %v3762_v44, %v3761_v47  ;;  %v3296_v34 = vxor.u32 2147483648, %v3295_v56  ;;  %v8431_v22 = vmin.u32 %v3486_v53, %v12319_v45  ;;  %v12332_v6 = vsel %vm12301_vm13, 0, %v3507_v31 }
 0x36e   : > { %vm3764_vm1 = vcmp.lt.s32.totalorder %v3745_v62, 1  ;;  %vm3765_vm10 = vcmp.lt.s32.totalorder %v3745_v62, 2  ;;  %vm3766_vm6 = vcmp.lt.s32.totalorder %v3745_v62, 3  ;;  %vm3767_vm11 = vcmp.lt.s32.totalorder %v3745_v62, 4  ;;  %v12334_v30 = vpop.eup %9102 }
 0x36f   : > { %v3772_v41 = vsel %vm3764_vm1, %v3751_v20, %v3754_v13  ;;  %v3488_v16 = vclz %v8431_v22  ;;  %v3768_v35 = vsel %vm3764_vm1, %v3748_v63, %v3751_v20  ;;  %v3769_v59 = vsel %vm3767_vm11, %v3757_v0, 2102212464  ;;  %v12336_v57 = vpop.eup %9104 }
 0x370   : > { %v3773_v47 = vsel %vm3767_vm11, %v3760_v1, 920167782  ;;  %v3770_v61 = vsel %vm3766_vm6, %v3754_v13, %v3769_v59  ;;  %v3776_v29 = vsel %vm3764_vm1, %v3754_v13, %v3757_v0  ;;  %v3777_v11 = vsel %vm3767_vm11, %v3763_v43, 1326507024 }
 0x371   : > { %v3774_v53 = vsel %vm3766_vm6, %v3757_v0, %v3773_v47  ;;  %v3297_v32 = vsel %vm3214_vm0, %v3296_v34, %v3295_v56  ;;  %v8432_v52 = vadd.s32 4294967294, %v3488_v16  ;;  %v3778_v39 = vsel %vm3766_vm6, %v3760_v1, %v3777_v11 }
 0x372   : > { %v3775_v4 = vsel %vm3765_vm10, %v3772_v41, %v3774_v53  ;;  %v3771_v22 = vsel %vm3765_vm10, %v3768_v35, %v3770_v61  ;;  %v3779_v20 = vsel %vm3765_vm10, %v3776_v29, %v3778_v39  ;;  %vm3639_vm0 = vcmp.gt.s32.totalorder %v3638_v25, 0 }
 0x373   : > { %v12347_v24 = vmul.u32.u64.low %v12308_v26, %v3775_v4  ;;  %v12348_v44 = vmul.u32.u64.high %v12308_v26, %v3775_v4, %v12347_v24  ;;  %vm8433_vm5 = vcmp.lt.s32.totalorder %v8432_v52, 0  ;;  %v3640_v56 = vsel %vm3639_vm0, %v3638_v25, 0 }
 0x374   : > { %v12352_v0 = vmul.u32.u64.low %v12308_v26, %v3779_v20  ;;  %v12353_v13 = vmul.u32.u64.high %v12308_v26, %v3779_v20, %v12352_v0  ;;  %v3491_v34 = vsel %vm8433_vm5, 0, %v8432_v52  ;;  %v12355_v31 = vshll.u32 %v3636_v51, 8 }
 0x375   : > { %v13618_v1 = vand.u32 2147483647, %v12271_v19  ;;  %v12364_v62 = vsel %vm12214_vm3, %v11998_v21, %v3297_v32  ;;  %v3492_v43 = vsub.s32 32, %v3491_v34  ;;  %v3496_v41 = vsub.s32 4294967266, %v3491_v34 }
 0x376   : > { %v12367_v16 = vadd.s32 3, %v12332_v6  ;;  %v3787_v35 = vmul.u32 %v12308_v26, %v3771_v22  ;;  %v3790_v25 = vadd.s32 1, %v12348_v44  ;;  %v3642_v51 = vand.u32 31, %v3640_v56 }
 0x377   : > { %v12359_v63 = vand.u32 8388607, %v13618_v1  ;;  %v8446_v59 = vadd.s32 4294967169, %v3840_v49  ;;  %v3493_v47 = vshll.u32 %v12319_v45, %v3491_v34  ;;  %v3494_v61 = vshrl.u32 %v12306_v55, %v3492_v43 }
 0x378   : > { %v3497_v53 = vadd.s32 127, %v3496_v41  ;;  %vm3789_vm3 = vc.u32 %v12353_v13, %v12347_v24  ;;  %v3641_v29 = vshrl.u32 %v3640_v56, 5  ;;  %v3643_v11 = vsub.s32 32, %v3642_v51 }
 0x379   : > { %v3791_v50 = vsel %vm3789_vm3, %v3790_v25, %v12348_v44  ;;  %v3645_v32 = vshll.u32 %v13388_v36, %v3642_v51  ;;  %v3495_v52 = vor.u32 %v3494_v61, %v3493_v47  ;;  %v3648_v39 = vshll.u32 %v13383_v7, %v3642_v51 }
 0x37a   : > { %v3498_v26 = vshll.u32 %v3497_v53, 23  ;;  %v3792_v4 = vadd.s32 %v3791_v50, %v3787_v35  ;;  %v3646_v49 = vshrl.u32 %v13383_v7, %v3643_v11  ;;  %v3649_v45 = vshrl.u32 %v13384_v28, %v3643_v11 }
 0x37b   : > { %v3651_v55 = vshll.u32 %v13384_v28, %v3642_v51  ;;  %v3652_v22 = vshrl.u32 %v13385_v14, %v3643_v11  ;;  %v3502_v0 = vcvt.s32.f32 %v3495_v52  ;;  %v3654_v34 = vshll.u32 %v13385_v14, %v3642_v51 }
 0x37c   : > { %v3499_v20 = vor.u32 4788187, %v3498_v26  ;;  %v3793_v44 = vadd.s32 536870912, %v3792_v4  ;;  %vm3734_vm9 = vcmp.lt.s32.totalorder %v12198_v15, 0  ;;  %v3647_v56 = vor.u32 %v3646_v49, %v3645_v32 }
 0x37d   : > { %v3650_v1 = vor.u32 %v3649_v45, %v3648_v39  ;;  %v3653_v43 = vor.u32 %v3652_v22, %v3651_v55  ;;  %v3655_v41 = vshrl.u32 %v13386_v37, %v3643_v11  ;;  %v3657_v47 = vshll.u32 %v13386_v37, %v3642_v51 }
 0x37e   : > { %v3500_v35 = vand.u32 2147483647, %v3499_v20  ;;  %v3794_v25 = vshrl.u32 %v3793_v44, 30  ;;  %v3658_v61 = vshrl.u32 %v13387_v27, %v3643_v11  ;;  %9106 = vcosq.f32 %v12364_v62 }
 0x37f   : > { %v12389_v53 = vand.u32 3, %v12332_v6  ;;  %v3656_v50 = vor.u32 %v3655_v41, %v3654_v34  ;;  %v3846_v52 = vadd.s32 1, %v8446_v59  ;;  %v3644_v32 = vshrl.u32 %v13388_v36, %v3643_v11 }
 0x380   : > { %v3503_v26 = vmul.f32 %v3502_v0, %v3500_v35  ;;  %v3795_v21 = vshll.u32 %v3794_v25, 30  ;;  %v3659_v39 = vor.u32 %v3658_v61, %v3657_v47  ;;  %v13620_v49 = vand.u32 2147483647, %v12198_v15 }
 0x381   : > { %13619 = vst [vmem:[#allocation105_spill] sm:$0xff] %v12389_v53  ;;  %v3818_v51 = vsub.s32 4, %v3794_v25  ;;  %vm3660_vm15 = vcmp.lt.s32.totalorder %v3641_v29, 1  ;;  %vm3661_vm12 = vcmp.lt.s32.totalorder %v3641_v29, 2  ;;  %vm3663_vm7 = vcmp.lt.s32.totalorder %v3641_v29, 4 }
 0x382   : > { %vm12394_vm4 = vcmp.le.f32.partialorder %v13620_v49, 0.7853982  ;;  %v3504_v55 = vxor.u32 2147483648, %v3503_v26  ;;  %v12398_v6 = vsub.s32 %v3792_v4, %v3795_v21  ;;  %v3665_v22 = vsel %vm3663_vm7, %v3653_v43, 2102212464 }
 0x383   : > { %v3668_v59 = vsel %vm3660_vm15, %v3647_v56, %v3650_v1  ;;  %vm3662_vm8 = vcmp.lt.s32.totalorder %v3641_v29, 3  ;;  %v3669_v20 = vsel %vm3663_vm7, %v3656_v50, 920167782  ;;  %v3672_v0 = vsel %vm3660_vm15, %v3650_v1, %v3653_v43 }
 0x384   : > { %v3673_v11 = vsel %vm3663_vm7, %v3659_v39, 1326507024  ;;  %v3798_v44 = vsub.s32 0, %v12398_v6  ;;  %v3664_v34 = vsel %vm3660_vm15, %v3644_v32, %v3647_v56  ;;  %v3666_v41 = vsel %vm3662_vm8, %v3650_v1, %v3665_v22 }
 0x385   : > { %v3670_v35 = vsel %vm3662_vm8, %v3653_v43, %v3669_v20  ;;  %v3505_v47 = vsel %vm3422_vm2, %v3504_v55, %v3503_v26  ;;  %v3674_v49 = vsel %vm3662_vm8, %v3656_v50, %v3673_v11  ;;  %v3844_v21 = vor.u32 8388608, %v12359_v63 }
 0x386   : > { %v3671_v61 = vsel %vm3661_vm12, %v3668_v59, %v3670_v35  ;;  %v8443_v4 = vmin.u32 %v3798_v44, %v12398_v6  ;;  %v3819_v53 = vsel %vm3734_vm9, %v3818_v51, %v3794_v25  ;;  %v3675_v39 = vsel %vm3661_vm12, %v3672_v0, %v3674_v49 }
 0x387   : > { %vm3847_vm1 = vcmp.gt.s32.totalorder %v3846_v52, 0  ;;  %v3667_v56 = vsel %vm3661_vm12, %v3664_v34, %v3666_v41  ;;  %v12411_v1 = vmul.u32.u64.low %v12355_v31, %v3675_v39  ;;  %v12412_v43 = vmul.u32.u64.high %v12355_v31, %v3675_v39, %v12411_v1 }
 0x388   : > { %v3848_v26 = vsel %vm3847_vm1, %v3846_v52, 0  ;;  %v12417_v50 = vsel %vm12301_vm13, %v12025_v60, %v3505_v47  ;;  %v3800_v63 = vclz %v8443_v4  ;;  %9108 = vsinq.f32 %v12364_v62 }
 0x389   : > { %v12420_v32 = vmul.u32.u64.low %v12355_v31, %v3671_v61  ;;  %v12421_v55 = vmul.u32.u64.high %v12355_v31, %v3671_v61, %v12420_v32  ;;  %v12426_v29 = vand.u32 3, %v12367_v16  ;;  %v3850_v25 = vand.u32 31, %v3848_v26 }
 0x38a   : > { %v12428_v51 = vshll.u32 %v3844_v21, 8  ;;  %v3788_v52 = vadd.s32 %v12347_v24, %v12353_v13  ;;  %v8444_v2 = vadd.s32 4294967294, %v3800_v63  ;;  %v12434_v22 = vsel %vm12394_vm4, 0, %v3819_v53 }
 0x38b   : > { %v3683_v59 = vmul.u32 %v12355_v31, %v3667_v56  ;;  %9110 = vcosq.f32 %v12417_v50  ;;  %vm3685_vm2 = vc.u32 %v12412_v43, %v12420_v32  ;;  %v12440_v62 = vshrl.u32 %v3848_v26, 5  ;;  %v12442_v20 = vpop.eup %9106 }
 0x38c   : > { %v3851_v16 = vsub.s32 32, %v3850_v25  ;;  %vm8445_vm13 = vcmp.lt.s32.totalorder %v8444_v2, 0  ;;  %v3686_v24 = vadd.s32 1, %v12421_v55  ;;  %v3853_v13 = vshll.u32 %v13388_v36, %v3850_v25 }
 0x38d   : > { %v3856_v53 = vshll.u32 %v13383_v7, %v3850_v25  ;;  %v3803_v0 = vsel %vm8445_vm13, 0, %v8444_v2  ;;  %v3859_v44 = vshll.u32 %v13384_v28, %v3850_v25  ;;  %vm3630_vm10 = vcmp.lt.s32.totalorder %v12228_v54, 0 }
 0x38e   : > { %v3854_v31 = vshrl.u32 %v13383_v7, %v3851_v16  ;;  %v3857_v11 = vshrl.u32 %v13384_v28, %v3851_v16  ;;  %v3804_v34 = vsub.s32 32, %v3803_v0  ;;  %v3805_v41 = vshll.u32 %v12398_v6, %v3803_v0 }
 0x38f   : > { %v3808_v35 = vsub.s32 4294967266, %v3803_v0  ;;  %v3687_v47 = vsel %vm3685_vm2, %v3686_v24, %v12421_v55  ;;  %v3860_v4 = vshrl.u32 %v13385_v14, %v3851_v16  ;;  %v3862_v7 = vshll.u32 %v13385_v14, %v3850_v25 }
 0x390   : > { %v3688_v61 = vadd.s32 %v3687_v47, %v3683_v59  ;;  %v3855_v49 = vor.u32 %v3854_v31, %v3853_v13  ;;  %v3858_v21 = vor.u32 %v3857_v11, %v3856_v53  ;;  %v3806_v39 = vshrl.u32 %v3788_v52, %v3804_v34 }
 0x391   : > { %v3809_v56 = vadd.s32 127, %v3808_v35  ;;  %v3863_v1 = vshrl.u32 %v13386_v37, %v3851_v16  ;;  %v3861_v26 = vor.u32 %v3860_v4, %v3859_v44  ;;  %v3865_v6 = vshll.u32 %v13386_v37, %v3850_v25 }
 0x392   : > { %v3689_v28 = vadd.s32 536870912, %v3688_v61  ;;  %v3866_v63 = vshrl.u32 %v13387_v27, %v3851_v16  ;;  %v3807_v55 = vor.u32 %v3806_v39, %v3805_v41  ;;  %vm3868_vm6 = vcmp.lt.s32.totalorder %v12440_v62, 1 }
 0x393   : > { %v3810_v2 = vshll.u32 %v3809_v56, 23  ;;  %v3864_v59 = vor.u32 %v3863_v1, %v3862_v7  ;;  %v13623_v52 = vand.u32 2147483647, %v12228_v54  ;;  %vm3870_vm5 = vcmp.lt.s32.totalorder %v12440_v62, 3 }
 0x394   : > { %v3690_v14 = vshrl.u32 %v3689_v28, 30  ;;  %v3867_v13 = vor.u32 %v3866_v63, %v3865_v6  ;;  %vm3871_vm0 = vcmp.lt.s32.totalorder %v12440_v62, 4  ;;  %v3814_v25 = vcvt.s32.f32 %v3807_v55 }
 0x395   : > { %vm12461_vm11 = vcmp.le.f32.partialorder %v13623_v52, 0.7853982  ;;  %v3811_v37 = vor.u32 4788187, %v3810_v2  ;;  %v3852_v27 = vshrl.u32 %v13388_v36, %v3851_v16  ;;  %v3873_v53 = vsel %vm3871_vm0, %v3861_v26, 2102212464  ;;  %v12470_v34 = vpop.eup %9108 }
 0x396   : > { %v3691_v0 = vshll.u32 %v3690_v14, 30  ;;  %v3714_v31 = vsub.s32 4, %v3690_v14  ;;  %v3876_v11 = vsel %vm3868_vm6, %v3855_v49, %v3858_v21  ;;  %v3877_v44 = vsel %vm3871_vm0, %v3864_v59, 920167782 }
 0x397   : > { %v3812_v41 = vand.u32 2147483647, %v3811_v37  ;;  %v3878_v35 = vsel %vm3870_vm5, %v3861_v26, %v3877_v44  ;;  %v3880_v47 = vsel %vm3868_vm6, %v3858_v21, %v3861_v26  ;;  %v3881_v4 = vsel %vm3871_vm0, %v3867_v13, 1326507024 }
 0x398   : > { %v12476_v39 = vsub.s32 %v3688_v61, %v3691_v0  ;;  %vm3869_vm3 = vcmp.lt.s32.totalorder %v12440_v62, 2  ;;  %v3872_v36 = vsel %vm3868_vm6, %v3852_v27, %v3855_v49  ;;  %v3882_v16 = vsel %vm3870_vm5, %v3864_v59, %v3881_v4  ;;  %v12483_v56 = vpop.eup %9110 }
 0x399   : > { %v3815_v7 = vmul.f32 %v3814_v25, %v3812_v41  ;;  %v3874_v1 = vsel %vm3870_vm5, %v3858_v21, %v3873_v53  ;;  %v3879_v28 = vsel %vm3869_vm3, %v3876_v11, %v3878_v35  ;;  %v3883_v61 = vsel %vm3869_vm3, %v3880_v47, %v3882_v16  ;;  %v13626_v35 = vld [vmem:[#allocation67_spill] sm:$0xff] }
 0x39a   : > { %v3694_v26 = vsub.s32 0, %v12476_v39  ;;  %v3715_v49 = vsel %vm3630_vm10, %v3714_v31, %v3690_v14  ;;  %vm808_vm15 = vweird.f32 %v10617_v12  ;;  %v813_v6 = vxor.u32 2147483648, %v11376_v8 }
 0x39b   : > { %v3684_v63 = vadd.s32 %v12420_v32, %v12412_v43  ;;  %v12499_v21 = vmul.u32.u64.low %v12428_v51, %v3883_v61  ;;  %v12500_v55 = vmul.u32.u64.high %v12428_v51, %v3883_v61, %v12499_v21  ;;  %v816_v2 = vxor.u32 2147483648, %v11363_v3 }
 0x39c   : > { %v8439_v59 = vmin.u32 %v3694_v26, %v12476_v39  ;;  %v3875_v52 = vsel %vm3869_vm3, %v3872_v36, %v3874_v1  ;;  %v12507_v14 = vmul.u32.u64.low %v12428_v51, %v3879_v28  ;;  %v12508_v13 = vmul.u32.u64.high %v12428_v51, %v3879_v28, %v12507_v14 }
 0x39d   : > { %v3816_v37 = vxor.u32 2147483648, %v3815_v7  ;;  %v3717_v25 = vsel %vm12461_vm11, 0, %v3715_v49  ;;  %v1021_v43 = vxor.u32 2147483648, %v11442_v9  ;;  %vm4139_vm12 = vcmp.eq.s32.totalorder %v11148_v58, 0 }
 0x39e   : > { %v3696_v32 = vclz %v8439_v59  ;;  %v1024_v27 = vxor.u32 2147483648, %v11431_v42  ;;  %v4141_v53 = vsel %vm4139_vm12, %v11363_v3, %v813_v6  ;;  %vm4142_vm7 = vcmp.eq.s32.totalorder %v11148_v58, 2  ;;  %v13627_v59 = vld [vmem:[#allocation64_spill] sm:$0xff] }
 0x39f   : > { %v3891_v62 = vmul.u32 %v12428_v51, %v3875_v52  ;;  %vm3893_vm8 = vc.u32 %v12500_v55, %v12507_v14  ;;  %vm4138_vm1 = vcmp.lt.s32.totalorder %v11148_v58, 2  ;;  %v4144_v0 = vsel %vm4142_vm7, %v816_v2, %v11376_v8 }
 0x3a0   : > { %v8440_v31 = vadd.s32 4294967294, %v3696_v32  ;;  %v3894_v11 = vadd.s32 1, %v12508_v13  ;;  %vm1016_vm2 = vweird.f32 %v10701_v38  ;;  %v4145_v44 = vsel %vm4138_vm1, %v4141_v53, %v4144_v0 }
 0x3a1   : > { %v3817_v41 = vsel %vm3734_vm9, %v3816_v37, %v3815_v7  ;;  %vm4344_vm13 = vcmp.lt.s32.totalorder %v13626_v35, 2  ;;  %vm4345_vm6 = vcmp.eq.s32.totalorder %v13626_v35, 0  ;;  %vm4348_vm5 = vcmp.eq.s32.totalorder %v13626_v35, 2 }
 0x3a2   : > { %vm8441_vm0 = vcmp.lt.s32.totalorder %v8440_v31, 0  ;;  %v3895_v58 = vsel %vm3893_vm8, %v3894_v11, %v12508_v13  ;;  %v4347_v51 = vsel %vm4345_vm6, %v11431_v42, %v1021_v43  ;;  %v4350_v47 = vsel %vm4348_vm5, %v1024_v27, %v11442_v9 }
 0x3a3   : > { %v3699_v4 = vsel %vm8441_vm0, 0, %v8440_v31  ;;  %v3896_v36 = vadd.s32 %v3895_v58, %v3891_v62  ;;  %v4146_v16 = vsel %vm808_vm15, nan, %v4145_v44  ;;  %v4351_v1 = vsel %vm4344_vm13, %v4347_v51, %v4350_v47  ;;  %v13628_v62 = vld [vmem:[#allocation68_spill] sm:$0xff]  ;;  %v13629_v47 = vld [vmem:[#allocation37_spill] sm:$0xff] }
 0x3a4   : > { %v3700_v7 = vsub.s32 32, %v3699_v4  ;;  %v3701_v28 = vshll.u32 %v12476_v39, %v3699_v4  ;;  %v3704_v61 = vsub.s32 4294967266, %v3699_v4  ;;  %v4352_v26 = vsel %vm1016_vm2, nan, %v4351_v1  ;;  %v13633_v1 = vld [vmem:[#allocation32_spill] sm:$0xff] }
 0x3a5   : > { %v3897_v49 = vadd.s32 536870912, %v3896_v36  ;;  %v7404_v21 = vpack.c.bf16 %v4352_v26, %v4146_v16  ;;  %vm812_vm9 = vcmp.eq.s32.totalorder %v13627_v59, 0  ;;  %vm815_vm3 = vcmp.eq.s32.totalorder %v13627_v59, 2 }
 0x3a6   : > { %v3702_v52 = vshrl.u32 %v3684_v63, %v3700_v7  ;;  %v3705_v13 = vadd.s32 127, %v3704_v61  ;;  %v814_v37 = vsel %vm812_vm9, %v11363_v3, %v813_v6  ;;  %v817_v32 = vsel %vm815_vm3, %v816_v2, %v11376_v8  ;;  %v13635_v61 = vld [vmem:[#allocation26_spill] sm:$0xff] }
 0x3a7   : > { %9112 = vsinq.f32 %v12417_v50  ;;  %v3820_v39 = vsel %vm12394_vm4, %v12198_v15, %v3817_v41  ;;  %v12544_v53 = vshrl.u32 %v3897_v49, 30  ;;  %7549 = vmatmul.mubr.bf16.vlgmr.msra.gmra.mxu0 %v7404_v21  ;;  %vm1020_vm12 = vcmp.eq.s32.totalorder %v13628_v62, 0 }
 0x3a8   : > { %v3703_v0 = vor.u32 %v3702_v52, %v3701_v28  ;;  %v3706_v31 = vshll.u32 %v3705_v13, 23  ;;  %vm811_vm7 = vcmp.lt.s32.totalorder %v13627_v59, 2  ;;  %v1022_v63 = vsel %vm1020_vm12, %v11431_v42, %v1021_v43  ;;  %v13634_v28 = vld [vmem:[#allocation29_spill] sm:$0xff] }
 0x3a9   : > { %v12549_v3 = vadd.s32 3, %v3717_v25  ;;  %v3899_v8 = vshll.u32 %v12544_v53, 30  ;;  %v818_v50 = vsel %vm811_vm7, %v814_v37, %v817_v32  ;;  %vm1023_vm8 = vcmp.eq.s32.totalorder %v13628_v62, 2 }
 0x3aa   : > { %v3707_v45 = vor.u32 4788187, %v3706_v31  ;;  %v12553_v6 = vand.u32 3, %v3717_v25  ;;  %vm1019_vm4 = vcmp.lt.s32.totalorder %v13628_v62, 2  ;;  %v1025_v2 = vsel %vm1023_vm8, %v1024_v27, %v11442_v9  ;;  %v13630_v9 = vld [vmem:[#allocation36_spill] sm:$0xff]  ;;  %v13636_v31 = vld [vmem:[#allocation9_spill] sm:$0xff] }
 0x3ab   : > { %9114 = vcosq.f32 %v3820_v39  ;;  %v3892_v11 = vadd.s32 %v12507_v14, %v12500_v55  ;;  %v12558_v44 = vsub.s32 %v3896_v36, %v3899_v8  ;;  %v1026_v42 = vsel %vm1019_vm4, %v1022_v63, %v1025_v2  ;;  %v13631_v55 = vld [vmem:[#allocation12_spill] sm:$0xff]  ;;  %v13632_v14 = vld [vmem:[#allocation30_spill] sm:$0xff] }
 0x3ac   : > { %v3708_v43 = vand.u32 2147483647, %v3707_v45  ;;  %v3710_v41 = vcvt.s32.f32 %v3703_v0  ;;  %v819_v35 = vsel %vm808_vm15, nan, %v818_v50  ;;  %v1027_v58 = vsel %vm1016_vm2, nan, %v1026_v42 }
 0x3ad   : > { %v3902_v25 = vsub.s32 0, %v12558_v44  ;;  %v7388_v51 = vpack.c.bf16 %v1027_v58, %v819_v35  ;;  %v1333_v4 = vxor.u32 2147483648, %v13629_v47  ;;  %v1336_v27 = vxor.u32 2147483648, %v13630_v9 }
 0x3ae   : > { %v3711_v16 = vmul.f32 %v3710_v41, %v3708_v43  ;;  %vm1328_vm1 = vweird.f32 %v13631_v55  ;;  %v1541_v36 = vxor.u32 2147483648, %v13632_v14  ;;  %v4652_v7 = vand.u32 3, %v13633_v1 }
 0x3af   : > { %v8447_v12 = vmin.u32 %v3902_v25, %v12558_v44  ;;  %7742 = vmatmul.mubr.bf16.vlgmr.msra.gmra.mxu1 %v7388_v51  ;;  %v1544_v38 = vxor.u32 2147483648, %v13634_v28  ;;  %v4858_v26 = vand.u32 3, %v13635_v61  ;;  %v1329_v49 = vadd.s32 3, %v13633_v1 }
 0x3b0   : > { %v3712_v21 = vxor.u32 2147483648, %v3711_v16  ;;  %vm4653_vm15 = vcmp.lt.s32.totalorder %v4652_v7, 2  ;;  %vm4654_vm2 = vcmp.eq.s32.totalorder %v4652_v7, 0  ;;  %vm4657_vm13 = vcmp.eq.s32.totalorder %v4652_v7, 2 }
 0x3b1   : > { %v3904_v59 = vclz %v8447_v12  ;;  %v4656_v52 = vsel %vm4654_vm2, %v13630_v9, %v1333_v4  ;;  %v4659_v13 = vsel %vm4657_vm13, %v1336_v27, %v13629_v47  ;;  %vm4859_vm6 = vcmp.lt.s32.totalorder %v4858_v26, 2 }
 0x3b2   : > { %v3713_v37 = vsel %vm3630_vm10, %v3712_v21, %v3711_v16  ;;  %v4660_v32 = vsel %vm4653_vm15, %v4656_v52, %v4659_v13  ;;  %vm4860_vm5 = vcmp.eq.s32.totalorder %v4858_v26, 0  ;;  %vm4863_vm0 = vcmp.eq.s32.totalorder %v4858_v26, 2  ;;  %v13638_v21 = vld [vmem:[#allocation75_spill] sm:$0xff] }
 0x3b3   : > { %v12581_v62 = vsel %vm12461_vm11, %v12228_v54, %v3713_v37  ;;  %v8448_v0 = vadd.s32 4294967294, %v3904_v59  ;;  %vm1536_vm9 = vweird.f32 %v13636_v31  ;;  %v4862_v63 = vsel %vm4860_vm5, %v13634_v28, %v1541_v36  ;;  %v8982_v31 = vld [vmem:[%s13197_s5 + $0x38] sm:$0xff]  }
 0x3b4   : > { %v12585_v8 = vpop.eup %9112  ;;  %v4661_v50 = vsel %vm1328_vm1, nan, %v4660_v32  ;;  %v4865_v45 = vsel %vm4863_vm0, %v1544_v38, %v13632_v14  ;;  %v1330_v2 = vand.u32 3, %v1329_v49  ;;  %v1537_v42 = vadd.s32 3, %v13635_v61  ;;  %v13637_v49 = vld [vmem:[#allocation13_spill] sm:$0xff]  ;;  %8679 = vmatprep.subr.bf16.mxu0 %v8982_v31 }
 0x3b5   : > { %9116 = vsinq.f32 %v3820_v39  ;;  %vm8449_vm10 = vcmp.lt.s32.totalorder %v8448_v0, 0  ;;  %v3922_v24 = vsub.s32 4, %v12544_v53  ;;  %v4866_v43 = vsel %vm4859_vm6, %v4862_v63, %v4865_v45  ;;  %8680 = vmatpush3.bf16.msra.mxu0 %v8982_v31  ;;  %v13655_v31 = vld [vmem:[#allocation15_spill] sm:$0xff] }
 0x3b6   : > { %9118 = vcosq.f32 %v12581_v62  ;;  %v3907_v41 = vsel %vm8449_vm10, 0, %v8448_v0  ;;  %v4867_v35 = vsel %vm1536_vm9, nan, %v4866_v43  ;;  %vm1331_vm11 = vcmp.lt.s32.totalorder %v1330_v2, 2 }
 0x3b7   : > { %v3908_v58 = vsub.s32 32, %v3907_v41  ;;  %v3912_v25 = vsub.s32 4294967266, %v3907_v41  ;;  %v7407_v51 = vpack.c.bf16 %v4867_v35, %v4661_v50  ;;  %vm1332_vm3 = vcmp.eq.s32.totalorder %v1330_v2, 0  ;;  %v13640_v50 = vld [vmem:[#allocation79_spill] sm:$0xff] }
 0x3b8   : > { %v12596_v16 = vpop.eup %9114  ;;  %v3909_v39 = vshll.u32 %v12558_v44, %v3907_v41  ;;  %v1334_v1 = vsel %vm1332_vm3, %v13630_v9, %v1333_v4  ;;  %vm1335_vm12 = vcmp.eq.s32.totalorder %v1330_v2, 2  ;;  %v1538_v7 = vand.u32 3, %v1537_v42  ;;  %v13639_v9 = vld [vmem:[#allocation74_spill] sm:$0xff]  ;;  %v13644_v2 = vld [vmem:[#allocation69_spill] sm:$0xff]  ;;  %v13645_v35 = vld [vmem:[#allocation71_spill] sm:$0xff] }
 0x3b9   : > { %v3910_v12 = vshrl.u32 %v3892_v11, %v3908_v58  ;;  %v3913_v61 = vadd.s32 127, %v3912_v25  ;;  %8595 = vmatprep.mubr.msk.bf16.mxu0 %vm699_vm14, %v7407_v51  ;;  %v1337_v26 = vsel %vm1335_vm12, %v1336_v27, %v13629_v47  ;;  %vm1224_vm7 = vweird.f32 %v13637_v49  ;;  %v8983_v58 = vld [vmem:[%s13197_s5 + $0x30] sm:$0xff]   ;;  %v13654_v49 = vld [vmem:[#allocation39_spill] sm:$0xff] }
 0x3ba   : > { %v1229_v59 = vxor.u32 2147483648, %v13638_v21  ;;  %v1338_v52 = vsel %vm1331_vm11, %v1334_v1, %v1337_v26  ;;  %vm1539_vm8 = vcmp.lt.s32.totalorder %v1538_v7, 2  ;;  %vm1540_vm4 = vcmp.eq.s32.totalorder %v1538_v7, 0  ;;  %v13646_v1 = vld [vmem:[#allocation25_spill] sm:$0xff]  ;;  %8681 = vmatprep.subr.bf16.mxu0 %v8983_v58 }
 0x3bb   : > { %vm1543_vm15 = vcmp.eq.s32.totalorder %v1538_v7, 2  ;;  %v3911_v44 = vor.u32 %v3910_v12, %v3909_v39  ;;  %v3914_v13 = vshll.u32 %v3913_v61, 23  ;;  %v1542_v4 = vsel %vm1540_vm4, %v13634_v28, %v1541_v36  ;;  %8682 = vmatpush3.bf16.msra.mxu0 %v8983_v58  ;;  %v13669_v28 = vld [vmem:[#allocation46_spill] sm:$0xff] }
 0x3bc   : > { %v1232_v11 = vxor.u32 2147483648, %v13639_v9  ;;  %vm3838_vm2 = vcmp.lt.s32.totalorder %v12271_v19, 0  ;;  %v1339_v47 = vsel %vm1328_vm1, nan, %v1338_v52  ;;  %v1545_v27 = vsel %vm1543_vm15, %v1544_v38, %v13632_v14 }
 0x3bd   : > { %vm1432_vm13 = vweird.f32 %v11098_v48  ;;  %v1437_v37 = vxor.u32 2147483648, %v11743_v23  ;;  %v3915_v32 = vor.u32 4788187, %v3914_v13  ;;  %v3918_v0 = vcvt.s32.f32 %v3911_v44 }
 0x3be   : > { %v1546_v63 = vsel %vm1539_vm8, %v1542_v4, %v1545_v27  ;;  %v1440_v45 = vxor.u32 2147483648, %v13640_v50  ;;  %v13641_v36 = vand.u32 2147483647, %v12271_v19  ;;  %vm4550_vm1 = vcmp.lt.s32.totalorder %v13644_v2, 2 }
 0x3bf   : > { %v1547_v55 = vsel %vm1536_vm9, nan, %v1546_v63  ;;  %vm4551_vm5 = vcmp.eq.s32.totalorder %v13644_v2, 0  ;;  %vm4554_vm0 = vcmp.eq.s32.totalorder %v13644_v2, 2  ;;  %v3916_v14 = vand.u32 2147483647, %v3915_v32  ;;  %v13647_v32 = vld [vmem:[#allocation72_spill] sm:$0xff] }
 0x3c0   : > { %vm12616_vm6 = vcmp.le.f32.partialorder %v13641_v36, 0.7853982  ;;  %v7391_v38 = vpack.c.bf16 %v1547_v55, %v1339_v47  ;;  %v4553_v42 = vsel %vm4551_vm5, %v13639_v9, %v1229_v59  ;;  %v4556_v43 = vsel %vm4554_vm0, %v1232_v11, %v13638_v21  ;;  %v13651_v2 = vld [vmem:[#allocation45_spill] sm:$0xff] }
 0x3c1   : > { %v4557_v41 = vsel %vm4550_vm1, %v4553_v42, %v4556_v43  ;;  %vm4756_vm10 = vcmp.lt.s32.totalorder %v13645_v35, 2  ;;  %vm4757_vm11 = vcmp.eq.s32.totalorder %v13645_v35, 0  ;;  %vm4760_vm3 = vcmp.eq.s32.totalorder %v13645_v35, 2  ;;  %v13653_v43 = vld [vmem:[#allocation33_spill] sm:$0xff] }
 0x3c2   : > { %v3919_v25 = vmul.f32 %v3918_v0, %v3916_v14  ;;  %8615 = vmatprep.mubr.msk.bf16.mxu1 %vm699_vm14, %v7391_v38  ;;  %v4759_v51 = vsel %vm4757_vm11, %v13640_v50, %v1437_v37  ;;  %v4762_v39 = vsel %vm4760_vm3, %v1440_v45, %v11743_v23  ;;  %vm1227_vm9 = vcmp.lt.s32.totalorder %v13646_v1, 2  ;;  %v12640_v7 = vpop.eup %9116  ;;  %v8984_v0 = vld [vmem:[%s13197_s5 + $0x28] sm:$0xff]   ;;  %v13652_v38 = vld [vmem:[#allocation44_spill] sm:$0xff] }
 0x3c3   : > { %v4558_v12 = vsel %vm1224_vm7, nan, %v4557_v41  ;;  %v4763_v61 = vsel %vm4756_vm10, %v4759_v51, %v4762_v39  ;;  %vm1228_vm12 = vcmp.eq.s32.totalorder %v13646_v1, 0  ;;  %vm1231_vm8 = vcmp.eq.s32.totalorder %v13646_v1, 2  ;;  %v12646_v26 = vpop.eup %9118  ;;  %8683 = vmatprep.subr.bf16.mxu0 %v8984_v0  ;;  %v13657_v39 = vld [vmem:[#allocation80_spill] sm:$0xff] }
 0x3c4   : > { %v3920_v52 = vxor.u32 2147483648, %v3919_v25  ;;  %v4764_v44 = vsel %vm1432_vm13, nan, %v4763_v61  ;;  %v1230_v13 = vsel %vm1228_vm12, %v13639_v9, %v1229_v59  ;;  %v1233_v4 = vsel %vm1231_vm8, %v1232_v11, %v13638_v21  ;;  %8684 = vmatpush3.bf16.msra.mxu0 %v8984_v0  ;;  %v13659_v0 = vld [vmem:[#allocation83_spill] sm:$0xff] }
 0x3c5   : > { %v7406_v47 = vpack.c.bf16 %v4764_v44, %v4558_v12  ;;  %v1234_v27 = vsel %vm1227_vm9, %v1230_v13, %v1233_v4  ;;  %vm1436_vm4 = vcmp.eq.s32.totalorder %v13647_v32, 0  ;;  %vm1439_vm15 = vcmp.eq.s32.totalorder %v13647_v32, 2 }
 0x3c6   : > { %v3921_v63 = vsel %vm3838_vm2, %v3920_v52, %v3919_v25  ;;  %vm1435_vm1 = vcmp.lt.s32.totalorder %v13647_v32, 2  ;;  %v1438_v59 = vsel %vm1436_vm4, %v13640_v50, %v1437_v37  ;;  %v1441_v21 = vsel %vm1439_vm15, %v1440_v45, %v11743_v23  ;;  %v13649_v45 = vld [vmem:[#allocation43_spill] sm:$0xff]  ;;  %v13656_v25 = vld [vmem:[#allocation81_spill] sm:$0xff] }
 0x3c7   : > { %9120 = vsinq.f32 %v12581_v62  ;;  %v12664_v9 = vand.u32 3, %v12549_v3  ;;  %v12671_v11 = vsel %vm3838_vm2, %v3922_v24, %v12544_v53  ;;  %7557 = vmatmul.mubr.bf16.gmra.mxu0 %v7406_v47  ;;  %v1442_v36 = vsel %vm1435_vm1, %v1438_v59, %v1441_v21  ;;  %v13648_v62 = vld [vmem:[#allocation14_spill] sm:$0xff] }
 0x3c8   : > { %v12676_v37 = vsel %vm12616_vm6, %v12271_v19, %v3921_v63  ;;  %v1235_v23 = vsel %vm1224_vm7, nan, %v1234_v27  ;;  %v1443_v3 = vsel %vm1432_vm13, nan, %v1442_v36  ;;  %vm1744_vm5 = vweird.f32 %v13648_v62  ;;  %v13650_v24 = vld [vmem:[#allocation42_spill] sm:$0xff]  ;;  %v13660_v36 = vld [vmem:[#allocation20_spill] sm:$0xff] }
 0x3c9   : > { %v7390_v50 = vpack.c.bf16 %v1443_v3, %v1235_v23  ;;  %v1749_v53 = vxor.u32 2147483648, %v13649_v45  ;;  %v1752_v55 = vxor.u32 2147483648, %v13650_v24  ;;  %v1957_v14 = vxor.u32 2147483648, %v13651_v2  ;;  %v13658_v47 = vld [vmem:[#allocation18_spill] sm:$0xff] }
 0x3ca   : > { %v1960_v42 = vxor.u32 2147483648, %v13652_v38  ;;  %v5064_v41 = vand.u32 3, %v13653_v43  ;;  %v5270_v35 = vand.u32 3, %v13654_v49  ;;  %v1745_v48 = vadd.s32 3, %v13653_v43 }
 0x3cb   : > { %7750 = vmatmul.mubr.bf16.gmra.mxu1 %v7390_v50  ;;  %vm1952_vm7 = vweird.f32 %v13655_v31  ;;  %v1953_v58 = vadd.s32 3, %v13654_v49  ;;  %v1645_v51 = vxor.u32 2147483648, %v13656_v25  ;;  %v1648_v1 = vxor.u32 2147483648, %v13657_v39 }
 0x3cc   : > { %vm5065_vm2 = vcmp.lt.s32.totalorder %v5064_v41, 2  ;;  %vm5066_vm13 = vcmp.eq.s32.totalorder %v5064_v41, 0  ;;  %vm5069_vm0 = vcmp.eq.s32.totalorder %v5064_v41, 2  ;;  %vm5271_vm10 = vcmp.lt.s32.totalorder %v5270_v35, 2  ;;  %v13661_v41 = vld [vmem:[#allocation82_spill] sm:$0xff] }
 0x3cd   : > { %v5068_v12 = vsel %vm5066_vm13, %v13650_v24, %v1749_v53  ;;  %v5071_v61 = vsel %vm5069_vm0, %v1752_v55, %v13649_v45  ;;  %vm5272_vm11 = vcmp.eq.s32.totalorder %v5270_v35, 0  ;;  %vm5275_vm3 = vcmp.eq.s32.totalorder %v5270_v35, 2 }
 0x3ce   : > { %v5072_v52 = vsel %vm5065_vm2, %v5068_v12, %v5071_v61  ;;  %v5274_v44 = vsel %vm5272_vm11, %v13652_v38, %v1957_v14  ;;  %v5277_v13 = vsel %vm5275_vm3, %v1960_v42, %v13651_v2  ;;  %v1746_v4 = vand.u32 3, %v1745_v48  ;;  %v13662_v12 = vld [vmem:[#allocation73_spill] sm:$0xff] }
 0x3cf   : > { %vm1640_vm9 = vweird.f32 %v13658_v47  ;;  %v5073_v27 = vsel %vm1744_vm5, nan, %v5072_v52  ;;  %v5278_v32 = vsel %vm5271_vm10, %v5274_v44, %v5277_v13  ;;  %v1954_v63 = vand.u32 3, %v1953_v58  ;;  %v13664_v44 = vld [vmem:[#allocation76_spill] sm:$0xff]  ;;  %v13672_v47 = vld [vmem:[#allocation22_spill] sm:$0xff] }
 0x3d0   : > { %v1853_v59 = vxor.u32 2147483648, %v13659_v0  ;;  %v5279_v21 = vsel %vm1952_vm7, nan, %v5278_v32  ;;  %vm1747_vm12 = vcmp.lt.s32.totalorder %v1746_v4, 2  ;;  %vm1748_vm8 = vcmp.eq.s32.totalorder %v1746_v4, 0 }
 0x3d1   : > { %vm1751_vm4 = vcmp.eq.s32.totalorder %v1746_v4, 2  ;;  %vm1848_vm15 = vweird.f32 %v13660_v36  ;;  %v7409_v23 = vpack.c.bf16 %v5279_v21, %v5073_v27  ;;  %v1750_v3 = vsel %vm1748_vm8, %v13650_v24, %v1749_v53  ;;  %v13663_v24 = vld [vmem:[#allocation77_spill] sm:$0xff]  ;;  %v13665_v4 = vld [vmem:[#allocation35_spill] sm:$0xff] }
 0x3d2   : > { %v1753_v50 = vsel %vm1751_vm4, %v1752_v55, %v13649_v45  ;;  %vm1955_vm1 = vcmp.lt.s32.totalorder %v1954_v63, 2  ;;  %vm1956_vm2 = vcmp.eq.s32.totalorder %v1954_v63, 0  ;;  %vm1959_vm13 = vcmp.eq.s32.totalorder %v1954_v63, 2 }
 0x3d3   : > { %v1754_v43 = vsel %vm1747_vm12, %v1750_v3, %v1753_v50  ;;  %v1856_v49 = vxor.u32 2147483648, %v13661_v41  ;;  %8596 = vmatprep.mubr.msk.bf16.mxu0 %vm699_vm14, %v7409_v23  ;;  %v1958_v48 = vsel %vm1956_vm2, %v13652_v38, %v1957_v14  ;;  %v1961_v58 = vsel %vm1959_vm13, %v1960_v42, %v13651_v2  ;;  %v13666_v50 = vld [vmem:[#allocation54_spill] sm:$0xff] }
 0x3d4   : > { %v1755_v35 = vsel %vm1744_vm5, nan, %v1754_v43  ;;  %vm4962_vm0 = vcmp.lt.s32.totalorder %v13662_v12, 2  ;;  %v12714_v53 = vpop.eup %9120  ;;  %v1962_v45 = vsel %vm1955_vm1, %v1958_v48, %v1961_v58  ;;  %vm4963_vm10 = vcmp.eq.s32.totalorder %v13662_v12, 0  ;;  %v13670_v48 = vld [vmem:[#allocation50_spill] sm:$0xff] }
 0x3d5   : > { %vm4966_vm11 = vcmp.eq.s32.totalorder %v13662_v12, 2  ;;  %vm5168_vm3 = vcmp.lt.s32.totalorder %v13663_v24, 2  ;;  %v1963_v55 = vsel %vm1952_vm7, nan, %v1962_v45  ;;  %v4965_v62 = vsel %vm4963_vm10, %v13657_v39, %v1645_v51  ;;  %v13671_v12 = vld [vmem:[#allocation40_spill] sm:$0xff] }
 0x3d6   : > { %v4968_v14 = vsel %vm4966_vm11, %v1648_v1, %v13656_v25  ;;  %vm5169_vm5 = vcmp.eq.s32.totalorder %v13663_v24, 0  ;;  %v7393_v2 = vpack.c.bf16 %v1963_v55, %v1755_v35  ;;  %vm5172_vm12 = vcmp.eq.s32.totalorder %v13663_v24, 2  ;;  %v13673_v24 = vld [vmem:[#allocation17_spill] sm:$0xff] }
 0x3d7   : > { %v4969_v38 = vsel %vm4962_vm0, %v4965_v62, %v4968_v14  ;;  %v5171_v42 = vsel %vm5169_vm5, %v13661_v41, %v1853_v59  ;;  %v5174_v52 = vsel %vm5172_vm12, %v1856_v49, %v13659_v0  ;;  %vm1643_vm8 = vcmp.lt.s32.totalorder %v13664_v44, 2 }
 0x3d8   : > { %v4970_v61 = vsel %vm1640_vm9, nan, %v4969_v38  ;;  %vm1644_vm7 = vcmp.eq.s32.totalorder %v13664_v44, 0  ;;  %8616 = vmatprep.mubr.msk.bf16.mxu1 %vm699_vm14, %v7393_v2  ;;  %v5175_v31 = vsel %vm5168_vm3, %v5171_v42, %v5174_v52  ;;  %vm1647_vm4 = vcmp.eq.s32.totalorder %v13664_v44, 2 }
 0x3d9   : > { %v1646_v13 = vsel %vm1644_vm7, %v13657_v39, %v1645_v51  ;;  %vm1851_vm1 = vcmp.lt.s32.totalorder %v13665_v4, 2  ;;  %v5176_v27 = vsel %vm1848_vm15, nan, %v5175_v31  ;;  %v1649_v32 = vsel %vm1647_vm4, %v1648_v1, %v13656_v25 }
 0x3da   : > { %vm1852_vm2 = vcmp.eq.s32.totalorder %v13665_v4, 0  ;;  %vm1855_vm13 = vcmp.eq.s32.totalorder %v13665_v4, 2  ;;  %v7408_v63 = vpack.c.bf16 %v5176_v27, %v4970_v61  ;;  %v1650_v21 = vsel %vm1643_vm8, %v1646_v13, %v1649_v32 }
 0x3db   : > { %v1854_v23 = vsel %vm1852_vm2, %v13661_v41, %v1853_v59  ;;  %v1857_v3 = vsel %vm1855_vm13, %v1856_v49, %v13659_v0  ;;  %v12745_v51 = vsel %vm12616_vm6, 0, %v12671_v11  ;;  %9122 = vcosq.f32 %v12676_v37  ;;  %v13667_v59 = vld [vmem:[#allocation49_spill] sm:$0xff]  ;;  %v13668_v0 = vld [vmem:[#allocation47_spill] sm:$0xff] }
 0x3dc   : > { %v1651_v25 = vsel %vm1640_vm9, nan, %v1650_v21  ;;  %v1858_v39 = vsel %vm1851_vm1, %v1854_v23, %v1857_v3  ;;  %7565 = vmatmul.mubr.bf16.gmra.mxu0 %v7408_v63  ;;  %v2165_v43 = vxor.u32 2147483648, %v13666_v50  ;;  %v2168_v41 = vxor.u32 2147483648, %v13667_v59 }
 0x3dd   : > { %v1859_v1 = vsel %vm1848_vm15, nan, %v1858_v39  ;;  %v2373_v49 = vxor.u32 2147483648, %v13668_v0  ;;  %v2376_v11 = vxor.u32 2147483648, %v13669_v28  ;;  %v5476_v58 = vand.u32 3, %v13670_v48 }
 0x3de   : > { %v7392_v35 = vpack.c.bf16 %v1859_v1, %v1651_v25  ;;  %v5682_v45 = vand.u32 3, %v13671_v12  ;;  %vm2160_vm6 = vweird.f32 %v13672_v47  ;;  %vm2368_vm9 = vweird.f32 %v13673_v24  ;;  %v13674_v1 = vld [vmem:[#allocation90_spill] sm:$0xff] }
 0x3df   : > { %v2161_v36 = vadd.s32 3, %v13670_v48  ;;  %v2369_v55 = vadd.s32 3, %v13671_v12  ;;  %vm5477_vm15 = vcmp.lt.s32.totalorder %v5476_v58, 2  ;;  %vm5478_vm0 = vcmp.eq.s32.totalorder %v5476_v58, 0  ;;  %v13677_v48 = vld [vmem:[#allocation85_spill] sm:$0xff] }
 0x3e0   : > { %7758 = vmatmul.mubr.bf16.gmra.mxu1 %v7392_v35  ;;  %vm5481_vm10 = vcmp.eq.s32.totalorder %v5476_v58, 2  ;;  %vm5683_vm11 = vcmp.lt.s32.totalorder %v5682_v45, 2  ;;  %v5480_v62 = vsel %vm5478_vm0, %v13667_v59, %v2165_v43  ;;  %vm5684_vm3 = vcmp.eq.s32.totalorder %v5682_v45, 0 }
 0x3e1   : > { %v5483_v14 = vsel %vm5481_vm10, %v2168_v41, %v13666_v50  ;;  %vm5687_vm5 = vcmp.eq.s32.totalorder %v5682_v45, 2  ;;  %v5686_v38 = vsel %vm5684_vm3, %v13669_v28, %v2373_v49  ;;  %v2162_v61 = vand.u32 3, %v2161_v36 }
 0x3e2   : > { %v5484_v2 = vsel %vm5477_vm15, %v5480_v62, %v5483_v14  ;;  %v5689_v42 = vsel %vm5687_vm5, %v2376_v11, %v13668_v0  ;;  %v2370_v31 = vand.u32 3, %v2369_v55  ;;  %v2061_v13 = vxor.u32 2147483648, %v11942_v5  ;;  %v13679_v55 = vld [vmem:[#allocation84_spill] sm:$0xff] }
 0x3e3   : > { %v5485_v52 = vsel %vm2160_vm6, nan, %v5484_v2  ;;  %v5690_v44 = vsel %vm5683_vm11, %v5686_v38, %v5689_v42  ;;  %vm2163_vm12 = vcmp.lt.s32.totalorder %v2162_v61, 2  ;;  %vm2164_vm8 = vcmp.eq.s32.totalorder %v2162_v61, 0 }
 0x3e4   : > { %v5691_v4 = vsel %vm2368_vm9, nan, %v5690_v44  ;;  %vm2167_vm7 = vcmp.eq.s32.totalorder %v2162_v61, 2  ;;  %vm2056_vm4 = vweird.f32 %v11399_v18  ;;  %v2166_v32 = vsel %vm2164_vm8, %v13667_v59, %v2165_v43  ;;  %v13675_v59 = vld [vmem:[#allocation21_spill] sm:$0xff] }
 0x3e5   : > { %v7411_v27 = vpack.c.bf16 %v5691_v4, %v5485_v52  ;;  %v2169_v63 = vsel %vm2167_vm7, %v2168_v41, %v13666_v50  ;;  %vm2371_vm1 = vcmp.lt.s32.totalorder %v2370_v31, 2  ;;  %vm2372_vm2 = vcmp.eq.s32.totalorder %v2370_v31, 0  ;;  %v13676_v50 = vld [vmem:[#allocation89_spill] sm:$0xff]  ;;  %v13680_v52 = vld [vmem:[#allocation88_spill] sm:$0xff] }
 0x3e6   : > { %v2170_v21 = vsel %vm2163_vm12, %v2166_v32, %v2169_v63  ;;  %vm2375_vm13 = vcmp.eq.s32.totalorder %v2370_v31, 2  ;;  %v2064_v23 = vxor.u32 2147483648, %v11938_v46  ;;  %v2374_v25 = vsel %vm2372_vm2, %v13669_v28, %v2373_v49  ;;  %v13683_v32 = vld [vmem:[#allocation60_spill] sm:$0xff] }
 0x3e7   : > { %8597 = vmatprep.mubr.msk.bf16.mxu0 %vm699_vm14, %v7411_v27  ;;  %v2171_v3 = vsel %vm2160_vm6, nan, %v2170_v21  ;;  %v2377_v39 = vsel %vm2375_vm13, %v2376_v11, %v13668_v0  ;;  %v2269_v35 = vxor.u32 2147483648, %v13674_v1  ;;  %vm2264_vm15 = vweird.f32 %v13675_v59  ;;  %v13678_v11 = vld [vmem:[#allocation86_spill] sm:$0xff] }
 0x3e8   : > { %v2378_v43 = vsel %vm2371_vm1, %v2374_v25, %v2377_v39  ;;  %v2272_v41 = vxor.u32 2147483648, %v13676_v50  ;;  %vm5375_vm0 = vcmp.eq.s32.totalorder %v13677_v48, 0  ;;  %v12784_v58 = vpop.eup %9122  ;;  %vm5374_vm6 = vcmp.lt.s32.totalorder %v13677_v48, 2  ;;  %v13686_v39 = vld [vmem:[#allocation57_spill] sm:$0xff] }
 0x3e9   : > { %v2379_v12 = vsel %vm2368_vm9, nan, %v2378_v43  ;;  %v5377_v49 = vsel %vm5375_vm0, %v11938_v46, %v2061_v13  ;;  %vm5378_vm10 = vcmp.eq.s32.totalorder %v13677_v48, 2  ;;  %vm5581_vm11 = vcmp.eq.s32.totalorder %v13678_v11, 0 }
 0x3ea   : > { %v7395_v0 = vpack.c.bf16 %v2379_v12, %v2171_v3  ;;  %v5380_v28 = vsel %vm5378_vm10, %v2064_v23, %v11942_v5  ;;  %vm5584_vm3 = vcmp.eq.s32.totalorder %v13678_v11, 2  ;;  %vm5580_vm5 = vcmp.lt.s32.totalorder %v13678_v11, 2  ;;  %v13685_v3 = vld [vmem:[#allocation55_spill] sm:$0xff]  ;;  %v13688_v12 = vld [vmem:[#allocation28_spill] sm:$0xff] }
 0x3eb   : > { %v5381_v45 = vsel %vm5374_vm6, %v5377_v49, %v5380_v28  ;;  %v5583_v47 = vsel %vm5581_vm11, %v13676_v50, %v2269_v35  ;;  %v5586_v24 = vsel %vm5584_vm3, %v2272_v41, %v13674_v1  ;;  %vm2059_vm9 = vcmp.lt.s32.totalorder %v13679_v55, 2 }
 0x3ec   : > { %8617 = vmatprep.mubr.msk.bf16.mxu1 %vm699_vm14, %v7395_v0  ;;  %v5587_v36 = vsel %vm5580_vm5, %v5583_v47, %v5586_v24  ;;  %vm2060_vm12 = vcmp.eq.s32.totalorder %v13679_v55, 0  ;;  %vm2063_vm8 = vcmp.eq.s32.totalorder %v13679_v55, 2  ;;  %v5382_v62 = vsel %vm2056_vm4, nan, %v5381_v45 }
 0x3ed   : > { %v5588_v14 = vsel %vm2264_vm15, nan, %v5587_v36  ;;  %v2062_v2 = vsel %vm2060_vm12, %v11938_v46, %v2061_v13  ;;  %v2065_v38 = vsel %vm2063_vm8, %v2064_v23, %v11942_v5  ;;  %vm2268_vm7 = vcmp.eq.s32.totalorder %v13680_v52, 0  ;;  %v13681_v46 = vld [vmem:[#allocation34_spill] sm:$0xff]  ;;  %v13684_v23 = vld [vmem:[#allocation56_spill] sm:$0xff] }
 0x3ee   : > { %v7410_v42 = vpack.c.bf16 %v5588_v14, %v5382_v62  ;;  %v2066_v61 = vsel %vm2059_vm9, %v2062_v2, %v2065_v38  ;;  %vm2271_vm1 = vcmp.eq.s32.totalorder %v13680_v52, 2  ;;  %vm2267_vm2 = vcmp.lt.s32.totalorder %v13680_v52, 2  ;;  %v13682_v5 = vld [vmem:[#allocation10_spill] sm:$0xff]  ;;  %v13689_v36 = vld [vmem:[#allocation24_spill] sm:$0xff] }
 0x3ef   : > { %v2067_v44 = vsel %vm2056_vm4, nan, %v2066_v61  ;;  %v2270_v31 = vsel %vm2268_vm7, %v13676_v50, %v2269_v35  ;;  %v2273_v4 = vsel %vm2271_vm1, %v2272_v41, %v13674_v1  ;;  %vm2576_vm13 = vweird.f32 %v13681_v46  ;;  %v13687_v50 = vld [vmem:[#allocation51_spill] sm:$0xff]  ;;  %v8985_v62 = vld [vmem:[%s13197_s5 + $0x20] sm:$0xff]  }
 0x3f0   : > { %7573 = vmatmul.mubr.bf16.gmra.mxu0 %v7410_v42  ;;  %v2274_v27 = vsel %vm2267_vm2, %v2270_v31, %v2273_v4  ;;  %v2581_v13 = vxor.u32 2147483648, %v13682_v5  ;;  %v2584_v63 = vxor.u32 2147483648, %v13683_v32  ;;  %v2789_v18 = vxor.u32 2147483648, %v13684_v23  ;;  %8685 = vmatprep.subr.bf16.mxu0 %v8985_v62 }
 0x3f1   : > { %v2275_v21 = vsel %vm2264_vm15, nan, %v2274_v27  ;;  %v2792_v25 = vxor.u32 2147483648, %v13685_v3  ;;  %v5888_v43 = vand.u32 3, %v13686_v39  ;;  %v6094_v1 = vand.u32 3, %v13687_v50  ;;  %8686 = vmatpush3.bf16.msra.mxu0 %v8985_v62  ;;  %v13695_v62 = vld [vmem:[#allocation62_spill] sm:$0xff] }
 0x3f2   : > { %v7394_v35 = vpack.c.bf16 %v2275_v21, %v2067_v44  ;;  %v2577_v41 = vadd.s32 3, %v13686_v39  ;;  %v2785_v48 = vadd.s32 3, %v13687_v50  ;;  %vm2784_vm4 = vweird.f32 %v13688_v12  ;;  %v13692_v39 = vld [vmem:[#allocation95_spill] sm:$0xff] }
 0x3f3   : > { %vm5889_vm0 = vcmp.lt.s32.totalorder %v5888_v43, 2  ;;  %vm5890_vm6 = vcmp.eq.s32.totalorder %v5888_v43, 0  ;;  %vm5893_vm10 = vcmp.eq.s32.totalorder %v5888_v43, 2  ;;  %vm6095_vm15 = vcmp.lt.s32.totalorder %v6094_v1, 2 }
 0x3f4   : > { %7766 = vmatmul.mubr.bf16.gmra.mxu1 %v7394_v35  ;;  %v5892_v59 = vsel %vm5890_vm6, %v13683_v32, %v2581_v13  ;;  %v5895_v49 = vsel %vm5893_vm10, %v2584_v63, %v13682_v5  ;;  %vm6096_vm11 = vcmp.eq.s32.totalorder %v6094_v1, 0  ;;  %vm6099_vm3 = vcmp.eq.s32.totalorder %v6094_v1, 2  ;;  %v13693_v35 = vld [vmem:[#allocation93_spill] sm:$0xff] }
 0x3f5   : > { %v5896_v0 = vsel %vm5889_vm0, %v5892_v59, %v5895_v49  ;;  %v6098_v28 = vsel %vm6096_vm11, %v13685_v3, %v2789_v18  ;;  %v2578_v11 = vand.u32 3, %v2577_v41  ;;  %v6101_v47 = vsel %vm6099_vm3, %v2792_v25, %v13684_v23  ;;  %v13694_v59 = vld [vmem:[#allocation94_spill] sm:$0xff] }
 0x3f6   : > { %v5897_v45 = vsel %vm2576_vm13, nan, %v5896_v0  ;;  %v2786_v24 = vand.u32 3, %v2785_v48  ;;  %vm2472_vm5 = vweird.f32 %v13689_v36  ;;  %v2477_v55 = vxor.u32 2147483648, %v12132_v40  ;;  %v13701_v36 = vld [vmem:[#allocation41_spill] sm:$0xff] }
 0x3f7   : > { %v6102_v14 = vsel %vm6095_vm15, %v6098_v28, %v6101_v47  ;;  %vm2579_vm9 = vcmp.lt.s32.totalorder %v2578_v11, 2  ;;  %vm2580_vm12 = vcmp.eq.s32.totalorder %v2578_v11, 0  ;;  %vm2583_vm8 = vcmp.eq.s32.totalorder %v2578_v11, 2 }
 0x3f8   : > { %v6103_v2 = vsel %vm2784_vm4, nan, %v6102_v14  ;;  %v2582_v38 = vsel %vm2580_vm12, %v13683_v32, %v2581_v13  ;;  %v2585_v42 = vsel %vm2583_vm8, %v2584_v63, %v13682_v5  ;;  %vm2787_vm7 = vcmp.lt.s32.totalorder %v2786_v24, 2  ;;  %v8986_v5 = vld [vmem:[%s13197_s5 + $0x18] sm:$0xff]   ;;  %v13690_v63 = vld [vmem:[#allocation100_spill] sm:$0xff] }
 0x3f9   : > { %v7413_v61 = vpack.c.bf16 %v6103_v2, %v5897_v45  ;;  %v2586_v52 = vsel %vm2579_vm9, %v2582_v38, %v2585_v42  ;;  %vm2788_vm1 = vcmp.eq.s32.totalorder %v2786_v24, 0  ;;  %vm2791_vm2 = vcmp.eq.s32.totalorder %v2786_v24, 2  ;;  %8687 = vmatprep.subr.bf16.mxu0 %v8986_v5  ;;  %v13696_v2 = vld [vmem:[#allocation11_spill] sm:$0xff] }
 0x3fa   : > { %v2587_v44 = vsel %vm2576_vm13, nan, %v2586_v52  ;;  %v2790_v31 = vsel %vm2788_vm1, %v13685_v3, %v2789_v18  ;;  %v2793_v4 = vsel %vm2791_vm2, %v2792_v25, %v13684_v23  ;;  %v2480_v27 = vxor.u32 2147483648, %v12095_v17  ;;  %v13691_v18 = vld [vmem:[#allocation92_spill] sm:$0xff]  ;;  %8688 = vmatpush3.bf16.msra.mxu0 %v8986_v5  ;;  %v13697_v42 = vld [vmem:[#allocation59_spill] sm:$0xff]  ;;  %v13698_v52 = vld [vmem:[#allocation58_spill] sm:$0xff] }
 0x3fb   : > { %8598 = vmatprep.mubr.msk.bf16.mxu0 %vm699_vm14, %v7413_v61  ;;  %v2794_v13 = vsel %vm2787_vm7, %v2790_v31, %v2793_v4  ;;  %vm2680_vm0 = vweird.f32 %v11697_v10  ;;  %v2685_v32 = vxor.u32 2147483648, %v12222_v33  ;;  %v2688_v46 = vxor.u32 2147483648, %v13690_v63  ;;  %v13700_v4 = vld [vmem:[#allocation52_spill] sm:$0xff]  ;;  %v13702_v5 = vld [vmem:[#allocation31_spill] sm:$0xff] }
 0x3fc   : > { %v2795_v21 = vsel %vm2784_vm4, nan, %v2794_v13  ;;  %vm5786_vm13 = vcmp.lt.s32.totalorder %v13691_v18, 2  ;;  %vm5787_vm6 = vcmp.eq.s32.totalorder %v13691_v18, 0  ;;  %vm5790_vm10 = vcmp.eq.s32.totalorder %v13691_v18, 2 }
 0x3fd   : > { %v7397_v23 = vpack.c.bf16 %v2795_v21, %v2587_v44  ;;  %v5789_v3 = vsel %vm5787_vm6, %v12095_v17, %v2477_v55  ;;  %v5792_v25 = vsel %vm5790_vm10, %v2480_v27, %v12132_v40  ;;  %vm5992_vm15 = vcmp.lt.s32.totalorder %v13692_v39, 2  ;;  %v13699_v44 = vld [vmem:[#allocation61_spill] sm:$0xff] }
 0x3fe   : > { %v5793_v43 = vsel %vm5786_vm13, %v5789_v3, %v5792_v25  ;;  %vm5993_vm11 = vcmp.eq.s32.totalorder %v13692_v39, 0  ;;  %vm5996_vm4 = vcmp.eq.s32.totalorder %v13692_v39, 2  ;;  %vm2475_vm3 = vcmp.lt.s32.totalorder %v13693_v35, 2 }
 0x3ff   : > { %8618 = vmatprep.mubr.msk.bf16.mxu1 %vm699_vm14, %v7397_v23  ;;  %v5794_v50 = vsel %vm2472_vm5, nan, %v5793_v43  ;;  %v5995_v1 = vsel %vm5993_vm11, %v13690_v63, %v2685_v32  ;;  %v5998_v41 = vsel %vm5996_vm4, %v2688_v46, %v12222_v33  ;;  %vm2476_vm9 = vcmp.eq.s32.totalorder %v13693_v35, 0  ;;  %v13703_v43 = vld [vmem:[#allocation102_spill] sm:$0xff] }
 0x400   : > { %v5999_v48 = vsel %vm5992_vm15, %v5995_v1, %v5998_v41  ;;  %v2478_v12 = vsel %vm2476_vm9, %v12095_v17, %v2477_v55  ;;  %vm2479_vm12 = vcmp.eq.s32.totalorder %v13693_v35, 2  ;;  %vm2683_vm8 = vcmp.lt.s32.totalorder %v13694_v59, 2  ;;  %v13704_v1 = vld [vmem:[#allocation78_spill] sm:$0xff] }
 0x401   : > { %v6000_v49 = vsel %vm2680_vm0, nan, %v5999_v48  ;;  %v2481_v0 = vsel %vm2479_vm12, %v2480_v27, %v12132_v40  ;;  %vm2684_vm7 = vcmp.eq.s32.totalorder %v13694_v59, 0  ;;  %vm2687_vm1 = vcmp.eq.s32.totalorder %v13694_v59, 2 }
 0x402   : > { %v7412_v28 = vpack.c.bf16 %v6000_v49, %v5794_v50  ;;  %v2482_v11 = vsel %vm2475_vm3, %v2478_v12, %v2481_v0  ;;  %v2686_v45 = vsel %vm2684_vm7, %v13690_v63, %v2685_v32  ;;  %v2689_v47 = vsel %vm2687_vm1, %v2688_v46, %v12222_v33  ;;  %v13705_v49 = vld [vmem:[#allocation101_spill] sm:$0xff] }
 0x403   : > { %9124 = vsinq.f32 %v12676_v37  ;;  %v12882_v17 = vadd.s32 3, %v12745_v51  ;;  %v2483_v24 = vsel %vm2472_vm5, nan, %v2482_v11  ;;  %v2690_v55 = vsel %vm2683_vm8, %v2686_v45, %v2689_v47 }
 0x404   : > { %7581 = vmatmul.mubr.bf16.gmra.mxu0 %v7412_v28  ;;  %v2691_v40 = vsel %vm2680_vm0, nan, %v2690_v55  ;;  %v2997_v14 = vxor.u32 2147483648, %v13695_v62  ;;  %v3000_v38 = vxor.u32 2147483648, %v13696_v2  ;;  %v3205_v61 = vxor.u32 2147483648, %v13697_v42  ;;  %v13706_v55 = vld [vmem:[#allocation87_spill] sm:$0xff] }
 0x405   : > { %v7396_v33 = vpack.c.bf16 %v2691_v40, %v2483_v24  ;;  %v3208_v37 = vxor.u32 2147483648, %v13698_v52  ;;  %v6300_v31 = vand.u32 3, %v13699_v44  ;;  %v6506_v27 = vand.u32 3, %v13700_v4 }
 0x406   : > { %vm2992_vm5 = vweird.f32 %v13701_v36  ;;  %vm3200_vm2 = vweird.f32 %v13702_v5  ;;  %v2993_v10 = vadd.s32 3, %v13699_v44  ;;  %v3201_v13 = vadd.s32 3, %v13700_v4 }
 0x407   : > { %7774 = vmatmul.mubr.bf16.gmra.mxu1 %v7396_v33  ;;  %vm6301_vm0 = vcmp.lt.s32.totalorder %v6300_v31, 2  ;;  %vm6302_vm13 = vcmp.eq.s32.totalorder %v6300_v31, 0  ;;  %vm6305_vm6 = vcmp.eq.s32.totalorder %v6300_v31, 2  ;;  %vm6507_vm10 = vcmp.lt.s32.totalorder %v6506_v27, 2  ;;  %v13708_v33 = vld [vmem:[#allocation98_spill] sm:$0xff] }
 0x408   : > { %v6304_v32 = vsel %vm6302_vm13, %v13696_v2, %v2997_v14  ;;  %v6307_v63 = vsel %vm6305_vm6, %v3000_v38, %v13695_v62  ;;  %vm6508_vm15 = vcmp.eq.s32.totalorder %v6506_v27, 0  ;;  %vm6511_vm11 = vcmp.eq.s32.totalorder %v6506_v27, 2  ;;  %v13709_v27 = vld [vmem:[#allocation96_spill] sm:$0xff] }
 0x409   : > { %v6308_v46 = vsel %vm6301_vm0, %v6304_v32, %v6307_v63  ;;  %v6510_v21 = vsel %vm6508_vm15, %v13698_v52, %v3205_v61  ;;  %v6513_v18 = vsel %vm6511_vm11, %v3208_v37, %v13697_v42  ;;  %v2994_v23 = vand.u32 3, %v2993_v10 }
 0x40a   : > { %v6309_v3 = vsel %vm2992_vm5, nan, %v6308_v46  ;;  %v6514_v25 = vsel %vm6507_vm10, %v6510_v21, %v6513_v18  ;;  %v3202_v39 = vand.u32 3, %v3201_v13  ;;  %v2893_v35 = vxor.u32 2147483648, %v13703_v43  ;;  %v13710_v46 = vld [vmem:[#allocation99_spill] sm:$0xff] }
 0x40b   : > { %v6515_v50 = vsel %vm3200_vm2, nan, %v6514_v25  ;;  %vm2995_vm4 = vcmp.lt.s32.totalorder %v2994_v23, 2  ;;  %vm2996_vm3 = vcmp.eq.s32.totalorder %v2994_v23, 0  ;;  %vm2999_vm9 = vcmp.eq.s32.totalorder %v2994_v23, 2  ;;  %v13711_v25 = vld [vmem:[#allocation48_spill] sm:$0xff] }
 0x40c   : > { %vm2888_vm12 = vweird.f32 %v13704_v1  ;;  %v7415_v41 = vpack.c.bf16 %v6515_v50, %v6309_v3  ;;  %v2998_v48 = vsel %vm2996_vm3, %v13696_v2, %v2997_v14  ;;  %v3001_v12 = vsel %vm2999_vm9, %v3000_v38, %v13695_v62  ;;  %v13707_v62 = vld [vmem:[#allocation97_spill] sm:$0xff] }
 0x40d   : > { %vm3203_vm8 = vcmp.lt.s32.totalorder %v3202_v39, 2  ;;  %v3002_v59 = vsel %vm2995_vm4, %v2998_v48, %v3001_v12  ;;  %vm3204_vm7 = vcmp.eq.s32.totalorder %v3202_v39, 0  ;;  %vm3207_vm1 = vcmp.eq.s32.totalorder %v3202_v39, 2  ;;  %v13712_v39 = vld [vmem:[#allocation65_spill] sm:$0xff]  ;;  %v13714_v48 = vld [vmem:[#allocation23_spill] sm:$0xff] }
 0x40e   : > { %v2896_v0 = vxor.u32 2147483648, %v13705_v49  ;;  %8599 = vmatprep.mubr.msk.bf16.mxu0 %vm699_vm14, %v7415_v41  ;;  %v3003_v28 = vsel %vm2992_vm5, nan, %v3002_v59  ;;  %v3206_v11 = vsel %vm3204_vm7, %v13698_v52, %v3205_v61  ;;  %v3209_v45 = vsel %vm3207_vm1, %v3208_v37, %v13697_v42  ;;  %v8987_v52 = vld [vmem:[%s13197_s5 + $0x10] sm:$0xff]   ;;  %v8988_v41 = vld [vmem:[%s13197_s5 + $0x8] sm:$0xff]  }
 0x40f   : > { %v3101_v47 = vxor.u32 2147483648, %v12336_v57  ;;  %v3210_v24 = vsel %vm3203_vm8, %v3206_v11, %v3209_v45  ;;  %vm3096_vm0 = vweird.f32 %v13706_v55  ;;  %v3104_v40 = vxor.u32 2147483648, %v12334_v30  ;;  %8689 = vmatprep.subr.bf16.mxu0 %v8987_v52 }
 0x410   : > { %vm6199_vm13 = vcmp.eq.s32.totalorder %v13707_v62, 0  ;;  %v12920_v14 = vpop.eup %9124  ;;  %v3211_v2 = vsel %vm3200_vm2, nan, %v3210_v24  ;;  %vm6198_vm5 = vcmp.lt.s32.totalorder %v13707_v62, 2  ;;  %vm6202_vm6 = vcmp.eq.s32.totalorder %v13707_v62, 2  ;;  %8690 = vmatpush3.bf16.msra.mxu0 %v8987_v52  ;;  %v13718_v24 = vld [vmem:[#allocation38_spill] sm:$0xff]  ;;  %v13719_v52 = vld [vmem:[#allocation91_spill] sm:$0xff] }
 0x411   : > { %v6201_v38 = vsel %vm6199_vm13, %v13705_v49, %v2893_v35  ;;  %v7399_v42 = vpack.c.bf16 %v3211_v2, %v3003_v28  ;;  %v6204_v61 = vsel %vm6202_vm6, %v2896_v0, %v13703_v43  ;;  %vm6405_vm10 = vcmp.eq.s32.totalorder %v13708_v33, 0  ;;  %v13717_v28 = vld [vmem:[#allocation16_spill] sm:$0xff]  ;;  %8691 = vmatprep.subr.bf16.mxu0 %v8988_v41 }
 0x412   : > { %vm6408_vm15 = vcmp.eq.s32.totalorder %v13708_v33, 2  ;;  %v6205_v37 = vsel %vm6198_vm5, %v6201_v38, %v6204_v61  ;;  %vm6404_vm2 = vcmp.lt.s32.totalorder %v13708_v33, 2  ;;  %v6407_v44 = vsel %vm6405_vm10, %v12334_v30, %v3101_v47 }
 0x413   : > { %v6410_v31 = vsel %vm6408_vm15, %v3104_v40, %v12336_v57  ;;  %8619 = vmatprep.mubr.msk.bf16.mxu1 %vm699_vm14, %v7399_v42  ;;  %vm2891_vm11 = vcmp.lt.s32.totalorder %v13709_v27, 2  ;;  %vm2892_vm4 = vcmp.eq.s32.totalorder %v13709_v27, 0  ;;  %vm2895_vm3 = vcmp.eq.s32.totalorder %v13709_v27, 2 }
 0x414   : > { %v6411_v4 = vsel %vm6404_vm2, %v6407_v44, %v6410_v31  ;;  %v6206_v36 = vsel %vm2888_vm12, nan, %v6205_v37  ;;  %v2894_v10 = vsel %vm2892_vm4, %v13705_v49, %v2893_v35  ;;  %v2897_v13 = vsel %vm2895_vm3, %v2896_v0, %v13703_v43  ;;  %v13713_v35 = vld [vmem:[#allocation19_spill] sm:$0xff]  ;;  %8692 = vmatpush3.bf16.msra.mxu0 %v8988_v41  ;;  %v13722_v41 = vld [vmem:[#allocation104_spill] sm:$0xff] }
 0x415   : > { %v6412_v5 = vsel %vm3096_vm0, nan, %v6411_v4  ;;  %v2898_v63 = vsel %vm2891_vm11, %v2894_v10, %v2897_v13  ;;  %vm3100_vm9 = vcmp.eq.s32.totalorder %v13710_v46, 0  ;;  %vm3103_vm8 = vcmp.eq.s32.totalorder %v13710_v46, 2 }
 0x416   : > { %v7414_v32 = vpack.c.bf16 %v6412_v5, %v6206_v36  ;;  %v2899_v21 = vsel %vm2888_vm12, nan, %v2898_v63  ;;  %vm3099_vm7 = vcmp.lt.s32.totalorder %v13710_v46, 2  ;;  %v3102_v18 = vsel %vm3100_vm9, %v12334_v30, %v3101_v47  ;;  %v13715_v30 = vld [vmem:[#allocation8_spill] sm:$0xff] }
 0x417   : > { %v3105_v23 = vsel %vm3103_vm8, %v3104_v40, %v12336_v57  ;;  %vm3408_vm1 = vweird.f32 %v13711_v25  ;;  %v3413_v43 = vxor.u32 2147483648, %v13712_v39  ;;  %v3416_v50 = vxor.u32 2147483648, %v13713_v35  ;;  %v13716_v57 = vld [vmem:[#allocation27_spill] sm:$0xff] }
 0x418   : > { %7589 = vmatmul.mubr.bf16.gmra.mxu0 %v7414_v32  ;;  %v3106_v3 = vsel %vm3099_vm7, %v3102_v18, %v3105_v23  ;;  %v3621_v12 = vxor.u32 2147483648, %v13714_v48  ;;  %v3624_v59 = vxor.u32 2147483648, %v13715_v30  ;;  %v6712_v49 = vand.u32 3, %v13716_v57 }
 0x419   : > { %v3107_v1 = vsel %vm3096_vm0, nan, %v3106_v3  ;;  %v6918_v11 = vand.u32 3, %v13717_v28  ;;  %v3409_v45 = vadd.s32 3, %v13716_v57  ;;  %v3617_v47 = vadd.s32 3, %v13717_v28  ;;  %v13720_v3 = vld [vmem:[#allocation103_spill] sm:$0xff] }
 0x41a   : > { %v7398_v0 = vpack.c.bf16 %v3107_v1, %v2899_v21  ;;  %vm3616_vm12 = vweird.f32 %v13718_v24  ;;  %vm6713_vm13 = vcmp.lt.s32.totalorder %v6712_v49, 2  ;;  %vm6714_vm5 = vcmp.eq.s32.totalorder %v6712_v49, 0  ;;  %v8989_v1 = vld [vmem:[%s13197_s5] sm:$0xff]  }
 0x41b   : > { %vm6717_vm6 = vcmp.eq.s32.totalorder %v6712_v49, 2  ;;  %v6716_v55 = vsel %vm6714_vm5, %v13713_v35, %v3413_v43  ;;  %vm6919_vm0 = vcmp.lt.s32.totalorder %v6918_v11, 2  ;;  %vm6920_vm10 = vcmp.eq.s32.totalorder %v6918_v11, 0  ;;  %8693 = vmatprep.subr.bf16.mxu0 %v8989_v1 }
 0x41c   : > { %7782 = vmatmul.mubr.bf16.gmra.mxu1 %v7398_v0  ;;  %v6719_v40 = vsel %vm6717_vm6, %v3416_v50, %v13712_v39  ;;  %v6922_v2 = vsel %vm6920_vm10, %v13715_v30, %v3621_v12  ;;  %vm6923_vm15 = vcmp.eq.s32.totalorder %v6918_v11, 2  ;;  %v3410_v38 = vand.u32 3, %v3409_v45  ;;  %8694 = vmatpush3.bf16.msra.mxu0 %v8989_v1 }
 0x41d   : > { %v6720_v62 = vsel %vm6713_vm13, %v6716_v55, %v6719_v40  ;;  %v6925_v61 = vsel %vm6923_vm15, %v3624_v59, %v13714_v48  ;;  %v3618_v33 = vand.u32 3, %v3617_v47  ;;  %vm3304_vm2 = vweird.f32 %v13719_v52 }
 0x41e   : > { %v6721_v42 = vsel %vm3408_vm1, nan, %v6720_v62  ;;  %v3309_v37 = vxor.u32 2147483648, %v12470_v34  ;;  %v6926_v44 = vsel %vm6919_vm0, %v6922_v2, %v6925_v61  ;;  %vm3411_vm11 = vcmp.lt.s32.totalorder %v3410_v38, 2  ;;  %v13723_v62 = vld [vmem:[#allocation70_spill] sm:$0xff] }
 0x41f   : > { %vm3412_vm4 = vcmp.eq.s32.totalorder %v3410_v38, 0  ;;  %vm3415_vm3 = vcmp.eq.s32.totalorder %v3410_v38, 2  ;;  %v6927_v31 = vsel %vm3616_vm12, nan, %v6926_v44  ;;  %vm3619_vm9 = vcmp.lt.s32.totalorder %v3618_v33, 2 }
 0x420   : > { %v3414_v4 = vsel %vm3412_vm4, %v13713_v35, %v3413_v43  ;;  %v3417_v27 = vsel %vm3415_vm3, %v3416_v50, %v13712_v39  ;;  %v7417_v36 = vpack.c.bf16 %v6927_v31, %v6721_v42  ;;  %vm3620_vm8 = vcmp.eq.s32.totalorder %v3618_v33, 0  ;;  %v13721_v35 = vld [vmem:[#allocation105_spill] sm:$0xff]  ;;  %v13725_v42 = vld [vmem:[#allocation63_spill] sm:$0xff] }
 0x421   : > { %v3418_v5 = vsel %vm3411_vm11, %v3414_v4, %v3417_v27  ;;  %vm3623_vm7 = vcmp.eq.s32.totalorder %v3618_v33, 2  ;;  %v3622_v13 = vsel %vm3620_vm8, %v13715_v30, %v3621_v12  ;;  %v3312_v63 = vxor.u32 2147483648, %v12442_v20  ;;  %v13726_v33 = vld [vmem:[#allocation53_spill] sm:$0xff] }
 0x422   : > { %v3419_v10 = vsel %vm3408_vm1, nan, %v3418_v5  ;;  %v3625_v32 = vsel %vm3623_vm7, %v3624_v59, %v13714_v48  ;;  %8600 = vmatprep.mubr.msk.bf16.mxu0 %vm699_vm14, %v7417_v36  ;;  %vm3512_vm13 = vweird.f32 %v12025_v60  ;;  %v3517_v21 = vxor.u32 2147483648, %v12585_v8 }
 0x423   : > { %v3626_v46 = vsel %vm3619_vm9, %v3622_v13, %v3625_v32  ;;  %v3520_v18 = vxor.u32 2147483648, %v12483_v56  ;;  %vm6610_vm1 = vcmp.lt.s32.totalorder %v13720_v3, 2  ;;  %vm6611_vm5 = vcmp.eq.s32.totalorder %v13720_v3, 0 }
 0x424   : > { %v3627_v23 = vsel %vm3616_vm12, nan, %v3626_v46  ;;  %vm6614_vm6 = vcmp.eq.s32.totalorder %v13720_v3, 2  ;;  %v6613_v39 = vsel %vm6611_vm5, %v12442_v20, %v3309_v37  ;;  %vm6816_vm0 = vcmp.lt.s32.totalorder %v13721_v35, 2 }
 0x425   : > { %v7401_v25 = vpack.c.bf16 %v3627_v23, %v3419_v10  ;;  %v6616_v43 = vsel %vm6614_vm6, %v3312_v63, %v12470_v34  ;;  %vm6817_vm10 = vcmp.eq.s32.totalorder %v13721_v35, 0  ;;  %vm6820_vm15 = vcmp.eq.s32.totalorder %v13721_v35, 2 }
 0x426   : > { %v6617_v50 = vsel %vm6610_vm1, %v6613_v39, %v6616_v43  ;;  %vm3307_vm12 = vcmp.lt.s32.totalorder %v13722_v41, 2  ;;  %v6819_v12 = vsel %vm6817_vm10, %v12483_v56, %v3517_v21  ;;  %v6822_v30 = vsel %vm6820_vm15, %v3520_v18, %v12585_v8 }
 0x427   : > { %8620 = vmatprep.mubr.msk.bf16.mxu1 %vm699_vm14, %v7401_v25  ;;  %v6618_v48 = vsel %vm3304_vm2, nan, %v6617_v50  ;;  %vm3308_vm11 = vcmp.eq.s32.totalorder %v13722_v41, 0  ;;  %v6823_v59 = vsel %vm6816_vm0, %v6819_v12, %v6822_v30  ;;  %vm3311_vm4 = vcmp.eq.s32.totalorder %v13722_v41, 2 }
 0x428   : > { %v3310_v57 = vsel %vm3308_vm11, %v12442_v20, %v3309_v37  ;;  %vm3515_vm3 = vcmp.lt.s32.totalorder %v12426_v29, 2  ;;  %v6824_v49 = vsel %vm3512_vm13, nan, %v6823_v59  ;;  %v3313_v0 = vsel %vm3311_vm4, %v3312_v63, %v12470_v34 }
 0x429   : > { %vm3516_vm9 = vcmp.eq.s32.totalorder %v12426_v29, 0  ;;  %vm3519_vm8 = vcmp.eq.s32.totalorder %v12426_v29, 2  ;;  %v7416_v28 = vpack.c.bf16 %v6824_v49, %v6618_v48  ;;  %v3314_v11 = vsel %vm3307_vm12, %v3310_v57, %v3313_v0 }
 0x42a   : > { %v3518_v20 = vsel %vm3516_vm9, %v12483_v56, %v3517_v21  ;;  %v3521_v45 = vsel %vm3519_vm8, %v3520_v18, %v12585_v8  ;;  %v13022_v47 = vand.u32 3, %v12882_v17  ;;  %v13025_v24 = vand.u32 3, %v12745_v51  ;;  %v13724_v17 = vld [vmem:[#allocation66_spill] sm:$0xff] }
 0x42b   : > { %v3315_v34 = vsel %vm3304_vm2, nan, %v3314_v11  ;;  %v3522_v55 = vsel %vm3515_vm3, %v3518_v20, %v3521_v45  ;;  %7597 = vmatmul.mubr.bf16.gmra.mxu0 %v7416_v28  ;;  %v3829_v40 = vxor.u32 2147483648, %v12640_v7  ;;  %v3832_v56 = vxor.u32 2147483648, %v12596_v16 }
 0x42c   : > { %v3523_v29 = vsel %vm3512_vm13, nan, %v3522_v55  ;;  %v4037_v8 = vxor.u32 2147483648, %v13723_v62  ;;  %v4040_v38 = vxor.u32 2147483648, %v13724_v17  ;;  %v7124_v51 = vand.u32 3, %v12434_v22 }
 0x42d   : > { %v7400_v2 = vpack.c.bf16 %v3523_v29, %v3315_v34  ;;  %v7330_v61 = vand.u32 3, %v13725_v42  ;;  %vm3824_vm2 = vweird.f32 %v12198_v15  ;;  %vm4032_vm7 = vweird.f32 %v13726_v33 }
 0x42e   : > { %v3825_v60 = vadd.s32 3, %v12434_v22  ;;  %v4033_v52 = vadd.s32 3, %v13725_v42  ;;  %vm7125_vm13 = vcmp.lt.s32.totalorder %v7124_v51, 2  ;;  %vm7126_vm1 = vcmp.eq.s32.totalorder %v7124_v51, 0 }
 0x42f   : > { %7790 = vmatmul.mubr.bf16.gmra.mxu1 %v7400_v2  ;;  %vm7129_vm5 = vcmp.eq.s32.totalorder %v7124_v51, 2  ;;  %vm7331_vm6 = vcmp.lt.s32.totalorder %v7330_v61, 2  ;;  %v7128_v37 = vsel %vm7126_vm1, %v12596_v16, %v3829_v40  ;;  %vm7332_vm0 = vcmp.eq.s32.totalorder %v7330_v61, 0 }
 0x430   : > { %v7131_v44 = vsel %vm7129_vm5, %v3832_v56, %v12640_v7  ;;  %vm7335_vm10 = vcmp.eq.s32.totalorder %v7330_v61, 2  ;;  %v7334_v4 = vsel %vm7332_vm0, %v13724_v17, %v4037_v8  ;;  %v3826_v36 = vand.u32 3, %v3825_v60 }
 0x431   : > { %v7132_v31 = vsel %vm7125_vm13, %v7128_v37, %v7131_v44  ;;  %v7337_v27 = vsel %vm7335_vm10, %v4040_v38, %v13723_v62  ;;  %v4034_v10 = vand.u32 3, %v4033_v52  ;;  %v3725_v13 = vxor.u32 2147483648, %v12714_v53  ;;  %v8990_v44 = vld [vmem:[#allocation2 + $0x38] sm:$0xff]  }
 0x432   : > { %v7133_v22 = vsel %vm3824_vm2, nan, %v7132_v31  ;;  %v7338_v5 = vsel %vm7331_vm6, %v7334_v4, %v7337_v27  ;;  %vm3827_vm15 = vcmp.lt.s32.totalorder %v3826_v36, 2  ;;  %vm3828_vm12 = vcmp.eq.s32.totalorder %v3826_v36, 0  ;;  %v8991_v31 = vld [vmem:[#allocation2 + $0x30] sm:$0xff]   ;;  %8711 = vmatprep.subr.bf16.mxu1 %v8990_v44 }
 0x433   : > { %v7339_v32 = vsel %vm4032_vm7, nan, %v7338_v5  ;;  %vm3831_vm11 = vcmp.eq.s32.totalorder %v3826_v36, 2  ;;  %vm3720_vm4 = vweird.f32 %v12228_v54  ;;  %v3830_v46 = vsel %vm3828_vm12, %v12596_v16, %v3829_v40  ;;  %8712 = vmatpush3.bf16.msra.mxu1 %v8990_v44 }
 0x434   : > { %v7419_v63 = vpack.c.bf16 %v7339_v32, %v7133_v22  ;;  %v3833_v21 = vsel %vm3831_vm11, %v3832_v56, %v12640_v7  ;;  %vm4035_vm3 = vcmp.lt.s32.totalorder %v4034_v10, 2  ;;  %vm4036_vm9 = vcmp.eq.s32.totalorder %v4034_v10, 0  ;;  %8713 = vmatprep.subr.bf16.mxu1 %v8991_v31 }
 0x435   : > { %v3834_v18 = vsel %vm3827_vm15, %v3830_v46, %v3833_v21  ;;  %vm4039_vm8 = vcmp.eq.s32.totalorder %v4034_v10, 2  ;;  %v3728_v23 = vxor.u32 2147483648, %v12646_v26  ;;  %v4038_v25 = vsel %vm4036_vm9, %v13724_v17, %v4037_v8  ;;  %v8992_v10 = vld [vmem:[#allocation2 + $0x28] sm:$0xff]   ;;  %v8993_v46 = vld [vmem:[#allocation2 + $0x20] sm:$0xff]   ;;  %v8994_v21 = vld [vmem:[#allocation2 + $0x18] sm:$0xff]  }
 0x436   : > { %8601 = vmatprep.mubr.msk.bf16.mxu0 %vm699_vm14, %v7419_v63  ;;  %v3835_v3 = vsel %vm3824_vm2, nan, %v3834_v18  ;;  %v4041_v39 = vsel %vm4039_vm8, %v4040_v38, %v13723_v62  ;;  %v3933_v43 = vxor.u32 2147483648, %v12920_v14  ;;  %vm3928_vm13 = vweird.f32 %v12271_v19 }
 0x437   : > { %v4042_v16 = vsel %vm4035_vm3, %v4038_v25, %v4041_v39  ;;  %v3936_v7 = vxor.u32 2147483648, %v12784_v58  ;;  %vm7023_vm1 = vcmp.eq.s32.totalorder %v12553_v6, 0  ;;  %vm7022_vm5 = vcmp.lt.s32.totalorder %v12553_v6, 2  ;;  %8714 = vmatpush3.bf16.msra.mxu1 %v8991_v31 }
 0x438   : > { %v4043_v35 = vsel %vm4032_vm7, nan, %v4042_v16  ;;  %v7025_v15 = vsel %vm7023_vm1, %v12646_v26, %v3725_v13  ;;  %vm7026_vm2 = vcmp.eq.s32.totalorder %v12553_v6, 2  ;;  %vm7229_vm6 = vcmp.eq.s32.totalorder %v13025_v24, 0  ;;  %8715 = vmatprep.subr.bf16.mxu1 %v8992_v10 }
 0x439   : > { %v7403_v50 = vpack.c.bf16 %v4043_v35, %v3835_v3  ;;  %v7028_v41 = vsel %vm7026_vm2, %v3728_v23, %v12714_v53  ;;  %vm7232_vm0 = vcmp.eq.s32.totalorder %v13025_v24, 2  ;;  %vm7228_vm10 = vcmp.lt.s32.totalorder %v13025_v24, 2 }
 0x43a   : > { %v7029_v1 = vsel %vm7022_vm5, %v7025_v15, %v7028_v41  ;;  %v7231_v48 = vsel %vm7229_vm6, %v12784_v58, %v3933_v43  ;;  %v7234_v12 = vsel %vm7232_vm0, %v3936_v7, %v12920_v14  ;;  %vm3723_vm7 = vcmp.lt.s32.totalorder %v12664_v9, 2 }
 0x43b   : > { %8621 = vmatprep.mubr.msk.bf16.mxu1 %vm699_vm14, %v7403_v50  ;;  %v7235_v30 = vsel %vm7228_vm10, %v7231_v48, %v7234_v12  ;;  %vm3724_vm15 = vcmp.eq.s32.totalorder %v12664_v9, 0  ;;  %vm3727_vm12 = vcmp.eq.s32.totalorder %v12664_v9, 2  ;;  %v7030_v6 = vsel %vm3720_vm4, nan, %v7029_v1  ;;  %8716 = vmatpush3.bf16.msra.mxu1 %v8992_v10 }
 0x43c   : > { %v7236_v59 = vsel %vm3928_vm13, nan, %v7235_v30  ;;  %v3726_v57 = vsel %vm3724_vm15, %v12646_v26, %v3725_v13  ;;  %v3729_v49 = vsel %vm3727_vm12, %v3728_v23, %v12714_v53  ;;  %vm3932_vm14 = vcmp.eq.s32.totalorder %v13022_v47, 0  ;;  %8717 = vmatprep.subr.bf16.mxu1 %v8993_v46 }
 0x43d   : > { %v7418_v0 = vpack.c.bf16 %v7236_v59, %v7030_v6  ;;  %v3730_v28 = vsel %vm3723_vm7, %v3726_v57, %v3729_v49  ;;  %vm3935_vm11 = vcmp.eq.s32.totalorder %v13022_v47, 2  ;;  %vm3931_vm3 = vcmp.lt.s32.totalorder %v13022_v47, 2 }
 0x43e   : > { %v3934_v9 = vsel %vm3932_vm14, %v12784_v58, %v3933_v43  ;;  %v3937_v11 = vsel %vm3935_vm11, %v3936_v7, %v12920_v14  ;;  %v3731_v45 = vsel %vm3720_vm4, nan, %v3730_v28  ;;  %v13096_v58 = vld [vmem:[%s13196_s4] ss:$0 sm:$0xff] }
 0x43f   : > { %7605 = vmatmul.mubr.bf16.gmra.mxu0 %v7418_v0  ;;  %v3938_v20 = vsel %vm3931_vm3, %v3934_v9, %v3937_v11  ;;  %8718 = vmatpush3.bf16.msra.mxu1 %v8993_v46  ;;  %v8997_v46 = vld [vmem:[#allocation2] sm:$0xff]  }
 0x440   : > { %v3939_v26 = vsel %vm3928_vm13, nan, %v3938_v20  ;;  %8719 = vmatprep.subr.bf16.mxu1 %v8994_v21 }
 0x441   : > { %v7402_v53 = vpack.c.bf16 %v3939_v26, %v3731_v45 }
 0x443   : > { %7798 = vmatmul.mubr.bf16.gmra.mxu1 %v7402_v53 }
 0x444   : > { %8720 = vmatpush3.bf16.msra.mxu1 %v8994_v21 }
 0x467   : > { %v7550_v24 = vpop.f32.mrf.mxu0 }
 0x469   : > { %v7552_v34 = vpop.f32.mrf.mxu0 }
 0x46b   : > { %v7553_v55 = vpop.f32.mrf.mxu0 }
 0x46d   : > { %v7555_v29 = vpop.f32.mrf.mxu0 }
 0x46f   : > { %v7743_v40 = vpop.f32.mrf.mxu1 }
 0x470   : > { %v7744_v47 = vadd.f32 %v7743_v40, %v7550_v24 }
 0x471   : > { %v7745_v14 = vpop.f32.mrf.mxu1 }
 0x472   : > { %v7813_v54 = vadd.f32 %v13096_v58, %v7744_v47 }
 0x473   : > { %v7746_v56 = vpop.f32.mrf.mxu1 }
 0x474   : > { %v7747_v62 = vadd.f32 %v7746_v56, %v7553_v55  ;;  %v7829_v2 = vmax.f32 %v7813_v54, 0.0 }
 0x475   : > { %v7748_v19 = vpop.f32.mrf.mxu1 }
 0x476   : > { %v7814_v8 = vadd.f32 %v13096_v58, %v7747_v62 }
 0x478   : > { %v7830_v17 = vmax.f32 %v7814_v8, 0.0 }
 0x47a   : > { %v7862_v38 = vpack.c.bf16 %v7830_v17, %v7829_v2 }
 0x47c   : > { %8695 = vmatprep.mubr.bf16.mxu0 %v7862_v38 }
 0x487   : > { %v7558_v51 = vpop.f32.mrf.mxu0 }
 0x489   : > { %v7560_v42 = vpop.f32.mrf.mxu0 }
 0x48b   : > { %v7751_v61 = vpop.f32.mrf.mxu1  ;;  %v7561_v33 = vpop.f32.mrf.mxu0 }
 0x48c   : > { %v7752_v60 = vadd.f32 %v7751_v61, %v7558_v51 }
 0x48d   : > { %v7753_v52 = vpop.f32.mrf.mxu1  ;;  %v7563_v37 = vpop.f32.mrf.mxu0 }
 0x48e   : > { %v7815_v27 = vadd.f32 %v13096_v58, %v7752_v60 }
 0x48f   : > { %v7754_v4 = vpop.f32.mrf.mxu1 }
 0x490   : > { %v7755_v36 = vadd.f32 %v7754_v4, %v7561_v33  ;;  %v7831_v13 = vmax.f32 %v7815_v27, 0.0  ;;  %v8995_v4 = vld [vmem:[#allocation2 + $0x10] sm:$0xff]  }
 0x491   : > { %v7756_v22 = vpop.f32.mrf.mxu1  ;;  %8721 = vmatprep.subr.bf16.mxu1 %v8995_v4 }
 0x492   : > { %v7816_v5 = vadd.f32 %v13096_v58, %v7755_v36  ;;  %8722 = vmatpush3.bf16.msra.mxu1 %v8995_v4 }
 0x494   : > { %v7832_v32 = vmax.f32 %v7816_v5, 0.0 }
 0x496   : > { %v7863_v63 = vpack.c.bf16 %v7832_v32, %v7831_v13 }
 0x498   : > { %8696 = vmatmul.mubr.bf16.vlgmr.msra.gmra.mxu0 %v7863_v63  ;;  %v8996_v63 = vld [vmem:[#allocation2 + $0x8] sm:$0xff]  }
 0x499   : > { %8723 = vmatprep.subr.bf16.mxu1 %v8996_v63 }
 0x49a   : > { %8724 = vmatpush3.bf16.msra.mxu1 %v8996_v63 }
 0x49b   : > { %8725 = vmatprep.subr.bf16.mxu1 %v8997_v46 }
 0x49c   : > { %v7566_v18 = vpop.f32.mrf.mxu0 }
 0x49e   : > { %v7568_v23 = vpop.f32.mrf.mxu0  ;;  %8726 = vmatpush3.bf16.msra.mxu1 %v8997_v46 }
 0x4a0   : > { %v7759_v3 = vpop.f32.mrf.mxu1  ;;  %v7569_v39 = vpop.f32.mrf.mxu0 }
 0x4a1   : > { %v7760_v25 = vadd.f32 %v7759_v3, %v7566_v18 }
 0x4a2   : > { %v7761_v43 = vpop.f32.mrf.mxu1  ;;  %v7571_v16 = vpop.f32.mrf.mxu0 }
 0x4a3   : > { %v7817_v35 = vadd.f32 %v13096_v58, %v7760_v25 }
 0x4a4   : > { %v7762_v7 = vpop.f32.mrf.mxu1 }
 0x4a5   : > { %v7763_v15 = vadd.f32 %v7762_v7, %v7569_v39  ;;  %v7833_v1 = vmax.f32 %v7817_v35, 0.0 }
 0x4a6   : > { %v7764_v50 = vpop.f32.mrf.mxu1 }
 0x4a7   : > { %v7818_v41 = vadd.f32 %v13096_v58, %v7763_v15 }
 0x4a9   : > { %v7834_v48 = vmax.f32 %v7818_v41, 0.0 }
 0x4ab   : > { %v7864_v12 = vpack.c.bf16 %v7834_v48, %v7833_v1 }
 0x4ad   : > { %8699 = vmatprep.mubr.bf16.mxu0 %v7864_v12 }
 0x4b0   : > { %v7574_v30 = vpop.f32.mrf.mxu0 }
 0x4b2   : > { %v7576_v6 = vpop.f32.mrf.mxu0 }
 0x4b4   : > { %v7767_v59 = vpop.f32.mrf.mxu1  ;;  %v7577_v57 = vpop.f32.mrf.mxu0 }
 0x4b5   : > { %v7768_v49 = vadd.f32 %v7767_v59, %v7574_v30 }
 0x4b6   : > { %v7769_v0 = vpop.f32.mrf.mxu1  ;;  %v7579_v28 = vpop.f32.mrf.mxu0 }
 0x4b7   : > { %v7819_v11 = vadd.f32 %v13096_v58, %v7768_v49 }
 0x4b8   : > { %v7770_v9 = vpop.f32.mrf.mxu1 }
 0x4b9   : > { %v7771_v20 = vadd.f32 %v7770_v9, %v7577_v57  ;;  %v7835_v53 = vmax.f32 %v7819_v11, 0.0 }
 0x4ba   : > { %v7772_v45 = vpop.f32.mrf.mxu1 }
 0x4bb   : > { %v7820_v26 = vadd.f32 %v13096_v58, %v7771_v20 }
 0x4bd   : > { %v7836_v24 = vmax.f32 %v7820_v26, 0.0 }
 0x4bf   : > { %v7865_v34 = vpack.c.bf16 %v7836_v24, %v7835_v53 }
 0x4c1   : > { %8700 = vmatmul.mubr.bf16.gmra.mxu0 %v7865_v34 }
 0x4c4   : > { %v7582_v55 = vpop.f32.mrf.mxu0 }
 0x4c6   : > { %v7584_v29 = vpop.f32.mrf.mxu0 }
 0x4c7   : > { %v7775_v40 = vpop.f32.mrf.mxu1 }
 0x4c8   : > { %v7776_v47 = vadd.f32 %v7775_v40, %v7582_v55  ;;  %v7585_v14 = vpop.f32.mrf.mxu0  ;;  %v8623_v40 = vld [vmem:[%s13198_s6] ss:$0 sm:$0xff] }
 0x4c9   : > { %v7777_v56 = vpop.f32.mrf.mxu1 }
 0x4ca   : > { %v7587_v54 = vpop.f32.mrf.mxu0  ;;  %v7821_v19 = vadd.f32 %v13096_v58, %v7776_v47 }
 0x4cb   : > { %v7778_v62 = vpop.f32.mrf.mxu1 }
 0x4cc   : > { %v7779_v8 = vadd.f32 %v7778_v62, %v7585_v14  ;;  %v7837_v38 = vmax.f32 %v7821_v19, 0.0 }
 0x4cd   : > { %v7780_v2 = vpop.f32.mrf.mxu1 }
 0x4ce   : > { %v7822_v17 = vadd.f32 %v13096_v58, %v7779_v8 }
 0x4d0   : > { %v7838_v51 = vmax.f32 %v7822_v17, 0.0 }
 0x4d2   : > { %v7866_v42 = vpack.c.bf16 %v7838_v51, %v7837_v38 }
 0x4d4   : > { %8703 = vmatprep.mubr.bf16.mxu0 %v7866_v42 }
 0x4d8   : > { %v7590_v61 = vpop.f32.mrf.mxu0 }
 0x4da   : > { %v7592_v33 = vpop.f32.mrf.mxu0 }
 0x4dc   : > { %v7783_v60 = vpop.f32.mrf.mxu1  ;;  %v7593_v52 = vpop.f32.mrf.mxu0 }
 0x4dd   : > { %v7784_v37 = vadd.f32 %v7783_v60, %v7590_v61 }
 0x4de   : > { %v7785_v44 = vpop.f32.mrf.mxu1  ;;  %v7595_v31 = vpop.f32.mrf.mxu0 }
 0x4df   : > { %v7823_v36 = vadd.f32 %v13096_v58, %v7784_v37 }
 0x4e0   : > { %v7786_v27 = vpop.f32.mrf.mxu1 }
 0x4e1   : > { %v7787_v22 = vadd.f32 %v7786_v27, %v7593_v52  ;;  %v7839_v13 = vmax.f32 %v7823_v36, 0.0 }
 0x4e2   : > { %v7788_v5 = vpop.f32.mrf.mxu1 }
 0x4e3   : > { %v7824_v10 = vadd.f32 %v13096_v58, %v7787_v22 }
 0x4e5   : > { %v7840_v32 = vmax.f32 %v7824_v10, 0.0 }
 0x4e7   : > { %v7867_v21 = vpack.c.bf16 %v7840_v32, %v7839_v13 }
 0x4e9   : > { %8704 = vmatmul.mubr.bf16.gmra.mxu0 %v7867_v21 }
 0x4eb   : > { %v7598_v18 = vpop.f32.mrf.mxu0 }
 0x4ed   : > { %v7600_v23 = vpop.f32.mrf.mxu0 }
 0x4ef   : > { %v7791_v3 = vpop.f32.mrf.mxu1  ;;  %v7601_v39 = vpop.f32.mrf.mxu0 }
 0x4f0   : > { %v7792_v25 = vadd.f32 %v7791_v3, %v7598_v18 }
 0x4f1   : > { %v7793_v43 = vpop.f32.mrf.mxu1  ;;  %v7603_v16 = vpop.f32.mrf.mxu0 }
 0x4f2   : > { %v7825_v35 = vadd.f32 %v13096_v58, %v7792_v25 }
 0x4f3   : > { %v7794_v7 = vpop.f32.mrf.mxu1 }
 0x4f4   : > { %v7795_v15 = vadd.f32 %v7794_v7, %v7601_v39  ;;  %v7841_v1 = vmax.f32 %v7825_v35, 0.0 }
 0x4f5   : > { %v7796_v50 = vpop.f32.mrf.mxu1 }
 0x4f6   : > { %v7826_v41 = vadd.f32 %v13096_v58, %v7795_v15 }
 0x4f8   : > { %v7842_v48 = vmax.f32 %v7826_v41, 0.0 }
 0x4fa   : > { %v7868_v12 = vpack.c.bf16 %v7842_v48, %v7841_v1 }
 0x4fc   : > { %8707 = vmatprep.mubr.bf16.mxu0 %v7868_v12 }
 0x4ff   : > { %v7606_v30 = vpop.f32.mrf.mxu0 }
 0x501   : > { %v7608_v6 = vpop.f32.mrf.mxu0 }
 0x503   : > { %v7799_v59 = vpop.f32.mrf.mxu1  ;;  %v7609_v57 = vpop.f32.mrf.mxu0 }
 0x504   : > { %v7800_v49 = vadd.f32 %v7799_v59, %v7606_v30 }
 0x505   : > { %v7801_v0 = vpop.f32.mrf.mxu1  ;;  %v7611_v28 = vpop.f32.mrf.mxu0 }
 0x506   : > { %v7827_v11 = vadd.f32 %v13096_v58, %v7800_v49 }
 0x507   : > { %v7802_v9 = vpop.f32.mrf.mxu1 }
 0x508   : > { %v7803_v20 = vadd.f32 %v7802_v9, %v7609_v57  ;;  %v7843_v53 = vmax.f32 %v7827_v11, 0.0  ;;  %v8632_v11 = vld [vmem:[%s13200_s8] ss:$0 sm:$0xff] }
 0x509   : > { %v7804_v45 = vpop.f32.mrf.mxu1 }
 0x50a   : > { %v7828_v26 = vadd.f32 %v13096_v58, %v7803_v20 }
 0x50c   : > { %v7844_v24 = vmax.f32 %v7828_v26, 0.0 }
 0x50e   : > { %v7869_v34 = vpack.c.bf16 %v7844_v24, %v7843_v53 }
 0x510   : > { %8708 = vmatmul.mubr.bf16.gmra.mxu0 %v7869_v34 }
 0x558   : > { %v8697_v55 = vpop.f32.mrf.mxu0 }
 0x559   : > { %v7967_v54 = vadd.f32 %v8697_v55, %v8623_v40 }
 0x55a   : > { %v7958_v29 = vpop.f32.mrf.mxu0 }
 0x55b   : > { %v7959_v14 = vadd.f32 %v8623_v40, %v7958_v29  ;;  %v8023_v58 = vmax.f32 %v7967_v54, 0.0 }
 0x55c   : > { %v8698_v47 = vpop.f32.mrf.mxu0 }
 0x55d   : > { %v7970_v56 = vadd.f32 %v8698_v47, %v8623_v40  ;;  %v8021_v2 = vmax.f32 %v7959_v14, 0.0 }
 0x55e   : > { %v7961_v62 = vpop.f32.mrf.mxu0 }
 0x55f   : > { %v7962_v19 = vadd.f32 %v8623_v40, %v7961_v62  ;;  %v8024_v8 = vmax.f32 %v7970_v56, 0.0 }
 0x561   : > { %v8022_v17 = vmax.f32 %v7962_v19, 0.0  ;;  %v8054_v51 = vpack.c.bf16 %v8024_v8, %v8023_v58 }
 0x563   : > { %v8053_v38 = vpack.c.bf16 %v8022_v17, %v8021_v2 }
 0x565   : > { %8727 = vmatprep.mubr.bf16.mxu1 %v8053_v38 }
 0x566   : > { %8728 = vmatmul.mubr.bf16.vlgmr.msra.gmra.mxu1 %v8054_v51 }
 0x581   : > { %v8701_v42 = vpop.f32.mrf.mxu0 }
 0x582   : > { %v7983_v37 = vadd.f32 %v8701_v42, %v8623_v40 }
 0x583   : > { %v7974_v61 = vpop.f32.mrf.mxu0 }
 0x584   : > { %v7975_v60 = vadd.f32 %v8623_v40, %v7974_v61  ;;  %v8027_v22 = vmax.f32 %v7983_v37, 0.0 }
 0x585   : > { %v8702_v33 = vpop.f32.mrf.mxu0 }
 0x586   : > { %v7986_v52 = vadd.f32 %v8702_v33, %v8623_v40  ;;  %v8025_v27 = vmax.f32 %v7975_v60, 0.0 }
 0x587   : > { %v7977_v44 = vpop.f32.mrf.mxu0 }
 0x588   : > { %v7978_v31 = vadd.f32 %v8623_v40, %v7977_v44  ;;  %v8028_v4 = vmax.f32 %v7986_v52, 0.0 }
 0x58a   : > { %v8026_v36 = vmax.f32 %v7978_v31, 0.0  ;;  %v8056_v10 = vpack.c.bf16 %v8028_v4, %v8027_v22 }
 0x58c   : > { %v8055_v5 = vpack.c.bf16 %v8026_v36, %v8025_v27 }
 0x58e   : > { %8731 = vmatprep.mubr.bf16.mxu1 %v8055_v5 }
 0x58f   : > { %8732 = vmatmul.mubr.bf16.gmra.mxu1 %v8056_v10 }
 0x5a9   : > { %v8705_v13 = vpop.f32.mrf.mxu0 }
 0x5aa   : > { %v7999_v18 = vadd.f32 %v8705_v13, %v8623_v40 }
 0x5ab   : > { %v7990_v32 = vpop.f32.mrf.mxu0 }
 0x5ac   : > { %v7991_v46 = vadd.f32 %v8623_v40, %v7990_v32  ;;  %v8031_v16 = vmax.f32 %v7999_v18, 0.0 }
 0x5ad   : > { %v8706_v63 = vpop.f32.mrf.mxu0 }
 0x5ae   : > { %v8002_v21 = vadd.f32 %v8706_v63, %v8623_v40  ;;  %v8029_v39 = vmax.f32 %v7991_v46, 0.0 }
 0x5af   : > { %v7993_v23 = vpop.f32.mrf.mxu0 }
 0x5b0   : > { %v7994_v3 = vadd.f32 %v8623_v40, %v7993_v23  ;;  %v8032_v25 = vmax.f32 %v8002_v21, 0.0 }
 0x5b2   : > { %v8030_v43 = vmax.f32 %v7994_v3, 0.0  ;;  %v8058_v35 = vpack.c.bf16 %v8032_v25, %v8031_v16 }
 0x5b4   : > { %v8057_v7 = vpack.c.bf16 %v8030_v43, %v8029_v39 }
 0x5b6   : > { %8735 = vmatprep.mubr.bf16.mxu1 %v8057_v7 }
 0x5b7   : > { %8736 = vmatmul.mubr.bf16.gmra.mxu1 %v8058_v35 }
 0x5d0   : > { %v8709_v15 = vpop.f32.mrf.mxu0 }
 0x5d1   : > { %v8015_v12 = vadd.f32 %v8709_v15, %v8623_v40 }
 0x5d2   : > { %v8006_v50 = vpop.f32.mrf.mxu0 }
 0x5d3   : > { %v8007_v1 = vadd.f32 %v8623_v40, %v8006_v50  ;;  %v8035_v0 = vmax.f32 %v8015_v12, 0.0 }
 0x5d4   : > { %v8710_v41 = vpop.f32.mrf.mxu0 }
 0x5d5   : > { %v8018_v48 = vadd.f32 %v8710_v41, %v8623_v40  ;;  %v8033_v57 = vmax.f32 %v8007_v1, 0.0 }
 0x5d6   : > { %v8009_v30 = vpop.f32.mrf.mxu0 }
 0x5d7   : > { %v8010_v6 = vadd.f32 %v8623_v40, %v8009_v30  ;;  %v8036_v59 = vmax.f32 %v8018_v48, 0.0 }
 0x5d9   : > { %v8034_v49 = vmax.f32 %v8010_v6, 0.0  ;;  %v8060_v9 = vpack.c.bf16 %v8036_v59, %v8035_v0 }
 0x5db   : > { %v8059_v28 = vpack.c.bf16 %v8034_v49, %v8033_v57 }
 0x5dd   : > { %8739 = vmatprep.mubr.bf16.mxu1 %v8059_v28 }
 0x5de   : > { %8740 = vmatmul.mubr.bf16.gmra.mxu1 %v8060_v9 }
 0x626   : > { %v8729_v20 = vpop.f32.mrf.mxu1 }
 0x627   : > { %v8159_v45 = vadd.f32 %v8729_v20, %v8632_v11 }
 0x628   : > { %v8150_v26 = vpop.f32.mrf.mxu1 }
 0x629   : > { %8215 = vst [vmem:[%s13123_s25 + $0x10] sm:$0xff] %v8159_v45  ;;  %v8151_v53 = vadd.f32 %v8632_v11, %v8150_v26 }
 0x62a   : > { %v8730_v24 = vpop.f32.mrf.mxu1 }
 0x62b   : > { %8213 = vst [vmem:[%s13123_s25] sm:$0xff] %v8151_v53  ;;  %v8162_v34 = vadd.f32 %v8730_v24, %v8632_v11 }
 0x62c   : > { %v8153_v55 = vpop.f32.mrf.mxu1 }
 0x62d   : > { %8216 = vst [vmem:[%s13123_s25 + $0x18] sm:$0xff] %v8162_v34  ;;  %v8154_v29 = vadd.f32 %v8632_v11, %v8153_v55 }
 0x62f   : > { %8214 = vst [vmem:[%s13123_s25 + $0x8] sm:$0xff] %v8154_v29 }
 0x64f   : > { %v8733_v40 = vpop.f32.mrf.mxu1 }
 0x650   : > { %v8175_v47 = vadd.f32 %v8733_v40, %v8632_v11 }
 0x651   : > { %v8166_v14 = vpop.f32.mrf.mxu1 }
 0x652   : > { %8219 = vst [vmem:[%s13123_s25 + $0x30] sm:$0xff] %v8175_v47  ;;  %v8167_v56 = vadd.f32 %v8632_v11, %v8166_v14 }
 0x653   : > { %v8734_v54 = vpop.f32.mrf.mxu1 }
 0x654   : > { %8217 = vst [vmem:[%s13123_s25 + $0x20] sm:$0xff] %v8167_v56  ;;  %v8178_v62 = vadd.f32 %v8734_v54, %v8632_v11 }
 0x655   : > { %v8169_v19 = vpop.f32.mrf.mxu1 }
 0x656   : > { %8220 = vst [vmem:[%s13123_s25 + $0x38] sm:$0xff] %v8178_v62  ;;  %v8170_v8 = vadd.f32 %v8632_v11, %v8169_v19 }
 0x658   : > { %8218 = vst [vmem:[%s13123_s25 + $0x28] sm:$0xff] %v8170_v8 }
 0x677   : > { %v8737_v2 = vpop.f32.mrf.mxu1 }
 0x678   : > { %v8191_v17 = vadd.f32 %v8737_v2, %v8632_v11 }
 0x679   : > { %v8182_v58 = vpop.f32.mrf.mxu1 }
 0x67a   : > { %8223 = vst [vmem:[%s13123_s25 + $0x50] sm:$0xff] %v8191_v17  ;;  %v8183_v38 = vadd.f32 %v8632_v11, %v8182_v58 }
 0x67b   : > { %v8738_v51 = vpop.f32.mrf.mxu1 }
 0x67c   : > { %8221 = vst [vmem:[%s13123_s25 + $0x40] sm:$0xff] %v8183_v38  ;;  %v8194_v42 = vadd.f32 %v8738_v51, %v8632_v11 }
 0x67d   : > { %v8185_v61 = vpop.f32.mrf.mxu1 }
 0x67e   : > { %8224 = vst [vmem:[%s13123_s25 + $0x58] sm:$0xff] %v8194_v42  ;;  %v8186_v33 = vadd.f32 %v8632_v11, %v8185_v61 }
 0x680   : > { %8222 = vst [vmem:[%s13123_s25 + $0x48] sm:$0xff] %v8186_v33 }
 0x69e   : > { %v8741_v60 = vpop.f32.mrf.mxu1 }
 0x69f   : > { %v8207_v52 = vadd.f32 %v8741_v60, %v8632_v11 }
 0x6a0   : > { %v8198_v37 = vpop.f32.mrf.mxu1 }
 0x6a1   : > { %8227 = vst [vmem:[%s13123_s25 + $0x70] sm:$0xff] %v8207_v52  ;;  %v8199_v44 = vadd.f32 %v8632_v11, %v8198_v37 }
 0x6a2   : > { %v8742_v31 = vpop.f32.mrf.mxu1 }
 0x6a3   : > { %8225 = vst [vmem:[%s13123_s25 + $0x60] sm:$0xff] %v8199_v44  ;;  %v8210_v4 = vadd.f32 %v8742_v31, %v8632_v11 }
 0x6a4   : > { %v8201_v27 = vpop.f32.mrf.mxu1 }
 0x6a5   : > { %8228 = vst [vmem:[%s13123_s25 + $0x78] sm:$0xff] %v8210_v4  ;;  %v8202_v36 = vadd.f32 %v8632_v11, %v8201_v27 }
 0x6a7   : > { %8226 = vst [vmem:[%s13123_s25 + $0x68] sm:$0xff] %v8202_v36 }
 0x6a8   : > { %9165 = shalt.err (!%p9162_p0)
}
 0x6a9   : > { %s9166_s21 = scalar_lea.hbm %s13144_s14, 2048  ;;  %s9170_s26 = scalar_lea.hbm %s13201_s9, 4096 }
 0x6aa   : > { %p9167_p1 = scmp.ne.s32.totalorder %s13144_s14, %s9166_s21  ;;  %p9171_p4 = scmp.lt.s32.totalorder %s13144_s14, %s13201_s9 }
 0x6ab   : > { %p9172_p7 = scmp.lt.s32.totalorder %s9170_s26, %s9166_s21 }
 0x6ac   : > { %p9168_p2 = pnand %p9167_p1, %p9322_p5 }
 0x6ad   : > { %p9173_p6 = por %p9172_p7, %p9171_p4 }
 0x6ae   : > { %p9169_p3 = pneg %p9168_p2 }
 0x6b0   : > { %p9174_p8 = pnand %p9173_p6, %p9169_p3 }
 0x6b2   : > { %9177 = shalt.err (!%p9174_p8)
}
 0x6b3   : > { %s9232_s16 = smov 128   ;;  %s9233_s17 = smov 8  }
 0x6b4   : > { %8875 = dma.vmem_to_hbm [thread:$0]  (%p9322_p5), %s13146_s27, 2048, %s13144_s14, %s13152_s13, %s9232_s16, %s9232_s16, %s9233_s17  }
 0x6b5 PF: > { %p8887_p9 = scmp.ge.s32.totalorder %s9216_s12, 2  ;;  %s8258_s22 = sand.u32 1, %s9204_s30  }
 0x6b6   : > { %p13727_p10 = scmp.ne.s32.totalorder %s13370_s20, 0  ;;  %s8259_s23 = scalar_lea.sflag [#allocation4], %s8258_s22 }
 0x6b8   : > { %p8882_p11 = pnand %p8887_p9, %p13727_p10 }
 0x6ba   : > { %p8883_p12 = pneg %p8882_p11 }
 0x6bc   : > { %9199 = dma.done.wait (%p8883_p12), %s8259_s23, 2048  }
 0x6bd   : > { %9201 = vsyncadd (%p8883_p12), %s8259_s23, 4294965248  ;;  %p20_p13 = scmp.ge.s32.totalorder %s9309_s15, 4   ;;  %s13728_s30 = smov %s9208_s10 }
 0x6be   : > { %s13729_s10 = smov %s9212_s11  ;;  %s13730_s11 = smov %s9320_s18 }
 0x6bf   : > { %s13731_s12 = smov %s9309_s15  ;;  %22 = sbr.rel (!%p20_p13) target bundleno = 4 (0x4), region = 96 }
 0x6c4   :  { %8264 = vsyncpa [#allocation3], 1 }
 0x6c5   :  { %8266 = vsyncpa [#allocation3 + $0x1], 1 }
 0x6c6   :  { %8267 = vsyncpa [#allocation4], 1 }
 0x6c7   :  { %8269 = vsyncpa [#allocation4 + $0x1], 1 }

</bundles_post_ra>
